<compile_context>
chip_gen: v5e
topology: v5e:2x2
jax: 0.10.0
libtpu: 0.0.40
codegen_flags: <defaults>
</compile_context>

<pallas_src>
import jax
import jax.numpy as jnp
from jax import lax
from jax.experimental import pallas as pl
from jax.experimental.pallas import tpu as pltpu


# --------------------------------------------------------------------------
# Scaled-down RepVGG backbone (deploy mode) + CSRNet head configuration.
# --------------------------------------------------------------------------
STAGE_CFG = [
    [(16, 2)],                # stage0
    [(16, 2), (16, 1)],       # stage1
    [(32, 2), (32, 1)],       # stage2
    [(48, 1), (48, 1)],       # stage3 (strides forced to 1, as in __init__)
]
BACKEND_CFG = [192, 96, 48, 48]   # make_layers(..., dilation=True): d=2, p=2


def _conv_plan(in_channels=3):
    plan = []
    cin = in_channels
    for stage in STAGE_CFG:
        for cout, stride in stage:
            plan.append(dict(cin=cin, cout=cout, stride=stride, dil=1, pad=1))
            cin = cout
    for cout in BACKEND_CFG:
        plan.append(dict(cin=cin, cout=cout, stride=1, dil=2, pad=2))
        cin = cout
    return plan, cin          # cin == 48 == layer3_last / backend tail


# --------------------------------------------------------------------------
# In-kernel conv helpers (all refs live in VMEM).
# --------------------------------------------------------------------------
def _conv_layer(src, dst, w_ref, b_ref, *, ho, wo, stride, dil, dst_pad):
    """3x3 conv + bias + ReLU from a zero-bordered src buffer into the
    interior of a zero-bordered dst buffer (in-kernel im2col via 9 tap
    matmuls per output row; patches never materialized)."""
    bias = b_ref[...]                                            # (1, cout)

    def row(h, carry):
        acc = None
        for kh in range(3):
            r = h * stride + kh * dil
            for kw in range(3):
                c0 = kw * dil
                if stride == 1:
                    lhs = src[r, pl.ds(c0, wo), :]               # (wo, cin)
                else:
                    lhs = src[r, pl.ds(c0, wo, stride), :]       # strided cols
                t = jnp.dot(lhs, w_ref[kh * 3 + kw],
                            preferred_element_type=jnp.float32)
                acc = t if acc is None else acc + t
        out = jnp.maximum(acc + bias, 0.0)
        dst[h + dst_pad, pl.ds(dst_pad, wo), :] = out
        return carry

    lax.fori_loop(0, ho, row, 0)


def _final_layer(src, w_ref, b_ref, w1_ref, b1_ref, o_ref, *, ho, wo, dil):
    """Last dilated backend conv + ReLU with the 1x1 output conv fused in
    (per-row weighted channel sum on the VPU/XLU)."""
    bias = b_ref[...]                                            # (1, 48)
    w1 = w1_ref[...]                                             # (1, 48)
    b1 = b1_ref[...]                                             # (1, 1)
    for h in range(ho):    # static unroll: ho is tiny (4) at density-map res.
        acc = None
        for kh in range(3):
            r = h + kh * dil
            for kw in range(3):
                lhs = src[r, pl.ds(kw * dil, wo), :]
                t = jnp.dot(lhs, w_ref[kh * 3 + kw],
                            preferred_element_type=jnp.float32)
                acc = t if acc is None else acc + t
        hdn = jnp.maximum(acc + bias, 0.0)                        # (wo, 48)
        dens = jnp.sum(hdn * w1, axis=-1, keepdims=True) + b1     # (wo, 1)
        o_ref[pl.ds(h * wo, wo), :] = dens


# --------------------------------------------------------------------------
# Parameter init (deterministic; stands in for the torch checkpoint).
# --------------------------------------------------------------------------
def _init_conv(key, ksize, cin, cout):
    kw_, kb_ = jax.random.split(key)
    fan_in = float(ksize * ksize * cin)
    w = jax.random.normal(kw_, (ksize, ksize, cin, cout),
                          jnp.float32) * (fan_in ** -0.5)
    b = jax.random.normal(kb_, (cout,), jnp.float32) * 0.01
    return w, b


def init_params(key):
    plan, last_c = _conv_plan()
    convs = []
    for cfg in plan:
        key, sub = jax.random.split(key)
        convs.append(_init_conv(sub, 3, cfg["cin"], cfg["cout"]))
    key, sub = jax.random.split(key)
    output = _init_conv(sub, 1, last_c, 1)
    return {"convs": convs, "output": output}


# --------------------------------------------------------------------------
# Forward pass: one fused pallas_call over the batch grid.
# --------------------------------------------------------------------------
def repvgg_csrnet_forward(params, x_nchw):
    plan, _ = _conv_plan()
    nconv = len(plan)
    n, _, h_in, w_in = x_nchw.shape

    # NCHW -> NHWC; spatially pre-pad only the network input (tiny, one-off).
    p0 = plan[0]["pad"]
    x = jnp.transpose(x_nchw, (0, 2, 3, 1)).astype(jnp.float32)
    x = jnp.pad(x, ((0, 0), (p0, p0), (p0, p0), (0, 0)))
    hp0, wp0 = h_in + 2 * p0, w_in + 2 * p0

    # Static per-layer output sizes + VMEM buffer shapes.  Buffer i holds the
    # output of conv i, zero-bordered with conv i+1's padding, so the padded
    # intermediates never touch HBM.
    sizes = []
    hh, ww = h_in, w_in
    for cfg in plan:
        d, p, s = cfg["dil"], cfg["pad"], cfg["stride"]
        hh = (hh + 2 * p - 2 * d - 1) // s + 1
        ww = (ww + 2 * p - 2 * d - 1) // s + 1
        assert hh >= 1 and ww >= 1, "input too small for this backbone"
        sizes.append((hh, ww))
    buf_shapes = []
    for i in range(nconv - 1):
        ho, wo = sizes[i]
        pn = plan[i + 1]["pad"]
        buf_shapes.append((ho + 2 * pn, wo + 2 * pn, plan[i]["cout"]))
    ho_f, wo_f = sizes[-1]

    def kernel(*refs):
        x_ref = refs[0]
        wb = refs[1:1 + 2 * nconv]
        w1_ref = refs[1 + 2 * nconv]
        b1_ref = refs[2 + 2 * nconv]
        o_ref = refs[3 + 2 * nconv]
        bufs = refs[4 + 2 * nconv:]

        # Zero the activation buffers: the borders double as conv padding.
        for buf in bufs:
            buf[...] = jnp.zeros_like(buf)

        src = x_ref
        for i in range(nconv - 1):
            cfg = plan[i]
            ho, wo = sizes[i]
            _conv_layer(src, bufs[i], wb[2 * i], wb[2 * i + 1],
                        ho=ho, wo=wo, stride=cfg["stride"], dil=cfg["dil"],
                        dst_pad=plan[i + 1]["pad"])
            src = bufs[i]

        last = nconv - 1
        _final_layer(src, wb[2 * last], wb[2 * last + 1], w1_ref, b1_ref,
                     o_ref, ho=ho_f, wo=wo_f, dil=plan[last]["dil"])

    # Operands: padded input (blocked per image) + resident VMEM weights.
    def vmem_spec():
        return pl.BlockSpec(memory_space=pltpu.MemorySpace.VMEM)

    operands = [x]
    in_specs = [pl.BlockSpec((None, hp0, wp0, plan[0]["cin"]),
                             lambda bi: (bi, 0, 0, 0))]
    for i, cfg in enumerate(plan):
        w, bias = params["convs"][i]
        operands.append(w.reshape(9, cfg["cin"], cfg["cout"])
                        .astype(jnp.float32))
        operands.append(bias.reshape(1, cfg["cout"]).astype(jnp.float32))
        in_specs += [vmem_spec(), vmem_spec()]
    w1, b1 = params["output"]
    operands.append(w1.reshape(1, w1.shape[-2]).astype(jnp.float32))
    operands.append(b1.reshape(1, 1).astype(jnp.float32))
    in_specs += [vmem_spec(), vmem_spec()]

    out = pl.pallas_call(
        kernel,
        out_shape=jax.ShapeDtypeStruct((n, ho_f * wo_f, 1), jnp.float32),
        grid=(n,),
        in_specs=in_specs,
        out_specs=pl.BlockSpec((None, ho_f * wo_f, 1), lambda bi: (bi, 0, 0)),
        scratch_shapes=[pltpu.VMEM(s, jnp.float32) for s in buf_shapes],
        compiler_params=pltpu.CompilerParams(
            dimension_semantics=("parallel",),
            vmem_limit_bytes=32 * 1024 * 1024),
    )(*operands)

    dens = out.reshape(n, ho_f, wo_f, 1)
    return jnp.transpose(dens, (0, 3, 1, 2))          # back to NCHW


if __name__ == "__main__":
    key = jax.random.PRNGKey(0)
    k_x, k_p = jax.random.split(key)
    x = jax.random.normal(k_x, (2, 3, 32, 32), jnp.float32)   # NCHW like torch
    params = init_params(k_p)

    fwd = jax.jit(repvgg_csrnet_forward)
    out = fwd(params, x)
    jax.block_until_ready(out)

    assert out.shape == (2, 1, 4, 4), out.shape
    assert out.dtype == jnp.float32
    print("KERNEL_OK")
</pallas_src>

<mosaic_0001>
module attributes {stable_mosaic.version = 11 : i64} {
  func.func @kernel(%arg0: i32, %arg1: memref<1x34x34x3xf32, #tpu.memory_space<vmem>>, %arg2: memref<9x3x16xf32, #tpu.memory_space<vmem>>, %arg3: memref<1x16xf32, #tpu.memory_space<vmem>>, %arg4: memref<9x16x16xf32, #tpu.memory_space<vmem>>, %arg5: memref<1x16xf32, #tpu.memory_space<vmem>>, %arg6: memref<9x16x16xf32, #tpu.memory_space<vmem>>, %arg7: memref<1x16xf32, #tpu.memory_space<vmem>>, %arg8: memref<9x16x32xf32, #tpu.memory_space<vmem>>, %arg9: memref<1x32xf32, #tpu.memory_space<vmem>>, %arg10: memref<9x32x32xf32, #tpu.memory_space<vmem>>, %arg11: memref<1x32xf32, #tpu.memory_space<vmem>>, %arg12: memref<9x32x48xf32, #tpu.memory_space<vmem>>, %arg13: memref<1x48xf32, #tpu.memory_space<vmem>>, %arg14: memref<9x48x48xf32, #tpu.memory_space<vmem>>, %arg15: memref<1x48xf32, #tpu.memory_space<vmem>>, %arg16: memref<9x48x192xf32, #tpu.memory_space<vmem>>, %arg17: memref<1x192xf32, #tpu.memory_space<vmem>>, %arg18: memref<9x192x96xf32, #tpu.memory_space<vmem>>, %arg19: memref<1x96xf32, #tpu.memory_space<vmem>>, %arg20: memref<9x96x48xf32, #tpu.memory_space<vmem>>, %arg21: memref<1x48xf32, #tpu.memory_space<vmem>>, %arg22: memref<9x48x48xf32, #tpu.memory_space<vmem>>, %arg23: memref<1x48xf32, #tpu.memory_space<vmem>>, %arg24: memref<1x48xf32, #tpu.memory_space<vmem>>, %arg25: memref<1x1xf32, #tpu.memory_space<vmem>>, %arg26: memref<1x16x1xf32, #tpu.memory_space<vmem>>, %arg27: memref<18x18x16xf32, #tpu.memory_space<vmem>>, %arg28: memref<10x10x16xf32, #tpu.memory_space<vmem>>, %arg29: memref<10x10x16xf32, #tpu.memory_space<vmem>>, %arg30: memref<6x6x32xf32, #tpu.memory_space<vmem>>, %arg31: memref<6x6x32xf32, #tpu.memory_space<vmem>>, %arg32: memref<6x6x48xf32, #tpu.memory_space<vmem>>, %arg33: memref<8x8x48xf32, #tpu.memory_space<vmem>>, %arg34: memref<8x8x192xf32, #tpu.memory_space<vmem>>, %arg35: memref<8x8x96xf32, #tpu.memory_space<vmem>>, %arg36: memref<8x8x48xf32, #tpu.memory_space<vmem>>) attributes {dimension_semantics = [#tpu.dimension_semantics<parallel>], iteration_bounds = array<i64: 2>, scalar_prefetch = 0 : i64, scratch_operands = 10 : i64, tpu.core_type = #tpu.core_type<tc>, window_params = [{transform_indices = @transform_0, window_bounds = array<i64: 1, 34, 34, 3>}, {pipeline_mode = #tpu.pipeline_mode<synchronous>, transform_indices = @transform_1, window_bounds = array<i64: 9, 3, 16>}, {pipeline_mode = #tpu.pipeline_mode<synchronous>, transform_indices = @transform_2, window_bounds = array<i64: 1, 16>}, {pipeline_mode = #tpu.pipeline_mode<synchronous>, transform_indices = @transform_3, window_bounds = array<i64: 9, 16, 16>}, {pipeline_mode = #tpu.pipeline_mode<synchronous>, transform_indices = @transform_4, window_bounds = array<i64: 1, 16>}, {pipeline_mode = #tpu.pipeline_mode<synchronous>, transform_indices = @transform_5, window_bounds = array<i64: 9, 16, 16>}, {pipeline_mode = #tpu.pipeline_mode<synchronous>, transform_indices = @transform_6, window_bounds = array<i64: 1, 16>}, {pipeline_mode = #tpu.pipeline_mode<synchronous>, transform_indices = @transform_7, window_bounds = array<i64: 9, 16, 32>}, {pipeline_mode = #tpu.pipeline_mode<synchronous>, transform_indices = @transform_8, window_bounds = array<i64: 1, 32>}, {pipeline_mode = #tpu.pipeline_mode<synchronous>, transform_indices = @transform_9, window_bounds = array<i64: 9, 32, 32>}, {pipeline_mode = #tpu.pipeline_mode<synchronous>, transform_indices = @transform_10, window_bounds = array<i64: 1, 32>}, {pipeline_mode = #tpu.pipeline_mode<synchronous>, transform_indices = @transform_11, window_bounds = array<i64: 9, 32, 48>}, {pipeline_mode = #tpu.pipeline_mode<synchronous>, transform_indices = @transform_12, window_bounds = array<i64: 1, 48>}, {pipeline_mode = #tpu.pipeline_mode<synchronous>, transform_indices = @transform_13, window_bounds = array<i64: 9, 48, 48>}, {pipeline_mode = #tpu.pipeline_mode<synchronous>, transform_indices = @transform_14, window_bounds = array<i64: 1, 48>}, {pipeline_mode = #tpu.pipeline_mode<synchronous>, transform_indices = @transform_15, window_bounds = array<i64: 9, 48, 192>}, {pipeline_mode = #tpu.pipeline_mode<synchronous>, transform_indices = @transform_16, window_bounds = array<i64: 1, 192>}, {pipeline_mode = #tpu.pipeline_mode<synchronous>, transform_indices = @transform_17, window_bounds = array<i64: 9, 192, 96>}, {pipeline_mode = #tpu.pipeline_mode<synchronous>, transform_indices = @transform_18, window_bounds = array<i64: 1, 96>}, {pipeline_mode = #tpu.pipeline_mode<synchronous>, transform_indices = @transform_19, window_bounds = array<i64: 9, 96, 48>}, {pipeline_mode = #tpu.pipeline_mode<synchronous>, transform_indices = @transform_20, window_bounds = array<i64: 1, 48>}, {pipeline_mode = #tpu.pipeline_mode<synchronous>, transform_indices = @transform_21, window_bounds = array<i64: 9, 48, 48>}, {pipeline_mode = #tpu.pipeline_mode<synchronous>, transform_indices = @transform_22, window_bounds = array<i64: 1, 48>}, {pipeline_mode = #tpu.pipeline_mode<synchronous>, transform_indices = @transform_23, window_bounds = array<i64: 1, 48>}, {pipeline_mode = #tpu.pipeline_mode<synchronous>, transform_indices = @transform_24, window_bounds = array<i64: 1, 1>}, {transform_indices = @transform_25, window_bounds = array<i64: 1, 16, 1>}]} {
    %cst = arith.constant 0.000000e+00 : f32
    %0 = vector.broadcast %cst : f32 to vector<18x18x16xf32>
    %c0 = arith.constant 0 : index
    %c0_0 = arith.constant 0 : index
    %c0_1 = arith.constant 0 : index
    %1 = vector.load %arg27[%c0, %c0_0, %c0_1] : memref<18x18x16xf32, #tpu.memory_space<vmem>>, vector<18x18x16xf32>
    tpu.vector_store %arg27[%c0, %c0_0, %c0_1], %0 {strides = array<i32>} : memref<18x18x16xf32, #tpu.memory_space<vmem>>, vector<18x18x16xf32>,
    %cst_2 = arith.constant 0.000000e+00 : f32
    %2 = vector.broadcast %cst_2 : f32 to vector<10x10x16xf32>
    %c0_3 = arith.constant 0 : index
    %c0_4 = arith.constant 0 : index
    %c0_5 = arith.constant 0 : index
    %3 = vector.load %arg28[%c0_3, %c0_4, %c0_5] : memref<10x10x16xf32, #tpu.memory_space<vmem>>, vector<10x10x16xf32>
    tpu.vector_store %arg28[%c0_3, %c0_4, %c0_5], %2 {strides = array<i32>} : memref<10x10x16xf32, #tpu.memory_space<vmem>>, vector<10x10x16xf32>,
    %cst_6 = arith.constant 0.000000e+00 : f32
    %4 = vector.broadcast %cst_6 : f32 to vector<10x10x16xf32>
    %c0_7 = arith.constant 0 : index
    %c0_8 = arith.constant 0 : index
    %c0_9 = arith.constant 0 : index
    %5 = vector.load %arg29[%c0_7, %c0_8, %c0_9] : memref<10x10x16xf32, #tpu.memory_space<vmem>>, vector<10x10x16xf32>
    tpu.vector_store %arg29[%c0_7, %c0_8, %c0_9], %4 {strides = array<i32>} : memref<10x10x16xf32, #tpu.memory_space<vmem>>, vector<10x10x16xf32>,
    %cst_10 = arith.constant 0.000000e+00 : f32
    %6 = vector.broadcast %cst_10 : f32 to vector<6x6x32xf32>
    %c0_11 = arith.constant 0 : index
    %c0_12 = arith.constant 0 : index
    %c0_13 = arith.constant 0 : index
    %7 = vector.load %arg30[%c0_11, %c0_12, %c0_13] : memref<6x6x32xf32, #tpu.memory_space<vmem>>, vector<6x6x32xf32>
    tpu.vector_store %arg30[%c0_11, %c0_12, %c0_13], %6 {strides = array<i32>} : memref<6x6x32xf32, #tpu.memory_space<vmem>>, vector<6x6x32xf32>,
    %cst_14 = arith.constant 0.000000e+00 : f32
    %8 = vector.broadcast %cst_14 : f32 to vector<6x6x32xf32>
    %c0_15 = arith.constant 0 : index
    %c0_16 = arith.constant 0 : index
    %c0_17 = arith.constant 0 : index
    %9 = vector.load %arg31[%c0_15, %c0_16, %c0_17] : memref<6x6x32xf32, #tpu.memory_space<vmem>>, vector<6x6x32xf32>
    tpu.vector_store %arg31[%c0_15, %c0_16, %c0_17], %8 {strides = array<i32>} : memref<6x6x32xf32, #tpu.memory_space<vmem>>, vector<6x6x32xf32>,
    %cst_18 = arith.constant 0.000000e+00 : f32
    %10 = vector.broadcast %cst_18 : f32 to vector<6x6x48xf32>
    %c0_19 = arith.constant 0 : index
    %c0_20 = arith.constant 0 : index
    %c0_21 = arith.constant 0 : index
    %11 = vector.load %arg32[%c0_19, %c0_20, %c0_21] : memref<6x6x48xf32, #tpu.memory_space<vmem>>, vector<6x6x48xf32>
    tpu.vector_store %arg32[%c0_19, %c0_20, %c0_21], %10 {strides = array<i32>} : memref<6x6x48xf32, #tpu.memory_space<vmem>>, vector<6x6x48xf32>,
    %cst_22 = arith.constant 0.000000e+00 : f32
    %12 = vector.broadcast %cst_22 : f32 to vector<8x8x48xf32>
    %c0_23 = arith.constant 0 : index
    %c0_24 = arith.constant 0 : index
    %c0_25 = arith.constant 0 : index
    %13 = vector.load %arg33[%c0_23, %c0_24, %c0_25] : memref<8x8x48xf32, #tpu.memory_space<vmem>>, vector<8x8x48xf32>
    tpu.vector_store %arg33[%c0_23, %c0_24, %c0_25], %12 {strides = array<i32>} : memref<8x8x48xf32, #tpu.memory_space<vmem>>, vector<8x8x48xf32>,
    %cst_26 = arith.constant 0.000000e+00 : f32
    %14 = vector.broadcast %cst_26 : f32 to vector<8x8x192xf32>
    %c0_27 = arith.constant 0 : index
    %c0_28 = arith.constant 0 : index
    %c0_29 = arith.constant 0 : index
    %15 = vector.load %arg34[%c0_27, %c0_28, %c0_29] : memref<8x8x192xf32, #tpu.memory_space<vmem>>, vector<8x8x192xf32>
    tpu.vector_store %arg34[%c0_27, %c0_28, %c0_29], %14 {strides = array<i32>} : memref<8x8x192xf32, #tpu.memory_space<vmem>>, vector<8x8x192xf32>,
    %cst_30 = arith.constant 0.000000e+00 : f32
    %16 = vector.broadcast %cst_30 : f32 to vector<8x8x96xf32>
    %c0_31 = arith.constant 0 : index
    %c0_32 = arith.constant 0 : index
    %c0_33 = arith.constant 0 : index
    %17 = vector.load %arg35[%c0_31, %c0_32, %c0_33] : memref<8x8x96xf32, #tpu.memory_space<vmem>>, vector<8x8x96xf32>
    tpu.vector_store %arg35[%c0_31, %c0_32, %c0_33], %16 {strides = array<i32>} : memref<8x8x96xf32, #tpu.memory_space<vmem>>, vector<8x8x96xf32>,
    %cst_34 = arith.constant 0.000000e+00 : f32
    %18 = vector.broadcast %cst_34 : f32 to vector<8x8x48xf32>
    %c0_35 = arith.constant 0 : index
    %c0_36 = arith.constant 0 : index
    %c0_37 = arith.constant 0 : index
    %19 = vector.load %arg36[%c0_35, %c0_36, %c0_37] : memref<8x8x48xf32, #tpu.memory_space<vmem>>, vector<8x8x48xf32>
    tpu.vector_store %arg36[%c0_35, %c0_36, %c0_37], %18 {strides = array<i32>} : memref<8x8x48xf32, #tpu.memory_space<vmem>>, vector<8x8x48xf32>,
    %c0_38 = arith.constant 0 : index
    %c0_39 = arith.constant 0 : index
    %20 = vector.load %arg3[%c0_38, %c0_39] : memref<1x16xf32, #tpu.memory_space<vmem>>, vector<1x16xf32>
    %c0_i32 = arith.constant 0 : i32
    %c16_i32 = arith.constant 16 : i32
    %21 = arith.addi %c0_i32, %c16_i32 : i32
    %c1_i32 = arith.constant 1 : i32
    scf.for %arg37 = %c0_i32 to %21 step %c1_i32  : i32 {
      %c2_i32 = arith.constant 2 : i32
      %307 = arith.muli %arg37, %c2_i32 : i32
      %c0_i32_362 = arith.constant 0 : i32
      %308 = arith.addi %307, %c0_i32_362 : i32
      %c0_363 = arith.constant 0 : index
      %309 = arith.index_cast %308 : i32 to index
      %c0_364 = arith.constant 0 : index
      %c0_365 = arith.constant 0 : index
      %310 = tpu.strided_load %arg1[%c0_363, %309, %c0_364, %c0_365] {strides = array<i32: 1, 1, 2, 1>} : memref<1x34x34x3xf32, #tpu.memory_space<vmem>>, vector<1x1x16x3xf32>
      %311 = vector.shape_cast %310 : vector<1x1x16x3xf32> to vector<16x3xf32>
      %c0_366 = arith.constant 0 : index
      %c0_367 = arith.constant 0 : index
      %c0_368 = arith.constant 0 : index
      %312 = vector.load %arg2[%c0_366, %c0_367, %c0_368] : memref<9x3x16xf32, #tpu.memory_space<vmem>>, vector<1x3x16xf32>
      %313 = vector.shape_cast %312 : vector<1x3x16xf32> to vector<3x16xf32>
      %cst_369 = arith.constant dense<0.000000e+00> : vector<16x16xf32>
      %314 = tpu.matmul %311, %313, %cst_369 {dimension_numbers = #tpu.dot_dimension_numbers<[1], [0], [0], [1], [0, 0, 1, 1], [], []>} : vector<16x3xf32>, vector<3x16xf32>, vector<16x16xf32> -> vector<16x16xf32>
      %c0_370 = arith.constant 0 : index
      %315 = arith.index_cast %308 : i32 to index
      %c1_371 = arith.constant 1 : index
      %c0_372 = arith.constant 0 : index
      %316 = tpu.strided_load %arg1[%c0_370, %315, %c1_371, %c0_372] {strides = array<i32: 1, 1, 2, 1>} : memref<1x34x34x3xf32, #tpu.memory_space<vmem>>, vector<1x1x16x3xf32>
      %317 = vector.shape_cast %316 : vector<1x1x16x3xf32> to vector<16x3xf32>
      %c1_373 = arith.constant 1 : index
      %c0_374 = arith.constant 0 : index
      %c0_375 = arith.constant 0 : index
      %318 = vector.load %arg2[%c1_373, %c0_374, %c0_375] : memref<9x3x16xf32, #tpu.memory_space<vmem>>, vector<1x3x16xf32>
      %319 = vector.shape_cast %318 : vector<1x3x16xf32> to vector<3x16xf32>
      %cst_376 = arith.constant dense<0.000000e+00> : vector<16x16xf32>
      %320 = tpu.matmul %317, %319, %cst_376 {dimension_numbers = #tpu.dot_dimension_numbers<[1], [0], [0], [1], [0, 0, 1, 1], [], []>} : vector<16x3xf32>, vector<3x16xf32>, vector<16x16xf32> -> vector<16x16xf32>
      %321 = arith.addf %314, %320 : vector<16x16xf32>
      %c0_377 = arith.constant 0 : index
      %322 = arith.index_cast %308 : i32 to index
      %c2_378 = arith.constant 2 : index
      %c0_379 = arith.constant 0 : index
      %323 = tpu.strided_load %arg1[%c0_377, %322, %c2_378, %c0_379] {strides = array<i32: 1, 1, 2, 1>} : memref<1x34x34x3xf32, #tpu.memory_space<vmem>>, vector<1x1x16x3xf32>
      %324 = vector.shape_cast %323 : vector<1x1x16x3xf32> to vector<16x3xf32>
      %c2_380 = arith.constant 2 : index
      %c0_381 = arith.constant 0 : index
      %c0_382 = arith.constant 0 : index
      %325 = vector.load %arg2[%c2_380, %c0_381, %c0_382] : memref<9x3x16xf32, #tpu.memory_space<vmem>>, vector<1x3x16xf32>
      %326 = vector.shape_cast %325 : vector<1x3x16xf32> to vector<3x16xf32>
      %cst_383 = arith.constant dense<0.000000e+00> : vector<16x16xf32>
      %327 = tpu.matmul %324, %326, %cst_383 {dimension_numbers = #tpu.dot_dimension_numbers<[1], [0], [0], [1], [0, 0, 1, 1], [], []>} : vector<16x3xf32>, vector<3x16xf32>, vector<16x16xf32> -> vector<16x16xf32>
      %328 = arith.addf %321, %327 : vector<16x16xf32>
      %c2_i32_384 = arith.constant 2 : i32
      %329 = arith.muli %arg37, %c2_i32_384 : i32
      %c1_i32_385 = arith.constant 1 : i32
      %330 = arith.addi %329, %c1_i32_385 : i32
      %c0_386 = arith.constant 0 : index
      %331 = arith.index_cast %330 : i32 to index
      %c0_387 = arith.constant 0 : index
      %c0_388 = arith.constant 0 : index
      %332 = tpu.strided_load %arg1[%c0_386, %331, %c0_387, %c0_388] {strides = array<i32: 1, 1, 2, 1>} : memref<1x34x34x3xf32, #tpu.memory_space<vmem>>, vector<1x1x16x3xf32>
      %333 = vector.shape_cast %332 : vector<1x1x16x3xf32> to vector<16x3xf32>
      %c3_389 = arith.constant 3 : index
      %c0_390 = arith.constant 0 : index
      %c0_391 = arith.constant 0 : index
      %334 = vector.load %arg2[%c3_389, %c0_390, %c0_391] : memref<9x3x16xf32, #tpu.memory_space<vmem>>, vector<1x3x16xf32>
      %335 = vector.shape_cast %334 : vector<1x3x16xf32> to vector<3x16xf32>
      %cst_392 = arith.constant dense<0.000000e+00> : vector<16x16xf32>
      %336 = tpu.matmul %333, %335, %cst_392 {dimension_numbers = #tpu.dot_dimension_numbers<[1], [0], [0], [1], [0, 0, 1, 1], [], []>} : vector<16x3xf32>, vector<3x16xf32>, vector<16x16xf32> -> vector<16x16xf32>
      %337 = arith.addf %328, %336 : vector<16x16xf32>
      %c0_393 = arith.constant 0 : index
      %338 = arith.index_cast %330 : i32 to index
      %c1_394 = arith.constant 1 : index
      %c0_395 = arith.constant 0 : index
      %339 = tpu.strided_load %arg1[%c0_393, %338, %c1_394, %c0_395] {strides = array<i32: 1, 1, 2, 1>} : memref<1x34x34x3xf32, #tpu.memory_space<vmem>>, vector<1x1x16x3xf32>
      %340 = vector.shape_cast %339 : vector<1x1x16x3xf32> to vector<16x3xf32>
      %c4_396 = arith.constant 4 : index
      %c0_397 = arith.constant 0 : index
      %c0_398 = arith.constant 0 : index
      %341 = vector.load %arg2[%c4_396, %c0_397, %c0_398] : memref<9x3x16xf32, #tpu.memory_space<vmem>>, vector<1x3x16xf32>
      %342 = vector.shape_cast %341 : vector<1x3x16xf32> to vector<3x16xf32>
      %cst_399 = arith.constant dense<0.000000e+00> : vector<16x16xf32>
      %343 = tpu.matmul %340, %342, %cst_399 {dimension_numbers = #tpu.dot_dimension_numbers<[1], [0], [0], [1], [0, 0, 1, 1], [], []>} : vector<16x3xf32>, vector<3x16xf32>, vector<16x16xf32> -> vector<16x16xf32>
      %344 = arith.addf %337, %343 : vector<16x16xf32>
      %c0_400 = arith.constant 0 : index
      %345 = arith.index_cast %330 : i32 to index
      %c2_401 = arith.constant 2 : index
      %c0_402 = arith.constant 0 : index
      %346 = tpu.strided_load %arg1[%c0_400, %345, %c2_401, %c0_402] {strides = array<i32: 1, 1, 2, 1>} : memref<1x34x34x3xf32, #tpu.memory_space<vmem>>, vector<1x1x16x3xf32>
      %347 = vector.shape_cast %346 : vector<1x1x16x3xf32> to vector<16x3xf32>
      %c5_403 = arith.constant 5 : index
      %c0_404 = arith.constant 0 : index
      %c0_405 = arith.constant 0 : index
      %348 = vector.load %arg2[%c5_403, %c0_404, %c0_405] : memref<9x3x16xf32, #tpu.memory_space<vmem>>, vector<1x3x16xf32>
      %349 = vector.shape_cast %348 : vector<1x3x16xf32> to vector<3x16xf32>
      %cst_406 = arith.constant dense<0.000000e+00> : vector<16x16xf32>
      %350 = tpu.matmul %347, %349, %cst_406 {dimension_numbers = #tpu.dot_dimension_numbers<[1], [0], [0], [1], [0, 0, 1, 1], [], []>} : vector<16x3xf32>, vector<3x16xf32>, vector<16x16xf32> -> vector<16x16xf32>
      %351 = arith.addf %344, %350 : vector<16x16xf32>
      %c2_i32_407 = arith.constant 2 : i32
      %352 = arith.muli %arg37, %c2_i32_407 : i32
      %c2_i32_408 = arith.constant 2 : i32
      %353 = arith.addi %352, %c2_i32_408 : i32
      %c0_409 = arith.constant 0 : index
      %354 = arith.index_cast %353 : i32 to index
      %c0_410 = arith.constant 0 : index
      %c0_411 = arith.constant 0 : index
      %355 = tpu.strided_load %arg1[%c0_409, %354, %c0_410, %c0_411] {strides = array<i32: 1, 1, 2, 1>} : memref<1x34x34x3xf32, #tpu.memory_space<vmem>>, vector<1x1x16x3xf32>
      %356 = vector.shape_cast %355 : vector<1x1x16x3xf32> to vector<16x3xf32>
      %c6_412 = arith.constant 6 : index
      %c0_413 = arith.constant 0 : index
      %c0_414 = arith.constant 0 : index
      %357 = vector.load %arg2[%c6_412, %c0_413, %c0_414] : memref<9x3x16xf32, #tpu.memory_space<vmem>>, vector<1x3x16xf32>
      %358 = vector.shape_cast %357 : vector<1x3x16xf32> to vector<3x16xf32>
      %cst_415 = arith.constant dense<0.000000e+00> : vector<16x16xf32>
      %359 = tpu.matmul %356, %358, %cst_415 {dimension_numbers = #tpu.dot_dimension_numbers<[1], [0], [0], [1], [0, 0, 1, 1], [], []>} : vector<16x3xf32>, vector<3x16xf32>, vector<16x16xf32> -> vector<16x16xf32>
      %360 = arith.addf %351, %359 : vector<16x16xf32>
      %c0_416 = arith.constant 0 : index
      %361 = arith.index_cast %353 : i32 to index
      %c1_417 = arith.constant 1 : index
      %c0_418 = arith.constant 0 : index
      %362 = tpu.strided_load %arg1[%c0_416, %361, %c1_417, %c0_418] {strides = array<i32: 1, 1, 2, 1>} : memref<1x34x34x3xf32, #tpu.memory_space<vmem>>, vector<1x1x16x3xf32>
      %363 = vector.shape_cast %362 : vector<1x1x16x3xf32> to vector<16x3xf32>
      %c7_419 = arith.constant 7 : index
      %c0_420 = arith.constant 0 : index
      %c0_421 = arith.constant 0 : index
      %364 = vector.load %arg2[%c7_419, %c0_420, %c0_421] : memref<9x3x16xf32, #tpu.memory_space<vmem>>, vector<1x3x16xf32>
      %365 = vector.shape_cast %364 : vector<1x3x16xf32> to vector<3x16xf32>
      %cst_422 = arith.constant dense<0.000000e+00> : vector<16x16xf32>
      %366 = tpu.matmul %363, %365, %cst_422 {dimension_numbers = #tpu.dot_dimension_numbers<[1], [0], [0], [1], [0, 0, 1, 1], [], []>} : vector<16x3xf32>, vector<3x16xf32>, vector<16x16xf32> -> vector<16x16xf32>
      %367 = arith.addf %360, %366 : vector<16x16xf32>
      %c0_423 = arith.constant 0 : index
      %368 = arith.index_cast %353 : i32 to index
      %c2_424 = arith.constant 2 : index
      %c0_425 = arith.constant 0 : index
      %369 = tpu.strided_load %arg1[%c0_423, %368, %c2_424, %c0_425] {strides = array<i32: 1, 1, 2, 1>} : memref<1x34x34x3xf32, #tpu.memory_space<vmem>>, vector<1x1x16x3xf32>
      %370 = vector.shape_cast %369 : vector<1x1x16x3xf32> to vector<16x3xf32>
      %c8_426 = arith.constant 8 : index
      %c0_427 = arith.constant 0 : index
      %c0_428 = arith.constant 0 : index
      %371 = vector.load %arg2[%c8_426, %c0_427, %c0_428] : memref<9x3x16xf32, #tpu.memory_space<vmem>>, vector<1x3x16xf32>
      %372 = vector.shape_cast %371 : vector<1x3x16xf32> to vector<3x16xf32>
      %cst_429 = arith.constant dense<0.000000e+00> : vector<16x16xf32>
      %373 = tpu.matmul %370, %372, %cst_429 {dimension_numbers = #tpu.dot_dimension_numbers<[1], [0], [0], [1], [0, 0, 1, 1], [], []>} : vector<16x3xf32>, vector<3x16xf32>, vector<16x16xf32> -> vector<16x16xf32>
      %374 = arith.addf %367, %373 : vector<16x16xf32>
      %375 = vector.broadcast %20 : vector<1x16xf32> to vector<16x16xf32>
      %376 = arith.addf %374, %375 : vector<16x16xf32>
      %cst_430 = arith.constant 0.000000e+00 : f32
      %377 = vector.broadcast %cst_430 : f32 to vector<16x16xf32>
      %378 = arith.maximumf %376, %377 : vector<16x16xf32>
      %c1_i32_431 = arith.constant 1 : i32
      %379 = arith.addi %arg37, %c1_i32_431 : i32
      %380 = arith.index_cast %379 : i32 to index
      %c1_432 = arith.constant 1 : index
      %c0_433 = arith.constant 0 : index
      %381 = vector.load %arg27[%380, %c1_432, %c0_433] : memref<18x18x16xf32, #tpu.memory_space<vmem>>, vector<1x16x16xf32>
      %382 = vector.shape_cast %381 : vector<1x16x16xf32> to vector<16x16xf32>
      %383 = vector.shape_cast %378 : vector<16x16xf32> to vector<1x16x16xf32>
      tpu.vector_store %arg27[%380, %c1_432, %c0_433], %383 {strides = array<i32>} : memref<18x18x16xf32, #tpu.memory_space<vmem>>, vector<1x16x16xf32>,
    }
    %c16_i32_40 = arith.constant 16 : i32
    %c0_41 = arith.constant 0 : index
    %c0_42 = arith.constant 0 : index
    %22 = vector.load %arg5[%c0_41, %c0_42] : memref<1x16xf32, #tpu.memory_space<vmem>>, vector<1x16xf32>
    %c0_i32_43 = arith.constant 0 : i32
    %c8_i32 = arith.constant 8 : i32
    %23 = arith.addi %c0_i32_43, %c8_i32 : i32
    %c1_i32_44 = arith.constant 1 : i32
    scf.for %arg37 = %c0_i32_43 to %23 step %c1_i32_44  : i32 {
      %c2_i32 = arith.constant 2 : i32
      %307 = arith.muli %arg37, %c2_i32 : i32
      %c0_i32_362 = arith.constant 0 : i32
      %308 = arith.addi %307, %c0_i32_362 : i32
      %309 = arith.index_cast %308 : i32 to index
      %c0_363 = arith.constant 0 : index
      %c0_364 = arith.constant 0 : index
      %310 = tpu.strided_load %arg27[%309, %c0_363, %c0_364] {strides = array<i32: 1, 2, 1>} : memref<18x18x16xf32, #tpu.memory_space<vmem>>, vector<1x8x16xf32>
      %311 = vector.shape_cast %310 : vector<1x8x16xf32> to vector<8x16xf32>
      %c0_365 = arith.constant 0 : index
      %c0_366 = arith.constant 0 : index
      %c0_367 = arith.constant 0 : index
      %312 = vector.load %arg4[%c0_365, %c0_366, %c0_367] : memref<9x16x16xf32, #tpu.memory_space<vmem>>, vector<1x16x16xf32>
      %313 = vector.shape_cast %312 : vector<1x16x16xf32> to vector<16x16xf32>
      %cst_368 = arith.constant dense<0.000000e+00> : vector<8x16xf32>
      %314 = tpu.matmul %311, %313, %cst_368 {dimension_numbers = #tpu.dot_dimension_numbers<[1], [0], [0], [1], [0, 0, 1, 1], [], []>} : vector<8x16xf32>, vector<16x16xf32>, vector<8x16xf32> -> vector<8x16xf32>
      %315 = arith.index_cast %308 : i32 to index
      %c1_369 = arith.constant 1 : index
      %c0_370 = arith.constant 0 : index
      %316 = tpu.strided_load %arg27[%315, %c1_369, %c0_370] {strides = array<i32: 1, 2, 1>} : memref<18x18x16xf32, #tpu.memory_space<vmem>>, vector<1x8x16xf32>
      %317 = vector.shape_cast %316 : vector<1x8x16xf32> to vector<8x16xf32>
      %c1_371 = arith.constant 1 : index
      %c0_372 = arith.constant 0 : index
      %c0_373 = arith.constant 0 : index
      %318 = vector.load %arg4[%c1_371, %c0_372, %c0_373] : memref<9x16x16xf32, #tpu.memory_space<vmem>>, vector<1x16x16xf32>
      %319 = vector.shape_cast %318 : vector<1x16x16xf32> to vector<16x16xf32>
      %cst_374 = arith.constant dense<0.000000e+00> : vector<8x16xf32>
      %320 = tpu.matmul %317, %319, %cst_374 {dimension_numbers = #tpu.dot_dimension_numbers<[1], [0], [0], [1], [0, 0, 1, 1], [], []>} : vector<8x16xf32>, vector<16x16xf32>, vector<8x16xf32> -> vector<8x16xf32>
      %321 = arith.addf %314, %320 : vector<8x16xf32>
      %322 = arith.index_cast %308 : i32 to index
      %c2_375 = arith.constant 2 : index
      %c0_376 = arith.constant 0 : index
      %323 = tpu.strided_load %arg27[%322, %c2_375, %c0_376] {strides = array<i32: 1, 2, 1>} : memref<18x18x16xf32, #tpu.memory_space<vmem>>, vector<1x8x16xf32>
      %324 = vector.shape_cast %323 : vector<1x8x16xf32> to vector<8x16xf32>
      %c2_377 = arith.constant 2 : index
      %c0_378 = arith.constant 0 : index
      %c0_379 = arith.constant 0 : index
      %325 = vector.load %arg4[%c2_377, %c0_378, %c0_379] : memref<9x16x16xf32, #tpu.memory_space<vmem>>, vector<1x16x16xf32>
      %326 = vector.shape_cast %325 : vector<1x16x16xf32> to vector<16x16xf32>
      %cst_380 = arith.constant dense<0.000000e+00> : vector<8x16xf32>
      %327 = tpu.matmul %324, %326, %cst_380 {dimension_numbers = #tpu.dot_dimension_numbers<[1], [0], [0], [1], [0, 0, 1, 1], [], []>} : vector<8x16xf32>, vector<16x16xf32>, vector<8x16xf32> -> vector<8x16xf32>
      %328 = arith.addf %321, %327 : vector<8x16xf32>
      %c2_i32_381 = arith.constant 2 : i32
      %329 = arith.muli %arg37, %c2_i32_381 : i32
      %c1_i32_382 = arith.constant 1 : i32
      %330 = arith.addi %329, %c1_i32_382 : i32
      %331 = arith.index_cast %330 : i32 to index
      %c0_383 = arith.constant 0 : index
      %c0_384 = arith.constant 0 : index
      %332 = tpu.strided_load %arg27[%331, %c0_383, %c0_384] {strides = array<i32: 1, 2, 1>} : memref<18x18x16xf32, #tpu.memory_space<vmem>>, vector<1x8x16xf32>
      %333 = vector.shape_cast %332 : vector<1x8x16xf32> to vector<8x16xf32>
      %c3_385 = arith.constant 3 : index
      %c0_386 = arith.constant 0 : index
      %c0_387 = arith.constant 0 : index
      %334 = vector.load %arg4[%c3_385, %c0_386, %c0_387] : memref<9x16x16xf32, #tpu.memory_space<vmem>>, vector<1x16x16xf32>
      %335 = vector.shape_cast %334 : vector<1x16x16xf32> to vector<16x16xf32>
      %cst_388 = arith.constant dense<0.000000e+00> : vector<8x16xf32>
      %336 = tpu.matmul %333, %335, %cst_388 {dimension_numbers = #tpu.dot_dimension_numbers<[1], [0], [0], [1], [0, 0, 1, 1], [], []>} : vector<8x16xf32>, vector<16x16xf32>, vector<8x16xf32> -> vector<8x16xf32>
      %337 = arith.addf %328, %336 : vector<8x16xf32>
      %338 = arith.index_cast %330 : i32 to index
      %c1_389 = arith.constant 1 : index
      %c0_390 = arith.constant 0 : index
      %339 = tpu.strided_load %arg27[%338, %c1_389, %c0_390] {strides = array<i32: 1, 2, 1>} : memref<18x18x16xf32, #tpu.memory_space<vmem>>, vector<1x8x16xf32>
      %340 = vector.shape_cast %339 : vector<1x8x16xf32> to vector<8x16xf32>
      %c4_391 = arith.constant 4 : index
      %c0_392 = arith.constant 0 : index
      %c0_393 = arith.constant 0 : index
      %341 = vector.load %arg4[%c4_391, %c0_392, %c0_393] : memref<9x16x16xf32, #tpu.memory_space<vmem>>, vector<1x16x16xf32>
      %342 = vector.shape_cast %341 : vector<1x16x16xf32> to vector<16x16xf32>
      %cst_394 = arith.constant dense<0.000000e+00> : vector<8x16xf32>
      %343 = tpu.matmul %340, %342, %cst_394 {dimension_numbers = #tpu.dot_dimension_numbers<[1], [0], [0], [1], [0, 0, 1, 1], [], []>} : vector<8x16xf32>, vector<16x16xf32>, vector<8x16xf32> -> vector<8x16xf32>
      %344 = arith.addf %337, %343 : vector<8x16xf32>
      %345 = arith.index_cast %330 : i32 to index
      %c2_395 = arith.constant 2 : index
      %c0_396 = arith.constant 0 : index
      %346 = tpu.strided_load %arg27[%345, %c2_395, %c0_396] {strides = array<i32: 1, 2, 1>} : memref<18x18x16xf32, #tpu.memory_space<vmem>>, vector<1x8x16xf32>
      %347 = vector.shape_cast %346 : vector<1x8x16xf32> to vector<8x16xf32>
      %c5_397 = arith.constant 5 : index
      %c0_398 = arith.constant 0 : index
      %c0_399 = arith.constant 0 : index
      %348 = vector.load %arg4[%c5_397, %c0_398, %c0_399] : memref<9x16x16xf32, #tpu.memory_space<vmem>>, vector<1x16x16xf32>
      %349 = vector.shape_cast %348 : vector<1x16x16xf32> to vector<16x16xf32>
      %cst_400 = arith.constant dense<0.000000e+00> : vector<8x16xf32>
      %350 = tpu.matmul %347, %349, %cst_400 {dimension_numbers = #tpu.dot_dimension_numbers<[1], [0], [0], [1], [0, 0, 1, 1], [], []>} : vector<8x16xf32>, vector<16x16xf32>, vector<8x16xf32> -> vector<8x16xf32>
      %351 = arith.addf %344, %350 : vector<8x16xf32>
      %c2_i32_401 = arith.constant 2 : i32
      %352 = arith.muli %arg37, %c2_i32_401 : i32
      %c2_i32_402 = arith.constant 2 : i32
      %353 = arith.addi %352, %c2_i32_402 : i32
      %354 = arith.index_cast %353 : i32 to index
      %c0_403 = arith.constant 0 : index
      %c0_404 = arith.constant 0 : index
      %355 = tpu.strided_load %arg27[%354, %c0_403, %c0_404] {strides = array<i32: 1, 2, 1>} : memref<18x18x16xf32, #tpu.memory_space<vmem>>, vector<1x8x16xf32>
      %356 = vector.shape_cast %355 : vector<1x8x16xf32> to vector<8x16xf32>
      %c6_405 = arith.constant 6 : index
      %c0_406 = arith.constant 0 : index
      %c0_407 = arith.constant 0 : index
      %357 = vector.load %arg4[%c6_405, %c0_406, %c0_407] : memref<9x16x16xf32, #tpu.memory_space<vmem>>, vector<1x16x16xf32>
      %358 = vector.shape_cast %357 : vector<1x16x16xf32> to vector<16x16xf32>
      %cst_408 = arith.constant dense<0.000000e+00> : vector<8x16xf32>
      %359 = tpu.matmul %356, %358, %cst_408 {dimension_numbers = #tpu.dot_dimension_numbers<[1], [0], [0], [1], [0, 0, 1, 1], [], []>} : vector<8x16xf32>, vector<16x16xf32>, vector<8x16xf32> -> vector<8x16xf32>
      %360 = arith.addf %351, %359 : vector<8x16xf32>
      %361 = arith.index_cast %353 : i32 to index
      %c1_409 = arith.constant 1 : index
      %c0_410 = arith.constant 0 : index
      %362 = tpu.strided_load %arg27[%361, %c1_409, %c0_410] {strides = array<i32: 1, 2, 1>} : memref<18x18x16xf32, #tpu.memory_space<vmem>>, vector<1x8x16xf32>
      %363 = vector.shape_cast %362 : vector<1x8x16xf32> to vector<8x16xf32>
      %c7_411 = arith.constant 7 : index
      %c0_412 = arith.constant 0 : index
      %c0_413 = arith.constant 0 : index
      %364 = vector.load %arg4[%c7_411, %c0_412, %c0_413] : memref<9x16x16xf32, #tpu.memory_space<vmem>>, vector<1x16x16xf32>
      %365 = vector.shape_cast %364 : vector<1x16x16xf32> to vector<16x16xf32>
      %cst_414 = arith.constant dense<0.000000e+00> : vector<8x16xf32>
      %366 = tpu.matmul %363, %365, %cst_414 {dimension_numbers = #tpu.dot_dimension_numbers<[1], [0], [0], [1], [0, 0, 1, 1], [], []>} : vector<8x16xf32>, vector<16x16xf32>, vector<8x16xf32> -> vector<8x16xf32>
      %367 = arith.addf %360, %366 : vector<8x16xf32>
      %368 = arith.index_cast %353 : i32 to index
      %c2_415 = arith.constant 2 : index
      %c0_416 = arith.constant 0 : index
      %369 = tpu.strided_load %arg27[%368, %c2_415, %c0_416] {strides = array<i32: 1, 2, 1>} : memref<18x18x16xf32, #tpu.memory_space<vmem>>, vector<1x8x16xf32>
      %370 = vector.shape_cast %369 : vector<1x8x16xf32> to vector<8x16xf32>
      %c8_417 = arith.constant 8 : index
      %c0_418 = arith.constant 0 : index
      %c0_419 = arith.constant 0 : index
      %371 = vector.load %arg4[%c8_417, %c0_418, %c0_419] : memref<9x16x16xf32, #tpu.memory_space<vmem>>, vector<1x16x16xf32>
      %372 = vector.shape_cast %371 : vector<1x16x16xf32> to vector<16x16xf32>
      %cst_420 = arith.constant dense<0.000000e+00> : vector<8x16xf32>
      %373 = tpu.matmul %370, %372, %cst_420 {dimension_numbers = #tpu.dot_dimension_numbers<[1], [0], [0], [1], [0, 0, 1, 1], [], []>} : vector<8x16xf32>, vector<16x16xf32>, vector<8x16xf32> -> vector<8x16xf32>
      %374 = arith.addf %367, %373 : vector<8x16xf32>
      %375 = vector.broadcast %22 : vector<1x16xf32> to vector<8x16xf32>
      %376 = arith.addf %374, %375 : vector<8x16xf32>
      %cst_421 = arith.constant 0.000000e+00 : f32
      %377 = vector.broadcast %cst_421 : f32 to vector<8x16xf32>
      %378 = arith.maximumf %376, %377 : vector<8x16xf32>
      %c1_i32_422 = arith.constant 1 : i32
      %379 = arith.addi %arg37, %c1_i32_422 : i32
      %380 = arith.index_cast %379 : i32 to index
      %c1_423 = arith.constant 1 : index
      %c0_424 = arith.constant 0 : index
      %381 = vector.load %arg28[%380, %c1_423, %c0_424] : memref<10x10x16xf32, #tpu.memory_space<vmem>>, vector<1x8x16xf32>
      %382 = vector.shape_cast %381 : vector<1x8x16xf32> to vector<8x16xf32>
      %383 = vector.shape_cast %378 : vector<8x16xf32> to vector<1x8x16xf32>
      tpu.vector_store %arg28[%380, %c1_423, %c0_424], %383 {strides = array<i32>} : memref<10x10x16xf32, #tpu.memory_space<vmem>>, vector<1x8x16xf32>,
    }
    %c8_i32_45 = arith.constant 8 : i32
    %c0_46 = arith.constant 0 : index
    %c0_47 = arith.constant 0 : index
    %24 = vector.load %arg7[%c0_46, %c0_47] : memref<1x16xf32, #tpu.memory_space<vmem>>, vector<1x16xf32>
    %c0_i32_48 = arith.constant 0 : i32
    %c8_i32_49 = arith.constant 8 : i32
    %25 = arith.addi %c0_i32_48, %c8_i32_49 : i32
    %c1_i32_50 = arith.constant 1 : i32
    scf.for %arg37 = %c0_i32_48 to %25 step %c1_i32_50  : i32 {
      %c1_i32_362 = arith.constant 1 : i32
      %307 = arith.muli %arg37, %c1_i32_362 : i32
      %c0_i32_363 = arith.constant 0 : i32
      %308 = arith.addi %307, %c0_i32_363 : i32
      %309 = arith.index_cast %308 : i32 to index
      %c0_364 = arith.constant 0 : index
      %c0_365 = arith.constant 0 : index
      %310 = vector.load %arg28[%309, %c0_364, %c0_365] : memref<10x10x16xf32, #tpu.memory_space<vmem>>, vector<1x8x16xf32>
      %311 = vector.shape_cast %310 : vector<1x8x16xf32> to vector<8x16xf32>
      %c0_366 = arith.constant 0 : index
      %c0_367 = arith.constant 0 : index
      %c0_368 = arith.constant 0 : index
      %312 = vector.load %arg6[%c0_366, %c0_367, %c0_368] : memref<9x16x16xf32, #tpu.memory_space<vmem>>, vector<1x16x16xf32>
      %313 = vector.shape_cast %312 : vector<1x16x16xf32> to vector<16x16xf32>
      %cst_369 = arith.constant dense<0.000000e+00> : vector<8x16xf32>
      %314 = tpu.matmul %311, %313, %cst_369 {dimension_numbers = #tpu.dot_dimension_numbers<[1], [0], [0], [1], [0, 0, 1, 1], [], []>} : vector<8x16xf32>, vector<16x16xf32>, vector<8x16xf32> -> vector<8x16xf32>
      %315 = arith.index_cast %308 : i32 to index
      %c1_370 = arith.constant 1 : index
      %c0_371 = arith.constant 0 : index
      %316 = vector.load %arg28[%315, %c1_370, %c0_371] : memref<10x10x16xf32, #tpu.memory_space<vmem>>, vector<1x8x16xf32>
      %317 = vector.shape_cast %316 : vector<1x8x16xf32> to vector<8x16xf32>
      %c1_372 = arith.constant 1 : index
      %c0_373 = arith.constant 0 : index
      %c0_374 = arith.constant 0 : index
      %318 = vector.load %arg6[%c1_372, %c0_373, %c0_374] : memref<9x16x16xf32, #tpu.memory_space<vmem>>, vector<1x16x16xf32>
      %319 = vector.shape_cast %318 : vector<1x16x16xf32> to vector<16x16xf32>
      %cst_375 = arith.constant dense<0.000000e+00> : vector<8x16xf32>
      %320 = tpu.matmul %317, %319, %cst_375 {dimension_numbers = #tpu.dot_dimension_numbers<[1], [0], [0], [1], [0, 0, 1, 1], [], []>} : vector<8x16xf32>, vector<16x16xf32>, vector<8x16xf32> -> vector<8x16xf32>
      %321 = arith.addf %314, %320 : vector<8x16xf32>
      %322 = arith.index_cast %308 : i32 to index
      %c2_376 = arith.constant 2 : index
      %c0_377 = arith.constant 0 : index
      %323 = vector.load %arg28[%322, %c2_376, %c0_377] : memref<10x10x16xf32, #tpu.memory_space<vmem>>, vector<1x8x16xf32>
      %324 = vector.shape_cast %323 : vector<1x8x16xf32> to vector<8x16xf32>
      %c2_378 = arith.constant 2 : index
      %c0_379 = arith.constant 0 : index
      %c0_380 = arith.constant 0 : index
      %325 = vector.load %arg6[%c2_378, %c0_379, %c0_380] : memref<9x16x16xf32, #tpu.memory_space<vmem>>, vector<1x16x16xf32>
      %326 = vector.shape_cast %325 : vector<1x16x16xf32> to vector<16x16xf32>
      %cst_381 = arith.constant dense<0.000000e+00> : vector<8x16xf32>
      %327 = tpu.matmul %324, %326, %cst_381 {dimension_numbers = #tpu.dot_dimension_numbers<[1], [0], [0], [1], [0, 0, 1, 1], [], []>} : vector<8x16xf32>, vector<16x16xf32>, vector<8x16xf32> -> vector<8x16xf32>
      %328 = arith.addf %321, %327 : vector<8x16xf32>
      %c1_i32_382 = arith.constant 1 : i32
      %329 = arith.muli %arg37, %c1_i32_382 : i32
      %c1_i32_383 = arith.constant 1 : i32
      %330 = arith.addi %329, %c1_i32_383 : i32
      %331 = arith.index_cast %330 : i32 to index
      %c0_384 = arith.constant 0 : index
      %c0_385 = arith.constant 0 : index
      %332 = vector.load %arg28[%331, %c0_384, %c0_385] : memref<10x10x16xf32, #tpu.memory_space<vmem>>, vector<1x8x16xf32>
      %333 = vector.shape_cast %332 : vector<1x8x16xf32> to vector<8x16xf32>
      %c3_386 = arith.constant 3 : index
      %c0_387 = arith.constant 0 : index
      %c0_388 = arith.constant 0 : index
      %334 = vector.load %arg6[%c3_386, %c0_387, %c0_388] : memref<9x16x16xf32, #tpu.memory_space<vmem>>, vector<1x16x16xf32>
      %335 = vector.shape_cast %334 : vector<1x16x16xf32> to vector<16x16xf32>
      %cst_389 = arith.constant dense<0.000000e+00> : vector<8x16xf32>
      %336 = tpu.matmul %333, %335, %cst_389 {dimension_numbers = #tpu.dot_dimension_numbers<[1], [0], [0], [1], [0, 0, 1, 1], [], []>} : vector<8x16xf32>, vector<16x16xf32>, vector<8x16xf32> -> vector<8x16xf32>
      %337 = arith.addf %328, %336 : vector<8x16xf32>
      %338 = arith.index_cast %330 : i32 to index
      %c1_390 = arith.constant 1 : index
      %c0_391 = arith.constant 0 : index
      %339 = vector.load %arg28[%338, %c1_390, %c0_391] : memref<10x10x16xf32, #tpu.memory_space<vmem>>, vector<1x8x16xf32>
      %340 = vector.shape_cast %339 : vector<1x8x16xf32> to vector<8x16xf32>
      %c4_392 = arith.constant 4 : index
      %c0_393 = arith.constant 0 : index
      %c0_394 = arith.constant 0 : index
      %341 = vector.load %arg6[%c4_392, %c0_393, %c0_394] : memref<9x16x16xf32, #tpu.memory_space<vmem>>, vector<1x16x16xf32>
      %342 = vector.shape_cast %341 : vector<1x16x16xf32> to vector<16x16xf32>
      %cst_395 = arith.constant dense<0.000000e+00> : vector<8x16xf32>
      %343 = tpu.matmul %340, %342, %cst_395 {dimension_numbers = #tpu.dot_dimension_numbers<[1], [0], [0], [1], [0, 0, 1, 1], [], []>} : vector<8x16xf32>, vector<16x16xf32>, vector<8x16xf32> -> vector<8x16xf32>
      %344 = arith.addf %337, %343 : vector<8x16xf32>
      %345 = arith.index_cast %330 : i32 to index
      %c2_396 = arith.constant 2 : index
      %c0_397 = arith.constant 0 : index
      %346 = vector.load %arg28[%345, %c2_396, %c0_397] : memref<10x10x16xf32, #tpu.memory_space<vmem>>, vector<1x8x16xf32>
      %347 = vector.shape_cast %346 : vector<1x8x16xf32> to vector<8x16xf32>
      %c5_398 = arith.constant 5 : index
      %c0_399 = arith.constant 0 : index
      %c0_400 = arith.constant 0 : index
      %348 = vector.load %arg6[%c5_398, %c0_399, %c0_400] : memref<9x16x16xf32, #tpu.memory_space<vmem>>, vector<1x16x16xf32>
      %349 = vector.shape_cast %348 : vector<1x16x16xf32> to vector<16x16xf32>
      %cst_401 = arith.constant dense<0.000000e+00> : vector<8x16xf32>
      %350 = tpu.matmul %347, %349, %cst_401 {dimension_numbers = #tpu.dot_dimension_numbers<[1], [0], [0], [1], [0, 0, 1, 1], [], []>} : vector<8x16xf32>, vector<16x16xf32>, vector<8x16xf32> -> vector<8x16xf32>
      %351 = arith.addf %344, %350 : vector<8x16xf32>
      %c1_i32_402 = arith.constant 1 : i32
      %352 = arith.muli %arg37, %c1_i32_402 : i32
      %c2_i32 = arith.constant 2 : i32
      %353 = arith.addi %352, %c2_i32 : i32
      %354 = arith.index_cast %353 : i32 to index
      %c0_403 = arith.constant 0 : index
      %c0_404 = arith.constant 0 : index
      %355 = vector.load %arg28[%354, %c0_403, %c0_404] : memref<10x10x16xf32, #tpu.memory_space<vmem>>, vector<1x8x16xf32>
      %356 = vector.shape_cast %355 : vector<1x8x16xf32> to vector<8x16xf32>
      %c6_405 = arith.constant 6 : index
      %c0_406 = arith.constant 0 : index
      %c0_407 = arith.constant 0 : index
      %357 = vector.load %arg6[%c6_405, %c0_406, %c0_407] : memref<9x16x16xf32, #tpu.memory_space<vmem>>, vector<1x16x16xf32>
      %358 = vector.shape_cast %357 : vector<1x16x16xf32> to vector<16x16xf32>
      %cst_408 = arith.constant dense<0.000000e+00> : vector<8x16xf32>
      %359 = tpu.matmul %356, %358, %cst_408 {dimension_numbers = #tpu.dot_dimension_numbers<[1], [0], [0], [1], [0, 0, 1, 1], [], []>} : vector<8x16xf32>, vector<16x16xf32>, vector<8x16xf32> -> vector<8x16xf32>
      %360 = arith.addf %351, %359 : vector<8x16xf32>
      %361 = arith.index_cast %353 : i32 to index
      %c1_409 = arith.constant 1 : index
      %c0_410 = arith.constant 0 : index
      %362 = vector.load %arg28[%361, %c1_409, %c0_410] : memref<10x10x16xf32, #tpu.memory_space<vmem>>, vector<1x8x16xf32>
      %363 = vector.shape_cast %362 : vector<1x8x16xf32> to vector<8x16xf32>
      %c7_411 = arith.constant 7 : index
      %c0_412 = arith.constant 0 : index
      %c0_413 = arith.constant 0 : index
      %364 = vector.load %arg6[%c7_411, %c0_412, %c0_413] : memref<9x16x16xf32, #tpu.memory_space<vmem>>, vector<1x16x16xf32>
      %365 = vector.shape_cast %364 : vector<1x16x16xf32> to vector<16x16xf32>
      %cst_414 = arith.constant dense<0.000000e+00> : vector<8x16xf32>
      %366 = tpu.matmul %363, %365, %cst_414 {dimension_numbers = #tpu.dot_dimension_numbers<[1], [0], [0], [1], [0, 0, 1, 1], [], []>} : vector<8x16xf32>, vector<16x16xf32>, vector<8x16xf32> -> vector<8x16xf32>
      %367 = arith.addf %360, %366 : vector<8x16xf32>
      %368 = arith.index_cast %353 : i32 to index
      %c2_415 = arith.constant 2 : index
      %c0_416 = arith.constant 0 : index
      %369 = vector.load %arg28[%368, %c2_415, %c0_416] : memref<10x10x16xf32, #tpu.memory_space<vmem>>, vector<1x8x16xf32>
      %370 = vector.shape_cast %369 : vector<1x8x16xf32> to vector<8x16xf32>
      %c8_417 = arith.constant 8 : index
      %c0_418 = arith.constant 0 : index
      %c0_419 = arith.constant 0 : index
      %371 = vector.load %arg6[%c8_417, %c0_418, %c0_419] : memref<9x16x16xf32, #tpu.memory_space<vmem>>, vector<1x16x16xf32>
      %372 = vector.shape_cast %371 : vector<1x16x16xf32> to vector<16x16xf32>
      %cst_420 = arith.constant dense<0.000000e+00> : vector<8x16xf32>
      %373 = tpu.matmul %370, %372, %cst_420 {dimension_numbers = #tpu.dot_dimension_numbers<[1], [0], [0], [1], [0, 0, 1, 1], [], []>} : vector<8x16xf32>, vector<16x16xf32>, vector<8x16xf32> -> vector<8x16xf32>
      %374 = arith.addf %367, %373 : vector<8x16xf32>
      %375 = vector.broadcast %24 : vector<1x16xf32> to vector<8x16xf32>
      %376 = arith.addf %374, %375 : vector<8x16xf32>
      %cst_421 = arith.constant 0.000000e+00 : f32
      %377 = vector.broadcast %cst_421 : f32 to vector<8x16xf32>
      %378 = arith.maximumf %376, %377 : vector<8x16xf32>
      %c1_i32_422 = arith.constant 1 : i32
      %379 = arith.addi %arg37, %c1_i32_422 : i32
      %380 = arith.index_cast %379 : i32 to index
      %c1_423 = arith.constant 1 : index
      %c0_424 = arith.constant 0 : index
      %381 = vector.load %arg29[%380, %c1_423, %c0_424] : memref<10x10x16xf32, #tpu.memory_space<vmem>>, vector<1x8x16xf32>
      %382 = vector.shape_cast %381 : vector<1x8x16xf32> to vector<8x16xf32>
      %383 = vector.shape_cast %378 : vector<8x16xf32> to vector<1x8x16xf32>
      tpu.vector_store %arg29[%380, %c1_423, %c0_424], %383 {strides = array<i32>} : memref<10x10x16xf32, #tpu.memory_space<vmem>>, vector<1x8x16xf32>,
    }
    %c8_i32_51 = arith.constant 8 : i32
    %c0_52 = arith.constant 0 : index
    %c0_53 = arith.constant 0 : index
    %26 = vector.load %arg9[%c0_52, %c0_53] : memref<1x32xf32, #tpu.memory_space<vmem>>, vector<1x32xf32>
    %c0_i32_54 = arith.constant 0 : i32
    %c4_i32 = arith.constant 4 : i32
    %27 = arith.addi %c0_i32_54, %c4_i32 : i32
    %c1_i32_55 = arith.constant 1 : i32
    scf.for %arg37 = %c0_i32_54 to %27 step %c1_i32_55  : i32 {
      %c2_i32 = arith.constant 2 : i32
      %307 = arith.muli %arg37, %c2_i32 : i32
      %c0_i32_362 = arith.constant 0 : i32
      %308 = arith.addi %307, %c0_i32_362 : i32
      %309 = arith.index_cast %308 : i32 to index
      %c0_363 = arith.constant 0 : index
      %c0_364 = arith.constant 0 : index
      %310 = tpu.strided_load %arg29[%309, %c0_363, %c0_364] {strides = array<i32: 1, 2, 1>} : memref<10x10x16xf32, #tpu.memory_space<vmem>>, vector<1x4x16xf32>
      %311 = vector.shape_cast %310 : vector<1x4x16xf32> to vector<4x16xf32>
      %c0_365 = arith.constant 0 : index
      %c0_366 = arith.constant 0 : index
      %c0_367 = arith.constant 0 : index
      %312 = vector.load %arg8[%c0_365, %c0_366, %c0_367] : memref<9x16x32xf32, #tpu.memory_space<vmem>>, vector<1x16x32xf32>
      %313 = vector.shape_cast %312 : vector<1x16x32xf32> to vector<16x32xf32>
      %cst_368 = arith.constant dense<0.000000e+00> : vector<4x32xf32>
      %314 = tpu.matmul %311, %313, %cst_368 {dimension_numbers = #tpu.dot_dimension_numbers<[1], [0], [0], [1], [0, 0, 1, 1], [], []>} : vector<4x16xf32>, vector<16x32xf32>, vector<4x32xf32> -> vector<4x32xf32>
      %315 = arith.index_cast %308 : i32 to index
      %c1_369 = arith.constant 1 : index
      %c0_370 = arith.constant 0 : index
      %316 = tpu.strided_load %arg29[%315, %c1_369, %c0_370] {strides = array<i32: 1, 2, 1>} : memref<10x10x16xf32, #tpu.memory_space<vmem>>, vector<1x4x16xf32>
      %317 = vector.shape_cast %316 : vector<1x4x16xf32> to vector<4x16xf32>
      %c1_371 = arith.constant 1 : index
      %c0_372 = arith.constant 0 : index
      %c0_373 = arith.constant 0 : index
      %318 = vector.load %arg8[%c1_371, %c0_372, %c0_373] : memref<9x16x32xf32, #tpu.memory_space<vmem>>, vector<1x16x32xf32>
      %319 = vector.shape_cast %318 : vector<1x16x32xf32> to vector<16x32xf32>
      %cst_374 = arith.constant dense<0.000000e+00> : vector<4x32xf32>
      %320 = tpu.matmul %317, %319, %cst_374 {dimension_numbers = #tpu.dot_dimension_numbers<[1], [0], [0], [1], [0, 0, 1, 1], [], []>} : vector<4x16xf32>, vector<16x32xf32>, vector<4x32xf32> -> vector<4x32xf32>
      %321 = arith.addf %314, %320 : vector<4x32xf32>
      %322 = arith.index_cast %308 : i32 to index
      %c2_375 = arith.constant 2 : index
      %c0_376 = arith.constant 0 : index
      %323 = tpu.strided_load %arg29[%322, %c2_375, %c0_376] {strides = array<i32: 1, 2, 1>} : memref<10x10x16xf32, #tpu.memory_space<vmem>>, vector<1x4x16xf32>
      %324 = vector.shape_cast %323 : vector<1x4x16xf32> to vector<4x16xf32>
      %c2_377 = arith.constant 2 : index
      %c0_378 = arith.constant 0 : index
      %c0_379 = arith.constant 0 : index
      %325 = vector.load %arg8[%c2_377, %c0_378, %c0_379] : memref<9x16x32xf32, #tpu.memory_space<vmem>>, vector<1x16x32xf32>
      %326 = vector.shape_cast %325 : vector<1x16x32xf32> to vector<16x32xf32>
      %cst_380 = arith.constant dense<0.000000e+00> : vector<4x32xf32>
      %327 = tpu.matmul %324, %326, %cst_380 {dimension_numbers = #tpu.dot_dimension_numbers<[1], [0], [0], [1], [0, 0, 1, 1], [], []>} : vector<4x16xf32>, vector<16x32xf32>, vector<4x32xf32> -> vector<4x32xf32>
      %328 = arith.addf %321, %327 : vector<4x32xf32>
      %c2_i32_381 = arith.constant 2 : i32
      %329 = arith.muli %arg37, %c2_i32_381 : i32
      %c1_i32_382 = arith.constant 1 : i32
      %330 = arith.addi %329, %c1_i32_382 : i32
      %331 = arith.index_cast %330 : i32 to index
      %c0_383 = arith.constant 0 : index
      %c0_384 = arith.constant 0 : index
      %332 = tpu.strided_load %arg29[%331, %c0_383, %c0_384] {strides = array<i32: 1, 2, 1>} : memref<10x10x16xf32, #tpu.memory_space<vmem>>, vector<1x4x16xf32>
      %333 = vector.shape_cast %332 : vector<1x4x16xf32> to vector<4x16xf32>
      %c3_385 = arith.constant 3 : index
      %c0_386 = arith.constant 0 : index
      %c0_387 = arith.constant 0 : index
      %334 = vector.load %arg8[%c3_385, %c0_386, %c0_387] : memref<9x16x32xf32, #tpu.memory_space<vmem>>, vector<1x16x32xf32>
      %335 = vector.shape_cast %334 : vector<1x16x32xf32> to vector<16x32xf32>
      %cst_388 = arith.constant dense<0.000000e+00> : vector<4x32xf32>
      %336 = tpu.matmul %333, %335, %cst_388 {dimension_numbers = #tpu.dot_dimension_numbers<[1], [0], [0], [1], [0, 0, 1, 1], [], []>} : vector<4x16xf32>, vector<16x32xf32>, vector<4x32xf32> -> vector<4x32xf32>
      %337 = arith.addf %328, %336 : vector<4x32xf32>
      %338 = arith.index_cast %330 : i32 to index
      %c1_389 = arith.constant 1 : index
      %c0_390 = arith.constant 0 : index
      %339 = tpu.strided_load %arg29[%338, %c1_389, %c0_390] {strides = array<i32: 1, 2, 1>} : memref<10x10x16xf32, #tpu.memory_space<vmem>>, vector<1x4x16xf32>
      %340 = vector.shape_cast %339 : vector<1x4x16xf32> to vector<4x16xf32>
      %c4_391 = arith.constant 4 : index
      %c0_392 = arith.constant 0 : index
      %c0_393 = arith.constant 0 : index
      %341 = vector.load %arg8[%c4_391, %c0_392, %c0_393] : memref<9x16x32xf32, #tpu.memory_space<vmem>>, vector<1x16x32xf32>
      %342 = vector.shape_cast %341 : vector<1x16x32xf32> to vector<16x32xf32>
      %cst_394 = arith.constant dense<0.000000e+00> : vector<4x32xf32>
      %343 = tpu.matmul %340, %342, %cst_394 {dimension_numbers = #tpu.dot_dimension_numbers<[1], [0], [0], [1], [0, 0, 1, 1], [], []>} : vector<4x16xf32>, vector<16x32xf32>, vector<4x32xf32> -> vector<4x32xf32>
      %344 = arith.addf %337, %343 : vector<4x32xf32>
      %345 = arith.index_cast %330 : i32 to index
      %c2_395 = arith.constant 2 : index
      %c0_396 = arith.constant 0 : index
      %346 = tpu.strided_load %arg29[%345, %c2_395, %c0_396] {strides = array<i32: 1, 2, 1>} : memref<10x10x16xf32, #tpu.memory_space<vmem>>, vector<1x4x16xf32>
      %347 = vector.shape_cast %346 : vector<1x4x16xf32> to vector<4x16xf32>
      %c5_397 = arith.constant 5 : index
      %c0_398 = arith.constant 0 : index
      %c0_399 = arith.constant 0 : index
      %348 = vector.load %arg8[%c5_397, %c0_398, %c0_399] : memref<9x16x32xf32, #tpu.memory_space<vmem>>, vector<1x16x32xf32>
      %349 = vector.shape_cast %348 : vector<1x16x32xf32> to vector<16x32xf32>
      %cst_400 = arith.constant dense<0.000000e+00> : vector<4x32xf32>
      %350 = tpu.matmul %347, %349, %cst_400 {dimension_numbers = #tpu.dot_dimension_numbers<[1], [0], [0], [1], [0, 0, 1, 1], [], []>} : vector<4x16xf32>, vector<16x32xf32>, vector<4x32xf32> -> vector<4x32xf32>
      %351 = arith.addf %344, %350 : vector<4x32xf32>
      %c2_i32_401 = arith.constant 2 : i32
      %352 = arith.muli %arg37, %c2_i32_401 : i32
      %c2_i32_402 = arith.constant 2 : i32
      %353 = arith.addi %352, %c2_i32_402 : i32
      %354 = arith.index_cast %353 : i32 to index
      %c0_403 = arith.constant 0 : index
      %c0_404 = arith.constant 0 : index
      %355 = tpu.strided_load %arg29[%354, %c0_403, %c0_404] {strides = array<i32: 1, 2, 1>} : memref<10x10x16xf32, #tpu.memory_space<vmem>>, vector<1x4x16xf32>
      %356 = vector.shape_cast %355 : vector<1x4x16xf32> to vector<4x16xf32>
      %c6_405 = arith.constant 6 : index
      %c0_406 = arith.constant 0 : index
      %c0_407 = arith.constant 0 : index
      %357 = vector.load %arg8[%c6_405, %c0_406, %c0_407] : memref<9x16x32xf32, #tpu.memory_space<vmem>>, vector<1x16x32xf32>
      %358 = vector.shape_cast %357 : vector<1x16x32xf32> to vector<16x32xf32>
      %cst_408 = arith.constant dense<0.000000e+00> : vector<4x32xf32>
      %359 = tpu.matmul %356, %358, %cst_408 {dimension_numbers = #tpu.dot_dimension_numbers<[1], [0], [0], [1], [0, 0, 1, 1], [], []>} : vector<4x16xf32>, vector<16x32xf32>, vector<4x32xf32> -> vector<4x32xf32>
      %360 = arith.addf %351, %359 : vector<4x32xf32>
      %361 = arith.index_cast %353 : i32 to index
      %c1_409 = arith.constant 1 : index
      %c0_410 = arith.constant 0 : index
      %362 = tpu.strided_load %arg29[%361, %c1_409, %c0_410] {strides = array<i32: 1, 2, 1>} : memref<10x10x16xf32, #tpu.memory_space<vmem>>, vector<1x4x16xf32>
      %363 = vector.shape_cast %362 : vector<1x4x16xf32> to vector<4x16xf32>
      %c7_411 = arith.constant 7 : index
      %c0_412 = arith.constant 0 : index
      %c0_413 = arith.constant 0 : index
      %364 = vector.load %arg8[%c7_411, %c0_412, %c0_413] : memref<9x16x32xf32, #tpu.memory_space<vmem>>, vector<1x16x32xf32>
      %365 = vector.shape_cast %364 : vector<1x16x32xf32> to vector<16x32xf32>
      %cst_414 = arith.constant dense<0.000000e+00> : vector<4x32xf32>
      %366 = tpu.matmul %363, %365, %cst_414 {dimension_numbers = #tpu.dot_dimension_numbers<[1], [0], [0], [1], [0, 0, 1, 1], [], []>} : vector<4x16xf32>, vector<16x32xf32>, vector<4x32xf32> -> vector<4x32xf32>
      %367 = arith.addf %360, %366 : vector<4x32xf32>
      %368 = arith.index_cast %353 : i32 to index
      %c2_415 = arith.constant 2 : index
      %c0_416 = arith.constant 0 : index
      %369 = tpu.strided_load %arg29[%368, %c2_415, %c0_416] {strides = array<i32: 1, 2, 1>} : memref<10x10x16xf32, #tpu.memory_space<vmem>>, vector<1x4x16xf32>
      %370 = vector.shape_cast %369 : vector<1x4x16xf32> to vector<4x16xf32>
      %c8_417 = arith.constant 8 : index
      %c0_418 = arith.constant 0 : index
      %c0_419 = arith.constant 0 : index
      %371 = vector.load %arg8[%c8_417, %c0_418, %c0_419] : memref<9x16x32xf32, #tpu.memory_space<vmem>>, vector<1x16x32xf32>
      %372 = vector.shape_cast %371 : vector<1x16x32xf32> to vector<16x32xf32>
      %cst_420 = arith.constant dense<0.000000e+00> : vector<4x32xf32>
      %373 = tpu.matmul %370, %372, %cst_420 {dimension_numbers = #tpu.dot_dimension_numbers<[1], [0], [0], [1], [0, 0, 1, 1], [], []>} : vector<4x16xf32>, vector<16x32xf32>, vector<4x32xf32> -> vector<4x32xf32>
      %374 = arith.addf %367, %373 : vector<4x32xf32>
      %375 = vector.broadcast %26 : vector<1x32xf32> to vector<4x32xf32>
      %376 = arith.addf %374, %375 : vector<4x32xf32>
      %cst_421 = arith.constant 0.000000e+00 : f32
      %377 = vector.broadcast %cst_421 : f32 to vector<4x32xf32>
      %378 = arith.maximumf %376, %377 : vector<4x32xf32>
      %c1_i32_422 = arith.constant 1 : i32
      %379 = arith.addi %arg37, %c1_i32_422 : i32
      %380 = arith.index_cast %379 : i32 to index
      %c1_423 = arith.constant 1 : index
      %c0_424 = arith.constant 0 : index
      %381 = vector.load %arg30[%380, %c1_423, %c0_424] : memref<6x6x32xf32, #tpu.memory_space<vmem>>, vector<1x4x32xf32>
      %382 = vector.shape_cast %381 : vector<1x4x32xf32> to vector<4x32xf32>
      %383 = vector.shape_cast %378 : vector<4x32xf32> to vector<1x4x32xf32>
      tpu.vector_store %arg30[%380, %c1_423, %c0_424], %383 {strides = array<i32>} : memref<6x6x32xf32, #tpu.memory_space<vmem>>, vector<1x4x32xf32>,
    }
    %c4_i32_56 = arith.constant 4 : i32
    %c0_57 = arith.constant 0 : index
    %c0_58 = arith.constant 0 : index
    %28 = vector.load %arg11[%c0_57, %c0_58] : memref<1x32xf32, #tpu.memory_space<vmem>>, vector<1x32xf32>
    %c0_i32_59 = arith.constant 0 : i32
    %c4_i32_60 = arith.constant 4 : i32
    %29 = arith.addi %c0_i32_59, %c4_i32_60 : i32
    %c1_i32_61 = arith.constant 1 : i32
    scf.for %arg37 = %c0_i32_59 to %29 step %c1_i32_61  : i32 {
      %c1_i32_362 = arith.constant 1 : i32
      %307 = arith.muli %arg37, %c1_i32_362 : i32
      %c0_i32_363 = arith.constant 0 : i32
      %308 = arith.addi %307, %c0_i32_363 : i32
      %309 = arith.index_cast %308 : i32 to index
      %c0_364 = arith.constant 0 : index
      %c0_365 = arith.constant 0 : index
      %310 = vector.load %arg30[%309, %c0_364, %c0_365] : memref<6x6x32xf32, #tpu.memory_space<vmem>>, vector<1x4x32xf32>
      %311 = vector.shape_cast %310 : vector<1x4x32xf32> to vector<4x32xf32>
      %c0_366 = arith.constant 0 : index
      %c0_367 = arith.constant 0 : index
      %c0_368 = arith.constant 0 : index
      %312 = vector.load %arg10[%c0_366, %c0_367, %c0_368] : memref<9x32x32xf32, #tpu.memory_space<vmem>>, vector<1x32x32xf32>
      %313 = vector.shape_cast %312 : vector<1x32x32xf32> to vector<32x32xf32>
      %cst_369 = arith.constant dense<0.000000e+00> : vector<4x32xf32>
      %314 = tpu.matmul %311, %313, %cst_369 {dimension_numbers = #tpu.dot_dimension_numbers<[1], [0], [0], [1], [0, 0, 1, 1], [], []>} : vector<4x32xf32>, vector<32x32xf32>, vector<4x32xf32> -> vector<4x32xf32>
      %315 = arith.index_cast %308 : i32 to index
      %c1_370 = arith.constant 1 : index
      %c0_371 = arith.constant 0 : index
      %316 = vector.load %arg30[%315, %c1_370, %c0_371] : memref<6x6x32xf32, #tpu.memory_space<vmem>>, vector<1x4x32xf32>
      %317 = vector.shape_cast %316 : vector<1x4x32xf32> to vector<4x32xf32>
      %c1_372 = arith.constant 1 : index
      %c0_373 = arith.constant 0 : index
      %c0_374 = arith.constant 0 : index
      %318 = vector.load %arg10[%c1_372, %c0_373, %c0_374] : memref<9x32x32xf32, #tpu.memory_space<vmem>>, vector<1x32x32xf32>
      %319 = vector.shape_cast %318 : vector<1x32x32xf32> to vector<32x32xf32>
      %cst_375 = arith.constant dense<0.000000e+00> : vector<4x32xf32>
      %320 = tpu.matmul %317, %319, %cst_375 {dimension_numbers = #tpu.dot_dimension_numbers<[1], [0], [0], [1], [0, 0, 1, 1], [], []>} : vector<4x32xf32>, vector<32x32xf32>, vector<4x32xf32> -> vector<4x32xf32>
      %321 = arith.addf %314, %320 : vector<4x32xf32>
      %322 = arith.index_cast %308 : i32 to index
      %c2_376 = arith.constant 2 : index
      %c0_377 = arith.constant 0 : index
      %323 = vector.load %arg30[%322, %c2_376, %c0_377] : memref<6x6x32xf32, #tpu.memory_space<vmem>>, vector<1x4x32xf32>
      %324 = vector.shape_cast %323 : vector<1x4x32xf32> to vector<4x32xf32>
      %c2_378 = arith.constant 2 : index
      %c0_379 = arith.constant 0 : index
      %c0_380 = arith.constant 0 : index
      %325 = vector.load %arg10[%c2_378, %c0_379, %c0_380] : memref<9x32x32xf32, #tpu.memory_space<vmem>>, vector<1x32x32xf32>
      %326 = vector.shape_cast %325 : vector<1x32x32xf32> to vector<32x32xf32>
      %cst_381 = arith.constant dense<0.000000e+00> : vector<4x32xf32>
      %327 = tpu.matmul %324, %326, %cst_381 {dimension_numbers = #tpu.dot_dimension_numbers<[1], [0], [0], [1], [0, 0, 1, 1], [], []>} : vector<4x32xf32>, vector<32x32xf32>, vector<4x32xf32> -> vector<4x32xf32>
      %328 = arith.addf %321, %327 : vector<4x32xf32>
      %c1_i32_382 = arith.constant 1 : i32
      %329 = arith.muli %arg37, %c1_i32_382 : i32
      %c1_i32_383 = arith.constant 1 : i32
      %330 = arith.addi %329, %c1_i32_383 : i32
      %331 = arith.index_cast %330 : i32 to index
      %c0_384 = arith.constant 0 : index
      %c0_385 = arith.constant 0 : index
      %332 = vector.load %arg30[%331, %c0_384, %c0_385] : memref<6x6x32xf32, #tpu.memory_space<vmem>>, vector<1x4x32xf32>
      %333 = vector.shape_cast %332 : vector<1x4x32xf32> to vector<4x32xf32>
      %c3_386 = arith.constant 3 : index
      %c0_387 = arith.constant 0 : index
      %c0_388 = arith.constant 0 : index
      %334 = vector.load %arg10[%c3_386, %c0_387, %c0_388] : memref<9x32x32xf32, #tpu.memory_space<vmem>>, vector<1x32x32xf32>
      %335 = vector.shape_cast %334 : vector<1x32x32xf32> to vector<32x32xf32>
      %cst_389 = arith.constant dense<0.000000e+00> : vector<4x32xf32>
      %336 = tpu.matmul %333, %335, %cst_389 {dimension_numbers = #tpu.dot_dimension_numbers<[1], [0], [0], [1], [0, 0, 1, 1], [], []>} : vector<4x32xf32>, vector<32x32xf32>, vector<4x32xf32> -> vector<4x32xf32>
      %337 = arith.addf %328, %336 : vector<4x32xf32>
      %338 = arith.index_cast %330 : i32 to index
      %c1_390 = arith.constant 1 : index
      %c0_391 = arith.constant 0 : index
      %339 = vector.load %arg30[%338, %c1_390, %c0_391] : memref<6x6x32xf32, #tpu.memory_space<vmem>>, vector<1x4x32xf32>
      %340 = vector.shape_cast %339 : vector<1x4x32xf32> to vector<4x32xf32>
      %c4_392 = arith.constant 4 : index
      %c0_393 = arith.constant 0 : index
      %c0_394 = arith.constant 0 : index
      %341 = vector.load %arg10[%c4_392, %c0_393, %c0_394] : memref<9x32x32xf32, #tpu.memory_space<vmem>>, vector<1x32x32xf32>
      %342 = vector.shape_cast %341 : vector<1x32x32xf32> to vector<32x32xf32>
      %cst_395 = arith.constant dense<0.000000e+00> : vector<4x32xf32>
      %343 = tpu.matmul %340, %342, %cst_395 {dimension_numbers = #tpu.dot_dimension_numbers<[1], [0], [0], [1], [0, 0, 1, 1], [], []>} : vector<4x32xf32>, vector<32x32xf32>, vector<4x32xf32> -> vector<4x32xf32>
      %344 = arith.addf %337, %343 : vector<4x32xf32>
      %345 = arith.index_cast %330 : i32 to index
      %c2_396 = arith.constant 2 : index
      %c0_397 = arith.constant 0 : index
      %346 = vector.load %arg30[%345, %c2_396, %c0_397] : memref<6x6x32xf32, #tpu.memory_space<vmem>>, vector<1x4x32xf32>
      %347 = vector.shape_cast %346 : vector<1x4x32xf32> to vector<4x32xf32>
      %c5_398 = arith.constant 5 : index
      %c0_399 = arith.constant 0 : index
      %c0_400 = arith.constant 0 : index
      %348 = vector.load %arg10[%c5_398, %c0_399, %c0_400] : memref<9x32x32xf32, #tpu.memory_space<vmem>>, vector<1x32x32xf32>
      %349 = vector.shape_cast %348 : vector<1x32x32xf32> to vector<32x32xf32>
      %cst_401 = arith.constant dense<0.000000e+00> : vector<4x32xf32>
      %350 = tpu.matmul %347, %349, %cst_401 {dimension_numbers = #tpu.dot_dimension_numbers<[1], [0], [0], [1], [0, 0, 1, 1], [], []>} : vector<4x32xf32>, vector<32x32xf32>, vector<4x32xf32> -> vector<4x32xf32>
      %351 = arith.addf %344, %350 : vector<4x32xf32>
      %c1_i32_402 = arith.constant 1 : i32
      %352 = arith.muli %arg37, %c1_i32_402 : i32
      %c2_i32 = arith.constant 2 : i32
      %353 = arith.addi %352, %c2_i32 : i32
      %354 = arith.index_cast %353 : i32 to index
      %c0_403 = arith.constant 0 : index
      %c0_404 = arith.constant 0 : index
      %355 = vector.load %arg30[%354, %c0_403, %c0_404] : memref<6x6x32xf32, #tpu.memory_space<vmem>>, vector<1x4x32xf32>
      %356 = vector.shape_cast %355 : vector<1x4x32xf32> to vector<4x32xf32>
      %c6_405 = arith.constant 6 : index
      %c0_406 = arith.constant 0 : index
      %c0_407 = arith.constant 0 : index
      %357 = vector.load %arg10[%c6_405, %c0_406, %c0_407] : memref<9x32x32xf32, #tpu.memory_space<vmem>>, vector<1x32x32xf32>
      %358 = vector.shape_cast %357 : vector<1x32x32xf32> to vector<32x32xf32>
      %cst_408 = arith.constant dense<0.000000e+00> : vector<4x32xf32>
      %359 = tpu.matmul %356, %358, %cst_408 {dimension_numbers = #tpu.dot_dimension_numbers<[1], [0], [0], [1], [0, 0, 1, 1], [], []>} : vector<4x32xf32>, vector<32x32xf32>, vector<4x32xf32> -> vector<4x32xf32>
      %360 = arith.addf %351, %359 : vector<4x32xf32>
      %361 = arith.index_cast %353 : i32 to index
      %c1_409 = arith.constant 1 : index
      %c0_410 = arith.constant 0 : index
      %362 = vector.load %arg30[%361, %c1_409, %c0_410] : memref<6x6x32xf32, #tpu.memory_space<vmem>>, vector<1x4x32xf32>
      %363 = vector.shape_cast %362 : vector<1x4x32xf32> to vector<4x32xf32>
      %c7_411 = arith.constant 7 : index
      %c0_412 = arith.constant 0 : index
      %c0_413 = arith.constant 0 : index
      %364 = vector.load %arg10[%c7_411, %c0_412, %c0_413] : memref<9x32x32xf32, #tpu.memory_space<vmem>>, vector<1x32x32xf32>
      %365 = vector.shape_cast %364 : vector<1x32x32xf32> to vector<32x32xf32>
      %cst_414 = arith.constant dense<0.000000e+00> : vector<4x32xf32>
      %366 = tpu.matmul %363, %365, %cst_414 {dimension_numbers = #tpu.dot_dimension_numbers<[1], [0], [0], [1], [0, 0, 1, 1], [], []>} : vector<4x32xf32>, vector<32x32xf32>, vector<4x32xf32> -> vector<4x32xf32>
      %367 = arith.addf %360, %366 : vector<4x32xf32>
      %368 = arith.index_cast %353 : i32 to index
      %c2_415 = arith.constant 2 : index
      %c0_416 = arith.constant 0 : index
      %369 = vector.load %arg30[%368, %c2_415, %c0_416] : memref<6x6x32xf32, #tpu.memory_space<vmem>>, vector<1x4x32xf32>
      %370 = vector.shape_cast %369 : vector<1x4x32xf32> to vector<4x32xf32>
      %c8_417 = arith.constant 8 : index
      %c0_418 = arith.constant 0 : index
      %c0_419 = arith.constant 0 : index
      %371 = vector.load %arg10[%c8_417, %c0_418, %c0_419] : memref<9x32x32xf32, #tpu.memory_space<vmem>>, vector<1x32x32xf32>
      %372 = vector.shape_cast %371 : vector<1x32x32xf32> to vector<32x32xf32>
      %cst_420 = arith.constant dense<0.000000e+00> : vector<4x32xf32>
      %373 = tpu.matmul %370, %372, %cst_420 {dimension_numbers = #tpu.dot_dimension_numbers<[1], [0], [0], [1], [0, 0, 1, 1], [], []>} : vector<4x32xf32>, vector<32x32xf32>, vector<4x32xf32> -> vector<4x32xf32>
      %374 = arith.addf %367, %373 : vector<4x32xf32>
      %375 = vector.broadcast %28 : vector<1x32xf32> to vector<4x32xf32>
      %376 = arith.addf %374, %375 : vector<4x32xf32>
      %cst_421 = arith.constant 0.000000e+00 : f32
      %377 = vector.broadcast %cst_421 : f32 to vector<4x32xf32>
      %378 = arith.maximumf %376, %377 : vector<4x32xf32>
      %c1_i32_422 = arith.constant 1 : i32
      %379 = arith.addi %arg37, %c1_i32_422 : i32
      %380 = arith.index_cast %379 : i32 to index
      %c1_423 = arith.constant 1 : index
      %c0_424 = arith.constant 0 : index
      %381 = vector.load %arg31[%380, %c1_423, %c0_424] : memref<6x6x32xf32, #tpu.memory_space<vmem>>, vector<1x4x32xf32>
      %382 = vector.shape_cast %381 : vector<1x4x32xf32> to vector<4x32xf32>
      %383 = vector.shape_cast %378 : vector<4x32xf32> to vector<1x4x32xf32>
      tpu.vector_store %arg31[%380, %c1_423, %c0_424], %383 {strides = array<i32>} : memref<6x6x32xf32, #tpu.memory_space<vmem>>, vector<1x4x32xf32>,
    }
    %c4_i32_62 = arith.constant 4 : i32
    %c0_63 = arith.constant 0 : index
    %c0_64 = arith.constant 0 : index
    %30 = vector.load %arg13[%c0_63, %c0_64] : memref<1x48xf32, #tpu.memory_space<vmem>>, vector<1x48xf32>
    %c0_i32_65 = arith.constant 0 : i32
    %c4_i32_66 = arith.constant 4 : i32
    %31 = arith.addi %c0_i32_65, %c4_i32_66 : i32
    %c1_i32_67 = arith.constant 1 : i32
    scf.for %arg37 = %c0_i32_65 to %31 step %c1_i32_67  : i32 {
      %c1_i32_362 = arith.constant 1 : i32
      %307 = arith.muli %arg37, %c1_i32_362 : i32
      %c0_i32_363 = arith.constant 0 : i32
      %308 = arith.addi %307, %c0_i32_363 : i32
      %309 = arith.index_cast %308 : i32 to index
      %c0_364 = arith.constant 0 : index
      %c0_365 = arith.constant 0 : index
      %310 = vector.load %arg31[%309, %c0_364, %c0_365] : memref<6x6x32xf32, #tpu.memory_space<vmem>>, vector<1x4x32xf32>
      %311 = vector.shape_cast %310 : vector<1x4x32xf32> to vector<4x32xf32>
      %c0_366 = arith.constant 0 : index
      %c0_367 = arith.constant 0 : index
      %c0_368 = arith.constant 0 : index
      %312 = vector.load %arg12[%c0_366, %c0_367, %c0_368] : memref<9x32x48xf32, #tpu.memory_space<vmem>>, vector<1x32x48xf32>
      %313 = vector.shape_cast %312 : vector<1x32x48xf32> to vector<32x48xf32>
      %cst_369 = arith.constant dense<0.000000e+00> : vector<4x48xf32>
      %314 = tpu.matmul %311, %313, %cst_369 {dimension_numbers = #tpu.dot_dimension_numbers<[1], [0], [0], [1], [0, 0, 1, 1], [], []>} : vector<4x32xf32>, vector<32x48xf32>, vector<4x48xf32> -> vector<4x48xf32>
      %315 = arith.index_cast %308 : i32 to index
      %c1_370 = arith.constant 1 : index
      %c0_371 = arith.constant 0 : index
      %316 = vector.load %arg31[%315, %c1_370, %c0_371] : memref<6x6x32xf32, #tpu.memory_space<vmem>>, vector<1x4x32xf32>
      %317 = vector.shape_cast %316 : vector<1x4x32xf32> to vector<4x32xf32>
      %c1_372 = arith.constant 1 : index
      %c0_373 = arith.constant 0 : index
      %c0_374 = arith.constant 0 : index
      %318 = vector.load %arg12[%c1_372, %c0_373, %c0_374] : memref<9x32x48xf32, #tpu.memory_space<vmem>>, vector<1x32x48xf32>
      %319 = vector.shape_cast %318 : vector<1x32x48xf32> to vector<32x48xf32>
      %cst_375 = arith.constant dense<0.000000e+00> : vector<4x48xf32>
      %320 = tpu.matmul %317, %319, %cst_375 {dimension_numbers = #tpu.dot_dimension_numbers<[1], [0], [0], [1], [0, 0, 1, 1], [], []>} : vector<4x32xf32>, vector<32x48xf32>, vector<4x48xf32> -> vector<4x48xf32>
      %321 = arith.addf %314, %320 : vector<4x48xf32>
      %322 = arith.index_cast %308 : i32 to index
      %c2_376 = arith.constant 2 : index
      %c0_377 = arith.constant 0 : index
      %323 = vector.load %arg31[%322, %c2_376, %c0_377] : memref<6x6x32xf32, #tpu.memory_space<vmem>>, vector<1x4x32xf32>
      %324 = vector.shape_cast %323 : vector<1x4x32xf32> to vector<4x32xf32>
      %c2_378 = arith.constant 2 : index
      %c0_379 = arith.constant 0 : index
      %c0_380 = arith.constant 0 : index
      %325 = vector.load %arg12[%c2_378, %c0_379, %c0_380] : memref<9x32x48xf32, #tpu.memory_space<vmem>>, vector<1x32x48xf32>
      %326 = vector.shape_cast %325 : vector<1x32x48xf32> to vector<32x48xf32>
      %cst_381 = arith.constant dense<0.000000e+00> : vector<4x48xf32>
      %327 = tpu.matmul %324, %326, %cst_381 {dimension_numbers = #tpu.dot_dimension_numbers<[1], [0], [0], [1], [0, 0, 1, 1], [], []>} : vector<4x32xf32>, vector<32x48xf32>, vector<4x48xf32> -> vector<4x48xf32>
      %328 = arith.addf %321, %327 : vector<4x48xf32>
      %c1_i32_382 = arith.constant 1 : i32
      %329 = arith.muli %arg37, %c1_i32_382 : i32
      %c1_i32_383 = arith.constant 1 : i32
      %330 = arith.addi %329, %c1_i32_383 : i32
      %331 = arith.index_cast %330 : i32 to index
      %c0_384 = arith.constant 0 : index
      %c0_385 = arith.constant 0 : index
      %332 = vector.load %arg31[%331, %c0_384, %c0_385] : memref<6x6x32xf32, #tpu.memory_space<vmem>>, vector<1x4x32xf32>
      %333 = vector.shape_cast %332 : vector<1x4x32xf32> to vector<4x32xf32>
      %c3_386 = arith.constant 3 : index
      %c0_387 = arith.constant 0 : index
      %c0_388 = arith.constant 0 : index
      %334 = vector.load %arg12[%c3_386, %c0_387, %c0_388] : memref<9x32x48xf32, #tpu.memory_space<vmem>>, vector<1x32x48xf32>
      %335 = vector.shape_cast %334 : vector<1x32x48xf32> to vector<32x48xf32>
      %cst_389 = arith.constant dense<0.000000e+00> : vector<4x48xf32>
      %336 = tpu.matmul %333, %335, %cst_389 {dimension_numbers = #tpu.dot_dimension_numbers<[1], [0], [0], [1], [0, 0, 1, 1], [], []>} : vector<4x32xf32>, vector<32x48xf32>, vector<4x48xf32> -> vector<4x48xf32>
      %337 = arith.addf %328, %336 : vector<4x48xf32>
      %338 = arith.index_cast %330 : i32 to index
      %c1_390 = arith.constant 1 : index
      %c0_391 = arith.constant 0 : index
      %339 = vector.load %arg31[%338, %c1_390, %c0_391] : memref<6x6x32xf32, #tpu.memory_space<vmem>>, vector<1x4x32xf32>
      %340 = vector.shape_cast %339 : vector<1x4x32xf32> to vector<4x32xf32>
      %c4_392 = arith.constant 4 : index
      %c0_393 = arith.constant 0 : index
      %c0_394 = arith.constant 0 : index
      %341 = vector.load %arg12[%c4_392, %c0_393, %c0_394] : memref<9x32x48xf32, #tpu.memory_space<vmem>>, vector<1x32x48xf32>
      %342 = vector.shape_cast %341 : vector<1x32x48xf32> to vector<32x48xf32>
      %cst_395 = arith.constant dense<0.000000e+00> : vector<4x48xf32>
      %343 = tpu.matmul %340, %342, %cst_395 {dimension_numbers = #tpu.dot_dimension_numbers<[1], [0], [0], [1], [0, 0, 1, 1], [], []>} : vector<4x32xf32>, vector<32x48xf32>, vector<4x48xf32> -> vector<4x48xf32>
      %344 = arith.addf %337, %343 : vector<4x48xf32>
      %345 = arith.index_cast %330 : i32 to index
      %c2_396 = arith.constant 2 : index
      %c0_397 = arith.constant 0 : index
      %346 = vector.load %arg31[%345, %c2_396, %c0_397] : memref<6x6x32xf32, #tpu.memory_space<vmem>>, vector<1x4x32xf32>
      %347 = vector.shape_cast %346 : vector<1x4x32xf32> to vector<4x32xf32>
      %c5_398 = arith.constant 5 : index
      %c0_399 = arith.constant 0 : index
      %c0_400 = arith.constant 0 : index
      %348 = vector.load %arg12[%c5_398, %c0_399, %c0_400] : memref<9x32x48xf32, #tpu.memory_space<vmem>>, vector<1x32x48xf32>
      %349 = vector.shape_cast %348 : vector<1x32x48xf32> to vector<32x48xf32>
      %cst_401 = arith.constant dense<0.000000e+00> : vector<4x48xf32>
      %350 = tpu.matmul %347, %349, %cst_401 {dimension_numbers = #tpu.dot_dimension_numbers<[1], [0], [0], [1], [0, 0, 1, 1], [], []>} : vector<4x32xf32>, vector<32x48xf32>, vector<4x48xf32> -> vector<4x48xf32>
      %351 = arith.addf %344, %350 : vector<4x48xf32>
      %c1_i32_402 = arith.constant 1 : i32
      %352 = arith.muli %arg37, %c1_i32_402 : i32
      %c2_i32 = arith.constant 2 : i32
      %353 = arith.addi %352, %c2_i32 : i32
      %354 = arith.index_cast %353 : i32 to index
      %c0_403 = arith.constant 0 : index
      %c0_404 = arith.constant 0 : index
      %355 = vector.load %arg31[%354, %c0_403, %c0_404] : memref<6x6x32xf32, #tpu.memory_space<vmem>>, vector<1x4x32xf32>
      %356 = vector.shape_cast %355 : vector<1x4x32xf32> to vector<4x32xf32>
      %c6_405 = arith.constant 6 : index
      %c0_406 = arith.constant 0 : index
      %c0_407 = arith.constant 0 : index
      %357 = vector.load %arg12[%c6_405, %c0_406, %c0_407] : memref<9x32x48xf32, #tpu.memory_space<vmem>>, vector<1x32x48xf32>
      %358 = vector.shape_cast %357 : vector<1x32x48xf32> to vector<32x48xf32>
      %cst_408 = arith.constant dense<0.000000e+00> : vector<4x48xf32>
      %359 = tpu.matmul %356, %358, %cst_408 {dimension_numbers = #tpu.dot_dimension_numbers<[1], [0], [0], [1], [0, 0, 1, 1], [], []>} : vector<4x32xf32>, vector<32x48xf32>, vector<4x48xf32> -> vector<4x48xf32>
      %360 = arith.addf %351, %359 : vector<4x48xf32>
      %361 = arith.index_cast %353 : i32 to index
      %c1_409 = arith.constant 1 : index
      %c0_410 = arith.constant 0 : index
      %362 = vector.load %arg31[%361, %c1_409, %c0_410] : memref<6x6x32xf32, #tpu.memory_space<vmem>>, vector<1x4x32xf32>
      %363 = vector.shape_cast %362 : vector<1x4x32xf32> to vector<4x32xf32>
      %c7_411 = arith.constant 7 : index
      %c0_412 = arith.constant 0 : index
      %c0_413 = arith.constant 0 : index
      %364 = vector.load %arg12[%c7_411, %c0_412, %c0_413] : memref<9x32x48xf32, #tpu.memory_space<vmem>>, vector<1x32x48xf32>
      %365 = vector.shape_cast %364 : vector<1x32x48xf32> to vector<32x48xf32>
      %cst_414 = arith.constant dense<0.000000e+00> : vector<4x48xf32>
      %366 = tpu.matmul %363, %365, %cst_414 {dimension_numbers = #tpu.dot_dimension_numbers<[1], [0], [0], [1], [0, 0, 1, 1], [], []>} : vector<4x32xf32>, vector<32x48xf32>, vector<4x48xf32> -> vector<4x48xf32>
      %367 = arith.addf %360, %366 : vector<4x48xf32>
      %368 = arith.index_cast %353 : i32 to index
      %c2_415 = arith.constant 2 : index
      %c0_416 = arith.constant 0 : index
      %369 = vector.load %arg31[%368, %c2_415, %c0_416] : memref<6x6x32xf32, #tpu.memory_space<vmem>>, vector<1x4x32xf32>
      %370 = vector.shape_cast %369 : vector<1x4x32xf32> to vector<4x32xf32>
      %c8_417 = arith.constant 8 : index
      %c0_418 = arith.constant 0 : index
      %c0_419 = arith.constant 0 : index
      %371 = vector.load %arg12[%c8_417, %c0_418, %c0_419] : memref<9x32x48xf32, #tpu.memory_space<vmem>>, vector<1x32x48xf32>
      %372 = vector.shape_cast %371 : vector<1x32x48xf32> to vector<32x48xf32>
      %cst_420 = arith.constant dense<0.000000e+00> : vector<4x48xf32>
      %373 = tpu.matmul %370, %372, %cst_420 {dimension_numbers = #tpu.dot_dimension_numbers<[1], [0], [0], [1], [0, 0, 1, 1], [], []>} : vector<4x32xf32>, vector<32x48xf32>, vector<4x48xf32> -> vector<4x48xf32>
      %374 = arith.addf %367, %373 : vector<4x48xf32>
      %375 = vector.broadcast %30 : vector<1x48xf32> to vector<4x48xf32>
      %376 = arith.addf %374, %375 : vector<4x48xf32>
      %cst_421 = arith.constant 0.000000e+00 : f32
      %377 = vector.broadcast %cst_421 : f32 to vector<4x48xf32>
      %378 = arith.maximumf %376, %377 : vector<4x48xf32>
      %c1_i32_422 = arith.constant 1 : i32
      %379 = arith.addi %arg37, %c1_i32_422 : i32
      %380 = arith.index_cast %379 : i32 to index
      %c1_423 = arith.constant 1 : index
      %c0_424 = arith.constant 0 : index
      %381 = vector.load %arg32[%380, %c1_423, %c0_424] : memref<6x6x48xf32, #tpu.memory_space<vmem>>, vector<1x4x48xf32>
      %382 = vector.shape_cast %381 : vector<1x4x48xf32> to vector<4x48xf32>
      %383 = vector.shape_cast %378 : vector<4x48xf32> to vector<1x4x48xf32>
      tpu.vector_store %arg32[%380, %c1_423, %c0_424], %383 {strides = array<i32>} : memref<6x6x48xf32, #tpu.memory_space<vmem>>, vector<1x4x48xf32>,
    }
    %c4_i32_68 = arith.constant 4 : i32
    %c0_69 = arith.constant 0 : index
    %c0_70 = arith.constant 0 : index
    %32 = vector.load %arg15[%c0_69, %c0_70] : memref<1x48xf32, #tpu.memory_space<vmem>>, vector<1x48xf32>
    %c0_i32_71 = arith.constant 0 : i32
    %c4_i32_72 = arith.constant 4 : i32
    %33 = arith.addi %c0_i32_71, %c4_i32_72 : i32
    %c1_i32_73 = arith.constant 1 : i32
    scf.for %arg37 = %c0_i32_71 to %33 step %c1_i32_73  : i32 {
      %c1_i32_362 = arith.constant 1 : i32
      %307 = arith.muli %arg37, %c1_i32_362 : i32
      %c0_i32_363 = arith.constant 0 : i32
      %308 = arith.addi %307, %c0_i32_363 : i32
      %309 = arith.index_cast %308 : i32 to index
      %c0_364 = arith.constant 0 : index
      %c0_365 = arith.constant 0 : index
      %310 = vector.load %arg32[%309, %c0_364, %c0_365] : memref<6x6x48xf32, #tpu.memory_space<vmem>>, vector<1x4x48xf32>
      %311 = vector.shape_cast %310 : vector<1x4x48xf32> to vector<4x48xf32>
      %c0_366 = arith.constant 0 : index
      %c0_367 = arith.constant 0 : index
      %c0_368 = arith.constant 0 : index
      %312 = vector.load %arg14[%c0_366, %c0_367, %c0_368] : memref<9x48x48xf32, #tpu.memory_space<vmem>>, vector<1x48x48xf32>
      %313 = vector.shape_cast %312 : vector<1x48x48xf32> to vector<48x48xf32>
      %cst_369 = arith.constant dense<0.000000e+00> : vector<4x48xf32>
      %314 = tpu.matmul %311, %313, %cst_369 {dimension_numbers = #tpu.dot_dimension_numbers<[1], [0], [0], [1], [0, 0, 1, 1], [], []>} : vector<4x48xf32>, vector<48x48xf32>, vector<4x48xf32> -> vector<4x48xf32>
      %315 = arith.index_cast %308 : i32 to index
      %c1_370 = arith.constant 1 : index
      %c0_371 = arith.constant 0 : index
      %316 = vector.load %arg32[%315, %c1_370, %c0_371] : memref<6x6x48xf32, #tpu.memory_space<vmem>>, vector<1x4x48xf32>
      %317 = vector.shape_cast %316 : vector<1x4x48xf32> to vector<4x48xf32>
      %c1_372 = arith.constant 1 : index
      %c0_373 = arith.constant 0 : index
      %c0_374 = arith.constant 0 : index
      %318 = vector.load %arg14[%c1_372, %c0_373, %c0_374] : memref<9x48x48xf32, #tpu.memory_space<vmem>>, vector<1x48x48xf32>
      %319 = vector.shape_cast %318 : vector<1x48x48xf32> to vector<48x48xf32>
      %cst_375 = arith.constant dense<0.000000e+00> : vector<4x48xf32>
      %320 = tpu.matmul %317, %319, %cst_375 {dimension_numbers = #tpu.dot_dimension_numbers<[1], [0], [0], [1], [0, 0, 1, 1], [], []>} : vector<4x48xf32>, vector<48x48xf32>, vector<4x48xf32> -> vector<4x48xf32>
      %321 = arith.addf %314, %320 : vector<4x48xf32>
      %322 = arith.index_cast %308 : i32 to index
      %c2_376 = arith.constant 2 : index
      %c0_377 = arith.constant 0 : index
      %323 = vector.load %arg32[%322, %c2_376, %c0_377] : memref<6x6x48xf32, #tpu.memory_space<vmem>>, vector<1x4x48xf32>
      %324 = vector.shape_cast %323 : vector<1x4x48xf32> to vector<4x48xf32>
      %c2_378 = arith.constant 2 : index
      %c0_379 = arith.constant 0 : index
      %c0_380 = arith.constant 0 : index
      %325 = vector.load %arg14[%c2_378, %c0_379, %c0_380] : memref<9x48x48xf32, #tpu.memory_space<vmem>>, vector<1x48x48xf32>
      %326 = vector.shape_cast %325 : vector<1x48x48xf32> to vector<48x48xf32>
      %cst_381 = arith.constant dense<0.000000e+00> : vector<4x48xf32>
      %327 = tpu.matmul %324, %326, %cst_381 {dimension_numbers = #tpu.dot_dimension_numbers<[1], [0], [0], [1], [0, 0, 1, 1], [], []>} : vector<4x48xf32>, vector<48x48xf32>, vector<4x48xf32> -> vector<4x48xf32>
      %328 = arith.addf %321, %327 : vector<4x48xf32>
      %c1_i32_382 = arith.constant 1 : i32
      %329 = arith.muli %arg37, %c1_i32_382 : i32
      %c1_i32_383 = arith.constant 1 : i32
      %330 = arith.addi %329, %c1_i32_383 : i32
      %331 = arith.index_cast %330 : i32 to index
      %c0_384 = arith.constant 0 : index
      %c0_385 = arith.constant 0 : index
      %332 = vector.load %arg32[%331, %c0_384, %c0_385] : memref<6x6x48xf32, #tpu.memory_space<vmem>>, vector<1x4x48xf32>
      %333 = vector.shape_cast %332 : vector<1x4x48xf32> to vector<4x48xf32>
      %c3_386 = arith.constant 3 : index
      %c0_387 = arith.constant 0 : index
      %c0_388 = arith.constant 0 : index
      %334 = vector.load %arg14[%c3_386, %c0_387, %c0_388] : memref<9x48x48xf32, #tpu.memory_space<vmem>>, vector<1x48x48xf32>
      %335 = vector.shape_cast %334 : vector<1x48x48xf32> to vector<48x48xf32>
      %cst_389 = arith.constant dense<0.000000e+00> : vector<4x48xf32>
      %336 = tpu.matmul %333, %335, %cst_389 {dimension_numbers = #tpu.dot_dimension_numbers<[1], [0], [0], [1], [0, 0, 1, 1], [], []>} : vector<4x48xf32>, vector<48x48xf32>, vector<4x48xf32> -> vector<4x48xf32>
      %337 = arith.addf %328, %336 : vector<4x48xf32>
      %338 = arith.index_cast %330 : i32 to index
      %c1_390 = arith.constant 1 : index
      %c0_391 = arith.constant 0 : index
      %339 = vector.load %arg32[%338, %c1_390, %c0_391] : memref<6x6x48xf32, #tpu.memory_space<vmem>>, vector<1x4x48xf32>
      %340 = vector.shape_cast %339 : vector<1x4x48xf32> to vector<4x48xf32>
      %c4_392 = arith.constant 4 : index
      %c0_393 = arith.constant 0 : index
      %c0_394 = arith.constant 0 : index
      %341 = vector.load %arg14[%c4_392, %c0_393, %c0_394] : memref<9x48x48xf32, #tpu.memory_space<vmem>>, vector<1x48x48xf32>
      %342 = vector.shape_cast %341 : vector<1x48x48xf32> to vector<48x48xf32>
      %cst_395 = arith.constant dense<0.000000e+00> : vector<4x48xf32>
      %343 = tpu.matmul %340, %342, %cst_395 {dimension_numbers = #tpu.dot_dimension_numbers<[1], [0], [0], [1], [0, 0, 1, 1], [], []>} : vector<4x48xf32>, vector<48x48xf32>, vector<4x48xf32> -> vector<4x48xf32>
      %344 = arith.addf %337, %343 : vector<4x48xf32>
      %345 = arith.index_cast %330 : i32 to index
      %c2_396 = arith.constant 2 : index
      %c0_397 = arith.constant 0 : index
      %346 = vector.load %arg32[%345, %c2_396, %c0_397] : memref<6x6x48xf32, #tpu.memory_space<vmem>>, vector<1x4x48xf32>
      %347 = vector.shape_cast %346 : vector<1x4x48xf32> to vector<4x48xf32>
      %c5_398 = arith.constant 5 : index
      %c0_399 = arith.constant 0 : index
      %c0_400 = arith.constant 0 : index
      %348 = vector.load %arg14[%c5_398, %c0_399, %c0_400] : memref<9x48x48xf32, #tpu.memory_space<vmem>>, vector<1x48x48xf32>
      %349 = vector.shape_cast %348 : vector<1x48x48xf32> to vector<48x48xf32>
      %cst_401 = arith.constant dense<0.000000e+00> : vector<4x48xf32>
      %350 = tpu.matmul %347, %349, %cst_401 {dimension_numbers = #tpu.dot_dimension_numbers<[1], [0], [0], [1], [0, 0, 1, 1], [], []>} : vector<4x48xf32>, vector<48x48xf32>, vector<4x48xf32> -> vector<4x48xf32>
      %351 = arith.addf %344, %350 : vector<4x48xf32>
      %c1_i32_402 = arith.constant 1 : i32
      %352 = arith.muli %arg37, %c1_i32_402 : i32
      %c2_i32 = arith.constant 2 : i32
      %353 = arith.addi %352, %c2_i32 : i32
      %354 = arith.index_cast %353 : i32 to index
      %c0_403 = arith.constant 0 : index
      %c0_404 = arith.constant 0 : index
      %355 = vector.load %arg32[%354, %c0_403, %c0_404] : memref<6x6x48xf32, #tpu.memory_space<vmem>>, vector<1x4x48xf32>
      %356 = vector.shape_cast %355 : vector<1x4x48xf32> to vector<4x48xf32>
      %c6_405 = arith.constant 6 : index
      %c0_406 = arith.constant 0 : index
      %c0_407 = arith.constant 0 : index
      %357 = vector.load %arg14[%c6_405, %c0_406, %c0_407] : memref<9x48x48xf32, #tpu.memory_space<vmem>>, vector<1x48x48xf32>
      %358 = vector.shape_cast %357 : vector<1x48x48xf32> to vector<48x48xf32>
      %cst_408 = arith.constant dense<0.000000e+00> : vector<4x48xf32>
      %359 = tpu.matmul %356, %358, %cst_408 {dimension_numbers = #tpu.dot_dimension_numbers<[1], [0], [0], [1], [0, 0, 1, 1], [], []>} : vector<4x48xf32>, vector<48x48xf32>, vector<4x48xf32> -> vector<4x48xf32>
      %360 = arith.addf %351, %359 : vector<4x48xf32>
      %361 = arith.index_cast %353 : i32 to index
      %c1_409 = arith.constant 1 : index
      %c0_410 = arith.constant 0 : index
      %362 = vector.load %arg32[%361, %c1_409, %c0_410] : memref<6x6x48xf32, #tpu.memory_space<vmem>>, vector<1x4x48xf32>
      %363 = vector.shape_cast %362 : vector<1x4x48xf32> to vector<4x48xf32>
      %c7_411 = arith.constant 7 : index
      %c0_412 = arith.constant 0 : index
      %c0_413 = arith.constant 0 : index
      %364 = vector.load %arg14[%c7_411, %c0_412, %c0_413] : memref<9x48x48xf32, #tpu.memory_space<vmem>>, vector<1x48x48xf32>
      %365 = vector.shape_cast %364 : vector<1x48x48xf32> to vector<48x48xf32>
      %cst_414 = arith.constant dense<0.000000e+00> : vector<4x48xf32>
      %366 = tpu.matmul %363, %365, %cst_414 {dimension_numbers = #tpu.dot_dimension_numbers<[1], [0], [0], [1], [0, 0, 1, 1], [], []>} : vector<4x48xf32>, vector<48x48xf32>, vector<4x48xf32> -> vector<4x48xf32>
      %367 = arith.addf %360, %366 : vector<4x48xf32>
      %368 = arith.index_cast %353 : i32 to index
      %c2_415 = arith.constant 2 : index
      %c0_416 = arith.constant 0 : index
      %369 = vector.load %arg32[%368, %c2_415, %c0_416] : memref<6x6x48xf32, #tpu.memory_space<vmem>>, vector<1x4x48xf32>
      %370 = vector.shape_cast %369 : vector<1x4x48xf32> to vector<4x48xf32>
      %c8_417 = arith.constant 8 : index
      %c0_418 = arith.constant 0 : index
      %c0_419 = arith.constant 0 : index
      %371 = vector.load %arg14[%c8_417, %c0_418, %c0_419] : memref<9x48x48xf32, #tpu.memory_space<vmem>>, vector<1x48x48xf32>
      %372 = vector.shape_cast %371 : vector<1x48x48xf32> to vector<48x48xf32>
      %cst_420 = arith.constant dense<0.000000e+00> : vector<4x48xf32>
      %373 = tpu.matmul %370, %372, %cst_420 {dimension_numbers = #tpu.dot_dimension_numbers<[1], [0], [0], [1], [0, 0, 1, 1], [], []>} : vector<4x48xf32>, vector<48x48xf32>, vector<4x48xf32> -> vector<4x48xf32>
      %374 = arith.addf %367, %373 : vector<4x48xf32>
      %375 = vector.broadcast %32 : vector<1x48xf32> to vector<4x48xf32>
      %376 = arith.addf %374, %375 : vector<4x48xf32>
      %cst_421 = arith.constant 0.000000e+00 : f32
      %377 = vector.broadcast %cst_421 : f32 to vector<4x48xf32>
      %378 = arith.maximumf %376, %377 : vector<4x48xf32>
      %c2_i32_422 = arith.constant 2 : i32
      %379 = arith.addi %arg37, %c2_i32_422 : i32
      %380 = arith.index_cast %379 : i32 to index
      %c2_423 = arith.constant 2 : index
      %c0_424 = arith.constant 0 : index
      %381 = vector.load %arg33[%380, %c2_423, %c0_424] : memref<8x8x48xf32, #tpu.memory_space<vmem>>, vector<1x4x48xf32>
      %382 = vector.shape_cast %381 : vector<1x4x48xf32> to vector<4x48xf32>
      %383 = vector.shape_cast %378 : vector<4x48xf32> to vector<1x4x48xf32>
      tpu.vector_store %arg33[%380, %c2_423, %c0_424], %383 {strides = array<i32>} : memref<8x8x48xf32, #tpu.memory_space<vmem>>, vector<1x4x48xf32>,
    }
    %c4_i32_74 = arith.constant 4 : i32
    %c0_75 = arith.constant 0 : index
    %c0_76 = arith.constant 0 : index
    %34 = vector.load %arg17[%c0_75, %c0_76] : memref<1x192xf32, #tpu.memory_space<vmem>>, vector<1x192xf32>
    %c0_i32_77 = arith.constant 0 : i32
    %c4_i32_78 = arith.constant 4 : i32
    %35 = arith.addi %c0_i32_77, %c4_i32_78 : i32
    %c1_i32_79 = arith.constant 1 : i32
    scf.for %arg37 = %c0_i32_77 to %35 step %c1_i32_79  : i32 {
      %c1_i32_362 = arith.constant 1 : i32
      %307 = arith.muli %arg37, %c1_i32_362 : i32
      %c0_i32_363 = arith.constant 0 : i32
      %308 = arith.addi %307, %c0_i32_363 : i32
      %309 = arith.index_cast %308 : i32 to index
      %c0_364 = arith.constant 0 : index
      %c0_365 = arith.constant 0 : index
      %310 = vector.load %arg33[%309, %c0_364, %c0_365] : memref<8x8x48xf32, #tpu.memory_space<vmem>>, vector<1x4x48xf32>
      %311 = vector.shape_cast %310 : vector<1x4x48xf32> to vector<4x48xf32>
      %c0_366 = arith.constant 0 : index
      %c0_367 = arith.constant 0 : index
      %c0_368 = arith.constant 0 : index
      %312 = vector.load %arg16[%c0_366, %c0_367, %c0_368] : memref<9x48x192xf32, #tpu.memory_space<vmem>>, vector<1x48x192xf32>
      %313 = vector.shape_cast %312 : vector<1x48x192xf32> to vector<48x192xf32>
      %cst_369 = arith.constant dense<0.000000e+00> : vector<4x192xf32>
      %314 = tpu.matmul %311, %313, %cst_369 {dimension_numbers = #tpu.dot_dimension_numbers<[1], [0], [0], [1], [0, 0, 1, 1], [], []>} : vector<4x48xf32>, vector<48x192xf32>, vector<4x192xf32> -> vector<4x192xf32>
      %315 = arith.index_cast %308 : i32 to index
      %c2_370 = arith.constant 2 : index
      %c0_371 = arith.constant 0 : index
      %316 = vector.load %arg33[%315, %c2_370, %c0_371] : memref<8x8x48xf32, #tpu.memory_space<vmem>>, vector<1x4x48xf32>
      %317 = vector.shape_cast %316 : vector<1x4x48xf32> to vector<4x48xf32>
      %c1_372 = arith.constant 1 : index
      %c0_373 = arith.constant 0 : index
      %c0_374 = arith.constant 0 : index
      %318 = vector.load %arg16[%c1_372, %c0_373, %c0_374] : memref<9x48x192xf32, #tpu.memory_space<vmem>>, vector<1x48x192xf32>
      %319 = vector.shape_cast %318 : vector<1x48x192xf32> to vector<48x192xf32>
      %cst_375 = arith.constant dense<0.000000e+00> : vector<4x192xf32>
      %320 = tpu.matmul %317, %319, %cst_375 {dimension_numbers = #tpu.dot_dimension_numbers<[1], [0], [0], [1], [0, 0, 1, 1], [], []>} : vector<4x48xf32>, vector<48x192xf32>, vector<4x192xf32> -> vector<4x192xf32>
      %321 = arith.addf %314, %320 : vector<4x192xf32>
      %322 = arith.index_cast %308 : i32 to index
      %c4_376 = arith.constant 4 : index
      %c0_377 = arith.constant 0 : index
      %323 = vector.load %arg33[%322, %c4_376, %c0_377] : memref<8x8x48xf32, #tpu.memory_space<vmem>>, vector<1x4x48xf32>
      %324 = vector.shape_cast %323 : vector<1x4x48xf32> to vector<4x48xf32>
      %c2_378 = arith.constant 2 : index
      %c0_379 = arith.constant 0 : index
      %c0_380 = arith.constant 0 : index
      %325 = vector.load %arg16[%c2_378, %c0_379, %c0_380] : memref<9x48x192xf32, #tpu.memory_space<vmem>>, vector<1x48x192xf32>
      %326 = vector.shape_cast %325 : vector<1x48x192xf32> to vector<48x192xf32>
      %cst_381 = arith.constant dense<0.000000e+00> : vector<4x192xf32>
      %327 = tpu.matmul %324, %326, %cst_381 {dimension_numbers = #tpu.dot_dimension_numbers<[1], [0], [0], [1], [0, 0, 1, 1], [], []>} : vector<4x48xf32>, vector<48x192xf32>, vector<4x192xf32> -> vector<4x192xf32>
      %328 = arith.addf %321, %327 : vector<4x192xf32>
      %c1_i32_382 = arith.constant 1 : i32
      %329 = arith.muli %arg37, %c1_i32_382 : i32
      %c2_i32 = arith.constant 2 : i32
      %330 = arith.addi %329, %c2_i32 : i32
      %331 = arith.index_cast %330 : i32 to index
      %c0_383 = arith.constant 0 : index
      %c0_384 = arith.constant 0 : index
      %332 = vector.load %arg33[%331, %c0_383, %c0_384] : memref<8x8x48xf32, #tpu.memory_space<vmem>>, vector<1x4x48xf32>
      %333 = vector.shape_cast %332 : vector<1x4x48xf32> to vector<4x48xf32>
      %c3_385 = arith.constant 3 : index
      %c0_386 = arith.constant 0 : index
      %c0_387 = arith.constant 0 : index
      %334 = vector.load %arg16[%c3_385, %c0_386, %c0_387] : memref<9x48x192xf32, #tpu.memory_space<vmem>>, vector<1x48x192xf32>
      %335 = vector.shape_cast %334 : vector<1x48x192xf32> to vector<48x192xf32>
      %cst_388 = arith.constant dense<0.000000e+00> : vector<4x192xf32>
      %336 = tpu.matmul %333, %335, %cst_388 {dimension_numbers = #tpu.dot_dimension_numbers<[1], [0], [0], [1], [0, 0, 1, 1], [], []>} : vector<4x48xf32>, vector<48x192xf32>, vector<4x192xf32> -> vector<4x192xf32>
      %337 = arith.addf %328, %336 : vector<4x192xf32>
      %338 = arith.index_cast %330 : i32 to index
      %c2_389 = arith.constant 2 : index
      %c0_390 = arith.constant 0 : index
      %339 = vector.load %arg33[%338, %c2_389, %c0_390] : memref<8x8x48xf32, #tpu.memory_space<vmem>>, vector<1x4x48xf32>
      %340 = vector.shape_cast %339 : vector<1x4x48xf32> to vector<4x48xf32>
      %c4_391 = arith.constant 4 : index
      %c0_392 = arith.constant 0 : index
      %c0_393 = arith.constant 0 : index
      %341 = vector.load %arg16[%c4_391, %c0_392, %c0_393] : memref<9x48x192xf32, #tpu.memory_space<vmem>>, vector<1x48x192xf32>
      %342 = vector.shape_cast %341 : vector<1x48x192xf32> to vector<48x192xf32>
      %cst_394 = arith.constant dense<0.000000e+00> : vector<4x192xf32>
      %343 = tpu.matmul %340, %342, %cst_394 {dimension_numbers = #tpu.dot_dimension_numbers<[1], [0], [0], [1], [0, 0, 1, 1], [], []>} : vector<4x48xf32>, vector<48x192xf32>, vector<4x192xf32> -> vector<4x192xf32>
      %344 = arith.addf %337, %343 : vector<4x192xf32>
      %345 = arith.index_cast %330 : i32 to index
      %c4_395 = arith.constant 4 : index
      %c0_396 = arith.constant 0 : index
      %346 = vector.load %arg33[%345, %c4_395, %c0_396] : memref<8x8x48xf32, #tpu.memory_space<vmem>>, vector<1x4x48xf32>
      %347 = vector.shape_cast %346 : vector<1x4x48xf32> to vector<4x48xf32>
      %c5_397 = arith.constant 5 : index
      %c0_398 = arith.constant 0 : index
      %c0_399 = arith.constant 0 : index
      %348 = vector.load %arg16[%c5_397, %c0_398, %c0_399] : memref<9x48x192xf32, #tpu.memory_space<vmem>>, vector<1x48x192xf32>
      %349 = vector.shape_cast %348 : vector<1x48x192xf32> to vector<48x192xf32>
      %cst_400 = arith.constant dense<0.000000e+00> : vector<4x192xf32>
      %350 = tpu.matmul %347, %349, %cst_400 {dimension_numbers = #tpu.dot_dimension_numbers<[1], [0], [0], [1], [0, 0, 1, 1], [], []>} : vector<4x48xf32>, vector<48x192xf32>, vector<4x192xf32> -> vector<4x192xf32>
      %351 = arith.addf %344, %350 : vector<4x192xf32>
      %c1_i32_401 = arith.constant 1 : i32
      %352 = arith.muli %arg37, %c1_i32_401 : i32
      %c4_i32_402 = arith.constant 4 : i32
      %353 = arith.addi %352, %c4_i32_402 : i32
      %354 = arith.index_cast %353 : i32 to index
      %c0_403 = arith.constant 0 : index
      %c0_404 = arith.constant 0 : index
      %355 = vector.load %arg33[%354, %c0_403, %c0_404] : memref<8x8x48xf32, #tpu.memory_space<vmem>>, vector<1x4x48xf32>
      %356 = vector.shape_cast %355 : vector<1x4x48xf32> to vector<4x48xf32>
      %c6_405 = arith.constant 6 : index
      %c0_406 = arith.constant 0 : index
      %c0_407 = arith.constant 0 : index
      %357 = vector.load %arg16[%c6_405, %c0_406, %c0_407] : memref<9x48x192xf32, #tpu.memory_space<vmem>>, vector<1x48x192xf32>
      %358 = vector.shape_cast %357 : vector<1x48x192xf32> to vector<48x192xf32>
      %cst_408 = arith.constant dense<0.000000e+00> : vector<4x192xf32>
      %359 = tpu.matmul %356, %358, %cst_408 {dimension_numbers = #tpu.dot_dimension_numbers<[1], [0], [0], [1], [0, 0, 1, 1], [], []>} : vector<4x48xf32>, vector<48x192xf32>, vector<4x192xf32> -> vector<4x192xf32>
      %360 = arith.addf %351, %359 : vector<4x192xf32>
      %361 = arith.index_cast %353 : i32 to index
      %c2_409 = arith.constant 2 : index
      %c0_410 = arith.constant 0 : index
      %362 = vector.load %arg33[%361, %c2_409, %c0_410] : memref<8x8x48xf32, #tpu.memory_space<vmem>>, vector<1x4x48xf32>
      %363 = vector.shape_cast %362 : vector<1x4x48xf32> to vector<4x48xf32>
      %c7_411 = arith.constant 7 : index
      %c0_412 = arith.constant 0 : index
      %c0_413 = arith.constant 0 : index
      %364 = vector.load %arg16[%c7_411, %c0_412, %c0_413] : memref<9x48x192xf32, #tpu.memory_space<vmem>>, vector<1x48x192xf32>
      %365 = vector.shape_cast %364 : vector<1x48x192xf32> to vector<48x192xf32>
      %cst_414 = arith.constant dense<0.000000e+00> : vector<4x192xf32>
      %366 = tpu.matmul %363, %365, %cst_414 {dimension_numbers = #tpu.dot_dimension_numbers<[1], [0], [0], [1], [0, 0, 1, 1], [], []>} : vector<4x48xf32>, vector<48x192xf32>, vector<4x192xf32> -> vector<4x192xf32>
      %367 = arith.addf %360, %366 : vector<4x192xf32>
      %368 = arith.index_cast %353 : i32 to index
      %c4_415 = arith.constant 4 : index
      %c0_416 = arith.constant 0 : index
      %369 = vector.load %arg33[%368, %c4_415, %c0_416] : memref<8x8x48xf32, #tpu.memory_space<vmem>>, vector<1x4x48xf32>
      %370 = vector.shape_cast %369 : vector<1x4x48xf32> to vector<4x48xf32>
      %c8_417 = arith.constant 8 : index
      %c0_418 = arith.constant 0 : index
      %c0_419 = arith.constant 0 : index
      %371 = vector.load %arg16[%c8_417, %c0_418, %c0_419] : memref<9x48x192xf32, #tpu.memory_space<vmem>>, vector<1x48x192xf32>
      %372 = vector.shape_cast %371 : vector<1x48x192xf32> to vector<48x192xf32>
      %cst_420 = arith.constant dense<0.000000e+00> : vector<4x192xf32>
      %373 = tpu.matmul %370, %372, %cst_420 {dimension_numbers = #tpu.dot_dimension_numbers<[1], [0], [0], [1], [0, 0, 1, 1], [], []>} : vector<4x48xf32>, vector<48x192xf32>, vector<4x192xf32> -> vector<4x192xf32>
      %374 = arith.addf %367, %373 : vector<4x192xf32>
      %375 = vector.broadcast %34 : vector<1x192xf32> to vector<4x192xf32>
      %376 = arith.addf %374, %375 : vector<4x192xf32>
      %cst_421 = arith.constant 0.000000e+00 : f32
      %377 = vector.broadcast %cst_421 : f32 to vector<4x192xf32>
      %378 = arith.maximumf %376, %377 : vector<4x192xf32>
      %c2_i32_422 = arith.constant 2 : i32
      %379 = arith.addi %arg37, %c2_i32_422 : i32
      %380 = arith.index_cast %379 : i32 to index
      %c2_423 = arith.constant 2 : index
      %c0_424 = arith.constant 0 : index
      %381 = vector.load %arg34[%380, %c2_423, %c0_424] : memref<8x8x192xf32, #tpu.memory_space<vmem>>, vector<1x4x192xf32>
      %382 = vector.shape_cast %381 : vector<1x4x192xf32> to vector<4x192xf32>
      %383 = vector.shape_cast %378 : vector<4x192xf32> to vector<1x4x192xf32>
      tpu.vector_store %arg34[%380, %c2_423, %c0_424], %383 {strides = array<i32>} : memref<8x8x192xf32, #tpu.memory_space<vmem>>, vector<1x4x192xf32>,
    }
    %c4_i32_80 = arith.constant 4 : i32
    %c0_81 = arith.constant 0 : index
    %c0_82 = arith.constant 0 : index
    %36 = vector.load %arg19[%c0_81, %c0_82] : memref<1x96xf32, #tpu.memory_space<vmem>>, vector<1x96xf32>
    %c0_i32_83 = arith.constant 0 : i32
    %c4_i32_84 = arith.constant 4 : i32
    %37 = arith.addi %c0_i32_83, %c4_i32_84 : i32
    %c1_i32_85 = arith.constant 1 : i32
    scf.for %arg37 = %c0_i32_83 to %37 step %c1_i32_85  : i32 {
      %c1_i32_362 = arith.constant 1 : i32
      %307 = arith.muli %arg37, %c1_i32_362 : i32
      %c0_i32_363 = arith.constant 0 : i32
      %308 = arith.addi %307, %c0_i32_363 : i32
      %309 = arith.index_cast %308 : i32 to index
      %c0_364 = arith.constant 0 : index
      %c0_365 = arith.constant 0 : index
      %310 = vector.load %arg34[%309, %c0_364, %c0_365] : memref<8x8x192xf32, #tpu.memory_space<vmem>>, vector<1x4x192xf32>
      %311 = vector.shape_cast %310 : vector<1x4x192xf32> to vector<4x192xf32>
      %c0_366 = arith.constant 0 : index
      %c0_367 = arith.constant 0 : index
      %c0_368 = arith.constant 0 : index
      %312 = vector.load %arg18[%c0_366, %c0_367, %c0_368] : memref<9x192x96xf32, #tpu.memory_space<vmem>>, vector<1x192x96xf32>
      %313 = vector.shape_cast %312 : vector<1x192x96xf32> to vector<192x96xf32>
      %cst_369 = arith.constant dense<0.000000e+00> : vector<4x96xf32>
      %314 = tpu.matmul %311, %313, %cst_369 {dimension_numbers = #tpu.dot_dimension_numbers<[1], [0], [0], [1], [0, 0, 1, 1], [], []>} : vector<4x192xf32>, vector<192x96xf32>, vector<4x96xf32> -> vector<4x96xf32>
      %315 = arith.index_cast %308 : i32 to index
      %c2_370 = arith.constant 2 : index
      %c0_371 = arith.constant 0 : index
      %316 = vector.load %arg34[%315, %c2_370, %c0_371] : memref<8x8x192xf32, #tpu.memory_space<vmem>>, vector<1x4x192xf32>
      %317 = vector.shape_cast %316 : vector<1x4x192xf32> to vector<4x192xf32>
      %c1_372 = arith.constant 1 : index
      %c0_373 = arith.constant 0 : index
      %c0_374 = arith.constant 0 : index
      %318 = vector.load %arg18[%c1_372, %c0_373, %c0_374] : memref<9x192x96xf32, #tpu.memory_space<vmem>>, vector<1x192x96xf32>
      %319 = vector.shape_cast %318 : vector<1x192x96xf32> to vector<192x96xf32>
      %cst_375 = arith.constant dense<0.000000e+00> : vector<4x96xf32>
      %320 = tpu.matmul %317, %319, %cst_375 {dimension_numbers = #tpu.dot_dimension_numbers<[1], [0], [0], [1], [0, 0, 1, 1], [], []>} : vector<4x192xf32>, vector<192x96xf32>, vector<4x96xf32> -> vector<4x96xf32>
      %321 = arith.addf %314, %320 : vector<4x96xf32>
      %322 = arith.index_cast %308 : i32 to index
      %c4_376 = arith.constant 4 : index
      %c0_377 = arith.constant 0 : index
      %323 = vector.load %arg34[%322, %c4_376, %c0_377] : memref<8x8x192xf32, #tpu.memory_space<vmem>>, vector<1x4x192xf32>
      %324 = vector.shape_cast %323 : vector<1x4x192xf32> to vector<4x192xf32>
      %c2_378 = arith.constant 2 : index
      %c0_379 = arith.constant 0 : index
      %c0_380 = arith.constant 0 : index
      %325 = vector.load %arg18[%c2_378, %c0_379, %c0_380] : memref<9x192x96xf32, #tpu.memory_space<vmem>>, vector<1x192x96xf32>
      %326 = vector.shape_cast %325 : vector<1x192x96xf32> to vector<192x96xf32>
      %cst_381 = arith.constant dense<0.000000e+00> : vector<4x96xf32>
      %327 = tpu.matmul %324, %326, %cst_381 {dimension_numbers = #tpu.dot_dimension_numbers<[1], [0], [0], [1], [0, 0, 1, 1], [], []>} : vector<4x192xf32>, vector<192x96xf32>, vector<4x96xf32> -> vector<4x96xf32>
      %328 = arith.addf %321, %327 : vector<4x96xf32>
      %c1_i32_382 = arith.constant 1 : i32
      %329 = arith.muli %arg37, %c1_i32_382 : i32
      %c2_i32 = arith.constant 2 : i32
      %330 = arith.addi %329, %c2_i32 : i32
      %331 = arith.index_cast %330 : i32 to index
      %c0_383 = arith.constant 0 : index
      %c0_384 = arith.constant 0 : index
      %332 = vector.load %arg34[%331, %c0_383, %c0_384] : memref<8x8x192xf32, #tpu.memory_space<vmem>>, vector<1x4x192xf32>
      %333 = vector.shape_cast %332 : vector<1x4x192xf32> to vector<4x192xf32>
      %c3_385 = arith.constant 3 : index
      %c0_386 = arith.constant 0 : index
      %c0_387 = arith.constant 0 : index
      %334 = vector.load %arg18[%c3_385, %c0_386, %c0_387] : memref<9x192x96xf32, #tpu.memory_space<vmem>>, vector<1x192x96xf32>
      %335 = vector.shape_cast %334 : vector<1x192x96xf32> to vector<192x96xf32>
      %cst_388 = arith.constant dense<0.000000e+00> : vector<4x96xf32>
      %336 = tpu.matmul %333, %335, %cst_388 {dimension_numbers = #tpu.dot_dimension_numbers<[1], [0], [0], [1], [0, 0, 1, 1], [], []>} : vector<4x192xf32>, vector<192x96xf32>, vector<4x96xf32> -> vector<4x96xf32>
      %337 = arith.addf %328, %336 : vector<4x96xf32>
      %338 = arith.index_cast %330 : i32 to index
      %c2_389 = arith.constant 2 : index
      %c0_390 = arith.constant 0 : index
      %339 = vector.load %arg34[%338, %c2_389, %c0_390] : memref<8x8x192xf32, #tpu.memory_space<vmem>>, vector<1x4x192xf32>
      %340 = vector.shape_cast %339 : vector<1x4x192xf32> to vector<4x192xf32>
      %c4_391 = arith.constant 4 : index
      %c0_392 = arith.constant 0 : index
      %c0_393 = arith.constant 0 : index
      %341 = vector.load %arg18[%c4_391, %c0_392, %c0_393] : memref<9x192x96xf32, #tpu.memory_space<vmem>>, vector<1x192x96xf32>
      %342 = vector.shape_cast %341 : vector<1x192x96xf32> to vector<192x96xf32>
      %cst_394 = arith.constant dense<0.000000e+00> : vector<4x96xf32>
      %343 = tpu.matmul %340, %342, %cst_394 {dimension_numbers = #tpu.dot_dimension_numbers<[1], [0], [0], [1], [0, 0, 1, 1], [], []>} : vector<4x192xf32>, vector<192x96xf32>, vector<4x96xf32> -> vector<4x96xf32>
      %344 = arith.addf %337, %343 : vector<4x96xf32>
      %345 = arith.index_cast %330 : i32 to index
      %c4_395 = arith.constant 4 : index
      %c0_396 = arith.constant 0 : index
      %346 = vector.load %arg34[%345, %c4_395, %c0_396] : memref<8x8x192xf32, #tpu.memory_space<vmem>>, vector<1x4x192xf32>
      %347 = vector.shape_cast %346 : vector<1x4x192xf32> to vector<4x192xf32>
      %c5_397 = arith.constant 5 : index
      %c0_398 = arith.constant 0 : index
      %c0_399 = arith.constant 0 : index
      %348 = vector.load %arg18[%c5_397, %c0_398, %c0_399] : memref<9x192x96xf32, #tpu.memory_space<vmem>>, vector<1x192x96xf32>
      %349 = vector.shape_cast %348 : vector<1x192x96xf32> to vector<192x96xf32>
      %cst_400 = arith.constant dense<0.000000e+00> : vector<4x96xf32>
      %350 = tpu.matmul %347, %349, %cst_400 {dimension_numbers = #tpu.dot_dimension_numbers<[1], [0], [0], [1], [0, 0, 1, 1], [], []>} : vector<4x192xf32>, vector<192x96xf32>, vector<4x96xf32> -> vector<4x96xf32>
      %351 = arith.addf %344, %350 : vector<4x96xf32>
      %c1_i32_401 = arith.constant 1 : i32
      %352 = arith.muli %arg37, %c1_i32_401 : i32
      %c4_i32_402 = arith.constant 4 : i32
      %353 = arith.addi %352, %c4_i32_402 : i32
      %354 = arith.index_cast %353 : i32 to index
      %c0_403 = arith.constant 0 : index
      %c0_404 = arith.constant 0 : index
      %355 = vector.load %arg34[%354, %c0_403, %c0_404] : memref<8x8x192xf32, #tpu.memory_space<vmem>>, vector<1x4x192xf32>
      %356 = vector.shape_cast %355 : vector<1x4x192xf32> to vector<4x192xf32>
      %c6_405 = arith.constant 6 : index
      %c0_406 = arith.constant 0 : index
      %c0_407 = arith.constant 0 : index
      %357 = vector.load %arg18[%c6_405, %c0_406, %c0_407] : memref<9x192x96xf32, #tpu.memory_space<vmem>>, vector<1x192x96xf32>
      %358 = vector.shape_cast %357 : vector<1x192x96xf32> to vector<192x96xf32>
      %cst_408 = arith.constant dense<0.000000e+00> : vector<4x96xf32>
      %359 = tpu.matmul %356, %358, %cst_408 {dimension_numbers = #tpu.dot_dimension_numbers<[1], [0], [0], [1], [0, 0, 1, 1], [], []>} : vector<4x192xf32>, vector<192x96xf32>, vector<4x96xf32> -> vector<4x96xf32>
      %360 = arith.addf %351, %359 : vector<4x96xf32>
      %361 = arith.index_cast %353 : i32 to index
      %c2_409 = arith.constant 2 : index
      %c0_410 = arith.constant 0 : index
      %362 = vector.load %arg34[%361, %c2_409, %c0_410] : memref<8x8x192xf32, #tpu.memory_space<vmem>>, vector<1x4x192xf32>
      %363 = vector.shape_cast %362 : vector<1x4x192xf32> to vector<4x192xf32>
      %c7_411 = arith.constant 7 : index
      %c0_412 = arith.constant 0 : index
      %c0_413 = arith.constant 0 : index
      %364 = vector.load %arg18[%c7_411, %c0_412, %c0_413] : memref<9x192x96xf32, #tpu.memory_space<vmem>>, vector<1x192x96xf32>
      %365 = vector.shape_cast %364 : vector<1x192x96xf32> to vector<192x96xf32>
      %cst_414 = arith.constant dense<0.000000e+00> : vector<4x96xf32>
      %366 = tpu.matmul %363, %365, %cst_414 {dimension_numbers = #tpu.dot_dimension_numbers<[1], [0], [0], [1], [0, 0, 1, 1], [], []>} : vector<4x192xf32>, vector<192x96xf32>, vector<4x96xf32> -> vector<4x96xf32>
      %367 = arith.addf %360, %366 : vector<4x96xf32>
      %368 = arith.index_cast %353 : i32 to index
      %c4_415 = arith.constant 4 : index
      %c0_416 = arith.constant 0 : index
      %369 = vector.load %arg34[%368, %c4_415, %c0_416] : memref<8x8x192xf32, #tpu.memory_space<vmem>>, vector<1x4x192xf32>
      %370 = vector.shape_cast %369 : vector<1x4x192xf32> to vector<4x192xf32>
      %c8_417 = arith.constant 8 : index
      %c0_418 = arith.constant 0 : index
      %c0_419 = arith.constant 0 : index
      %371 = vector.load %arg18[%c8_417, %c0_418, %c0_419] : memref<9x192x96xf32, #tpu.memory_space<vmem>>, vector<1x192x96xf32>
      %372 = vector.shape_cast %371 : vector<1x192x96xf32> to vector<192x96xf32>
      %cst_420 = arith.constant dense<0.000000e+00> : vector<4x96xf32>
      %373 = tpu.matmul %370, %372, %cst_420 {dimension_numbers = #tpu.dot_dimension_numbers<[1], [0], [0], [1], [0, 0, 1, 1], [], []>} : vector<4x192xf32>, vector<192x96xf32>, vector<4x96xf32> -> vector<4x96xf32>
      %374 = arith.addf %367, %373 : vector<4x96xf32>
      %375 = vector.broadcast %36 : vector<1x96xf32> to vector<4x96xf32>
      %376 = arith.addf %374, %375 : vector<4x96xf32>
      %cst_421 = arith.constant 0.000000e+00 : f32
      %377 = vector.broadcast %cst_421 : f32 to vector<4x96xf32>
      %378 = arith.maximumf %376, %377 : vector<4x96xf32>
      %c2_i32_422 = arith.constant 2 : i32
      %379 = arith.addi %arg37, %c2_i32_422 : i32
      %380 = arith.index_cast %379 : i32 to index
      %c2_423 = arith.constant 2 : index
      %c0_424 = arith.constant 0 : index
      %381 = vector.load %arg35[%380, %c2_423, %c0_424] : memref<8x8x96xf32, #tpu.memory_space<vmem>>, vector<1x4x96xf32>
      %382 = vector.shape_cast %381 : vector<1x4x96xf32> to vector<4x96xf32>
      %383 = vector.shape_cast %378 : vector<4x96xf32> to vector<1x4x96xf32>
      tpu.vector_store %arg35[%380, %c2_423, %c0_424], %383 {strides = array<i32>} : memref<8x8x96xf32, #tpu.memory_space<vmem>>, vector<1x4x96xf32>,
    }
    %c4_i32_86 = arith.constant 4 : i32
    %c0_87 = arith.constant 0 : index
    %c0_88 = arith.constant 0 : index
    %38 = vector.load %arg21[%c0_87, %c0_88] : memref<1x48xf32, #tpu.memory_space<vmem>>, vector<1x48xf32>
    %c0_i32_89 = arith.constant 0 : i32
    %c4_i32_90 = arith.constant 4 : i32
    %39 = arith.addi %c0_i32_89, %c4_i32_90 : i32
    %c1_i32_91 = arith.constant 1 : i32
    scf.for %arg37 = %c0_i32_89 to %39 step %c1_i32_91  : i32 {
      %c1_i32_362 = arith.constant 1 : i32
      %307 = arith.muli %arg37, %c1_i32_362 : i32
      %c0_i32_363 = arith.constant 0 : i32
      %308 = arith.addi %307, %c0_i32_363 : i32
      %309 = arith.index_cast %308 : i32 to index
      %c0_364 = arith.constant 0 : index
      %c0_365 = arith.constant 0 : index
      %310 = vector.load %arg35[%309, %c0_364, %c0_365] : memref<8x8x96xf32, #tpu.memory_space<vmem>>, vector<1x4x96xf32>
      %311 = vector.shape_cast %310 : vector<1x4x96xf32> to vector<4x96xf32>
      %c0_366 = arith.constant 0 : index
      %c0_367 = arith.constant 0 : index
      %c0_368 = arith.constant 0 : index
      %312 = vector.load %arg20[%c0_366, %c0_367, %c0_368] : memref<9x96x48xf32, #tpu.memory_space<vmem>>, vector<1x96x48xf32>
      %313 = vector.shape_cast %312 : vector<1x96x48xf32> to vector<96x48xf32>
      %cst_369 = arith.constant dense<0.000000e+00> : vector<4x48xf32>
      %314 = tpu.matmul %311, %313, %cst_369 {dimension_numbers = #tpu.dot_dimension_numbers<[1], [0], [0], [1], [0, 0, 1, 1], [], []>} : vector<4x96xf32>, vector<96x48xf32>, vector<4x48xf32> -> vector<4x48xf32>
      %315 = arith.index_cast %308 : i32 to index
      %c2_370 = arith.constant 2 : index
      %c0_371 = arith.constant 0 : index
      %316 = vector.load %arg35[%315, %c2_370, %c0_371] : memref<8x8x96xf32, #tpu.memory_space<vmem>>, vector<1x4x96xf32>
      %317 = vector.shape_cast %316 : vector<1x4x96xf32> to vector<4x96xf32>
      %c1_372 = arith.constant 1 : index
      %c0_373 = arith.constant 0 : index
      %c0_374 = arith.constant 0 : index
      %318 = vector.load %arg20[%c1_372, %c0_373, %c0_374] : memref<9x96x48xf32, #tpu.memory_space<vmem>>, vector<1x96x48xf32>
      %319 = vector.shape_cast %318 : vector<1x96x48xf32> to vector<96x48xf32>
      %cst_375 = arith.constant dense<0.000000e+00> : vector<4x48xf32>
      %320 = tpu.matmul %317, %319, %cst_375 {dimension_numbers = #tpu.dot_dimension_numbers<[1], [0], [0], [1], [0, 0, 1, 1], [], []>} : vector<4x96xf32>, vector<96x48xf32>, vector<4x48xf32> -> vector<4x48xf32>
      %321 = arith.addf %314, %320 : vector<4x48xf32>
      %322 = arith.index_cast %308 : i32 to index
      %c4_376 = arith.constant 4 : index
      %c0_377 = arith.constant 0 : index
      %323 = vector.load %arg35[%322, %c4_376, %c0_377] : memref<8x8x96xf32, #tpu.memory_space<vmem>>, vector<1x4x96xf32>
      %324 = vector.shape_cast %323 : vector<1x4x96xf32> to vector<4x96xf32>
      %c2_378 = arith.constant 2 : index
      %c0_379 = arith.constant 0 : index
      %c0_380 = arith.constant 0 : index
      %325 = vector.load %arg20[%c2_378, %c0_379, %c0_380] : memref<9x96x48xf32, #tpu.memory_space<vmem>>, vector<1x96x48xf32>
      %326 = vector.shape_cast %325 : vector<1x96x48xf32> to vector<96x48xf32>
      %cst_381 = arith.constant dense<0.000000e+00> : vector<4x48xf32>
      %327 = tpu.matmul %324, %326, %cst_381 {dimension_numbers = #tpu.dot_dimension_numbers<[1], [0], [0], [1], [0, 0, 1, 1], [], []>} : vector<4x96xf32>, vector<96x48xf32>, vector<4x48xf32> -> vector<4x48xf32>
      %328 = arith.addf %321, %327 : vector<4x48xf32>
      %c1_i32_382 = arith.constant 1 : i32
      %329 = arith.muli %arg37, %c1_i32_382 : i32
      %c2_i32 = arith.constant 2 : i32
      %330 = arith.addi %329, %c2_i32 : i32
      %331 = arith.index_cast %330 : i32 to index
      %c0_383 = arith.constant 0 : index
      %c0_384 = arith.constant 0 : index
      %332 = vector.load %arg35[%331, %c0_383, %c0_384] : memref<8x8x96xf32, #tpu.memory_space<vmem>>, vector<1x4x96xf32>
      %333 = vector.shape_cast %332 : vector<1x4x96xf32> to vector<4x96xf32>
      %c3_385 = arith.constant 3 : index
      %c0_386 = arith.constant 0 : index
      %c0_387 = arith.constant 0 : index
      %334 = vector.load %arg20[%c3_385, %c0_386, %c0_387] : memref<9x96x48xf32, #tpu.memory_space<vmem>>, vector<1x96x48xf32>
      %335 = vector.shape_cast %334 : vector<1x96x48xf32> to vector<96x48xf32>
      %cst_388 = arith.constant dense<0.000000e+00> : vector<4x48xf32>
      %336 = tpu.matmul %333, %335, %cst_388 {dimension_numbers = #tpu.dot_dimension_numbers<[1], [0], [0], [1], [0, 0, 1, 1], [], []>} : vector<4x96xf32>, vector<96x48xf32>, vector<4x48xf32> -> vector<4x48xf32>
      %337 = arith.addf %328, %336 : vector<4x48xf32>
      %338 = arith.index_cast %330 : i32 to index
      %c2_389 = arith.constant 2 : index
      %c0_390 = arith.constant 0 : index
      %339 = vector.load %arg35[%338, %c2_389, %c0_390] : memref<8x8x96xf32, #tpu.memory_space<vmem>>, vector<1x4x96xf32>
      %340 = vector.shape_cast %339 : vector<1x4x96xf32> to vector<4x96xf32>
      %c4_391 = arith.constant 4 : index
      %c0_392 = arith.constant 0 : index
      %c0_393 = arith.constant 0 : index
      %341 = vector.load %arg20[%c4_391, %c0_392, %c0_393] : memref<9x96x48xf32, #tpu.memory_space<vmem>>, vector<1x96x48xf32>
      %342 = vector.shape_cast %341 : vector<1x96x48xf32> to vector<96x48xf32>
      %cst_394 = arith.constant dense<0.000000e+00> : vector<4x48xf32>
      %343 = tpu.matmul %340, %342, %cst_394 {dimension_numbers = #tpu.dot_dimension_numbers<[1], [0], [0], [1], [0, 0, 1, 1], [], []>} : vector<4x96xf32>, vector<96x48xf32>, vector<4x48xf32> -> vector<4x48xf32>
      %344 = arith.addf %337, %343 : vector<4x48xf32>
      %345 = arith.index_cast %330 : i32 to index
      %c4_395 = arith.constant 4 : index
      %c0_396 = arith.constant 0 : index
      %346 = vector.load %arg35[%345, %c4_395, %c0_396] : memref<8x8x96xf32, #tpu.memory_space<vmem>>, vector<1x4x96xf32>
      %347 = vector.shape_cast %346 : vector<1x4x96xf32> to vector<4x96xf32>
      %c5_397 = arith.constant 5 : index
      %c0_398 = arith.constant 0 : index
      %c0_399 = arith.constant 0 : index
      %348 = vector.load %arg20[%c5_397, %c0_398, %c0_399] : memref<9x96x48xf32, #tpu.memory_space<vmem>>, vector<1x96x48xf32>
      %349 = vector.shape_cast %348 : vector<1x96x48xf32> to vector<96x48xf32>
      %cst_400 = arith.constant dense<0.000000e+00> : vector<4x48xf32>
      %350 = tpu.matmul %347, %349, %cst_400 {dimension_numbers = #tpu.dot_dimension_numbers<[1], [0], [0], [1], [0, 0, 1, 1], [], []>} : vector<4x96xf32>, vector<96x48xf32>, vector<4x48xf32> -> vector<4x48xf32>
      %351 = arith.addf %344, %350 : vector<4x48xf32>
      %c1_i32_401 = arith.constant 1 : i32
      %352 = arith.muli %arg37, %c1_i32_401 : i32
      %c4_i32_402 = arith.constant 4 : i32
      %353 = arith.addi %352, %c4_i32_402 : i32
      %354 = arith.index_cast %353 : i32 to index
      %c0_403 = arith.constant 0 : index
      %c0_404 = arith.constant 0 : index
      %355 = vector.load %arg35[%354, %c0_403, %c0_404] : memref<8x8x96xf32, #tpu.memory_space<vmem>>, vector<1x4x96xf32>
      %356 = vector.shape_cast %355 : vector<1x4x96xf32> to vector<4x96xf32>
      %c6_405 = arith.constant 6 : index
      %c0_406 = arith.constant 0 : index
      %c0_407 = arith.constant 0 : index
      %357 = vector.load %arg20[%c6_405, %c0_406, %c0_407] : memref<9x96x48xf32, #tpu.memory_space<vmem>>, vector<1x96x48xf32>
      %358 = vector.shape_cast %357 : vector<1x96x48xf32> to vector<96x48xf32>
      %cst_408 = arith.constant dense<0.000000e+00> : vector<4x48xf32>
      %359 = tpu.matmul %356, %358, %cst_408 {dimension_numbers = #tpu.dot_dimension_numbers<[1], [0], [0], [1], [0, 0, 1, 1], [], []>} : vector<4x96xf32>, vector<96x48xf32>, vector<4x48xf32> -> vector<4x48xf32>
      %360 = arith.addf %351, %359 : vector<4x48xf32>
      %361 = arith.index_cast %353 : i32 to index
      %c2_409 = arith.constant 2 : index
      %c0_410 = arith.constant 0 : index
      %362 = vector.load %arg35[%361, %c2_409, %c0_410] : memref<8x8x96xf32, #tpu.memory_space<vmem>>, vector<1x4x96xf32>
      %363 = vector.shape_cast %362 : vector<1x4x96xf32> to vector<4x96xf32>
      %c7_411 = arith.constant 7 : index
      %c0_412 = arith.constant 0 : index
      %c0_413 = arith.constant 0 : index
      %364 = vector.load %arg20[%c7_411, %c0_412, %c0_413] : memref<9x96x48xf32, #tpu.memory_space<vmem>>, vector<1x96x48xf32>
      %365 = vector.shape_cast %364 : vector<1x96x48xf32> to vector<96x48xf32>
      %cst_414 = arith.constant dense<0.000000e+00> : vector<4x48xf32>
      %366 = tpu.matmul %363, %365, %cst_414 {dimension_numbers = #tpu.dot_dimension_numbers<[1], [0], [0], [1], [0, 0, 1, 1], [], []>} : vector<4x96xf32>, vector<96x48xf32>, vector<4x48xf32> -> vector<4x48xf32>
      %367 = arith.addf %360, %366 : vector<4x48xf32>
      %368 = arith.index_cast %353 : i32 to index
      %c4_415 = arith.constant 4 : index
      %c0_416 = arith.constant 0 : index
      %369 = vector.load %arg35[%368, %c4_415, %c0_416] : memref<8x8x96xf32, #tpu.memory_space<vmem>>, vector<1x4x96xf32>
      %370 = vector.shape_cast %369 : vector<1x4x96xf32> to vector<4x96xf32>
      %c8_417 = arith.constant 8 : index
      %c0_418 = arith.constant 0 : index
      %c0_419 = arith.constant 0 : index
      %371 = vector.load %arg20[%c8_417, %c0_418, %c0_419] : memref<9x96x48xf32, #tpu.memory_space<vmem>>, vector<1x96x48xf32>
      %372 = vector.shape_cast %371 : vector<1x96x48xf32> to vector<96x48xf32>
      %cst_420 = arith.constant dense<0.000000e+00> : vector<4x48xf32>
      %373 = tpu.matmul %370, %372, %cst_420 {dimension_numbers = #tpu.dot_dimension_numbers<[1], [0], [0], [1], [0, 0, 1, 1], [], []>} : vector<4x96xf32>, vector<96x48xf32>, vector<4x48xf32> -> vector<4x48xf32>
      %374 = arith.addf %367, %373 : vector<4x48xf32>
      %375 = vector.broadcast %38 : vector<1x48xf32> to vector<4x48xf32>
      %376 = arith.addf %374, %375 : vector<4x48xf32>
      %cst_421 = arith.constant 0.000000e+00 : f32
      %377 = vector.broadcast %cst_421 : f32 to vector<4x48xf32>
      %378 = arith.maximumf %376, %377 : vector<4x48xf32>
      %c2_i32_422 = arith.constant 2 : i32
      %379 = arith.addi %arg37, %c2_i32_422 : i32
      %380 = arith.index_cast %379 : i32 to index
      %c2_423 = arith.constant 2 : index
      %c0_424 = arith.constant 0 : index
      %381 = vector.load %arg36[%380, %c2_423, %c0_424] : memref<8x8x48xf32, #tpu.memory_space<vmem>>, vector<1x4x48xf32>
      %382 = vector.shape_cast %381 : vector<1x4x48xf32> to vector<4x48xf32>
      %383 = vector.shape_cast %378 : vector<4x48xf32> to vector<1x4x48xf32>
      tpu.vector_store %arg36[%380, %c2_423, %c0_424], %383 {strides = array<i32>} : memref<8x8x48xf32, #tpu.memory_space<vmem>>, vector<1x4x48xf32>,
    }
    %c4_i32_92 = arith.constant 4 : i32
    %c0_93 = arith.constant 0 : index
    %c0_94 = arith.constant 0 : index
    %40 = vector.load %arg23[%c0_93, %c0_94] : memref<1x48xf32, #tpu.memory_space<vmem>>, vector<1x48xf32>
    %c0_95 = arith.constant 0 : index
    %c0_96 = arith.constant 0 : index
    %41 = vector.load %arg24[%c0_95, %c0_96] : memref<1x48xf32, #tpu.memory_space<vmem>>, vector<1x48xf32>
    %c0_97 = arith.constant 0 : index
    %c0_98 = arith.constant 0 : index
    %42 = vector.load %arg25[%c0_97, %c0_98] : memref<1x1xf32, #tpu.memory_space<vmem>>, vector<1x1xf32>
    %c0_99 = arith.constant 0 : index
    %c0_100 = arith.constant 0 : index
    %c0_101 = arith.constant 0 : index
    %43 = vector.load %arg36[%c0_99, %c0_100, %c0_101] : memref<8x8x48xf32, #tpu.memory_space<vmem>>, vector<1x4x48xf32>
    %44 = vector.shape_cast %43 : vector<1x4x48xf32> to vector<4x48xf32>
    %c0_102 = arith.constant 0 : index
    %c0_103 = arith.constant 0 : index
    %c0_104 = arith.constant 0 : index
    %45 = vector.load %arg22[%c0_102, %c0_103, %c0_104] : memref<9x48x48xf32, #tpu.memory_space<vmem>>, vector<1x48x48xf32>
    %46 = vector.shape_cast %45 : vector<1x48x48xf32> to vector<48x48xf32>
    %cst_105 = arith.constant dense<0.000000e+00> : vector<4x48xf32>
    %47 = tpu.matmul %44, %46, %cst_105 {dimension_numbers = #tpu.dot_dimension_numbers<[1], [0], [0], [1], [0, 0, 1, 1], [], []>} : vector<4x48xf32>, vector<48x48xf32>, vector<4x48xf32> -> vector<4x48xf32>
    %c0_106 = arith.constant 0 : index
    %c2 = arith.constant 2 : index
    %c0_107 = arith.constant 0 : index
    %48 = vector.load %arg36[%c0_106, %c2, %c0_107] : memref<8x8x48xf32, #tpu.memory_space<vmem>>, vector<1x4x48xf32>
    %49 = vector.shape_cast %48 : vector<1x4x48xf32> to vector<4x48xf32>
    %c1 = arith.constant 1 : index
    %c0_108 = arith.constant 0 : index
    %c0_109 = arith.constant 0 : index
    %50 = vector.load %arg22[%c1, %c0_108, %c0_109] : memref<9x48x48xf32, #tpu.memory_space<vmem>>, vector<1x48x48xf32>
    %51 = vector.shape_cast %50 : vector<1x48x48xf32> to vector<48x48xf32>
    %cst_110 = arith.constant dense<0.000000e+00> : vector<4x48xf32>
    %52 = tpu.matmul %49, %51, %cst_110 {dimension_numbers = #tpu.dot_dimension_numbers<[1], [0], [0], [1], [0, 0, 1, 1], [], []>} : vector<4x48xf32>, vector<48x48xf32>, vector<4x48xf32> -> vector<4x48xf32>
    %53 = arith.addf %47, %52 : vector<4x48xf32>
    %c0_111 = arith.constant 0 : index
    %c4 = arith.constant 4 : index
    %c0_112 = arith.constant 0 : index
    %54 = vector.load %arg36[%c0_111, %c4, %c0_112] : memref<8x8x48xf32, #tpu.memory_space<vmem>>, vector<1x4x48xf32>
    %55 = vector.shape_cast %54 : vector<1x4x48xf32> to vector<4x48xf32>
    %c2_113 = arith.constant 2 : index
    %c0_114 = arith.constant 0 : index
    %c0_115 = arith.constant 0 : index
    %56 = vector.load %arg22[%c2_113, %c0_114, %c0_115] : memref<9x48x48xf32, #tpu.memory_space<vmem>>, vector<1x48x48xf32>
    %57 = vector.shape_cast %56 : vector<1x48x48xf32> to vector<48x48xf32>
    %cst_116 = arith.constant dense<0.000000e+00> : vector<4x48xf32>
    %58 = tpu.matmul %55, %57, %cst_116 {dimension_numbers = #tpu.dot_dimension_numbers<[1], [0], [0], [1], [0, 0, 1, 1], [], []>} : vector<4x48xf32>, vector<48x48xf32>, vector<4x48xf32> -> vector<4x48xf32>
    %59 = arith.addf %53, %58 : vector<4x48xf32>
    %c2_117 = arith.constant 2 : index
    %c0_118 = arith.constant 0 : index
    %c0_119 = arith.constant 0 : index
    %60 = vector.load %arg36[%c2_117, %c0_118, %c0_119] : memref<8x8x48xf32, #tpu.memory_space<vmem>>, vector<1x4x48xf32>
    %61 = vector.shape_cast %60 : vector<1x4x48xf32> to vector<4x48xf32>
    %c3 = arith.constant 3 : index
    %c0_120 = arith.constant 0 : index
    %c0_121 = arith.constant 0 : index
    %62 = vector.load %arg22[%c3, %c0_120, %c0_121] : memref<9x48x48xf32, #tpu.memory_space<vmem>>, vector<1x48x48xf32>
    %63 = vector.shape_cast %62 : vector<1x48x48xf32> to vector<48x48xf32>
    %cst_122 = arith.constant dense<0.000000e+00> : vector<4x48xf32>
    %64 = tpu.matmul %61, %63, %cst_122 {dimension_numbers = #tpu.dot_dimension_numbers<[1], [0], [0], [1], [0, 0, 1, 1], [], []>} : vector<4x48xf32>, vector<48x48xf32>, vector<4x48xf32> -> vector<4x48xf32>
    %65 = arith.addf %59, %64 : vector<4x48xf32>
    %c2_123 = arith.constant 2 : index
    %c2_124 = arith.constant 2 : index
    %c0_125 = arith.constant 0 : index
    %66 = vector.load %arg36[%c2_123, %c2_124, %c0_125] : memref<8x8x48xf32, #tpu.memory_space<vmem>>, vector<1x4x48xf32>
    %67 = vector.shape_cast %66 : vector<1x4x48xf32> to vector<4x48xf32>
    %c4_126 = arith.constant 4 : index
    %c0_127 = arith.constant 0 : index
    %c0_128 = arith.constant 0 : index
    %68 = vector.load %arg22[%c4_126, %c0_127, %c0_128] : memref<9x48x48xf32, #tpu.memory_space<vmem>>, vector<1x48x48xf32>
    %69 = vector.shape_cast %68 : vector<1x48x48xf32> to vector<48x48xf32>
    %cst_129 = arith.constant dense<0.000000e+00> : vector<4x48xf32>
    %70 = tpu.matmul %67, %69, %cst_129 {dimension_numbers = #tpu.dot_dimension_numbers<[1], [0], [0], [1], [0, 0, 1, 1], [], []>} : vector<4x48xf32>, vector<48x48xf32>, vector<4x48xf32> -> vector<4x48xf32>
    %71 = arith.addf %65, %70 : vector<4x48xf32>
    %c2_130 = arith.constant 2 : index
    %c4_131 = arith.constant 4 : index
    %c0_132 = arith.constant 0 : index
    %72 = vector.load %arg36[%c2_130, %c4_131, %c0_132] : memref<8x8x48xf32, #tpu.memory_space<vmem>>, vector<1x4x48xf32>
    %73 = vector.shape_cast %72 : vector<1x4x48xf32> to vector<4x48xf32>
    %c5 = arith.constant 5 : index
    %c0_133 = arith.constant 0 : index
    %c0_134 = arith.constant 0 : index
    %74 = vector.load %arg22[%c5, %c0_133, %c0_134] : memref<9x48x48xf32, #tpu.memory_space<vmem>>, vector<1x48x48xf32>
    %75 = vector.shape_cast %74 : vector<1x48x48xf32> to vector<48x48xf32>
    %cst_135 = arith.constant dense<0.000000e+00> : vector<4x48xf32>
    %76 = tpu.matmul %73, %75, %cst_135 {dimension_numbers = #tpu.dot_dimension_numbers<[1], [0], [0], [1], [0, 0, 1, 1], [], []>} : vector<4x48xf32>, vector<48x48xf32>, vector<4x48xf32> -> vector<4x48xf32>
    %77 = arith.addf %71, %76 : vector<4x48xf32>
    %c4_136 = arith.constant 4 : index
    %c0_137 = arith.constant 0 : index
    %c0_138 = arith.constant 0 : index
    %78 = vector.load %arg36[%c4_136, %c0_137, %c0_138] : memref<8x8x48xf32, #tpu.memory_space<vmem>>, vector<1x4x48xf32>
    %79 = vector.shape_cast %78 : vector<1x4x48xf32> to vector<4x48xf32>
    %c6 = arith.constant 6 : index
    %c0_139 = arith.constant 0 : index
    %c0_140 = arith.constant 0 : index
    %80 = vector.load %arg22[%c6, %c0_139, %c0_140] : memref<9x48x48xf32, #tpu.memory_space<vmem>>, vector<1x48x48xf32>
    %81 = vector.shape_cast %80 : vector<1x48x48xf32> to vector<48x48xf32>
    %cst_141 = arith.constant dense<0.000000e+00> : vector<4x48xf32>
    %82 = tpu.matmul %79, %81, %cst_141 {dimension_numbers = #tpu.dot_dimension_numbers<[1], [0], [0], [1], [0, 0, 1, 1], [], []>} : vector<4x48xf32>, vector<48x48xf32>, vector<4x48xf32> -> vector<4x48xf32>
    %83 = arith.addf %77, %82 : vector<4x48xf32>
    %c4_142 = arith.constant 4 : index
    %c2_143 = arith.constant 2 : index
    %c0_144 = arith.constant 0 : index
    %84 = vector.load %arg36[%c4_142, %c2_143, %c0_144] : memref<8x8x48xf32, #tpu.memory_space<vmem>>, vector<1x4x48xf32>
    %85 = vector.shape_cast %84 : vector<1x4x48xf32> to vector<4x48xf32>
    %c7 = arith.constant 7 : index
    %c0_145 = arith.constant 0 : index
    %c0_146 = arith.constant 0 : index
    %86 = vector.load %arg22[%c7, %c0_145, %c0_146] : memref<9x48x48xf32, #tpu.memory_space<vmem>>, vector<1x48x48xf32>
    %87 = vector.shape_cast %86 : vector<1x48x48xf32> to vector<48x48xf32>
    %cst_147 = arith.constant dense<0.000000e+00> : vector<4x48xf32>
    %88 = tpu.matmul %85, %87, %cst_147 {dimension_numbers = #tpu.dot_dimension_numbers<[1], [0], [0], [1], [0, 0, 1, 1], [], []>} : vector<4x48xf32>, vector<48x48xf32>, vector<4x48xf32> -> vector<4x48xf32>
    %89 = arith.addf %83, %88 : vector<4x48xf32>
    %c4_148 = arith.constant 4 : index
    %c4_149 = arith.constant 4 : index
    %c0_150 = arith.constant 0 : index
    %90 = vector.load %arg36[%c4_148, %c4_149, %c0_150] : memref<8x8x48xf32, #tpu.memory_space<vmem>>, vector<1x4x48xf32>
    %91 = vector.shape_cast %90 : vector<1x4x48xf32> to vector<4x48xf32>
    %c8 = arith.constant 8 : index
    %c0_151 = arith.constant 0 : index
    %c0_152 = arith.constant 0 : index
    %92 = vector.load %arg22[%c8, %c0_151, %c0_152] : memref<9x48x48xf32, #tpu.memory_space<vmem>>, vector<1x48x48xf32>
    %93 = vector.shape_cast %92 : vector<1x48x48xf32> to vector<48x48xf32>
    %cst_153 = arith.constant dense<0.000000e+00> : vector<4x48xf32>
    %94 = tpu.matmul %91, %93, %cst_153 {dimension_numbers = #tpu.dot_dimension_numbers<[1], [0], [0], [1], [0, 0, 1, 1], [], []>} : vector<4x48xf32>, vector<48x48xf32>, vector<4x48xf32> -> vector<4x48xf32>
    %95 = arith.addf %89, %94 : vector<4x48xf32>
    %96 = vector.broadcast %40 : vector<1x48xf32> to vector<4x48xf32>
    %97 = arith.addf %95, %96 : vector<4x48xf32>
    %cst_154 = arith.constant 0.000000e+00 : f32
    %98 = vector.broadcast %cst_154 : f32 to vector<4x48xf32>
    %99 = arith.maximumf %97, %98 : vector<4x48xf32>
    %100 = vector.broadcast %41 : vector<1x48xf32> to vector<4x48xf32>
    %101 = arith.mulf %99, %100 : vector<4x48xf32>
    %cst_155 = arith.constant dense<0.000000e+00> : vector<4xf32>
    %102 = vector.multi_reduction <add>, %101, %cst_155 [1] : vector<4x48xf32> to vector<4xf32>
    %103 = vector.shape_cast %102 : vector<4xf32> to vector<4x1xf32>
    %104 = vector.broadcast %42 : vector<1x1xf32> to vector<4x1xf32>
    %105 = arith.addf %103, %104 : vector<4x1xf32>
    %c0_156 = arith.constant 0 : index
    %c0_157 = arith.constant 0 : index
    %c0_158 = arith.constant 0 : index
    %106 = vector.load %arg26[%c0_156, %c0_157, %c0_158] : memref<1x16x1xf32, #tpu.memory_space<vmem>>, vector<1x4x1xf32>
    %107 = vector.shape_cast %106 : vector<1x4x1xf32> to vector<4x1xf32>
    %108 = vector.shape_cast %105 : vector<4x1xf32> to vector<1x4x1xf32>
    tpu.vector_store %arg26[%c0_156, %c0_157, %c0_158], %108 {strides = array<i32>} : memref<1x16x1xf32, #tpu.memory_space<vmem>>, vector<1x4x1xf32>,
    %c1_159 = arith.constant 1 : index
    %c0_160 = arith.constant 0 : index
    %c0_161 = arith.constant 0 : index
    %109 = vector.load %arg36[%c1_159, %c0_160, %c0_161] : memref<8x8x48xf32, #tpu.memory_space<vmem>>, vector<1x4x48xf32>
    %110 = vector.shape_cast %109 : vector<1x4x48xf32> to vector<4x48xf32>
    %c0_162 = arith.constant 0 : index
    %c0_163 = arith.constant 0 : index
    %c0_164 = arith.constant 0 : index
    %111 = vector.load %arg22[%c0_162, %c0_163, %c0_164] : memref<9x48x48xf32, #tpu.memory_space<vmem>>, vector<1x48x48xf32>
    %112 = vector.shape_cast %111 : vector<1x48x48xf32> to vector<48x48xf32>
    %cst_165 = arith.constant dense<0.000000e+00> : vector<4x48xf32>
    %113 = tpu.matmul %110, %112, %cst_165 {dimension_numbers = #tpu.dot_dimension_numbers<[1], [0], [0], [1], [0, 0, 1, 1], [], []>} : vector<4x48xf32>, vector<48x48xf32>, vector<4x48xf32> -> vector<4x48xf32>
    %c1_166 = arith.constant 1 : index
    %c2_167 = arith.constant 2 : index
    %c0_168 = arith.constant 0 : index
    %114 = vector.load %arg36[%c1_166, %c2_167, %c0_168] : memref<8x8x48xf32, #tpu.memory_space<vmem>>, vector<1x4x48xf32>
    %115 = vector.shape_cast %114 : vector<1x4x48xf32> to vector<4x48xf32>
    %c1_169 = arith.constant 1 : index
    %c0_170 = arith.constant 0 : index
    %c0_171 = arith.constant 0 : index
    %116 = vector.load %arg22[%c1_169, %c0_170, %c0_171] : memref<9x48x48xf32, #tpu.memory_space<vmem>>, vector<1x48x48xf32>
    %117 = vector.shape_cast %116 : vector<1x48x48xf32> to vector<48x48xf32>
    %cst_172 = arith.constant dense<0.000000e+00> : vector<4x48xf32>
    %118 = tpu.matmul %115, %117, %cst_172 {dimension_numbers = #tpu.dot_dimension_numbers<[1], [0], [0], [1], [0, 0, 1, 1], [], []>} : vector<4x48xf32>, vector<48x48xf32>, vector<4x48xf32> -> vector<4x48xf32>
    %119 = arith.addf %113, %118 : vector<4x48xf32>
    %c1_173 = arith.constant 1 : index
    %c4_174 = arith.constant 4 : index
    %c0_175 = arith.constant 0 : index
    %120 = vector.load %arg36[%c1_173, %c4_174, %c0_175] : memref<8x8x48xf32, #tpu.memory_space<vmem>>, vector<1x4x48xf32>
    %121 = vector.shape_cast %120 : vector<1x4x48xf32> to vector<4x48xf32>
    %c2_176 = arith.constant 2 : index
    %c0_177 = arith.constant 0 : index
    %c0_178 = arith.constant 0 : index
    %122 = vector.load %arg22[%c2_176, %c0_177, %c0_178] : memref<9x48x48xf32, #tpu.memory_space<vmem>>, vector<1x48x48xf32>
    %123 = vector.shape_cast %122 : vector<1x48x48xf32> to vector<48x48xf32>
    %cst_179 = arith.constant dense<0.000000e+00> : vector<4x48xf32>
    %124 = tpu.matmul %121, %123, %cst_179 {dimension_numbers = #tpu.dot_dimension_numbers<[1], [0], [0], [1], [0, 0, 1, 1], [], []>} : vector<4x48xf32>, vector<48x48xf32>, vector<4x48xf32> -> vector<4x48xf32>
    %125 = arith.addf %119, %124 : vector<4x48xf32>
    %c3_180 = arith.constant 3 : index
    %c0_181 = arith.constant 0 : index
    %c0_182 = arith.constant 0 : index
    %126 = vector.load %arg36[%c3_180, %c0_181, %c0_182] : memref<8x8x48xf32, #tpu.memory_space<vmem>>, vector<1x4x48xf32>
    %127 = vector.shape_cast %126 : vector<1x4x48xf32> to vector<4x48xf32>
    %c3_183 = arith.constant 3 : index
    %c0_184 = arith.constant 0 : index
    %c0_185 = arith.constant 0 : index
    %128 = vector.load %arg22[%c3_183, %c0_184, %c0_185] : memref<9x48x48xf32, #tpu.memory_space<vmem>>, vector<1x48x48xf32>
    %129 = vector.shape_cast %128 : vector<1x48x48xf32> to vector<48x48xf32>
    %cst_186 = arith.constant dense<0.000000e+00> : vector<4x48xf32>
    %130 = tpu.matmul %127, %129, %cst_186 {dimension_numbers = #tpu.dot_dimension_numbers<[1], [0], [0], [1], [0, 0, 1, 1], [], []>} : vector<4x48xf32>, vector<48x48xf32>, vector<4x48xf32> -> vector<4x48xf32>
    %131 = arith.addf %125, %130 : vector<4x48xf32>
    %c3_187 = arith.constant 3 : index
    %c2_188 = arith.constant 2 : index
    %c0_189 = arith.constant 0 : index
    %132 = vector.load %arg36[%c3_187, %c2_188, %c0_189] : memref<8x8x48xf32, #tpu.memory_space<vmem>>, vector<1x4x48xf32>
    %133 = vector.shape_cast %132 : vector<1x4x48xf32> to vector<4x48xf32>
    %c4_190 = arith.constant 4 : index
    %c0_191 = arith.constant 0 : index
    %c0_192 = arith.constant 0 : index
    %134 = vector.load %arg22[%c4_190, %c0_191, %c0_192] : memref<9x48x48xf32, #tpu.memory_space<vmem>>, vector<1x48x48xf32>
    %135 = vector.shape_cast %134 : vector<1x48x48xf32> to vector<48x48xf32>
    %cst_193 = arith.constant dense<0.000000e+00> : vector<4x48xf32>
    %136 = tpu.matmul %133, %135, %cst_193 {dimension_numbers = #tpu.dot_dimension_numbers<[1], [0], [0], [1], [0, 0, 1, 1], [], []>} : vector<4x48xf32>, vector<48x48xf32>, vector<4x48xf32> -> vector<4x48xf32>
    %137 = arith.addf %131, %136 : vector<4x48xf32>
    %c3_194 = arith.constant 3 : index
    %c4_195 = arith.constant 4 : index
    %c0_196 = arith.constant 0 : index
    %138 = vector.load %arg36[%c3_194, %c4_195, %c0_196] : memref<8x8x48xf32, #tpu.memory_space<vmem>>, vector<1x4x48xf32>
    %139 = vector.shape_cast %138 : vector<1x4x48xf32> to vector<4x48xf32>
    %c5_197 = arith.constant 5 : index
    %c0_198 = arith.constant 0 : index
    %c0_199 = arith.constant 0 : index
    %140 = vector.load %arg22[%c5_197, %c0_198, %c0_199] : memref<9x48x48xf32, #tpu.memory_space<vmem>>, vector<1x48x48xf32>
    %141 = vector.shape_cast %140 : vector<1x48x48xf32> to vector<48x48xf32>
    %cst_200 = arith.constant dense<0.000000e+00> : vector<4x48xf32>
    %142 = tpu.matmul %139, %141, %cst_200 {dimension_numbers = #tpu.dot_dimension_numbers<[1], [0], [0], [1], [0, 0, 1, 1], [], []>} : vector<4x48xf32>, vector<48x48xf32>, vector<4x48xf32> -> vector<4x48xf32>
    %143 = arith.addf %137, %142 : vector<4x48xf32>
    %c5_201 = arith.constant 5 : index
    %c0_202 = arith.constant 0 : index
    %c0_203 = arith.constant 0 : index
    %144 = vector.load %arg36[%c5_201, %c0_202, %c0_203] : memref<8x8x48xf32, #tpu.memory_space<vmem>>, vector<1x4x48xf32>
    %145 = vector.shape_cast %144 : vector<1x4x48xf32> to vector<4x48xf32>
    %c6_204 = arith.constant 6 : index
    %c0_205 = arith.constant 0 : index
    %c0_206 = arith.constant 0 : index
    %146 = vector.load %arg22[%c6_204, %c0_205, %c0_206] : memref<9x48x48xf32, #tpu.memory_space<vmem>>, vector<1x48x48xf32>
    %147 = vector.shape_cast %146 : vector<1x48x48xf32> to vector<48x48xf32>
    %cst_207 = arith.constant dense<0.000000e+00> : vector<4x48xf32>
    %148 = tpu.matmul %145, %147, %cst_207 {dimension_numbers = #tpu.dot_dimension_numbers<[1], [0], [0], [1], [0, 0, 1, 1], [], []>} : vector<4x48xf32>, vector<48x48xf32>, vector<4x48xf32> -> vector<4x48xf32>
    %149 = arith.addf %143, %148 : vector<4x48xf32>
    %c5_208 = arith.constant 5 : index
    %c2_209 = arith.constant 2 : index
    %c0_210 = arith.constant 0 : index
    %150 = vector.load %arg36[%c5_208, %c2_209, %c0_210] : memref<8x8x48xf32, #tpu.memory_space<vmem>>, vector<1x4x48xf32>
    %151 = vector.shape_cast %150 : vector<1x4x48xf32> to vector<4x48xf32>
    %c7_211 = arith.constant 7 : index
    %c0_212 = arith.constant 0 : index
    %c0_213 = arith.constant 0 : index
    %152 = vector.load %arg22[%c7_211, %c0_212, %c0_213] : memref<9x48x48xf32, #tpu.memory_space<vmem>>, vector<1x48x48xf32>
    %153 = vector.shape_cast %152 : vector<1x48x48xf32> to vector<48x48xf32>
    %cst_214 = arith.constant dense<0.000000e+00> : vector<4x48xf32>
    %154 = tpu.matmul %151, %153, %cst_214 {dimension_numbers = #tpu.dot_dimension_numbers<[1], [0], [0], [1], [0, 0, 1, 1], [], []>} : vector<4x48xf32>, vector<48x48xf32>, vector<4x48xf32> -> vector<4x48xf32>
    %155 = arith.addf %149, %154 : vector<4x48xf32>
    %c5_215 = arith.constant 5 : index
    %c4_216 = arith.constant 4 : index
    %c0_217 = arith.constant 0 : index
    %156 = vector.load %arg36[%c5_215, %c4_216, %c0_217] : memref<8x8x48xf32, #tpu.memory_space<vmem>>, vector<1x4x48xf32>
    %157 = vector.shape_cast %156 : vector<1x4x48xf32> to vector<4x48xf32>
    %c8_218 = arith.constant 8 : index
    %c0_219 = arith.constant 0 : index
    %c0_220 = arith.constant 0 : index
    %158 = vector.load %arg22[%c8_218, %c0_219, %c0_220] : memref<9x48x48xf32, #tpu.memory_space<vmem>>, vector<1x48x48xf32>
    %159 = vector.shape_cast %158 : vector<1x48x48xf32> to vector<48x48xf32>
    %cst_221 = arith.constant dense<0.000000e+00> : vector<4x48xf32>
    %160 = tpu.matmul %157, %159, %cst_221 {dimension_numbers = #tpu.dot_dimension_numbers<[1], [0], [0], [1], [0, 0, 1, 1], [], []>} : vector<4x48xf32>, vector<48x48xf32>, vector<4x48xf32> -> vector<4x48xf32>
    %161 = arith.addf %155, %160 : vector<4x48xf32>
    %162 = vector.broadcast %40 : vector<1x48xf32> to vector<4x48xf32>
    %163 = arith.addf %161, %162 : vector<4x48xf32>
    %cst_222 = arith.constant 0.000000e+00 : f32
    %164 = vector.broadcast %cst_222 : f32 to vector<4x48xf32>
    %165 = arith.maximumf %163, %164 : vector<4x48xf32>
    %166 = vector.broadcast %41 : vector<1x48xf32> to vector<4x48xf32>
    %167 = arith.mulf %165, %166 : vector<4x48xf32>
    %cst_223 = arith.constant dense<0.000000e+00> : vector<4xf32>
    %168 = vector.multi_reduction <add>, %167, %cst_223 [1] : vector<4x48xf32> to vector<4xf32>
    %169 = vector.shape_cast %168 : vector<4xf32> to vector<4x1xf32>
    %170 = vector.broadcast %42 : vector<1x1xf32> to vector<4x1xf32>
    %171 = arith.addf %169, %170 : vector<4x1xf32>
    %c0_224 = arith.constant 0 : index
    %c4_225 = arith.constant 4 : index
    %c0_226 = arith.constant 0 : index
    %172 = vector.load %arg26[%c0_224, %c4_225, %c0_226] : memref<1x16x1xf32, #tpu.memory_space<vmem>>, vector<1x4x1xf32>
    %173 = vector.shape_cast %172 : vector<1x4x1xf32> to vector<4x1xf32>
    %174 = vector.shape_cast %171 : vector<4x1xf32> to vector<1x4x1xf32>
    tpu.vector_store %arg26[%c0_224, %c4_225, %c0_226], %174 {strides = array<i32>} : memref<1x16x1xf32, #tpu.memory_space<vmem>>, vector<1x4x1xf32>,
    %c2_227 = arith.constant 2 : index
    %c0_228 = arith.constant 0 : index
    %c0_229 = arith.constant 0 : index
    %175 = vector.load %arg36[%c2_227, %c0_228, %c0_229] : memref<8x8x48xf32, #tpu.memory_space<vmem>>, vector<1x4x48xf32>
    %176 = vector.shape_cast %175 : vector<1x4x48xf32> to vector<4x48xf32>
    %c0_230 = arith.constant 0 : index
    %c0_231 = arith.constant 0 : index
    %c0_232 = arith.constant 0 : index
    %177 = vector.load %arg22[%c0_230, %c0_231, %c0_232] : memref<9x48x48xf32, #tpu.memory_space<vmem>>, vector<1x48x48xf32>
    %178 = vector.shape_cast %177 : vector<1x48x48xf32> to vector<48x48xf32>
    %cst_233 = arith.constant dense<0.000000e+00> : vector<4x48xf32>
    %179 = tpu.matmul %176, %178, %cst_233 {dimension_numbers = #tpu.dot_dimension_numbers<[1], [0], [0], [1], [0, 0, 1, 1], [], []>} : vector<4x48xf32>, vector<48x48xf32>, vector<4x48xf32> -> vector<4x48xf32>
    %c2_234 = arith.constant 2 : index
    %c2_235 = arith.constant 2 : index
    %c0_236 = arith.constant 0 : index
    %180 = vector.load %arg36[%c2_234, %c2_235, %c0_236] : memref<8x8x48xf32, #tpu.memory_space<vmem>>, vector<1x4x48xf32>
    %181 = vector.shape_cast %180 : vector<1x4x48xf32> to vector<4x48xf32>
    %c1_237 = arith.constant 1 : index
    %c0_238 = arith.constant 0 : index
    %c0_239 = arith.constant 0 : index
    %182 = vector.load %arg22[%c1_237, %c0_238, %c0_239] : memref<9x48x48xf32, #tpu.memory_space<vmem>>, vector<1x48x48xf32>
    %183 = vector.shape_cast %182 : vector<1x48x48xf32> to vector<48x48xf32>
    %cst_240 = arith.constant dense<0.000000e+00> : vector<4x48xf32>
    %184 = tpu.matmul %181, %183, %cst_240 {dimension_numbers = #tpu.dot_dimension_numbers<[1], [0], [0], [1], [0, 0, 1, 1], [], []>} : vector<4x48xf32>, vector<48x48xf32>, vector<4x48xf32> -> vector<4x48xf32>
    %185 = arith.addf %179, %184 : vector<4x48xf32>
    %c2_241 = arith.constant 2 : index
    %c4_242 = arith.constant 4 : index
    %c0_243 = arith.constant 0 : index
    %186 = vector.load %arg36[%c2_241, %c4_242, %c0_243] : memref<8x8x48xf32, #tpu.memory_space<vmem>>, vector<1x4x48xf32>
    %187 = vector.shape_cast %186 : vector<1x4x48xf32> to vector<4x48xf32>
    %c2_244 = arith.constant 2 : index
    %c0_245 = arith.constant 0 : index
    %c0_246 = arith.constant 0 : index
    %188 = vector.load %arg22[%c2_244, %c0_245, %c0_246] : memref<9x48x48xf32, #tpu.memory_space<vmem>>, vector<1x48x48xf32>
    %189 = vector.shape_cast %188 : vector<1x48x48xf32> to vector<48x48xf32>
    %cst_247 = arith.constant dense<0.000000e+00> : vector<4x48xf32>
    %190 = tpu.matmul %187, %189, %cst_247 {dimension_numbers = #tpu.dot_dimension_numbers<[1], [0], [0], [1], [0, 0, 1, 1], [], []>} : vector<4x48xf32>, vector<48x48xf32>, vector<4x48xf32> -> vector<4x48xf32>
    %191 = arith.addf %185, %190 : vector<4x48xf32>
    %c4_248 = arith.constant 4 : index
    %c0_249 = arith.constant 0 : index
    %c0_250 = arith.constant 0 : index
    %192 = vector.load %arg36[%c4_248, %c0_249, %c0_250] : memref<8x8x48xf32, #tpu.memory_space<vmem>>, vector<1x4x48xf32>
    %193 = vector.shape_cast %192 : vector<1x4x48xf32> to vector<4x48xf32>
    %c3_251 = arith.constant 3 : index
    %c0_252 = arith.constant 0 : index
    %c0_253 = arith.constant 0 : index
    %194 = vector.load %arg22[%c3_251, %c0_252, %c0_253] : memref<9x48x48xf32, #tpu.memory_space<vmem>>, vector<1x48x48xf32>
    %195 = vector.shape_cast %194 : vector<1x48x48xf32> to vector<48x48xf32>
    %cst_254 = arith.constant dense<0.000000e+00> : vector<4x48xf32>
    %196 = tpu.matmul %193, %195, %cst_254 {dimension_numbers = #tpu.dot_dimension_numbers<[1], [0], [0], [1], [0, 0, 1, 1], [], []>} : vector<4x48xf32>, vector<48x48xf32>, vector<4x48xf32> -> vector<4x48xf32>
    %197 = arith.addf %191, %196 : vector<4x48xf32>
    %c4_255 = arith.constant 4 : index
    %c2_256 = arith.constant 2 : index
    %c0_257 = arith.constant 0 : index
    %198 = vector.load %arg36[%c4_255, %c2_256, %c0_257] : memref<8x8x48xf32, #tpu.memory_space<vmem>>, vector<1x4x48xf32>
    %199 = vector.shape_cast %198 : vector<1x4x48xf32> to vector<4x48xf32>
    %c4_258 = arith.constant 4 : index
    %c0_259 = arith.constant 0 : index
    %c0_260 = arith.constant 0 : index
    %200 = vector.load %arg22[%c4_258, %c0_259, %c0_260] : memref<9x48x48xf32, #tpu.memory_space<vmem>>, vector<1x48x48xf32>
    %201 = vector.shape_cast %200 : vector<1x48x48xf32> to vector<48x48xf32>
    %cst_261 = arith.constant dense<0.000000e+00> : vector<4x48xf32>
    %202 = tpu.matmul %199, %201, %cst_261 {dimension_numbers = #tpu.dot_dimension_numbers<[1], [0], [0], [1], [0, 0, 1, 1], [], []>} : vector<4x48xf32>, vector<48x48xf32>, vector<4x48xf32> -> vector<4x48xf32>
    %203 = arith.addf %197, %202 : vector<4x48xf32>
    %c4_262 = arith.constant 4 : index
    %c4_263 = arith.constant 4 : index
    %c0_264 = arith.constant 0 : index
    %204 = vector.load %arg36[%c4_262, %c4_263, %c0_264] : memref<8x8x48xf32, #tpu.memory_space<vmem>>, vector<1x4x48xf32>
    %205 = vector.shape_cast %204 : vector<1x4x48xf32> to vector<4x48xf32>
    %c5_265 = arith.constant 5 : index
    %c0_266 = arith.constant 0 : index
    %c0_267 = arith.constant 0 : index
    %206 = vector.load %arg22[%c5_265, %c0_266, %c0_267] : memref<9x48x48xf32, #tpu.memory_space<vmem>>, vector<1x48x48xf32>
    %207 = vector.shape_cast %206 : vector<1x48x48xf32> to vector<48x48xf32>
    %cst_268 = arith.constant dense<0.000000e+00> : vector<4x48xf32>
    %208 = tpu.matmul %205, %207, %cst_268 {dimension_numbers = #tpu.dot_dimension_numbers<[1], [0], [0], [1], [0, 0, 1, 1], [], []>} : vector<4x48xf32>, vector<48x48xf32>, vector<4x48xf32> -> vector<4x48xf32>
    %209 = arith.addf %203, %208 : vector<4x48xf32>
    %c6_269 = arith.constant 6 : index
    %c0_270 = arith.constant 0 : index
    %c0_271 = arith.constant 0 : index
    %210 = vector.load %arg36[%c6_269, %c0_270, %c0_271] : memref<8x8x48xf32, #tpu.memory_space<vmem>>, vector<1x4x48xf32>
    %211 = vector.shape_cast %210 : vector<1x4x48xf32> to vector<4x48xf32>
    %c6_272 = arith.constant 6 : index
    %c0_273 = arith.constant 0 : index
    %c0_274 = arith.constant 0 : index
    %212 = vector.load %arg22[%c6_272, %c0_273, %c0_274] : memref<9x48x48xf32, #tpu.memory_space<vmem>>, vector<1x48x48xf32>
    %213 = vector.shape_cast %212 : vector<1x48x48xf32> to vector<48x48xf32>
    %cst_275 = arith.constant dense<0.000000e+00> : vector<4x48xf32>
    %214 = tpu.matmul %211, %213, %cst_275 {dimension_numbers = #tpu.dot_dimension_numbers<[1], [0], [0], [1], [0, 0, 1, 1], [], []>} : vector<4x48xf32>, vector<48x48xf32>, vector<4x48xf32> -> vector<4x48xf32>
    %215 = arith.addf %209, %214 : vector<4x48xf32>
    %c6_276 = arith.constant 6 : index
    %c2_277 = arith.constant 2 : index
    %c0_278 = arith.constant 0 : index
    %216 = vector.load %arg36[%c6_276, %c2_277, %c0_278] : memref<8x8x48xf32, #tpu.memory_space<vmem>>, vector<1x4x48xf32>
    %217 = vector.shape_cast %216 : vector<1x4x48xf32> to vector<4x48xf32>
    %c7_279 = arith.constant 7 : index
    %c0_280 = arith.constant 0 : index
    %c0_281 = arith.constant 0 : index
    %218 = vector.load %arg22[%c7_279, %c0_280, %c0_281] : memref<9x48x48xf32, #tpu.memory_space<vmem>>, vector<1x48x48xf32>
    %219 = vector.shape_cast %218 : vector<1x48x48xf32> to vector<48x48xf32>
    %cst_282 = arith.constant dense<0.000000e+00> : vector<4x48xf32>
    %220 = tpu.matmul %217, %219, %cst_282 {dimension_numbers = #tpu.dot_dimension_numbers<[1], [0], [0], [1], [0, 0, 1, 1], [], []>} : vector<4x48xf32>, vector<48x48xf32>, vector<4x48xf32> -> vector<4x48xf32>
    %221 = arith.addf %215, %220 : vector<4x48xf32>
    %c6_283 = arith.constant 6 : index
    %c4_284 = arith.constant 4 : index
    %c0_285 = arith.constant 0 : index
    %222 = vector.load %arg36[%c6_283, %c4_284, %c0_285] : memref<8x8x48xf32, #tpu.memory_space<vmem>>, vector<1x4x48xf32>
    %223 = vector.shape_cast %222 : vector<1x4x48xf32> to vector<4x48xf32>
    %c8_286 = arith.constant 8 : index
    %c0_287 = arith.constant 0 : index
    %c0_288 = arith.constant 0 : index
    %224 = vector.load %arg22[%c8_286, %c0_287, %c0_288] : memref<9x48x48xf32, #tpu.memory_space<vmem>>, vector<1x48x48xf32>
    %225 = vector.shape_cast %224 : vector<1x48x48xf32> to vector<48x48xf32>
    %cst_289 = arith.constant dense<0.000000e+00> : vector<4x48xf32>
    %226 = tpu.matmul %223, %225, %cst_289 {dimension_numbers = #tpu.dot_dimension_numbers<[1], [0], [0], [1], [0, 0, 1, 1], [], []>} : vector<4x48xf32>, vector<48x48xf32>, vector<4x48xf32> -> vector<4x48xf32>
    %227 = arith.addf %221, %226 : vector<4x48xf32>
    %228 = vector.broadcast %40 : vector<1x48xf32> to vector<4x48xf32>
    %229 = arith.addf %227, %228 : vector<4x48xf32>
    %cst_290 = arith.constant 0.000000e+00 : f32
    %230 = vector.broadcast %cst_290 : f32 to vector<4x48xf32>
    %231 = arith.maximumf %229, %230 : vector<4x48xf32>
    %232 = vector.broadcast %41 : vector<1x48xf32> to vector<4x48xf32>
    %233 = arith.mulf %231, %232 : vector<4x48xf32>
    %cst_291 = arith.constant dense<0.000000e+00> : vector<4xf32>
    %234 = vector.multi_reduction <add>, %233, %cst_291 [1] : vector<4x48xf32> to vector<4xf32>
    %235 = vector.shape_cast %234 : vector<4xf32> to vector<4x1xf32>
    %236 = vector.broadcast %42 : vector<1x1xf32> to vector<4x1xf32>
    %237 = arith.addf %235, %236 : vector<4x1xf32>
    %c0_292 = arith.constant 0 : index
    %c8_293 = arith.constant 8 : index
    %c0_294 = arith.constant 0 : index
    %238 = vector.load %arg26[%c0_292, %c8_293, %c0_294] : memref<1x16x1xf32, #tpu.memory_space<vmem>>, vector<1x4x1xf32>
    %239 = vector.shape_cast %238 : vector<1x4x1xf32> to vector<4x1xf32>
    %240 = vector.shape_cast %237 : vector<4x1xf32> to vector<1x4x1xf32>
    tpu.vector_store %arg26[%c0_292, %c8_293, %c0_294], %240 {strides = array<i32>} : memref<1x16x1xf32, #tpu.memory_space<vmem>>, vector<1x4x1xf32>,
    %c3_295 = arith.constant 3 : index
    %c0_296 = arith.constant 0 : index
    %c0_297 = arith.constant 0 : index
    %241 = vector.load %arg36[%c3_295, %c0_296, %c0_297] : memref<8x8x48xf32, #tpu.memory_space<vmem>>, vector<1x4x48xf32>
    %242 = vector.shape_cast %241 : vector<1x4x48xf32> to vector<4x48xf32>
    %c0_298 = arith.constant 0 : index
    %c0_299 = arith.constant 0 : index
    %c0_300 = arith.constant 0 : index
    %243 = vector.load %arg22[%c0_298, %c0_299, %c0_300] : memref<9x48x48xf32, #tpu.memory_space<vmem>>, vector<1x48x48xf32>
    %244 = vector.shape_cast %243 : vector<1x48x48xf32> to vector<48x48xf32>
    %cst_301 = arith.constant dense<0.000000e+00> : vector<4x48xf32>
    %245 = tpu.matmul %242, %244, %cst_301 {dimension_numbers = #tpu.dot_dimension_numbers<[1], [0], [0], [1], [0, 0, 1, 1], [], []>} : vector<4x48xf32>, vector<48x48xf32>, vector<4x48xf32> -> vector<4x48xf32>
    %c3_302 = arith.constant 3 : index
    %c2_303 = arith.constant 2 : index
    %c0_304 = arith.constant 0 : index
    %246 = vector.load %arg36[%c3_302, %c2_303, %c0_304] : memref<8x8x48xf32, #tpu.memory_space<vmem>>, vector<1x4x48xf32>
    %247 = vector.shape_cast %246 : vector<1x4x48xf32> to vector<4x48xf32>
    %c1_305 = arith.constant 1 : index
    %c0_306 = arith.constant 0 : index
    %c0_307 = arith.constant 0 : index
    %248 = vector.load %arg22[%c1_305, %c0_306, %c0_307] : memref<9x48x48xf32, #tpu.memory_space<vmem>>, vector<1x48x48xf32>
    %249 = vector.shape_cast %248 : vector<1x48x48xf32> to vector<48x48xf32>
    %cst_308 = arith.constant dense<0.000000e+00> : vector<4x48xf32>
    %250 = tpu.matmul %247, %249, %cst_308 {dimension_numbers = #tpu.dot_dimension_numbers<[1], [0], [0], [1], [0, 0, 1, 1], [], []>} : vector<4x48xf32>, vector<48x48xf32>, vector<4x48xf32> -> vector<4x48xf32>
    %251 = arith.addf %245, %250 : vector<4x48xf32>
    %c3_309 = arith.constant 3 : index
    %c4_310 = arith.constant 4 : index
    %c0_311 = arith.constant 0 : index
    %252 = vector.load %arg36[%c3_309, %c4_310, %c0_311] : memref<8x8x48xf32, #tpu.memory_space<vmem>>, vector<1x4x48xf32>
    %253 = vector.shape_cast %252 : vector<1x4x48xf32> to vector<4x48xf32>
    %c2_312 = arith.constant 2 : index
    %c0_313 = arith.constant 0 : index
    %c0_314 = arith.constant 0 : index
    %254 = vector.load %arg22[%c2_312, %c0_313, %c0_314] : memref<9x48x48xf32, #tpu.memory_space<vmem>>, vector<1x48x48xf32>
    %255 = vector.shape_cast %254 : vector<1x48x48xf32> to vector<48x48xf32>
    %cst_315 = arith.constant dense<0.000000e+00> : vector<4x48xf32>
    %256 = tpu.matmul %253, %255, %cst_315 {dimension_numbers = #tpu.dot_dimension_numbers<[1], [0], [0], [1], [0, 0, 1, 1], [], []>} : vector<4x48xf32>, vector<48x48xf32>, vector<4x48xf32> -> vector<4x48xf32>
    %257 = arith.addf %251, %256 : vector<4x48xf32>
    %c5_316 = arith.constant 5 : index
    %c0_317 = arith.constant 0 : index
    %c0_318 = arith.constant 0 : index
    %258 = vector.load %arg36[%c5_316, %c0_317, %c0_318] : memref<8x8x48xf32, #tpu.memory_space<vmem>>, vector<1x4x48xf32>
    %259 = vector.shape_cast %258 : vector<1x4x48xf32> to vector<4x48xf32>
    %c3_319 = arith.constant 3 : index
    %c0_320 = arith.constant 0 : index
    %c0_321 = arith.constant 0 : index
    %260 = vector.load %arg22[%c3_319, %c0_320, %c0_321] : memref<9x48x48xf32, #tpu.memory_space<vmem>>, vector<1x48x48xf32>
    %261 = vector.shape_cast %260 : vector<1x48x48xf32> to vector<48x48xf32>
    %cst_322 = arith.constant dense<0.000000e+00> : vector<4x48xf32>
    %262 = tpu.matmul %259, %261, %cst_322 {dimension_numbers = #tpu.dot_dimension_numbers<[1], [0], [0], [1], [0, 0, 1, 1], [], []>} : vector<4x48xf32>, vector<48x48xf32>, vector<4x48xf32> -> vector<4x48xf32>
    %263 = arith.addf %257, %262 : vector<4x48xf32>
    %c5_323 = arith.constant 5 : index
    %c2_324 = arith.constant 2 : index
    %c0_325 = arith.constant 0 : index
    %264 = vector.load %arg36[%c5_323, %c2_324, %c0_325] : memref<8x8x48xf32, #tpu.memory_space<vmem>>, vector<1x4x48xf32>
    %265 = vector.shape_cast %264 : vector<1x4x48xf32> to vector<4x48xf32>
    %c4_326 = arith.constant 4 : index
    %c0_327 = arith.constant 0 : index
    %c0_328 = arith.constant 0 : index
    %266 = vector.load %arg22[%c4_326, %c0_327, %c0_328] : memref<9x48x48xf32, #tpu.memory_space<vmem>>, vector<1x48x48xf32>
    %267 = vector.shape_cast %266 : vector<1x48x48xf32> to vector<48x48xf32>
    %cst_329 = arith.constant dense<0.000000e+00> : vector<4x48xf32>
    %268 = tpu.matmul %265, %267, %cst_329 {dimension_numbers = #tpu.dot_dimension_numbers<[1], [0], [0], [1], [0, 0, 1, 1], [], []>} : vector<4x48xf32>, vector<48x48xf32>, vector<4x48xf32> -> vector<4x48xf32>
    %269 = arith.addf %263, %268 : vector<4x48xf32>
    %c5_330 = arith.constant 5 : index
    %c4_331 = arith.constant 4 : index
    %c0_332 = arith.constant 0 : index
    %270 = vector.load %arg36[%c5_330, %c4_331, %c0_332] : memref<8x8x48xf32, #tpu.memory_space<vmem>>, vector<1x4x48xf32>
    %271 = vector.shape_cast %270 : vector<1x4x48xf32> to vector<4x48xf32>
    %c5_333 = arith.constant 5 : index
    %c0_334 = arith.constant 0 : index
    %c0_335 = arith.constant 0 : index
    %272 = vector.load %arg22[%c5_333, %c0_334, %c0_335] : memref<9x48x48xf32, #tpu.memory_space<vmem>>, vector<1x48x48xf32>
    %273 = vector.shape_cast %272 : vector<1x48x48xf32> to vector<48x48xf32>
    %cst_336 = arith.constant dense<0.000000e+00> : vector<4x48xf32>
    %274 = tpu.matmul %271, %273, %cst_336 {dimension_numbers = #tpu.dot_dimension_numbers<[1], [0], [0], [1], [0, 0, 1, 1], [], []>} : vector<4x48xf32>, vector<48x48xf32>, vector<4x48xf32> -> vector<4x48xf32>
    %275 = arith.addf %269, %274 : vector<4x48xf32>
    %c7_337 = arith.constant 7 : index
    %c0_338 = arith.constant 0 : index
    %c0_339 = arith.constant 0 : index
    %276 = vector.load %arg36[%c7_337, %c0_338, %c0_339] : memref<8x8x48xf32, #tpu.memory_space<vmem>>, vector<1x4x48xf32>
    %277 = vector.shape_cast %276 : vector<1x4x48xf32> to vector<4x48xf32>
    %c6_340 = arith.constant 6 : index
    %c0_341 = arith.constant 0 : index
    %c0_342 = arith.constant 0 : index
    %278 = vector.load %arg22[%c6_340, %c0_341, %c0_342] : memref<9x48x48xf32, #tpu.memory_space<vmem>>, vector<1x48x48xf32>
    %279 = vector.shape_cast %278 : vector<1x48x48xf32> to vector<48x48xf32>
    %cst_343 = arith.constant dense<0.000000e+00> : vector<4x48xf32>
    %280 = tpu.matmul %277, %279, %cst_343 {dimension_numbers = #tpu.dot_dimension_numbers<[1], [0], [0], [1], [0, 0, 1, 1], [], []>} : vector<4x48xf32>, vector<48x48xf32>, vector<4x48xf32> -> vector<4x48xf32>
    %281 = arith.addf %275, %280 : vector<4x48xf32>
    %c7_344 = arith.constant 7 : index
    %c2_345 = arith.constant 2 : index
    %c0_346 = arith.constant 0 : index
    %282 = vector.load %arg36[%c7_344, %c2_345, %c0_346] : memref<8x8x48xf32, #tpu.memory_space<vmem>>, vector<1x4x48xf32>
    %283 = vector.shape_cast %282 : vector<1x4x48xf32> to vector<4x48xf32>
    %c7_347 = arith.constant 7 : index
    %c0_348 = arith.constant 0 : index
    %c0_349 = arith.constant 0 : index
    %284 = vector.load %arg22[%c7_347, %c0_348, %c0_349] : memref<9x48x48xf32, #tpu.memory_space<vmem>>, vector<1x48x48xf32>
    %285 = vector.shape_cast %284 : vector<1x48x48xf32> to vector<48x48xf32>
    %cst_350 = arith.constant dense<0.000000e+00> : vector<4x48xf32>
    %286 = tpu.matmul %283, %285, %cst_350 {dimension_numbers = #tpu.dot_dimension_numbers<[1], [0], [0], [1], [0, 0, 1, 1], [], []>} : vector<4x48xf32>, vector<48x48xf32>, vector<4x48xf32> -> vector<4x48xf32>
    %287 = arith.addf %281, %286 : vector<4x48xf32>
    %c7_351 = arith.constant 7 : index
    %c4_352 = arith.constant 4 : index
    %c0_353 = arith.constant 0 : index
    %288 = vector.load %arg36[%c7_351, %c4_352, %c0_353] : memref<8x8x48xf32, #tpu.memory_space<vmem>>, vector<1x4x48xf32>
    %289 = vector.shape_cast %288 : vector<1x4x48xf32> to vector<4x48xf32>
    %c8_354 = arith.constant 8 : index
    %c0_355 = arith.constant 0 : index
    %c0_356 = arith.constant 0 : index
    %290 = vector.load %arg22[%c8_354, %c0_355, %c0_356] : memref<9x48x48xf32, #tpu.memory_space<vmem>>, vector<1x48x48xf32>
    %291 = vector.shape_cast %290 : vector<1x48x48xf32> to vector<48x48xf32>
    %cst_357 = arith.constant dense<0.000000e+00> : vector<4x48xf32>
    %292 = tpu.matmul %289, %291, %cst_357 {dimension_numbers = #tpu.dot_dimension_numbers<[1], [0], [0], [1], [0, 0, 1, 1], [], []>} : vector<4x48xf32>, vector<48x48xf32>, vector<4x48xf32> -> vector<4x48xf32>
    %293 = arith.addf %287, %292 : vector<4x48xf32>
    %294 = vector.broadcast %40 : vector<1x48xf32> to vector<4x48xf32>
    %295 = arith.addf %293, %294 : vector<4x48xf32>
    %cst_358 = arith.constant 0.000000e+00 : f32
    %296 = vector.broadcast %cst_358 : f32 to vector<4x48xf32>
    %297 = arith.maximumf %295, %296 : vector<4x48xf32>
    %298 = vector.broadcast %41 : vector<1x48xf32> to vector<4x48xf32>
    %299 = arith.mulf %297, %298 : vector<4x48xf32>
    %cst_359 = arith.constant dense<0.000000e+00> : vector<4xf32>
    %300 = vector.multi_reduction <add>, %299, %cst_359 [1] : vector<4x48xf32> to vector<4xf32>
    %301 = vector.shape_cast %300 : vector<4xf32> to vector<4x1xf32>
    %302 = vector.broadcast %42 : vector<1x1xf32> to vector<4x1xf32>
    %303 = arith.addf %301, %302 : vector<4x1xf32>
    %c0_360 = arith.constant 0 : index
    %c12 = arith.constant 12 : index
    %c0_361 = arith.constant 0 : index
    %304 = vector.load %arg26[%c0_360, %c12, %c0_361] : memref<1x16x1xf32, #tpu.memory_space<vmem>>, vector<1x4x1xf32>
    %305 = vector.shape_cast %304 : vector<1x4x1xf32> to vector<4x1xf32>
    %306 = vector.shape_cast %303 : vector<4x1xf32> to vector<1x4x1xf32>
    tpu.vector_store %arg26[%c0_360, %c12, %c0_361], %306 {strides = array<i32>} : memref<1x16x1xf32, #tpu.memory_space<vmem>>, vector<1x4x1xf32>,
    return
  }
  func.func @transform_0(%arg0: i32) -> (i32, i32, i32, i32) {
    %c0_i32 = arith.constant 0 : i32
    %c0_i32_0 = arith.constant 0 : i32
    %c0_i32_1 = arith.constant 0 : i32
    %c0_i32_2 = arith.constant 0 : i32
    return %arg0, %c0_i32, %c0_i32_0, %c0_i32_1 : i32, i32, i32, i32
  }
  func.func @transform_1(%arg0: i32) -> (i32, i32, i32) {
    %c0_i32 = arith.constant 0 : i32
    %c0_i32_0 = arith.constant 0 : i32
    %c0_i32_1 = arith.constant 0 : i32
    %c0_i32_2 = arith.constant 0 : i32
    return %c0_i32, %c0_i32_0, %c0_i32_1 : i32, i32, i32
  }
  func.func @transform_2(%arg0: i32) -> (i32, i32) {
    %c0_i32 = arith.constant 0 : i32
    %c0_i32_0 = arith.constant 0 : i32
    %c0_i32_1 = arith.constant 0 : i32
    return %c0_i32, %c0_i32_0 : i32, i32
  }
  func.func @transform_3(%arg0: i32) -> (i32, i32, i32) {
    %c0_i32 = arith.constant 0 : i32
    %c0_i32_0 = arith.constant 0 : i32
    %c0_i32_1 = arith.constant 0 : i32
    %c0_i32_2 = arith.constant 0 : i32
    return %c0_i32, %c0_i32_0, %c0_i32_1 : i32, i32, i32
  }
  func.func @transform_4(%arg0: i32) -> (i32, i32) {
    %c0_i32 = arith.constant 0 : i32
    %c0_i32_0 = arith.constant 0 : i32
    %c0_i32_1 = arith.constant 0 : i32
    return %c0_i32, %c0_i32_0 : i32, i32
  }
  func.func @transform_5(%arg0: i32) -> (i32, i32, i32) {
    %c0_i32 = arith.constant 0 : i32
    %c0_i32_0 = arith.constant 0 : i32
    %c0_i32_1 = arith.constant 0 : i32
    %c0_i32_2 = arith.constant 0 : i32
    return %c0_i32, %c0_i32_0, %c0_i32_1 : i32, i32, i32
  }
  func.func @transform_6(%arg0: i32) -> (i32, i32) {
    %c0_i32 = arith.constant 0 : i32
    %c0_i32_0 = arith.constant 0 : i32
    %c0_i32_1 = arith.constant 0 : i32
    return %c0_i32, %c0_i32_0 : i32, i32
  }
  func.func @transform_7(%arg0: i32) -> (i32, i32, i32) {
    %c0_i32 = arith.constant 0 : i32
    %c0_i32_0 = arith.constant 0 : i32
    %c0_i32_1 = arith.constant 0 : i32
    %c0_i32_2 = arith.constant 0 : i32
    return %c0_i32, %c0_i32_0, %c0_i32_1 : i32, i32, i32
  }
  func.func @transform_8(%arg0: i32) -> (i32, i32) {
    %c0_i32 = arith.constant 0 : i32
    %c0_i32_0 = arith.constant 0 : i32
    %c0_i32_1 = arith.constant 0 : i32
    return %c0_i32, %c0_i32_0 : i32, i32
  }
  func.func @transform_9(%arg0: i32) -> (i32, i32, i32) {
    %c0_i32 = arith.constant 0 : i32
    %c0_i32_0 = arith.constant 0 : i32
    %c0_i32_1 = arith.constant 0 : i32
    %c0_i32_2 = arith.constant 0 : i32
    return %c0_i32, %c0_i32_0, %c0_i32_1 : i32, i32, i32
  }
  func.func @transform_10(%arg0: i32) -> (i32, i32) {
    %c0_i32 = arith.constant 0 : i32
    %c0_i32_0 = arith.constant 0 : i32
    %c0_i32_1 = arith.constant 0 : i32
    return %c0_i32, %c0_i32_0 : i32, i32
  }
  func.func @transform_11(%arg0: i32) -> (i32, i32, i32) {
    %c0_i32 = arith.constant 0 : i32
    %c0_i32_0 = arith.constant 0 : i32
    %c0_i32_1 = arith.constant 0 : i32
    %c0_i32_2 = arith.constant 0 : i32
    return %c0_i32, %c0_i32_0, %c0_i32_1 : i32, i32, i32
  }
  func.func @transform_12(%arg0: i32) -> (i32, i32) {
    %c0_i32 = arith.constant 0 : i32
    %c0_i32_0 = arith.constant 0 : i32
    %c0_i32_1 = arith.constant 0 : i32
    return %c0_i32, %c0_i32_0 : i32, i32
  }
  func.func @transform_13(%arg0: i32) -> (i32, i32, i32) {
    %c0_i32 = arith.constant 0 : i32
    %c0_i32_0 = arith.constant 0 : i32
    %c0_i32_1 = arith.constant 0 : i32
    %c0_i32_2 = arith.constant 0 : i32
    return %c0_i32, %c0_i32_0, %c0_i32_1 : i32, i32, i32
  }
  func.func @transform_14(%arg0: i32) -> (i32, i32) {
    %c0_i32 = arith.constant 0 : i32
    %c0_i32_0 = arith.constant 0 : i32
    %c0_i32_1 = arith.constant 0 : i32
    return %c0_i32, %c0_i32_0 : i32, i32
  }
  func.func @transform_15(%arg0: i32) -> (i32, i32, i32) {
    %c0_i32 = arith.constant 0 : i32
    %c0_i32_0 = arith.constant 0 : i32
    %c0_i32_1 = arith.constant 0 : i32
    %c0_i32_2 = arith.constant 0 : i32
    return %c0_i32, %c0_i32_0, %c0_i32_1 : i32, i32, i32
  }
  func.func @transform_16(%arg0: i32) -> (i32, i32) {
    %c0_i32 = arith.constant 0 : i32
    %c0_i32_0 = arith.constant 0 : i32
    %c0_i32_1 = arith.constant 0 : i32
    return %c0_i32, %c0_i32_0 : i32, i32
  }
  func.func @transform_17(%arg0: i32) -> (i32, i32, i32) {
    %c0_i32 = arith.constant 0 : i32
    %c0_i32_0 = arith.constant 0 : i32
    %c0_i32_1 = arith.constant 0 : i32
    %c0_i32_2 = arith.constant 0 : i32
    return %c0_i32, %c0_i32_0, %c0_i32_1 : i32, i32, i32
  }
  func.func @transform_18(%arg0: i32) -> (i32, i32) {
    %c0_i32 = arith.constant 0 : i32
    %c0_i32_0 = arith.constant 0 : i32
    %c0_i32_1 = arith.constant 0 : i32
    return %c0_i32, %c0_i32_0 : i32, i32
  }
  func.func @transform_19(%arg0: i32) -> (i32, i32, i32) {
    %c0_i32 = arith.constant 0 : i32
    %c0_i32_0 = arith.constant 0 : i32
    %c0_i32_1 = arith.constant 0 : i32
    %c0_i32_2 = arith.constant 0 : i32
    return %c0_i32, %c0_i32_0, %c0_i32_1 : i32, i32, i32
  }
  func.func @transform_20(%arg0: i32) -> (i32, i32) {
    %c0_i32 = arith.constant 0 : i32
    %c0_i32_0 = arith.constant 0 : i32
    %c0_i32_1 = arith.constant 0 : i32
    return %c0_i32, %c0_i32_0 : i32, i32
  }
  func.func @transform_21(%arg0: i32) -> (i32, i32, i32) {
    %c0_i32 = arith.constant 0 : i32
    %c0_i32_0 = arith.constant 0 : i32
    %c0_i32_1 = arith.constant 0 : i32
    %c0_i32_2 = arith.constant 0 : i32
    return %c0_i32, %c0_i32_0, %c0_i32_1 : i32, i32, i32
  }
  func.func @transform_22(%arg0: i32) -> (i32, i32) {
    %c0_i32 = arith.constant 0 : i32
    %c0_i32_0 = arith.constant 0 : i32
    %c0_i32_1 = arith.constant 0 : i32
    return %c0_i32, %c0_i32_0 : i32, i32
  }
  func.func @transform_23(%arg0: i32) -> (i32, i32) {
    %c0_i32 = arith.constant 0 : i32
    %c0_i32_0 = arith.constant 0 : i32
    %c0_i32_1 = arith.constant 0 : i32
    return %c0_i32, %c0_i32_0 : i32, i32
  }
  func.func @transform_24(%arg0: i32) -> (i32, i32) {
    %c0_i32 = arith.constant 0 : i32
    %c0_i32_0 = arith.constant 0 : i32
    %c0_i32_1 = arith.constant 0 : i32
    return %c0_i32, %c0_i32_0 : i32, i32
  }
  func.func @transform_25(%arg0: i32) -> (i32, i32, i32) {
    %c0_i32 = arith.constant 0 : i32
    %c0_i32_0 = arith.constant 0 : i32
    %c0_i32_1 = arith.constant 0 : i32
    return %arg0, %c0_i32, %c0_i32_0 : i32, i32, i32
  }
}

</mosaic_0001>

<bundles_post_ra>
// kernel: repvgg_csrnet_forward.1
= control target key start
LH: loop header
LB: loop body
LE: loop exit
PB: predicated region body
PF: predicated region fallthrough
CT: control target
= control target key end

     0   :  { %s10561_s0 = inlined_call_operand.vmem [shape: f32[2,34,34,3], index: 0, kind: input, shape index: {}]   ;;  %s10562_s1 = inlined_call_operand.vmem [shape: f32[9,3,16], index: 1, kind: input, shape index: {}]   ;;  %s10563_s2 = inlined_call_operand.vmem [shape: f32[1,16], index: 2, kind: input, shape index: {}]   ;;  %s10564_s3 = inlined_call_operand.vmem [shape: f32[9,16,16], index: 3, kind: input, shape index: {}]   ;;  %s10565_s4 = inlined_call_operand.vmem [shape: f32[1,16], index: 4, kind: input, shape index: {}]   ;;  %s10566_s5 = inlined_call_operand.vmem [shape: f32[9,16,16], index: 5, kind: input, shape index: {}]   ;;  %s10567_s6 = inlined_call_operand.vmem [shape: f32[1,16], index: 6, kind: input, shape index: {}]   ;;  %s10568_s7 = inlined_call_operand.vmem [shape: f32[9,16,32], index: 7, kind: input, shape index: {}]   ;;  %s10569_s8 = inlined_call_operand.vmem [shape: f32[1,32], index: 8, kind: input, shape index: {}]   ;;  %s10570_s9 = inlined_call_operand.vmem [shape: f32[9,32,32], index: 9, kind: input, shape index: {}]   ;;  %s10571_s10 = inlined_call_operand.vmem [shape: f32[1,32], index: 10, kind: input, shape index: {}]   ;;  %s10572_s11 = inlined_call_operand.vmem [shape: f32[9,32,48], index: 11, kind: input, shape index: {}]   ;;  %s10573_s12 = inlined_call_operand.vmem [shape: f32[1,48], index: 12, kind: input, shape index: {}]   ;;  %s10574_s13 = inlined_call_operand.vmem [shape: f32[9,48,48], index: 13, kind: input, shape index: {}]   ;;  %s10575_s14 = inlined_call_operand.vmem [shape: f32[1,48], index: 14, kind: input, shape index: {}]   ;;  %s10576_s15 = inlined_call_operand.vmem [shape: f32[9,48,192], index: 15, kind: input, shape index: {}]   ;;  %s10577_s16 = inlined_call_operand.vmem [shape: f32[1,192], index: 16, kind: input, shape index: {}]   ;;  %s10578_s17 = inlined_call_operand.vmem [shape: f32[9,192,96], index: 17, kind: input, shape index: {}]   ;;  %s10579_s18 = inlined_call_operand.vmem [shape: f32[1,96], index: 18, kind: input, shape index: {}]   ;;  %s10580_s19 = inlined_call_operand.vmem [shape: f32[9,96,48], index: 19, kind: input, shape index: {}]   ;;  %s10581_s20 = inlined_call_operand.vmem [shape: f32[1,48], index: 20, kind: input, shape index: {}]   ;;  %s10582_s21 = inlined_call_operand.vmem [shape: f32[9,48,48], index: 21, kind: input, shape index: {}]   ;;  %s10583_s22 = inlined_call_operand.vmem [shape: f32[1,48], index: 22, kind: input, shape index: {}]   ;;  %s10584_s23 = inlined_call_operand.vmem [shape: f32[1,48], index: 23, kind: input, shape index: {}]   ;;  %s10585_s24 = inlined_call_operand.<no memory space> [shape: f32[1,1], index: 24, kind: input, shape index: {}]   ;;  %s10586_s25 = inlined_call_operand.vmem [shape: f32[2,16,1], index: 25, kind: output, shape index: {}]  }
   0x1   :  { %10596 = sst [smem:[#allocation13_spill]] %s10561_s0  ;;  %v30_v0 = vstv %s10585_s24 }
   0x2   :  { %10597 = sst [smem:[#allocation14_spill]] %s10562_s1  ;;  %31 = vst [vmem:[#allocation12] sm:$0x1] %v30_v0 }
   0x3   :  { %10598 = sst [smem:[#allocation15_spill]] %s10563_s2 }
   0x4   :  { %10599 = sst [smem:[#allocation16_spill]] %s10564_s3 }
   0x5   :  { %10600 = sst [smem:[#allocation17_spill]] %s10565_s4 }
   0x6   :  { %10601 = sst [smem:[#allocation18_spill]] %s10566_s5 }
   0x7   :  { %10602 = sst [smem:[#allocation19_spill]] %s10567_s6  ;;  %s7419_s6 = smov 0  }
   0x8   :  { %10603 = sst [smem:[#allocation20_spill]] %s10568_s7 }
   0x9   :  { %10604 = sst [smem:[#allocation21_spill]] %s10569_s8 }
   0xa   :  { %10605 = sst [smem:[#allocation22_spill]] %s10570_s9 }
   0xb   :  { %10606 = sst [smem:[#allocation23_spill]] %s10586_s25 }
   0xc LB: > { %s6049_s30 = sadd.s32 4294967295, %s7243_s6   ;;  %p6053_p0 = scmp.ge.s32.totalorder %s7243_s6, 1  ;;  %s7243_s6 = sphi %s7419_s6, %s37_s6  }
   0xd   : > { %p689_p1 = scmp.lt.s32.totalorder %s7243_s6, 3 }
   0xf   : > { %p690_p2 = pnand %p6053_p0, %p689_p1 }
  0x10   : > { %p757_p3 = scmp.lt.s32.totalorder (!%p690_p2), %s6049_s30, 1  ;;  %s10607_s25 = sld [smem:[#allocation23_spill]] (!%p690_p2) }
  0x11   : > { %693 = sbr.rel (%p690_p2) target bundleno = 2384 (0x950), region = 120  ;;  %s10608_s4 = sld [smem:[#allocation13_spill]] (!%p690_p2) }
  0x12   : > { %s10609_s0 = sld [smem:[#allocation15_spill]] (!%p690_p2)  ;;  %s7720_s29 = smov (!%p690_p2), 0  }
  0x16   : > { %vm767_vm0 = vcmask 130048   ;;  %v7285_v1 = vmov 0.0   ;;  %s10621_s30 = smov (!%p757_p3, %s6049_s30), 1  ;;  %vm770_vm1 = vcmask 123904   ;;  %vm863_vm2 = vcmask 259072  }
  0x17   : > { %768 = vst.msk [vmem:[#allocation2] sm:$0xff] %vm767_vm0, %v7285_v1  ;;  %s7104_s24 = smul.u32 1360, %s10621_s30  ;;  %s7098_s7 = sshll.u32 %s10621_s30, 4  ;;  %vm876_vm3 = vcmask 390144   ;;  %vm883_vm4 = vcmask 392192   ;;  %vm893_vm5 = vcmask 523264  }
  0x18   : > { %769 = vst.msk [vmem:[#allocation2 + $0x8] sm:$0xff] %vm767_vm0, %v7285_v1  ;;  %s7438_s1 = scalar_lea.vmem %s10607_s25, %s7098_s7  ;;  %v7504_v2 = vld [vmem:[%s10609_s0] sm:$0x1]  ;;  %vm909_vm6 = vcmask 785408  }
  0x19   : > { %772 = vst.msk [vmem:[#allocation2 + $0x18] sm:$0xff] %vm767_vm0, %v7285_v1  ;;  %s7445_s28 = scalar_lea.vmem %s10608_s4, %s7104_s24 }
  0x1a   : > { %773 = vst.msk [vmem:[#allocation2 + $0x20] sm:$0xff] %vm767_vm0, %v7285_v1 }
  0x1b   : > { %775 = vst.msk [vmem:[#allocation2 + $0x30] sm:$0xff] %vm767_vm0, %v7285_v1 }
  0x1c   : > { %776 = vst.msk [vmem:[#allocation2 + $0x38] sm:$0xff] %vm767_vm0, %v7285_v1 }
  0x1d   : > { %778 = vst.msk [vmem:[#allocation2 + $0x48] sm:$0xff] %vm767_vm0, %v7285_v1 }
  0x1e   : > { %779 = vst.msk [vmem:[#allocation2 + $0x50] sm:$0xff] %vm767_vm0, %v7285_v1 }
  0x1f   : > { %781 = vst.msk [vmem:[#allocation2 + $0x60] sm:$0xff] %vm767_vm0, %v7285_v1 }
  0x20   : > { %782 = vst.msk [vmem:[#allocation2 + $0x68] sm:$0xff] %vm767_vm0, %v7285_v1 }
  0x21   : > { %784 = vst.msk [vmem:[#allocation2 + $0x78] sm:$0xff] %vm767_vm0, %v7285_v1 }
  0x22   : > { %785 = vst.msk [vmem:[#allocation2 + $0x80] sm:$0xff] %vm767_vm0, %v7285_v1 }
  0x23   : > { %787 = vst.msk [vmem:[#allocation2 + $0x90] sm:$0xff] %vm767_vm0, %v7285_v1 }
  0x24   : > { %788 = vst.msk [vmem:[#allocation2 + $0x98] sm:$0xff] %vm767_vm0, %v7285_v1 }
  0x25   : > { %790 = vst.msk [vmem:[#allocation2 + $0xa8] sm:$0xff] %vm767_vm0, %v7285_v1 }
  0x26   : > { %791 = vst.msk [vmem:[#allocation2 + $0xb0] sm:$0xff] %vm767_vm0, %v7285_v1 }
  0x27   : > { %793 = vst.msk [vmem:[#allocation2 + $0xc0] sm:$0xff] %vm767_vm0, %v7285_v1 }
  0x28   : > { %794 = vst.msk [vmem:[#allocation2 + $0xc8] sm:$0xff] %vm767_vm0, %v7285_v1 }
  0x29   : > { %796 = vst.msk [vmem:[#allocation2 + $0xd8] sm:$0xff] %vm767_vm0, %v7285_v1 }
  0x2a   : > { %797 = vst.msk [vmem:[#allocation2 + $0xe0] sm:$0xff] %vm767_vm0, %v7285_v1 }
  0x2b   : > { %799 = vst.msk [vmem:[#allocation2 + $0xf0] sm:$0xff] %vm767_vm0, %v7285_v1 }
  0x2c   : > { %800 = vst.msk [vmem:[#allocation2 + $0xf8] sm:$0xff] %vm767_vm0, %v7285_v1 }
  0x2d   : > { %802 = vst.msk [vmem:[#allocation2 + $0x108] sm:$0xff] %vm767_vm0, %v7285_v1 }
  0x2e   : > { %803 = vst.msk [vmem:[#allocation2 + $0x110] sm:$0xff] %vm767_vm0, %v7285_v1 }
  0x2f   : > { %805 = vst.msk [vmem:[#allocation2 + $0x120] sm:$0xff] %vm767_vm0, %v7285_v1 }
  0x30   : > { %806 = vst.msk [vmem:[#allocation2 + $0x128] sm:$0xff] %vm767_vm0, %v7285_v1 }
  0x31   : > { %808 = vst.msk [vmem:[#allocation2 + $0x138] sm:$0xff] %vm767_vm0, %v7285_v1 }
  0x32   : > { %809 = vst.msk [vmem:[#allocation2 + $0x140] sm:$0xff] %vm767_vm0, %v7285_v1 }
  0x33   : > { %811 = vst.msk [vmem:[#allocation2 + $0x150] sm:$0xff] %vm767_vm0, %v7285_v1 }
  0x34   : > { %812 = vst.msk [vmem:[#allocation2 + $0x158] sm:$0xff] %vm767_vm0, %v7285_v1 }
  0x35   : > { %814 = vst.msk [vmem:[#allocation2 + $0x168] sm:$0xff] %vm767_vm0, %v7285_v1 }
  0x36   : > { %815 = vst.msk [vmem:[#allocation2 + $0x170] sm:$0xff] %vm767_vm0, %v7285_v1 }
  0x37   : > { %817 = vst.msk [vmem:[#allocation2 + $0x180] sm:$0xff] %vm767_vm0, %v7285_v1 }
  0x38   : > { %818 = vst.msk [vmem:[#allocation2 + $0x188] sm:$0xff] %vm767_vm0, %v7285_v1 }
  0x39   : > { %820 = vst.msk [vmem:[#allocation2 + $0x198] sm:$0xff] %vm767_vm0, %v7285_v1 }
  0x3a   : > { %821 = vst.msk [vmem:[#allocation2 + $0x1a0] sm:$0xff] %vm767_vm0, %v7285_v1 }
  0x3b   : > { %823 = vst.msk [vmem:[#allocation3] sm:$0xff] %vm767_vm0, %v7285_v1 }
  0x3c   : > { %825 = vst.msk [vmem:[#allocation3 + $0x10] sm:$0xff] %vm767_vm0, %v7285_v1 }
  0x3d   : > { %827 = vst.msk [vmem:[#allocation3 + $0x20] sm:$0xff] %vm767_vm0, %v7285_v1 }
  0x3e   : > { %829 = vst.msk [vmem:[#allocation3 + $0x30] sm:$0xff] %vm767_vm0, %v7285_v1 }
  0x3f   : > { %831 = vst.msk [vmem:[#allocation3 + $0x40] sm:$0xff] %vm767_vm0, %v7285_v1 }
  0x40   : > { %833 = vst.msk [vmem:[#allocation3 + $0x50] sm:$0xff] %vm767_vm0, %v7285_v1 }
  0x41   : > { %835 = vst.msk [vmem:[#allocation3 + $0x60] sm:$0xff] %vm767_vm0, %v7285_v1 }
  0x42   : > { %837 = vst.msk [vmem:[#allocation3 + $0x70] sm:$0xff] %vm767_vm0, %v7285_v1 }
  0x43   : > { %839 = vst.msk [vmem:[#allocation3 + $0x80] sm:$0xff] %vm767_vm0, %v7285_v1 }
  0x44   : > { %841 = vst.msk [vmem:[#allocation3 + $0x90] sm:$0xff] %vm767_vm0, %v7285_v1 }
  0x45   : > { %843 = vst.msk [vmem:[#allocation4] sm:$0xff] %vm767_vm0, %v7285_v1 }
  0x46   : > { %845 = vst.msk [vmem:[#allocation4 + $0x10] sm:$0xff] %vm767_vm0, %v7285_v1 }
  0x47   : > { %847 = vst.msk [vmem:[#allocation4 + $0x20] sm:$0xff] %vm767_vm0, %v7285_v1 }
  0x48   : > { %849 = vst.msk [vmem:[#allocation4 + $0x30] sm:$0xff] %vm767_vm0, %v7285_v1 }
  0x49   : > { %851 = vst.msk [vmem:[#allocation4 + $0x40] sm:$0xff] %vm767_vm0, %v7285_v1 }
  0x4a   : > { %853 = vst.msk [vmem:[#allocation4 + $0x50] sm:$0xff] %vm767_vm0, %v7285_v1 }
  0x4b   : > { %855 = vst.msk [vmem:[#allocation4 + $0x60] sm:$0xff] %vm767_vm0, %v7285_v1 }
  0x4c   : > { %857 = vst.msk [vmem:[#allocation4 + $0x70] sm:$0xff] %vm767_vm0, %v7285_v1 }
  0x4d   : > { %859 = vst.msk [vmem:[#allocation4 + $0x80] sm:$0xff] %vm767_vm0, %v7285_v1 }
  0x4e   : > { %861 = vst.msk [vmem:[#allocation4 + $0x90] sm:$0xff] %vm767_vm0, %v7285_v1 }
  0x4f   : > { %892 = vst [vmem:[#allocation9] sm:$0xff] %v7285_v1 }
  0x50   : > { %895 = vst [vmem:[#allocation9 + $0x10] sm:$0xff] %v7285_v1 }
  0x51   : > { %897 = vst [vmem:[#allocation9 + $0x20] sm:$0xff] %v7285_v1 }
  0x52   : > { %899 = vst [vmem:[#allocation9 + $0x30] sm:$0xff] %v7285_v1 }
  0x53   : > { %901 = vst [vmem:[#allocation9 + $0x40] sm:$0xff] %v7285_v1 }
  0x54   : > { %903 = vst [vmem:[#allocation9 + $0x50] sm:$0xff] %v7285_v1 }
  0x55   : > { %905 = vst [vmem:[#allocation9 + $0x60] sm:$0xff] %v7285_v1 }
  0x56   : > { %907 = vst [vmem:[#allocation9 + $0x70] sm:$0xff] %v7285_v1 }
  0x57   : > { %771 = vst.msk [vmem:[#allocation2 + $0x10] sm:$0x3] %vm770_vm1, %v7285_v1 }
  0x58   : > { %774 = vst.msk [vmem:[#allocation2 + $0x28] sm:$0x3] %vm770_vm1, %v7285_v1 }
  0x59   : > { %777 = vst.msk [vmem:[#allocation2 + $0x40] sm:$0x3] %vm770_vm1, %v7285_v1 }
  0x5a   : > { %780 = vst.msk [vmem:[#allocation2 + $0x58] sm:$0x3] %vm770_vm1, %v7285_v1 }
  0x5b   : > { %783 = vst.msk [vmem:[#allocation2 + $0x70] sm:$0x3] %vm770_vm1, %v7285_v1 }
  0x5c   : > { %786 = vst.msk [vmem:[#allocation2 + $0x88] sm:$0x3] %vm770_vm1, %v7285_v1 }
  0x5d   : > { %789 = vst.msk [vmem:[#allocation2 + $0xa0] sm:$0x3] %vm770_vm1, %v7285_v1 }
  0x5e   : > { %792 = vst.msk [vmem:[#allocation2 + $0xb8] sm:$0x3] %vm770_vm1, %v7285_v1 }
  0x5f   : > { %795 = vst.msk [vmem:[#allocation2 + $0xd0] sm:$0x3] %vm770_vm1, %v7285_v1 }
  0x60   : > { %798 = vst.msk [vmem:[#allocation2 + $0xe8] sm:$0x3] %vm770_vm1, %v7285_v1 }
  0x61   : > { %801 = vst.msk [vmem:[#allocation2 + $0x100] sm:$0x3] %vm770_vm1, %v7285_v1 }
  0x62   : > { %804 = vst.msk [vmem:[#allocation2 + $0x118] sm:$0x3] %vm770_vm1, %v7285_v1 }
  0x63   : > { %807 = vst.msk [vmem:[#allocation2 + $0x130] sm:$0x3] %vm770_vm1, %v7285_v1 }
  0x64   : > { %810 = vst.msk [vmem:[#allocation2 + $0x148] sm:$0x3] %vm770_vm1, %v7285_v1 }
  0x65   : > { %813 = vst.msk [vmem:[#allocation2 + $0x160] sm:$0x3] %vm770_vm1, %v7285_v1 }
  0x66   : > { %816 = vst.msk [vmem:[#allocation2 + $0x178] sm:$0x3] %vm770_vm1, %v7285_v1 }
  0x67   : > { %819 = vst.msk [vmem:[#allocation2 + $0x190] sm:$0x3] %vm770_vm1, %v7285_v1 }
  0x68   : > { %822 = vst.msk [vmem:[#allocation2 + $0x1a8] sm:$0x3] %vm770_vm1, %v7285_v1 }
  0x69   : > { %824 = vst.msk [vmem:[#allocation3 + $0x8] sm:$0x3] %vm770_vm1, %v7285_v1 }
  0x6a   : > { %826 = vst.msk [vmem:[#allocation3 + $0x18] sm:$0x3] %vm770_vm1, %v7285_v1 }
  0x6b   : > { %828 = vst.msk [vmem:[#allocation3 + $0x28] sm:$0x3] %vm770_vm1, %v7285_v1 }
  0x6c   : > { %830 = vst.msk [vmem:[#allocation3 + $0x38] sm:$0x3] %vm770_vm1, %v7285_v1 }
  0x6d   : > { %832 = vst.msk [vmem:[#allocation3 + $0x48] sm:$0x3] %vm770_vm1, %v7285_v1 }
  0x6e   : > { %834 = vst.msk [vmem:[#allocation3 + $0x58] sm:$0x3] %vm770_vm1, %v7285_v1 }
  0x6f   : > { %836 = vst.msk [vmem:[#allocation3 + $0x68] sm:$0x3] %vm770_vm1, %v7285_v1 }
  0x70   : > { %838 = vst.msk [vmem:[#allocation3 + $0x78] sm:$0x3] %vm770_vm1, %v7285_v1 }
  0x71   : > { %840 = vst.msk [vmem:[#allocation3 + $0x88] sm:$0x3] %vm770_vm1, %v7285_v1 }
  0x72   : > { %842 = vst.msk [vmem:[#allocation3 + $0x98] sm:$0x3] %vm770_vm1, %v7285_v1 }
  0x73   : > { %844 = vst.msk [vmem:[#allocation4 + $0x8] sm:$0x3] %vm770_vm1, %v7285_v1 }
  0x74   : > { %846 = vst.msk [vmem:[#allocation4 + $0x18] sm:$0x3] %vm770_vm1, %v7285_v1 }
  0x75   : > { %848 = vst.msk [vmem:[#allocation4 + $0x28] sm:$0x3] %vm770_vm1, %v7285_v1 }
  0x76   : > { %850 = vst.msk [vmem:[#allocation4 + $0x38] sm:$0x3] %vm770_vm1, %v7285_v1 }
  0x77   : > { %852 = vst.msk [vmem:[#allocation4 + $0x48] sm:$0x3] %vm770_vm1, %v7285_v1 }
  0x78   : > { %854 = vst.msk [vmem:[#allocation4 + $0x58] sm:$0x3] %vm770_vm1, %v7285_v1 }
  0x79   : > { %856 = vst.msk [vmem:[#allocation4 + $0x68] sm:$0x3] %vm770_vm1, %v7285_v1 }
  0x7a   : > { %858 = vst.msk [vmem:[#allocation4 + $0x78] sm:$0x3] %vm770_vm1, %v7285_v1 }
  0x7b   : > { %860 = vst.msk [vmem:[#allocation4 + $0x88] sm:$0x3] %vm770_vm1, %v7285_v1 }
  0x7c   : > { %862 = vst.msk [vmem:[#allocation4 + $0x98] sm:$0x3] %vm770_vm1, %v7285_v1 }
  0x7d   : > { %864 = vst.msk [vmem:[#allocation5] sm:$0x3f] %vm863_vm2, %v7285_v1 }
  0x7e   : > { %865 = vst.msk [vmem:[#allocation5 + $0x8] sm:$0x3f] %vm863_vm2, %v7285_v1 }
  0x7f   : > { %866 = vst.msk [vmem:[#allocation5 + $0x10] sm:$0x3f] %vm863_vm2, %v7285_v1 }
  0x80   : > { %867 = vst.msk [vmem:[#allocation5 + $0x18] sm:$0x3f] %vm863_vm2, %v7285_v1 }
  0x81   : > { %868 = vst.msk [vmem:[#allocation5 + $0x20] sm:$0x3f] %vm863_vm2, %v7285_v1 }
  0x82   : > { %869 = vst.msk [vmem:[#allocation5 + $0x28] sm:$0x3f] %vm863_vm2, %v7285_v1 }
  0x83   : > { %870 = vst.msk [vmem:[#allocation6] sm:$0x3f] %vm863_vm2, %v7285_v1 }
  0x84   : > { %871 = vst.msk [vmem:[#allocation6 + $0x8] sm:$0x3f] %vm863_vm2, %v7285_v1 }
  0x85   : > { %872 = vst.msk [vmem:[#allocation6 + $0x10] sm:$0x3f] %vm863_vm2, %v7285_v1 }
  0x86   : > { %873 = vst.msk [vmem:[#allocation6 + $0x18] sm:$0x3f] %vm863_vm2, %v7285_v1 }
  0x87   : > { %874 = vst.msk [vmem:[#allocation6 + $0x20] sm:$0x3f] %vm863_vm2, %v7285_v1 }
  0x88   : > { %875 = vst.msk [vmem:[#allocation6 + $0x28] sm:$0x3f] %vm863_vm2, %v7285_v1 }
  0x89   : > { %877 = vst.msk [vmem:[#allocation7] sm:$0x3f] %vm876_vm3, %v7285_v1 }
  0x8a   : > { %878 = vst.msk [vmem:[#allocation7 + $0x8] sm:$0x3f] %vm876_vm3, %v7285_v1 }
  0x8b   : > { %879 = vst.msk [vmem:[#allocation7 + $0x10] sm:$0x3f] %vm876_vm3, %v7285_v1 }
  0x8c   : > { %880 = vst.msk [vmem:[#allocation7 + $0x18] sm:$0x3f] %vm876_vm3, %v7285_v1 }
  0x8d   : > { %881 = vst.msk [vmem:[#allocation7 + $0x20] sm:$0x3f] %vm876_vm3, %v7285_v1 }
  0x8e   : > { %882 = vst.msk [vmem:[#allocation7 + $0x28] sm:$0x3f] %vm876_vm3, %v7285_v1 }
  0x8f   : > { %884 = vst.msk [vmem:[#allocation8] sm:$0xff] %vm883_vm4, %v7285_v1 }
  0x90   : > { %885 = vst.msk [vmem:[#allocation8 + $0x8] sm:$0xff] %vm883_vm4, %v7285_v1 }
  0x91   : > { %886 = vst.msk [vmem:[#allocation8 + $0x10] sm:$0xff] %vm883_vm4, %v7285_v1 }
  0x92   : > { %887 = vst.msk [vmem:[#allocation8 + $0x18] sm:$0xff] %vm883_vm4, %v7285_v1 }
  0x93   : > { %888 = vst.msk [vmem:[#allocation8 + $0x20] sm:$0xff] %vm883_vm4, %v7285_v1 }
  0x94   : > { %889 = vst.msk [vmem:[#allocation8 + $0x28] sm:$0xff] %vm883_vm4, %v7285_v1 }
  0x95   : > { %890 = vst.msk [vmem:[#allocation8 + $0x30] sm:$0xff] %vm883_vm4, %v7285_v1 }
  0x96   : > { %891 = vst.msk [vmem:[#allocation8 + $0x38] sm:$0xff] %vm883_vm4, %v7285_v1 }
  0x97   : > { %918 = vst.msk [vmem:[#allocation11] sm:$0xff] %vm883_vm4, %v7285_v1 }
  0x98   : > { %919 = vst.msk [vmem:[#allocation11 + $0x8] sm:$0xff] %vm883_vm4, %v7285_v1 }
  0x99   : > { %920 = vst.msk [vmem:[#allocation11 + $0x10] sm:$0xff] %vm883_vm4, %v7285_v1 }
  0x9a   : > { %921 = vst.msk [vmem:[#allocation11 + $0x18] sm:$0xff] %vm883_vm4, %v7285_v1 }
  0x9b   : > { %922 = vst.msk [vmem:[#allocation11 + $0x20] sm:$0xff] %vm883_vm4, %v7285_v1 }
  0x9c   : > { %923 = vst.msk [vmem:[#allocation11 + $0x28] sm:$0xff] %vm883_vm4, %v7285_v1 }
  0x9d   : > { %924 = vst.msk [vmem:[#allocation11 + $0x30] sm:$0xff] %vm883_vm4, %v7285_v1 }
  0x9e   : > { %925 = vst.msk [vmem:[#allocation11 + $0x38] sm:$0xff] %vm883_vm4, %v7285_v1 }
  0x9f   : > { %894 = vst.msk [vmem:[#allocation9 + $0x8] sm:$0xff] %vm893_vm5, %v7285_v1 }
  0xa0   : > { %896 = vst.msk [vmem:[#allocation9 + $0x18] sm:$0xff] %vm893_vm5, %v7285_v1 }
  0xa1   : > { %898 = vst.msk [vmem:[#allocation9 + $0x28] sm:$0xff] %vm893_vm5, %v7285_v1 }
  0xa2   : > { %900 = vst.msk [vmem:[#allocation9 + $0x38] sm:$0xff] %vm893_vm5, %v7285_v1 }
  0xa3   : > { %902 = vst.msk [vmem:[#allocation9 + $0x48] sm:$0xff] %vm893_vm5, %v7285_v1 }
  0xa4   : > { %904 = vst.msk [vmem:[#allocation9 + $0x58] sm:$0xff] %vm893_vm5, %v7285_v1 }
  0xa5   : > { %906 = vst.msk [vmem:[#allocation9 + $0x68] sm:$0xff] %vm893_vm5, %v7285_v1 }
  0xa6   : > { %908 = vst.msk [vmem:[#allocation9 + $0x78] sm:$0xff] %vm893_vm5, %v7285_v1 }
  0xa7   : > { %910 = vst.msk [vmem:[#allocation10] sm:$0xff] %vm909_vm6, %v7285_v1 }
  0xa8   : > { %911 = vst.msk [vmem:[#allocation10 + $0x8] sm:$0xff] %vm909_vm6, %v7285_v1 }
  0xa9   : > { %912 = vst.msk [vmem:[#allocation10 + $0x10] sm:$0xff] %vm909_vm6, %v7285_v1 }
  0xaa   : > { %913 = vst.msk [vmem:[#allocation10 + $0x18] sm:$0xff] %vm909_vm6, %v7285_v1 }
  0xab   : > { %914 = vst.msk [vmem:[#allocation10 + $0x20] sm:$0xff] %vm909_vm6, %v7285_v1 }
  0xac   : > { %915 = vst.msk [vmem:[#allocation10 + $0x28] sm:$0xff] %vm909_vm6, %v7285_v1 }
  0xad   : > { %916 = vst.msk [vmem:[#allocation10 + $0x30] sm:$0xff] %vm909_vm6, %v7285_v1 }
  0xae   : > { %917 = vst.msk [vmem:[#allocation10 + $0x38] sm:$0xff] %vm909_vm6, %v7285_v1 }
  0xaf LB: >> { %s10610_s24 = sld [smem:[#allocation14_spill]]  ;;  %vm953_vm7 = vcmask 1042432   ;;  %s6058_s0 = smul.u32 80, %s7247_s29  ;;  %vm946_vm8 = vcmask 23552   ;;  %v1297_v54 = vperm.slane %v7504_v2, 0  ;;  %s7247_s29 = sphi %s7720_s29, %s932_s29  }
  0xb0   : >> { %s5861_s5 = smul.u32 24, %s7247_s29  ;;  %s932_s29 = sadd.s32 1, %s7247_s29  }
  0xb1   : >> { %s7754_s26 = scalar_lea.vmem %s7445_s28, %s6058_s0  ;;  %p929_p4 = scmp.ge.s32.totalorder %s932_s29, 16  }
  0xb2   : >> { %v6061_v12 = vld [vmem:[%s7754_s26 + $0x11] ss:$2 sm:$0xff]  ;;  %v6069_v13 = vld [vmem:[%s7754_s26 + $0x2] ss:$2 sm:$0xff]  ;;  %v6060_v14 = vld [vmem:[%s7754_s26 + $0x1] ss:$2 sm:$0xff] }
  0xb3   : >> { %v6077_v15 = vld [vmem:[%s7754_s26 + $0x28] ss:$2 sm:$0xff]  ;;  %v6078_v18 = vld [vmem:[%s7754_s26 + $0x38] ss:$2 sm:$0xff]  ;;  %v6083_v19 = vld [vmem:[%s7754_s26 + $0x29] ss:$2 sm:$0xff] }
  0xb4   : >> { %v936_v16 = vld [vmem:[%s7754_s26] ss:$2 sm:$0xff]  ;;  %v6059_v20 = vld [vmem:[%s7754_s26 + $0x10] ss:$2 sm:$0xff]  ;;  %v6084_v22 = vld [vmem:[%s7754_s26 + $0x39] ss:$2 sm:$0xff] }
  0xb5   : >> { %v6062_v3 = vld [vmem:[%s10610_s24 + $0x4] sm:$0x7]  ;;  %v939_v4 = vld [vmem:[%s10610_s24] sm:$0x7]  ;;  %v6071_v5 = vld [vmem:[%s10610_s24 + $0x8] sm:$0x7] }
  0xb6   : >> { %7103 = vmatpush.msk.msra.mxu1 %vm953_vm7, %v6062_v3  ;;  %v6099_v6 = vld [vmem:[%s10610_s24 + $0x18] sm:$0x7]  ;;  %6063 = vmatpush.msk.msra.mxu0 %vm953_vm7, %v6062_v3  ;;  %v6079_v7 = vld [vmem:[%s10610_s24 + $0xc] sm:$0x7]  ;;  %v6085_v8 = vld [vmem:[%s10610_s24 + $0x10] sm:$0x7] }
  0xb7   : >> { %6072 = vmatpush.msk.msra.mxu2 %vm953_vm7, %v6071_v5  ;;  %v6105_v9 = vld [vmem:[%s10610_s24 + $0x1c] sm:$0x7]  ;;  %6080 = vmatpush.msk.msra.mxu3 %vm953_vm7, %v6079_v7  ;;  %v6091_v10 = vld [vmem:[%s10610_s24 + $0x14] sm:$0x7]  ;;  %v6111_v11 = vld [vmem:[%s10610_s24 + $0x20] sm:$0x7] }
  0xb8   : >> { %6066 = vmatpush.msk.msrb.mxu1 %vm953_vm7, %v939_v4  ;;  %6086 = vmatpush.msk.msrb.mxu0 %vm953_vm7, %v6085_v8  ;;  %v6070_v17 = vld [vmem:[%s7754_s26 + $0x12] ss:$2 sm:$0xff]  ;;  %v6103_v23 = vld [vmem:[%s7754_s26 + $0x51] ss:$2 sm:$0xff]  ;;  %v6104_v26 = vld [vmem:[%s7754_s26 + $0x61] ss:$2 sm:$0xff] }
  0xb9   : >> { %6100 = vmatpush.msk.msrb.mxu2 %vm953_vm7, %v6099_v6  ;;  %6106 = vmatpush.msk.msrb.mxu3 %vm953_vm7, %v6105_v9  ;;  %v6097_v21 = vld [vmem:[%s7754_s26 + $0x50] ss:$2 sm:$0xff]  ;;  %v6098_v25 = vld [vmem:[%s7754_s26 + $0x60] ss:$2 sm:$0xff]  ;;  %s5862_s0 = scalar_lea.vmem [#allocation2], %s5861_s5  ;;  %s10611_s7 = sld [smem:[#allocation17_spill]] (%p929_p4) }
  0xba   : >> { %6065 = vmatmul.msk.f32.vlgmr.msra.gmra.mxu1 %vm946_vm8, %v6061_v12  ;;  %6073 = vmatmul.msk.f32.vlgmr.msra.gmra.mxu2 %vm946_vm8, %v6069_v13  ;;  %v6089_v24 = vld [vmem:[%s7754_s26 + $0x2a] ss:$2 sm:$0xff]  ;;  %v6090_v28 = vld [vmem:[%s7754_s26 + $0x3a] ss:$2 sm:$0xff]  ;;  %s7814_s3 = smov (%p929_p4), 0  }
  0xbb   : >> { %6064 = vmatmul.msk.f32.vlgmr.msra.gmra.mxu0 %vm946_vm8, %v6060_v14  ;;  %6081 = vmatmul.msk.f32.vlgmr.msra.gmra.mxu3 %vm946_vm8, %v6077_v15  ;;  %v6109_v27 = vld [vmem:[%s7754_s26 + $0x52] ss:$2 sm:$0xff]  ;;  %v6110_v29 = vld [vmem:[%s7754_s26 + $0x62] ss:$2 sm:$0xff] }
  0xbc   : >> { %6092 = vmatpush.msk.msra.mxu1 %vm953_vm7, %v6091_v10  ;;  %6112 = vmatpush.msk.msra.mxu0 %vm953_vm7, %v6111_v11 }
  0xbf   : > { %v7812_v6 = vld [vmem:[%s10611_s7] sm:$0x1] (%p929_p4) }
  0xc2   : >> { %6067 = vmatmul.msk.f32.vlgmr.msrb.gmra.mxu1 %vm946_vm8, %v936_v16  ;;  %6074 = vmatmul.msk.f32.gmra.mxu2 %vm946_vm8, %v6070_v17 }
  0xc3   : >> { %6082 = vmatmul.msk.f32.gmra.mxu3 %vm946_vm8, %v6078_v18  ;;  %6087 = vmatmul.msk.f32.vlgmr.msrb.gmra.mxu0 %vm946_vm8, %v6083_v19 }
  0xca   : >> { %6068 = vmatmul.msk.f32.gmra.mxu1 %vm946_vm8, %v6059_v20  ;;  %6101 = vmatmul.msk.f32.vlgmr.msrb.gmra.mxu2 %vm946_vm8, %v6097_v21 }
  0xcb   : >> { %6088 = vmatmul.msk.f32.gmra.mxu0 %vm946_vm8, %v6084_v22  ;;  %6107 = vmatmul.msk.f32.vlgmr.msrb.gmra.mxu3 %vm946_vm8, %v6103_v23 }
  0xd2   : >> { %6093 = vmatmul.msk.f32.vlgmr.msra.gmra.mxu1 %vm946_vm8, %v6089_v24  ;;  %6102 = vmatmul.msk.f32.gmra.mxu2 %vm946_vm8, %v6098_v25 }
  0xd3   : >> { %6108 = vmatmul.msk.f32.gmra.mxu3 %vm946_vm8, %v6104_v26  ;;  %6113 = vmatmul.msk.f32.vlgmr.msra.gmra.mxu0 %vm946_vm8, %v6109_v27 }
  0xda   : >> { %6094 = vmatmul.msk.f32.gmra.mxu1 %vm946_vm8, %v6090_v28 }
  0xdb   : >> { %6114 = vmatmul.msk.f32.gmra.mxu0 %vm946_vm8, %v6110_v29 }
 0x137   : >> { %v977_v30 = vpop.f32.mrf.mxu1 }
 0x138   : >> { %v974_v31 = vpop.f32.mrf.mxu0 }
 0x13d   : >> { %v1044_v32 = vpop.f32.mrf.mxu2 }
 0x13e   : >> { %v1086_v33 = vpop.f32.mrf.mxu3 }
 0x13f   : >> { %v1006_v34 = vpop.f32.mrf.mxu1 }
 0x140   : >> { %v1126_v35 = vpop.f32.mrf.mxu0  ;;  %v1007_v36 = vadd.f32 %v1006_v34, %v974_v31 }
 0x142   : >> { %v1050_v38 = vadd.f32 %v1044_v32, %v1007_v36 }
 0x144   : >> { %v1092_v42 = vadd.f32 %v1086_v33, %v1050_v38 }
 0x145   : >> { %v1047_v37 = vpop.f32.mrf.mxu2 }
 0x146   : >> { %v1089_v39 = vpop.f32.mrf.mxu3  ;;  %v1132_v45 = vadd.f32 %v1126_v35, %v1092_v42 }
 0x147   : >> { %v1009_v40 = vpop.f32.mrf.mxu1 }
 0x148   : >> { %v1129_v41 = vpop.f32.mrf.mxu0  ;;  %v1010_v43 = vadd.f32 %v1009_v40, %v977_v30 }
 0x14a   : >> { %v1051_v46 = vadd.f32 %v1047_v37, %v1010_v43 }
 0x14c   : >> { %v1093_v51 = vadd.f32 %v1089_v39, %v1051_v46 }
 0x14d   : >> { %v1208_v44 = vpop.f32.mrf.mxu2 }
 0x14e   : >> { %v1248_v48 = vpop.f32.mrf.mxu3  ;;  %v1133_v55 = vadd.f32 %v1129_v41, %v1093_v51 }
 0x14f   : >> { %v1166_v47 = vpop.f32.mrf.mxu1 }
 0x150   : >> { %v1172_v49 = vadd.f32 %v1166_v47, %v1132_v45  ;;  %v1288_v50 = vpop.f32.mrf.mxu0 }
 0x152   : >> { %v1214_v52 = vadd.f32 %v1208_v44, %v1172_v49 }
 0x154   : >> { %v1254_v53 = vadd.f32 %v1248_v48, %v1214_v52 }
 0x155   : >> { %v1211_v58 = vpop.f32.mrf.mxu2 }
 0x156   : >> { %v1294_v56 = vadd.f32 %v1288_v50, %v1254_v53  ;;  %v1251_v61 = vpop.f32.mrf.mxu3 }
 0x157   : >> { %v1169_v57 = vpop.f32.mrf.mxu1 }
 0x158   : >> { %v1299_v59 = vadd.f32 %v1297_v54, %v1294_v56  ;;  %v1173_v60 = vadd.f32 %v1169_v57, %v1133_v55  ;;  %v1291_v0 = vpop.f32.mrf.mxu0 }
 0x15a   : >> { %v1301_v62 = vmax.f32 %v1299_v59, 0.0  ;;  %v1215_v63 = vadd.f32 %v1211_v58, %v1173_v60 }
 0x15c   : >> { %6115 = vst.msk [vmem:[%s5862_s0 + $0x19] sm:$0xff] %vm767_vm0, %v1301_v62  ;;  %v1255_v1 = vadd.f32 %v1251_v61, %v1215_v63 }
 0x15e   : >> { %v1295_v3 = vadd.f32 %v1291_v0, %v1255_v1 }
 0x160   : >> { %v1300_v4 = vadd.f32 %v1297_v54, %v1295_v3  ;;  %931 = sbr.rel (!%p929_p4) target bundleno = 175 (0xaf), region = 382 }
 0x162   : >> { %v1302_v5 = vmax.f32 %v1300_v4, 0.0 }
 0x164   : >> { %6116 = vst.msk [vmem:[%s5862_s0 + $0x21] sm:$0xff] %vm767_vm0, %v1302_v5 }
 0x165 LB: >> { %s10612_s27 = sld [smem:[#allocation16_spill]]  ;;  %s6118_s8 = smul.u32 48, %s7251_s3  ;;  %v1580_v49 = vperm.slane %v7812_v6, 0  ;;  %s7251_s3 = sphi %s7814_s3, %s1314_s3  }
 0x167   : >> { %s7856_s28 = scalar_lea.vmem [#allocation2], %s6118_s8 }
 0x16b   : >> { %v6126_v7 = vld [vmem:[%s10612_s27 + $0x28] sm:$0xff]  ;;  %v6121_v2 = vld [vmem:[%s10612_s27 + $0x18] sm:$0xff]  ;;  %v6125_v9 = vld [vmem:[%s10612_s27 + $0x20] sm:$0xff] }
 0x16c   : >> { %v1320_v8 = vld [vmem:[%s10612_s27 + $0x8] sm:$0xff]  ;;  %1394 = vmatpush.msra.mxu2 %v6126_v7  ;;  %1343 = vmatpush.msra.mxu0 %v6121_v2  ;;  %v6132_v10 = vld [vmem:[%s10612_s27 + $0x38] sm:$0xff]  ;;  %v6120_v12 = vld [vmem:[%s10612_s27 + $0x10] sm:$0xff] }
 0x16d   : >> { %v6146_v11 = vld [vmem:[%s10612_s27 + $0x68] sm:$0xff]  ;;  %1366 = vmatpush.msra.mxu1 %v1320_v8  ;;  %1425 = vmatpush.msra.mxu3 %v6132_v10  ;;  %v1319_v13 = vld [vmem:[%s10612_s27] sm:$0xff]  ;;  %v6131_v14 = vld [vmem:[%s10612_s27 + $0x30] sm:$0xff] }
 0x16e   : >> { %1395 = vmatpush.msra.mxu2 %v6125_v9  ;;  %1344 = vmatpush.msra.mxu0 %v6120_v12  ;;  %v6136_v15 = vld [vmem:[%s10612_s27 + $0x48] sm:$0xff]  ;;  %v6150_v16 = vld [vmem:[%s10612_s27 + $0x78] sm:$0xff]  ;;  %v6145_v22 = vld [vmem:[%s10612_s27 + $0x60] sm:$0xff] }
 0x16f   : >> { %1367 = vmatpush.msra.mxu1 %v1319_v13  ;;  %v6140_v17 = vld [vmem:[%s10612_s27 + $0x58] sm:$0xff]  ;;  %v6124_v18 = vld [vmem:[%s7856_s28 + $0x2] ss:$2 sm:$0xff]  ;;  %1426 = vmatpush.msra.mxu3 %v6131_v14  ;;  %v6119_v19 = vld [vmem:[%s7856_s28 + $0x1] ss:$2 sm:$0xff] }
 0x170   : >> { %1514 = vmatpush.msrb.mxu2 %v6146_v11  ;;  %v1318_v20 = vld [vmem:[%s7856_s28] ss:$2 sm:$0xff]  ;;  %1454 = vmatpush.msrb.mxu0 %v6136_v15  ;;  %v6149_v24 = vld [vmem:[%s10612_s27 + $0x70] sm:$0xff]  ;;  %v6134_v29 = vld [vmem:[%s7856_s28 + $0x19] ss:$2 sm:$0xff] }
 0x171   : >> { %6127 = vmatmul.msk.f32.vlgmr.msra.gmra.mxu2 %vm767_vm0, %v6124_v18  ;;  %6122 = vmatmul.msk.f32.vlgmr.msra.gmra.mxu0 %vm767_vm0, %v6119_v19  ;;  %v6130_v21 = vld [vmem:[%s7856_s28 + $0x18] ss:$2 sm:$0xff]  ;;  %v6139_v25 = vld [vmem:[%s10612_s27 + $0x50] sm:$0xff]  ;;  %v6154_v26 = vld [vmem:[%s10612_s27 + $0x88] sm:$0xff] }
 0x172   : >> { %v6135_v23 = vld [vmem:[%s10612_s27 + $0x40] sm:$0xff]  ;;  %6123 = vmatmul.msk.f32.vlgmr.msra.gmra.mxu1 %vm767_vm0, %v1318_v20  ;;  %6133 = vmatmul.msk.f32.vlgmr.msra.gmra.mxu3 %vm767_vm0, %v6130_v21  ;;  %v6144_v28 = vld [vmem:[%s7856_s28 + $0x30] ss:$2 sm:$0xff]  ;;  %v6148_v30 = vld [vmem:[%s7856_s28 + $0x31] ss:$2 sm:$0xff] }
 0x173   : >> { %1543 = vmatpush.msrb.mxu3 %v6150_v16  ;;  %1483 = vmatpush.msrb.mxu1 %v6140_v17  ;;  %v6153_v27 = vld [vmem:[%s10612_s27 + $0x80] sm:$0xff] }
 0x174   : >> { %1515 = vmatpush.msrb.mxu2 %v6145_v22  ;;  %1455 = vmatpush.msrb.mxu0 %v6135_v23  ;;  %v6138_v31 = vld [vmem:[%s7856_s28 + $0x1a] ss:$2 sm:$0xff] }
 0x175   : >> { %1544 = vmatpush.msrb.mxu3 %v6149_v24  ;;  %1484 = vmatpush.msrb.mxu1 %v6139_v25  ;;  %v6152_v32 = vld [vmem:[%s7856_s28 + $0x32] ss:$2 sm:$0xff]  ;;  %s6156_s28 = sshll.u32 %s7251_s3, 4  ;;  %s1314_s3 = sadd.s32 1, %s7251_s3  }
 0x176   : >> { %1572 = vmatpush.msra.mxu0 %v6154_v26  ;;  %s5879_s8 = scalar_lea.vmem [#allocation3], %s6156_s28  ;;  %p1311_p5 = scmp.ge.s32.totalorder %s1314_s3, 8  }
 0x177   : > { %s10613_s30 = sld [smem:[#allocation19_spill]] (%p1311_p5)  ;;  %s7905_s7 = smov (%p1311_p5), 0  }
 0x178   : >> { %1573 = vmatpush.msra.mxu0 %v6153_v27 }
 0x179   : >> { %6147 = vmatmul.msk.f32.vlgmr.msrb.gmra.mxu2 %vm767_vm0, %v6144_v28  ;;  %6137 = vmatmul.msk.f32.vlgmr.msrb.gmra.mxu0 %vm767_vm0, %v6134_v29 }
 0x17a   : >> { %6151 = vmatmul.msk.f32.vlgmr.msrb.gmra.mxu3 %vm767_vm0, %v6148_v30  ;;  %6141 = vmatmul.msk.f32.vlgmr.msrb.gmra.mxu1 %vm767_vm0, %v6138_v31 }
 0x17d   : > { %v7903_v53 = vld [vmem:[%s10613_s30] sm:$0x1] (%p1311_p5) }
 0x181   : >> { %6155 = vmatmul.msk.f32.vlgmr.msra.gmra.mxu0 %vm767_vm0, %v6152_v32 }
 0x1ee   : >> { %v1346_v33 = vpop.f32.mrf.mxu0 }
 0x1ef   : >> { %v1369_v34 = vpop.f32.mrf.mxu1 }
 0x1f0   : >> { %v1370_v35 = vadd.f32 %v1369_v34, %v1346_v33 }
 0x1f4   : >> { %v1397_v36 = vpop.f32.mrf.mxu2 }
 0x1f5   : >> { %v1400_v37 = vadd.f32 %v1397_v36, %v1370_v35  ;;  %v1428_v38 = vpop.f32.mrf.mxu3 }
 0x1f6   : >> { %v1457_v39 = vpop.f32.mrf.mxu0 }
 0x1f7   : >> { %v1431_v40 = vadd.f32 %v1428_v38, %v1400_v37  ;;  %v1486_v41 = vpop.f32.mrf.mxu1 }
 0x1f9   : >> { %v1460_v42 = vadd.f32 %v1457_v39, %v1431_v40 }
 0x1fb   : >> { %v1489_v43 = vadd.f32 %v1486_v41, %v1460_v42 }
 0x1fc   : >> { %v1517_v44 = vpop.f32.mrf.mxu2 }
 0x1fd   : >> { %v1520_v45 = vadd.f32 %v1517_v44, %v1489_v43  ;;  %v1546_v46 = vpop.f32.mrf.mxu3 }
 0x1fe   : >> { %v1575_v47 = vpop.f32.mrf.mxu0 }
 0x1ff   : >> { %v1549_v48 = vadd.f32 %v1546_v46, %v1520_v45 }
 0x201   : >> { %v1578_v50 = vadd.f32 %v1575_v47, %v1549_v48 }
 0x203   : >> { %v1582_v51 = vadd.f32 %v1580_v49, %v1578_v50  ;;  %1313 = sbr.rel (!%p1311_p5) target bundleno = 357 (0x165), region = 393 }
 0x205   : >> { %v1583_v52 = vmax.f32 %v1582_v51, 0.0 }
 0x207   : >> { %6157 = vst.msk [vmem:[%s5879_s8 + $0x11] sm:$0xff] %vm767_vm0, %v1583_v52 }
 0x208 LB: >> { %s10614_s29 = sld [smem:[#allocation18_spill]]  ;;  %s6158_s9 = sshll.u32 %s7255_s7, 4  ;;  %v1853_v33 = vperm.slane %v7903_v53, 0  ;;  %s7255_s7 = sphi %s7905_s7, %s1594_s7  }
 0x209   : >> { %s7943_s26 = scalar_lea.vmem [#allocation3], %s6158_s9  ;;  %s1594_s7 = sadd.s32 1, %s7255_s7  }
 0x20a   : >> { %p1591_p6 = scmp.ge.s32.totalorder %s1594_s7, 8  }
 0x20b   : > { %s10615_s24 = sld [smem:[#allocation21_spill]] (%p1591_p6)  ;;  %s7999_s4 = smov (%p1591_p6), 0  }
 0x20e   : >> { %v6164_v54 = vld [vmem:[%s10614_s29 + $0x28] sm:$0xff]  ;;  %v6160_v55 = vld [vmem:[%s10614_s29 + $0x18] sm:$0xff]  ;;  %v6163_v57 = vld [vmem:[%s10614_s29 + $0x20] sm:$0xff] }
 0x20f   : >> { %v1599_v56 = vld [vmem:[%s10614_s29 + $0x8] sm:$0xff]  ;;  %1671 = vmatpush.msra.mxu2 %v6164_v54  ;;  %1621 = vmatpush.msra.mxu0 %v6160_v55  ;;  %v6169_v58 = vld [vmem:[%s10614_s29 + $0x38] sm:$0xff]  ;;  %v6159_v60 = vld [vmem:[%s10614_s29 + $0x10] sm:$0xff] }
 0x210   : >> { %v6182_v59 = vld [vmem:[%s10614_s29 + $0x68] sm:$0xff]  ;;  %1644 = vmatpush.msra.mxu1 %v1599_v56  ;;  %1702 = vmatpush.msra.mxu3 %v6169_v58  ;;  %v1598_v61 = vld [vmem:[%s10614_s29] sm:$0xff]  ;;  %v6168_v62 = vld [vmem:[%s10614_s29 + $0x30] sm:$0xff] }
 0x211   : >> { %1672 = vmatpush.msra.mxu2 %v6163_v57  ;;  %1622 = vmatpush.msra.mxu0 %v6159_v60  ;;  %v6173_v63 = vld [vmem:[%s10614_s29 + $0x48] sm:$0xff]  ;;  %v1597_v3 = vld [vmem:[%s7943_s26] sm:$0xff]  ;;  %v6167_v4 = vld [vmem:[%s7943_s26 + $0x10] sm:$0xff] }
 0x212   : >> { %v1650_v0 = vld [vmem:[%s7943_s26 + $0x2] sm:$0xff]  ;;  %1645 = vmatpush.msra.mxu1 %v1598_v61  ;;  %1703 = vmatpush.msra.mxu3 %v6168_v62  ;;  %v6186_v5 = vld [vmem:[%s10614_s29 + $0x78] sm:$0xff]  ;;  %v6185_v8 = vld [vmem:[%s10614_s29 + $0x70] sm:$0xff] }
 0x213   : >> { %1789 = vmatpush.msrb.mxu2 %v6182_v59  ;;  %v1600_v1 = vld [vmem:[%s7943_s26 + $0x1] sm:$0xff]  ;;  %v6177_v6 = vld [vmem:[%s10614_s29 + $0x58] sm:$0xff]  ;;  %6162 = vmatmul.msk.f32.vlgmr.msra.gmra.mxu1 %vm767_vm0, %v1597_v3  ;;  %v6176_v9 = vld [vmem:[%s10614_s29 + $0x50] sm:$0xff] }
 0x214   : >> { %6165 = vmatmul.msk.f32.vlgmr.msra.gmra.mxu2 %vm767_vm0, %v1650_v0  ;;  %6161 = vmatmul.msk.f32.vlgmr.msra.gmra.mxu0 %vm767_vm0, %v1600_v1  ;;  %v6181_v7 = vld [vmem:[%s10614_s29 + $0x60] sm:$0xff]  ;;  %v6190_v10 = vld [vmem:[%s10614_s29 + $0x88] sm:$0xff]  ;;  %v6171_v13 = vld [vmem:[%s7943_s26 + $0x11] sm:$0xff] }
 0x215   : >> { %v6172_v2 = vld [vmem:[%s10614_s29 + $0x40] sm:$0xff]  ;;  %6170 = vmatmul.msk.f32.vlgmr.msra.gmra.mxu3 %vm767_vm0, %v6167_v4  ;;  %1730 = vmatpush.msrb.mxu0 %v6173_v63  ;;  %v6175_v14 = vld [vmem:[%s7943_s26 + $0x12] sm:$0xff] }
 0x216   : >> { %1817 = vmatpush.msrb.mxu3 %v6186_v5  ;;  %1758 = vmatpush.msrb.mxu1 %v6177_v6  ;;  %v6180_v11 = vld [vmem:[%s7943_s26 + $0x20] sm:$0xff] }
 0x217   : >> { %1790 = vmatpush.msrb.mxu2 %v6181_v7  ;;  %1731 = vmatpush.msrb.mxu0 %v6172_v2  ;;  %v6189_v12 = vld [vmem:[%s10614_s29 + $0x80] sm:$0xff] }
 0x218   : >> { %1818 = vmatpush.msrb.mxu3 %v6185_v8  ;;  %1759 = vmatpush.msrb.mxu1 %v6176_v9  ;;  %v6184_v15 = vld [vmem:[%s7943_s26 + $0x21] sm:$0xff]  ;;  %v7997_v37 = vld [vmem:[%s10615_s24] sm:$0x1] (%p1591_p6) }
 0x219   : >> { %1845 = vmatpush.msra.mxu0 %v6190_v10  ;;  %v6188_v16 = vld [vmem:[%s7943_s26 + $0x22] sm:$0xff]  ;;  %s5890_s26 = scalar_lea.vmem [#allocation4], %s6158_s9 }
 0x21b   : >> { %1846 = vmatpush.msra.mxu0 %v6189_v12  ;;  %6178 = vmatmul.msk.f32.vlgmr.msrb.gmra.mxu1 %vm767_vm0, %v6175_v14 }
 0x21c   : >> { %6183 = vmatmul.msk.f32.vlgmr.msrb.gmra.mxu2 %vm767_vm0, %v6180_v11  ;;  %6174 = vmatmul.msk.f32.vlgmr.msrb.gmra.mxu0 %vm767_vm0, %v6171_v13 }
 0x21d   : >> { %6187 = vmatmul.msk.f32.vlgmr.msrb.gmra.mxu3 %vm767_vm0, %v6184_v15 }
 0x224   : >> { %6191 = vmatmul.msk.f32.vlgmr.msra.gmra.mxu0 %vm767_vm0, %v6188_v16 }
 0x290   : >> { %v1647_v18 = vpop.f32.mrf.mxu1 }
 0x291   : >> { %v1624_v17 = vpop.f32.mrf.mxu0 }
 0x292   : >> { %v1648_v19 = vadd.f32 %v1647_v18, %v1624_v17 }
 0x297   : >> { %v1674_v20 = vpop.f32.mrf.mxu2 }
 0x298   : >> { %v1677_v21 = vadd.f32 %v1674_v20, %v1648_v19  ;;  %v1705_v22 = vpop.f32.mrf.mxu3  ;;  %v1761_v25 = vpop.f32.mrf.mxu1 }
 0x299   : >> { %v1733_v24 = vpop.f32.mrf.mxu0 }
 0x29a   : >> { %v1708_v23 = vadd.f32 %v1705_v22, %v1677_v21 }
 0x29c   : >> { %v1736_v26 = vadd.f32 %v1733_v24, %v1708_v23 }
 0x29e   : >> { %v1764_v27 = vadd.f32 %v1761_v25, %v1736_v26 }
 0x29f   : >> { %v1792_v28 = vpop.f32.mrf.mxu2 }
 0x2a0   : >> { %v1795_v29 = vadd.f32 %v1792_v28, %v1764_v27  ;;  %v1820_v30 = vpop.f32.mrf.mxu3 }
 0x2a1   : >> { %v1848_v32 = vpop.f32.mrf.mxu0 }
 0x2a2   : >> { %v1823_v31 = vadd.f32 %v1820_v30, %v1795_v29 }
 0x2a4   : >> { %v1851_v34 = vadd.f32 %v1848_v32, %v1823_v31 }
 0x2a6   : >> { %v1855_v35 = vadd.f32 %v1853_v33, %v1851_v34  ;;  %1593 = sbr.rel (!%p1591_p6) target bundleno = 520 (0x208), region = 404 }
 0x2a8   : >> { %v1856_v36 = vmax.f32 %v1855_v35, 0.0 }
 0x2aa   : >> { %6193 = vst.msk [vmem:[%s5890_s26 + $0x11] sm:$0xff] %vm767_vm0, %v1856_v36 }
 0x2ab LB: >> { %s10616_s5 = sld [smem:[#allocation20_spill]]  ;;  %s7099_s28 = sshll.u32 %s7259_s4, 5  ;;  %v2131_v17 = vperm.slane %v7997_v37, 0  ;;  %vm2138_vm9 = vcmask 257024   ;;  %s7259_s4 = sphi %s7999_s4, %s1865_s4  }
 0x2ac   : >> { %s8041_s25 = scalar_lea.vmem [#allocation4], %s7099_s28 }
 0x2b1   : >> { %v6203_v38 = vld [vmem:[%s10616_s5 + $0x28] sm:$0xff]  ;;  %v6198_v39 = vld [vmem:[%s10616_s5 + $0x18] sm:$0xff]  ;;  %v6202_v41 = vld [vmem:[%s10616_s5 + $0x20] sm:$0xff] }
 0x2b2   : >> { %v1871_v40 = vld [vmem:[%s10616_s5 + $0x8] sm:$0xff]  ;;  %1945 = vmatpush.msra.mxu2 %v6203_v38  ;;  %1894 = vmatpush.msra.mxu0 %v6198_v39  ;;  %v6209_v42 = vld [vmem:[%s10616_s5 + $0x38] sm:$0xff]  ;;  %v6197_v44 = vld [vmem:[%s10616_s5 + $0x10] sm:$0xff] }
 0x2b3   : >> { %v6223_v43 = vld [vmem:[%s10616_s5 + $0x68] sm:$0xff]  ;;  %1917 = vmatpush.msra.mxu1 %v1871_v40  ;;  %1976 = vmatpush.msra.mxu3 %v6209_v42  ;;  %v1870_v45 = vld [vmem:[%s10616_s5] sm:$0xff]  ;;  %v6208_v46 = vld [vmem:[%s10616_s5 + $0x30] sm:$0xff] }
 0x2b4   : >> { %1946 = vmatpush.msra.mxu2 %v6202_v41  ;;  %1895 = vmatpush.msra.mxu0 %v6197_v44  ;;  %v6213_v47 = vld [vmem:[%s10616_s5 + $0x48] sm:$0xff]  ;;  %v6227_v48 = vld [vmem:[%s10616_s5 + $0x78] sm:$0xff]  ;;  %v6196_v51 = vld [vmem:[%s8041_s25 + $0x1] ss:$2 sm:$0xf] }
 0x2b5   : >> { %v6217_v49 = vld [vmem:[%s10616_s5 + $0x58] sm:$0xff]  ;;  %v6201_v50 = vld [vmem:[%s8041_s25 + $0x2] ss:$2 sm:$0xf]  ;;  %1918 = vmatpush.msra.mxu1 %v1870_v45  ;;  %1977 = vmatpush.msra.mxu3 %v6208_v46  ;;  %v6226_v56 = vld [vmem:[%s10616_s5 + $0x70] sm:$0xff] }
 0x2b6   : >> { %2065 = vmatpush.msrb.mxu2 %v6223_v43  ;;  %v1869_v52 = vld [vmem:[%s8041_s25] ss:$2 sm:$0xf]  ;;  %v6207_v53 = vld [vmem:[%s8041_s25 + $0x10] ss:$2 sm:$0xf]  ;;  %6199 = vmatmul.msk.f32.vlgmr.msra.gmra.mxu0 %vm767_vm0, %v6196_v51 }
 0x2b7   : >> { %6204 = vmatmul.msk.f32.vlgmr.msra.gmra.mxu2 %vm767_vm0, %v6201_v50  ;;  %6200 = vmatmul.msk.f32.vlgmr.msra.gmra.mxu1 %vm767_vm0, %v1869_v52  ;;  %v6222_v54 = vld [vmem:[%s10616_s5 + $0x60] sm:$0xff]  ;;  %v6216_v57 = vld [vmem:[%s10616_s5 + $0x50] sm:$0xff]  ;;  %v6231_v58 = vld [vmem:[%s10616_s5 + $0x88] sm:$0xff] }
 0x2b8   : >> { %v6212_v55 = vld [vmem:[%s10616_s5 + $0x40] sm:$0xff]  ;;  %6210 = vmatmul.msk.f32.vlgmr.msra.gmra.mxu3 %vm767_vm0, %v6207_v53  ;;  %2005 = vmatpush.msrb.mxu0 %v6213_v47  ;;  %v6211_v61 = vld [vmem:[%s8041_s25 + $0x11] ss:$2 sm:$0xf] }
 0x2b9   : >> { %2094 = vmatpush.msrb.mxu3 %v6227_v48  ;;  %2034 = vmatpush.msrb.mxu1 %v6217_v49  ;;  %v6221_v59 = vld [vmem:[%s8041_s25 + $0x20] ss:$2 sm:$0xf]  ;;  %v6215_v62 = vld [vmem:[%s8041_s25 + $0x12] ss:$2 sm:$0xf] }
 0x2ba   : >> { %2066 = vmatpush.msrb.mxu2 %v6222_v54  ;;  %2006 = vmatpush.msrb.mxu0 %v6212_v55  ;;  %v6230_v60 = vld [vmem:[%s10616_s5 + $0x80] sm:$0xff] }
 0x2bb   : >> { %2095 = vmatpush.msrb.mxu3 %v6226_v56  ;;  %2035 = vmatpush.msrb.mxu1 %v6216_v57  ;;  %v6225_v63 = vld [vmem:[%s8041_s25 + $0x21] ss:$2 sm:$0xf]  ;;  %v6229_v0 = vld [vmem:[%s8041_s25 + $0x22] ss:$2 sm:$0xf] }
 0x2bc   : >> { %2123 = vmatpush.msra.mxu0 %v6231_v58  ;;  %s6233_s25 = sshll.u32 %s7259_s4, 3  ;;  %s1865_s4 = sadd.s32 1, %s7259_s4  }
 0x2bd   : >> { %s5907_s26 = scalar_lea.vmem [#allocation5], %s6233_s25  ;;  %p1862_p7 = scmp.ge.s32.totalorder %s1865_s4, 4  }
 0x2be   : >> { %2124 = vmatpush.msra.mxu0 %v6230_v60  ;;  %v8088_v21 = vld [vmem:[%s10571_s10] sm:$0x1] (%p1862_p7)  ;;  %s8090_s24 = smov (%p1862_p7), 0  }
 0x2bf   : >> { %6224 = vmatmul.msk.f32.vlgmr.msrb.gmra.mxu2 %vm767_vm0, %v6221_v59  ;;  %6214 = vmatmul.msk.f32.vlgmr.msrb.gmra.mxu0 %vm767_vm0, %v6211_v61 }
 0x2c0   : >> { %6218 = vmatmul.msk.f32.vlgmr.msrb.gmra.mxu1 %vm767_vm0, %v6215_v62  ;;  %6228 = vmatmul.msk.f32.vlgmr.msrb.gmra.mxu3 %vm767_vm0, %v6225_v63 }
 0x2c7   : >> { %6232 = vmatmul.msk.f32.vlgmr.msra.gmra.mxu0 %vm767_vm0, %v6229_v0 }
 0x333   : >> { %v1897_v1 = vpop.f32.mrf.mxu0 }
 0x334   : >> { %v1920_v3 = vpop.f32.mrf.mxu1 }
 0x335   : >> { %v1921_v4 = vadd.f32 %v1920_v3, %v1897_v1 }
 0x33a   : >> { %v1948_v5 = vpop.f32.mrf.mxu2 }
 0x33b   : >> { %v1951_v6 = vadd.f32 %v1948_v5, %v1921_v4  ;;  %v1979_v7 = vpop.f32.mrf.mxu3 }
 0x33c   : >> { %v2008_v8 = vpop.f32.mrf.mxu0 }
 0x33d   : >> { %v1982_v2 = vadd.f32 %v1979_v7, %v1951_v6  ;;  %v2037_v9 = vpop.f32.mrf.mxu1 }
 0x33f   : >> { %v2011_v10 = vadd.f32 %v2008_v8, %v1982_v2 }
 0x341   : >> { %v2040_v11 = vadd.f32 %v2037_v9, %v2011_v10 }
 0x342   : >> { %v2068_v12 = vpop.f32.mrf.mxu2 }
 0x343   : >> { %v2071_v13 = vadd.f32 %v2068_v12, %v2040_v11  ;;  %v2097_v14 = vpop.f32.mrf.mxu3 }
 0x344   : >> { %v2126_v16 = vpop.f32.mrf.mxu0 }
 0x345   : >> { %v2100_v15 = vadd.f32 %v2097_v14, %v2071_v13 }
 0x347   : >> { %v2129_v18 = vadd.f32 %v2126_v16, %v2100_v15 }
 0x349   : >> { %v2133_v19 = vadd.f32 %v2131_v17, %v2129_v18  ;;  %1864 = sbr.rel (!%p1862_p7) target bundleno = 683 (0x2ab), region = 415 }
 0x34b   : >> { %v2134_v20 = vmax.f32 %v2133_v19, 0.0 }
 0x34d   : >> { %6234 = vst.msk [vmem:[%s5907_s26 + $0x9] sm:$0xf] %vm2138_vm9, %v2134_v20 }
 0x34e LB: >> { %s10617_s7 = sld [smem:[#allocation22_spill]]  ;;  %s6235_s2 = sshll.u32 %s7263_s24, 3  ;;  %vm2160_vm10 = vcmask 261120   ;;  %v2424_v19 = vperm.slane %v8088_v21, 0  ;;  %s7263_s24 = sphi %s8090_s24, %s2146_s24  }
 0x34f   : >> { %s8137_s25 = scalar_lea.vmem [#allocation5], %s6235_s2  ;;  %s2146_s24 = sadd.s32 1, %s7263_s24  }
 0x350   : >> { %p2143_p8 = scmp.ge.s32.totalorder %s2146_s24, 4  }
 0x351   : > { %s8238_s9 = smov (%p2143_p8), 0  }
 0x354   : >> { %v6245_v22 = vld [vmem:[%s10617_s7 + $0x58] sm:$0xff]  ;;  %v6244_v25 = vld [vmem:[%s10617_s7 + $0x50] sm:$0xff]  ;;  %v6243_v29 = vld [vmem:[%s10617_s7 + $0x48] sm:$0xff] }
 0x355   : >> { %v6239_v23 = vld [vmem:[%s10617_s7 + $0x38] sm:$0xff]  ;;  %2228 = vmatpush.msra.mxu2 %v6245_v22  ;;  %v6238_v27 = vld [vmem:[%s10617_s7 + $0x30] sm:$0xff]  ;;  %v6237_v31 = vld [vmem:[%s10617_s7 + $0x28] sm:$0xff] }
 0x356   : >> { %v2153_v24 = vld [vmem:[%s10617_s7 + $0x18] sm:$0xff]  ;;  %2176 = vmatpush.msra.mxu0 %v6239_v23  ;;  %v2152_v28 = vld [vmem:[%s10617_s7 + $0x10] sm:$0xff]  ;;  %v2151_v32 = vld [vmem:[%s10617_s7 + $0x8] sm:$0xff] }
 0x357   : >> { %v6252_v26 = vld [vmem:[%s10617_s7 + $0x78] sm:$0xff]  ;;  %2199 = vmatpush.msra.mxu1 %v2153_v24  ;;  %v6251_v30 = vld [vmem:[%s10617_s7 + $0x70] sm:$0xff]  ;;  %2229 = vmatpush.msra.mxu2 %v6244_v25  ;;  %v6242_v33 = vld [vmem:[%s10617_s7 + $0x40] sm:$0xff] }
 0x358   : >> { %2261 = vmatpush.msra.mxu3 %v6252_v26  ;;  %2177 = vmatpush.msra.mxu0 %v6238_v27  ;;  %v6250_v34 = vld [vmem:[%s10617_s7 + $0x68] sm:$0xff]  ;;  %v2207_v35 = vld [vmem:[%s8137_s25 + $0x2] sm:$0xf]  ;;  %v6271_v38 = vld [vmem:[%s10617_s7 + $0xd8] sm:$0xff] }
 0x359   : >> { %2200 = vmatpush.msra.mxu1 %v2152_v28  ;;  %2230 = vmatpush.msra.mxu2 %v6243_v29  ;;  %v6236_v36 = vld [vmem:[%s10617_s7 + $0x20] sm:$0xff]  ;;  %v6248_v42 = vld [vmem:[%s8137_s25 + $0x8] sm:$0xf]  ;;  %v6258_v43 = vld [vmem:[%s10617_s7 + $0x98] sm:$0xff] }
 0x35a   : >> { %2262 = vmatpush.msra.mxu3 %v6251_v30  ;;  %2178 = vmatpush.msra.mxu0 %v6237_v31  ;;  %v2150_v37 = vld [vmem:[%s10617_s7] sm:$0xff]  ;;  %v6270_v44 = vld [vmem:[%s10617_s7 + $0xd0] sm:$0xff]  ;;  %v6277_v45 = vld [vmem:[%s10617_s7 + $0xf8] sm:$0xff] }
 0x35b   : >> { %2201 = vmatpush.msra.mxu1 %v2151_v32  ;;  %v6249_v39 = vld [vmem:[%s10617_s7 + $0x60] sm:$0xff]  ;;  %2231 = vmatpush.msra.mxu2 %v6242_v33  ;;  %v6257_v46 = vld [vmem:[%s10617_s7 + $0x90] sm:$0xff]  ;;  %v6264_v47 = vld [vmem:[%s10617_s7 + $0xb8] sm:$0xff] }
 0x35c   : >> { %2263 = vmatpush.msra.mxu3 %v6250_v34  ;;  %2179 = vmatpush.msra.mxu0 %v6236_v36  ;;  %v2154_v40 = vld [vmem:[%s8137_s25 + $0x1] sm:$0xf]  ;;  %v6269_v48 = vld [vmem:[%s10617_s7 + $0xc8] sm:$0xff]  ;;  %v6276_v49 = vld [vmem:[%s10617_s7 + $0xf0] sm:$0xff] }
 0x35d   : >> { %v2149_v41 = vld [vmem:[%s8137_s25] sm:$0xf]  ;;  %6246 = vmatmul.msk.f32.vlgmr.msra.gmra.mxu2 %vm2160_vm10, %v2207_v35  ;;  %2202 = vmatpush.msra.mxu1 %v2150_v37  ;;  %v6256_v50 = vld [vmem:[%s10617_s7 + $0x88] sm:$0xff]  ;;  %v6263_v51 = vld [vmem:[%s10617_s7 + $0xb0] sm:$0xff] }
 0x35e   : >> { %2354 = vmatpush.msrb.mxu2 %v6271_v38  ;;  %2264 = vmatpush.msra.mxu3 %v6249_v39  ;;  %v6268_v52 = vld [vmem:[%s10617_s7 + $0xc0] sm:$0xff]  ;;  %v6275_v53 = vld [vmem:[%s10617_s7 + $0xe8] sm:$0xff]  ;;  %v6267_v56 = vld [vmem:[%s8137_s25 + $0x10] sm:$0xf] }
 0x35f   : >> { %6240 = vmatmul.msk.f32.vlgmr.msra.gmra.mxu0 %vm2160_vm10, %v2154_v40  ;;  %6241 = vmatmul.msk.f32.vlgmr.msra.gmra.mxu1 %vm2160_vm10, %v2149_v41  ;;  %v6255_v54 = vld [vmem:[%s10617_s7 + $0x80] sm:$0xff]  ;;  %v6262_v55 = vld [vmem:[%s10617_s7 + $0xa8] sm:$0xff]  ;;  %v6273_v60 = vld [vmem:[%s8137_s25 + $0x11] sm:$0xf] }
 0x360   : >> { %6253 = vmatmul.msk.f32.vlgmr.msra.gmra.mxu3 %vm2160_vm10, %v6248_v42  ;;  %2291 = vmatpush.msrb.mxu0 %v6258_v43  ;;  %v6274_v57 = vld [vmem:[%s10617_s7 + $0xe0] sm:$0xff]  ;;  %v6254_v58 = vld [vmem:[%s8137_s25 + $0x9] sm:$0xf]  ;;  %v6283_v61 = vld [vmem:[%s10617_s7 + $0x118] sm:$0xff] }
 0x361   : >> { %2355 = vmatpush.msrb.mxu2 %v6270_v44  ;;  %2384 = vmatpush.msrb.mxu3 %v6277_v45  ;;  %v6261_v59 = vld [vmem:[%s10617_s7 + $0xa0] sm:$0xff]  ;;  %v6260_v62 = vld [vmem:[%s8137_s25 + $0xa] sm:$0xf]  ;;  %v6282_v63 = vld [vmem:[%s10617_s7 + $0x110] sm:$0xff] }
 0x362   : >> { %2292 = vmatpush.msrb.mxu0 %v6257_v46  ;;  %2321 = vmatpush.msrb.mxu1 %v6264_v47  ;;  %v6281_v0 = vld [vmem:[%s10617_s7 + $0x108] sm:$0xff]  ;;  %v6280_v1 = vld [vmem:[%s10617_s7 + $0x100] sm:$0xff]  ;;  %v6279_v3 = vld [vmem:[%s8137_s25 + $0x12] sm:$0xf]  ;;  %s5918_s25 = scalar_lea.vmem [#allocation6], %s6235_s2 }
 0x363   : >> { %2356 = vmatpush.msrb.mxu2 %v6269_v48  ;;  %2385 = vmatpush.msrb.mxu3 %v6276_v49  ;;  %v8236_v24 = vld [vmem:[%s10573_s12] sm:$0x1] (%p2143_p8) }
 0x364   : >> { %2293 = vmatpush.msrb.mxu0 %v6256_v50  ;;  %2322 = vmatpush.msrb.mxu1 %v6263_v51 }
 0x365   : >> { %2357 = vmatpush.msrb.mxu2 %v6268_v52  ;;  %2386 = vmatpush.msrb.mxu3 %v6275_v53 }
 0x366   : >> { %2294 = vmatpush.msrb.mxu0 %v6255_v54  ;;  %2323 = vmatpush.msrb.mxu1 %v6262_v55 }
 0x367   : >> { %6272 = vmatmul.msk.f32.vlgmr.msrb.gmra.mxu2 %vm2160_vm10, %v6267_v56  ;;  %2387 = vmatpush.msrb.mxu3 %v6274_v57 }
 0x368   : >> { %6259 = vmatmul.msk.f32.vlgmr.msrb.gmra.mxu0 %vm2160_vm10, %v6254_v58  ;;  %2324 = vmatpush.msrb.mxu1 %v6261_v59 }
 0x369   : >> { %6278 = vmatmul.msk.f32.vlgmr.msrb.gmra.mxu3 %vm2160_vm10, %v6273_v60  ;;  %2414 = vmatpush.msra.mxu0 %v6283_v61 }
 0x36a   : >> { %6265 = vmatmul.msk.f32.vlgmr.msrb.gmra.mxu1 %vm2160_vm10, %v6260_v62 }
 0x36b   : >> { %2415 = vmatpush.msra.mxu0 %v6282_v63 }
 0x36d   : >> { %2416 = vmatpush.msra.mxu0 %v6281_v0 }
 0x36f   : >> { %2417 = vmatpush.msra.mxu0 %v6280_v1 }
 0x370   : >> { %6284 = vmatmul.msk.f32.vlgmr.msra.gmra.mxu0 %vm2160_vm10, %v6279_v3 }
 0x3dc   : >> { %v2181_v4 = vpop.f32.mrf.mxu0  ;;  %v2204_v5 = vpop.f32.mrf.mxu1 }
 0x3dd   : >> { %v2205_v6 = vadd.f32 %v2204_v5, %v2181_v4 }
 0x3e0   : >> { %v2233_v7 = vpop.f32.mrf.mxu2 }
 0x3e1   : >> { %v2236_v2 = vadd.f32 %v2233_v7, %v2205_v6 }
 0x3e3   : >> { %v2266_v8 = vpop.f32.mrf.mxu3 }
 0x3e4   : >> { %v2269_v9 = vadd.f32 %v2266_v8, %v2236_v2 }
 0x3e5   : >> { %v2296_v10 = vpop.f32.mrf.mxu0 }
 0x3e6   : >> { %v2299_v11 = vadd.f32 %v2296_v10, %v2269_v9 }
 0x3e7   : >> { %v2326_v12 = vpop.f32.mrf.mxu1 }
 0x3e8   : >> { %v2329_v13 = vadd.f32 %v2326_v12, %v2299_v11 }
 0x3ea   : >> { %v2359_v14 = vpop.f32.mrf.mxu2 }
 0x3eb   : >> { %v2362_v15 = vadd.f32 %v2359_v14, %v2329_v13 }
 0x3ec   : >> { %v2389_v16 = vpop.f32.mrf.mxu3 }
 0x3ed   : >> { %v2392_v17 = vadd.f32 %v2389_v16, %v2362_v15  ;;  %v2419_v18 = vpop.f32.mrf.mxu0 }
 0x3ef   : >> { %v2422_v20 = vadd.f32 %v2419_v18, %v2392_v17 }
 0x3f1   : >> { %v2426_v22 = vadd.f32 %v2424_v19, %v2422_v20  ;;  %2145 = sbr.rel (!%p2143_p8) target bundleno = 846 (0x34e), region = 426 }
 0x3f3   : >> { %v2427_v23 = vmax.f32 %v2426_v22, 0.0 }
 0x3f5   : >> { %6286 = vst.msk [vmem:[%s5918_s25 + $0x9] sm:$0xf] %vm2138_vm9, %v2427_v23 }
 0x3f6 LB: >> { %v6297_v25 = vld [vmem:[%s10572_s11 + $0x58] sm:$0xff]  ;;  %v6296_v27 = vld [vmem:[%s10572_s11 + $0x50] sm:$0xff]  ;;  %v6295_v31 = vld [vmem:[%s10572_s11 + $0x48] sm:$0xff]  ;;  %s6287_s5 = sshll.u32 %s7267_s9, 3  ;;  %v2715_v22 = vperm.slane %v8236_v24, 0  ;;  %vm2720_vm11 = vcmask 388096   ;;  %s7267_s9 = sphi %s8238_s9, %s2437_s9  }
 0x3f7   : >> { %v6291_v21 = vld [vmem:[%s10572_s11 + $0x38] sm:$0xff]  ;;  %2519 = vmatpush.msra.mxu2 %v6297_v25  ;;  %v6290_v29 = vld [vmem:[%s10572_s11 + $0x30] sm:$0xff]  ;;  %v6289_v33 = vld [vmem:[%s10572_s11 + $0x28] sm:$0xff]  ;;  %s8285_s28 = scalar_lea.vmem [#allocation6], %s6287_s5  ;;  %s2437_s9 = sadd.s32 1, %s7267_s9  }
 0x3f8   : >> { %v2444_v26 = vld [vmem:[%s10572_s11 + $0x18] sm:$0xff]  ;;  %2467 = vmatpush.msra.mxu0 %v6291_v21  ;;  %v2443_v30 = vld [vmem:[%s10572_s11 + $0x10] sm:$0xff]  ;;  %v2442_v34 = vld [vmem:[%s10572_s11 + $0x8] sm:$0xff]  ;;  %p2434_p9 = scmp.ge.s32.totalorder %s2437_s9, 4  }
 0x3f9   : >> { %v6304_v28 = vld [vmem:[%s10572_s11 + $0x78] sm:$0xff]  ;;  %2490 = vmatpush.msra.mxu1 %v2444_v26  ;;  %v6303_v32 = vld [vmem:[%s10572_s11 + $0x70] sm:$0xff]  ;;  %2520 = vmatpush.msra.mxu2 %v6296_v27  ;;  %v6294_v35 = vld [vmem:[%s10572_s11 + $0x40] sm:$0xff]  ;;  %s8386_s30 = smov (%p2434_p9), 0  }
 0x3fa   : >> { %2552 = vmatpush.msra.mxu3 %v6304_v28  ;;  %2468 = vmatpush.msra.mxu0 %v6290_v29  ;;  %v6302_v36 = vld [vmem:[%s10572_s11 + $0x68] sm:$0xff]  ;;  %v6288_v38 = vld [vmem:[%s10572_s11 + $0x20] sm:$0xff]  ;;  %v6323_v40 = vld [vmem:[%s10572_s11 + $0xd8] sm:$0xff] }
 0x3fb   : >> { %2491 = vmatpush.msra.mxu1 %v2443_v30  ;;  %2521 = vmatpush.msra.mxu2 %v6295_v31  ;;  %v2441_v39 = vld [vmem:[%s10572_s11] sm:$0xff]  ;;  %v6310_v45 = vld [vmem:[%s10572_s11 + $0x98] sm:$0xff]  ;;  %v6322_v46 = vld [vmem:[%s10572_s11 + $0xd0] sm:$0xff] }
 0x3fc   : >> { %2553 = vmatpush.msra.mxu3 %v6303_v32  ;;  %2469 = vmatpush.msra.mxu0 %v6289_v33  ;;  %v2498_v37 = vld [vmem:[%s8285_s28 + $0x2] sm:$0xf]  ;;  %v6300_v44 = vld [vmem:[%s8285_s28 + $0x8] sm:$0xf]  ;;  %v6329_v47 = vld [vmem:[%s10572_s11 + $0xf8] sm:$0xff] }
 0x3fd   : >> { %2492 = vmatpush.msra.mxu1 %v2442_v34  ;;  %v6301_v41 = vld [vmem:[%s10572_s11 + $0x60] sm:$0xff]  ;;  %2522 = vmatpush.msra.mxu2 %v6294_v35  ;;  %v6309_v48 = vld [vmem:[%s10572_s11 + $0x90] sm:$0xff]  ;;  %v6316_v49 = vld [vmem:[%s10572_s11 + $0xb8] sm:$0xff] }
 0x3fe   : >> { %2554 = vmatpush.msra.mxu3 %v6302_v36  ;;  %2470 = vmatpush.msra.mxu0 %v6288_v38  ;;  %v2445_v42 = vld [vmem:[%s8285_s28 + $0x1] sm:$0xf]  ;;  %v6321_v50 = vld [vmem:[%s10572_s11 + $0xc8] sm:$0xff]  ;;  %v6328_v51 = vld [vmem:[%s10572_s11 + $0xf0] sm:$0xff] }
 0x3ff   : >> { %v2440_v43 = vld [vmem:[%s8285_s28] sm:$0xf]  ;;  %6298 = vmatmul.msk.f32.vlgmr.msra.gmra.mxu2 %vm2160_vm10, %v2498_v37  ;;  %2493 = vmatpush.msra.mxu1 %v2441_v39  ;;  %v6308_v52 = vld [vmem:[%s10572_s11 + $0x88] sm:$0xff]  ;;  %v6315_v53 = vld [vmem:[%s10572_s11 + $0xb0] sm:$0xff] }
 0x400   : >> { %2645 = vmatpush.msrb.mxu2 %v6323_v40  ;;  %2555 = vmatpush.msra.mxu3 %v6301_v41  ;;  %v6320_v54 = vld [vmem:[%s10572_s11 + $0xc0] sm:$0xff]  ;;  %v6327_v55 = vld [vmem:[%s10572_s11 + $0xe8] sm:$0xff]  ;;  %v6319_v58 = vld [vmem:[%s8285_s28 + $0x10] sm:$0xf] }
 0x401   : >> { %6292 = vmatmul.msk.f32.vlgmr.msra.gmra.mxu0 %vm2160_vm10, %v2445_v42  ;;  %6293 = vmatmul.msk.f32.vlgmr.msra.gmra.mxu1 %vm2160_vm10, %v2440_v43  ;;  %v6307_v56 = vld [vmem:[%s10572_s11 + $0x80] sm:$0xff]  ;;  %v6314_v57 = vld [vmem:[%s10572_s11 + $0xa8] sm:$0xff]  ;;  %v6325_v62 = vld [vmem:[%s8285_s28 + $0x11] sm:$0xf] }
 0x402   : >> { %6305 = vmatmul.msk.f32.vlgmr.msra.gmra.mxu3 %vm2160_vm10, %v6300_v44  ;;  %2582 = vmatpush.msrb.mxu0 %v6310_v45  ;;  %v6326_v59 = vld [vmem:[%s10572_s11 + $0xe0] sm:$0xff]  ;;  %v6306_v60 = vld [vmem:[%s8285_s28 + $0x9] sm:$0xf]  ;;  %v6335_v63 = vld [vmem:[%s10572_s11 + $0x118] sm:$0xff] }
 0x403   : >> { %2646 = vmatpush.msrb.mxu2 %v6322_v46  ;;  %2675 = vmatpush.msrb.mxu3 %v6329_v47  ;;  %v6313_v61 = vld [vmem:[%s10572_s11 + $0xa0] sm:$0xff]  ;;  %v6312_v0 = vld [vmem:[%s8285_s28 + $0xa] sm:$0xf]  ;;  %v6334_v1 = vld [vmem:[%s10572_s11 + $0x110] sm:$0xff] }
 0x404   : >> { %2583 = vmatpush.msrb.mxu0 %v6309_v48  ;;  %2612 = vmatpush.msrb.mxu1 %v6316_v49  ;;  %v6333_v3 = vld [vmem:[%s10572_s11 + $0x108] sm:$0xff]  ;;  %v6332_v4 = vld [vmem:[%s10572_s11 + $0x100] sm:$0xff]  ;;  %v6331_v5 = vld [vmem:[%s8285_s28 + $0x12] sm:$0xf]  ;;  %s5929_s28 = scalar_lea.vmem [#allocation7], %s6287_s5 }
 0x405   : >> { %2647 = vmatpush.msrb.mxu2 %v6321_v50  ;;  %2676 = vmatpush.msrb.mxu3 %v6328_v51  ;;  %v8384_v26 = vld [vmem:[%s10575_s14] sm:$0x1] (%p2434_p9) }
 0x406   : >> { %2584 = vmatpush.msrb.mxu0 %v6308_v52  ;;  %2613 = vmatpush.msrb.mxu1 %v6315_v53 }
 0x407   : >> { %2648 = vmatpush.msrb.mxu2 %v6320_v54  ;;  %2677 = vmatpush.msrb.mxu3 %v6327_v55 }
 0x408   : >> { %2585 = vmatpush.msrb.mxu0 %v6307_v56  ;;  %2614 = vmatpush.msrb.mxu1 %v6314_v57 }
 0x409   : >> { %6324 = vmatmul.msk.f32.vlgmr.msrb.gmra.mxu2 %vm2160_vm10, %v6319_v58  ;;  %2678 = vmatpush.msrb.mxu3 %v6326_v59 }
 0x40a   : >> { %6311 = vmatmul.msk.f32.vlgmr.msrb.gmra.mxu0 %vm2160_vm10, %v6306_v60  ;;  %2615 = vmatpush.msrb.mxu1 %v6313_v61 }
 0x40b   : >> { %6330 = vmatmul.msk.f32.vlgmr.msrb.gmra.mxu3 %vm2160_vm10, %v6325_v62  ;;  %2705 = vmatpush.msra.mxu0 %v6335_v63 }
 0x40c   : >> { %6317 = vmatmul.msk.f32.vlgmr.msrb.gmra.mxu1 %vm2160_vm10, %v6312_v0 }
 0x40d   : >> { %2706 = vmatpush.msra.mxu0 %v6334_v1 }
 0x40f   : >> { %2707 = vmatpush.msra.mxu0 %v6333_v3 }
 0x411   : >> { %2708 = vmatpush.msra.mxu0 %v6332_v4 }
 0x412   : >> { %6336 = vmatmul.msk.f32.vlgmr.msra.gmra.mxu0 %vm2160_vm10, %v6331_v5 }
 0x47e   : >> { %v2472_v6 = vpop.f32.mrf.mxu0  ;;  %v2495_v7 = vpop.f32.mrf.mxu1 }
 0x47f   : >> { %v2496_v2 = vadd.f32 %v2495_v7, %v2472_v6 }
 0x482   : >> { %v2524_v8 = vpop.f32.mrf.mxu2 }
 0x483   : >> { %v2527_v9 = vadd.f32 %v2524_v8, %v2496_v2 }
 0x485   : >> { %v2557_v10 = vpop.f32.mrf.mxu3 }
 0x486   : >> { %v2560_v11 = vadd.f32 %v2557_v10, %v2527_v9 }
 0x487   : >> { %v2587_v12 = vpop.f32.mrf.mxu0 }
 0x488   : >> { %v2590_v13 = vadd.f32 %v2587_v12, %v2560_v11 }
 0x489   : >> { %v2617_v14 = vpop.f32.mrf.mxu1 }
 0x48a   : >> { %v2620_v15 = vadd.f32 %v2617_v14, %v2590_v13 }
 0x48c   : >> { %v2650_v16 = vpop.f32.mrf.mxu2 }
 0x48d   : >> { %v2653_v17 = vadd.f32 %v2650_v16, %v2620_v15 }
 0x48e   : >> { %v2680_v18 = vpop.f32.mrf.mxu3 }
 0x48f   : >> { %v2683_v19 = vadd.f32 %v2680_v18, %v2653_v17  ;;  %v2710_v20 = vpop.f32.mrf.mxu0 }
 0x491   : >> { %v2713_v23 = vadd.f32 %v2710_v20, %v2683_v19 }
 0x493   : >> { %v2717_v25 = vadd.f32 %v2715_v22, %v2713_v23  ;;  %2436 = sbr.rel (!%p2434_p9) target bundleno = 1014 (0x3f6), region = 437 }
 0x495   : >> { %v2718_v21 = vmax.f32 %v2717_v25, 0.0 }
 0x497   : >> { %6338 = vst.msk [vmem:[%s5929_s28 + $0x9] sm:$0xf] %vm2720_vm11, %v2718_v21 }
 0x498 LB: >> { %v6345_v27 = vld [vmem:[%s10574_s13 + $0x58] sm:$0xff]  ;;  %v6353_v28 = vld [vmem:[%s10574_s13 + $0x88] sm:$0xff]  ;;  %v6344_v24 = vld [vmem:[%s10574_s13 + $0x50] sm:$0xff]  ;;  %s10594_s26 = sshll.u32 %s7271_s30, 3  ;;  %s7271_s30 = sphi %s8386_s30, %s2728_s30  }
 0x499   : >> { %2759 = vmatpush.msra.mxu0 %v6345_v27  ;;  %2813 = vmatpush.msra.mxu2 %v6353_v28  ;;  %v6352_v29 = vld [vmem:[%s10574_s13 + $0x80] sm:$0xff]  ;;  %v6362_v30 = vld [vmem:[%s10574_s13 + $0xb8] sm:$0xff]  ;;  %v2737_v31 = vld [vmem:[%s10574_s13 + $0x28] sm:$0xff]  ;;  %s8472_s5 = scalar_lea.vmem [#allocation7], %s10594_s26 }
 0x49a   : >> { %2848 = vmatpush.msra.mxu3 %v6362_v30  ;;  %2782 = vmatpush.msra.mxu1 %v2737_v31  ;;  %v6343_v32 = vld [vmem:[%s10574_s13 + $0x48] sm:$0xff]  ;;  %v6351_v33 = vld [vmem:[%s10574_s13 + $0x78] sm:$0xff]  ;;  %v6361_v34 = vld [vmem:[%s10574_s13 + $0xb0] sm:$0xff] }
 0x49b   : >> { %2760 = vmatpush.msra.mxu0 %v6344_v24  ;;  %2814 = vmatpush.msra.mxu2 %v6352_v29  ;;  %v2736_v35 = vld [vmem:[%s10574_s13 + $0x20] sm:$0xff]  ;;  %v6350_v37 = vld [vmem:[%s10574_s13 + $0x70] sm:$0xff]  ;;  %v6360_v38 = vld [vmem:[%s10574_s13 + $0xa8] sm:$0xff] }
 0x49c   : >> { %v6342_v36 = vld [vmem:[%s10574_s13 + $0x40] sm:$0xff]  ;;  %2849 = vmatpush.msra.mxu3 %v6361_v34  ;;  %2783 = vmatpush.msra.mxu1 %v2736_v35  ;;  %v2735_v39 = vld [vmem:[%s10574_s13 + $0x18] sm:$0xff]  ;;  %v2734_v41 = vld [vmem:[%s10574_s13 + $0x10] sm:$0xff] }
 0x49d   : >> { %2761 = vmatpush.msra.mxu0 %v6343_v32  ;;  %2815 = vmatpush.msra.mxu2 %v6351_v33  ;;  %v6359_v40 = vld [vmem:[%s10574_s13 + $0xa0] sm:$0xff]  ;;  %v6341_v42 = vld [vmem:[%s10574_s13 + $0x38] sm:$0xff]  ;;  %v6349_v43 = vld [vmem:[%s10574_s13 + $0x68] sm:$0xff] }
 0x49e   : >> { %2850 = vmatpush.msra.mxu3 %v6360_v38  ;;  %2784 = vmatpush.msra.mxu1 %v2735_v39  ;;  %v6358_v44 = vld [vmem:[%s10574_s13 + $0x98] sm:$0xff]  ;;  %v2733_v45 = vld [vmem:[%s10574_s13 + $0x8] sm:$0xff]  ;;  %v6340_v46 = vld [vmem:[%s10574_s13 + $0x30] sm:$0xff] }
 0x49f   : >> { %2762 = vmatpush.msra.mxu0 %v6342_v36  ;;  %2816 = vmatpush.msra.mxu2 %v6350_v37  ;;  %v6348_v47 = vld [vmem:[%s10574_s13 + $0x60] sm:$0xff]  ;;  %v6370_v48 = vld [vmem:[%s10574_s13 + $0xe8] sm:$0xff]  ;;  %v6357_v50 = vld [vmem:[%s10574_s13 + $0x90] sm:$0xff] }
 0x4a0   : >> { %2851 = vmatpush.msra.mxu3 %v6359_v40  ;;  %2785 = vmatpush.msra.mxu1 %v2734_v41  ;;  %v6387_v49 = vld [vmem:[%s10574_s13 + $0x148] sm:$0xff]  ;;  %v2732_v51 = vld [vmem:[%s10574_s13] sm:$0xff]  ;;  %v6395_v55 = vld [vmem:[%s10574_s13 + $0x178] sm:$0xff]  ;;  %v3023_v41 = vperm.slane %v8384_v26, 0 }
 0x4a1   : >> { %2763 = vmatpush.msra.mxu0 %v6341_v42  ;;  %2817 = vmatpush.msra.mxu2 %v6349_v43  ;;  %v2792_v52 = vld [vmem:[%s8472_s5 + $0x2] sm:$0xf]  ;;  %v6378_v56 = vld [vmem:[%s10574_s13 + $0x118] sm:$0xff]  ;;  %v6356_v58 = vld [vmem:[%s8472_s5 + $0x8] sm:$0xf] }
 0x4a2   : >> { %2852 = vmatpush.msra.mxu3 %v6358_v44  ;;  %2786 = vmatpush.msra.mxu1 %v2733_v45  ;;  %v6369_v53 = vld [vmem:[%s10574_s13 + $0xe0] sm:$0xff]  ;;  %v6368_v59 = vld [vmem:[%s10574_s13 + $0xd8] sm:$0xff]  ;;  %v6394_v61 = vld [vmem:[%s10574_s13 + $0x170] sm:$0xff] }
 0x4a3   : >> { %2764 = vmatpush.msra.mxu0 %v6340_v46  ;;  %2818 = vmatpush.msra.mxu2 %v6348_v47  ;;  %v6386_v54 = vld [vmem:[%s10574_s13 + $0x140] sm:$0xff]  ;;  %v6385_v60 = vld [vmem:[%s10574_s13 + $0x138] sm:$0xff]  ;;  %v6377_v62 = vld [vmem:[%s10574_s13 + $0x110] sm:$0xff] }
 0x4a4   : >> { %2853 = vmatpush.msra.mxu3 %v6357_v50  ;;  %2787 = vmatpush.msra.mxu1 %v2732_v51  ;;  %v2738_v57 = vld [vmem:[%s8472_s5 + $0x1] sm:$0xf]  ;;  %v6367_v63 = vld [vmem:[%s10574_s13 + $0xd0] sm:$0xff]  ;;  %v6393_v3 = vld [vmem:[%s10574_s13 + $0x168] sm:$0xff] }
 0x4a5   : >> { %2880 = vmatpush.msrb.mxu0 %v6370_v48  ;;  %2947 = vmatpush.msrb.mxu2 %v6387_v49  ;;  %v2731_v0 = vld [vmem:[%s8472_s5] sm:$0xf]  ;;  %v6384_v1 = vld [vmem:[%s10574_s13 + $0x130] sm:$0xff]  ;;  %v6376_v4 = vld [vmem:[%s10574_s13 + $0x108] sm:$0xff] }
 0x4a6   : >> { %6354 = vmatmul.msk.f32.vlgmr.msra.gmra.mxu2 %vm883_vm4, %v2792_v52  ;;  %2979 = vmatpush.msrb.mxu3 %v6395_v55  ;;  %v6366_v5 = vld [vmem:[%s10574_s13 + $0xc8] sm:$0xff]  ;;  %v6392_v7 = vld [vmem:[%s10574_s13 + $0x160] sm:$0xff]  ;;  %v6391_v10 = vld [vmem:[%s10574_s13 + $0x158] sm:$0xff] }
 0x4a7   : >> { %2881 = vmatpush.msrb.mxu0 %v6369_v53  ;;  %2948 = vmatpush.msrb.mxu2 %v6386_v54  ;;  %v6383_v6 = vld [vmem:[%s10574_s13 + $0x128] sm:$0xff]  ;;  %v6375_v2 = vld [vmem:[%s10574_s13 + $0x100] sm:$0xff]  ;;  %v6374_v11 = vld [vmem:[%s10574_s13 + $0xf8] sm:$0xff] }
 0x4a8   : >> { %2912 = vmatpush.msrb.mxu1 %v6378_v56  ;;  %6346 = vmatmul.msk.f32.vlgmr.msra.gmra.mxu0 %vm883_vm4, %v2738_v57  ;;  %v6365_v8 = vld [vmem:[%s10574_s13 + $0xc0] sm:$0xff]  ;;  %v6381_v12 = vld [vmem:[%s8472_s5 + $0x10] sm:$0xf]  ;;  %v6403_v13 = vld [vmem:[%s10574_s13 + $0x1a8] sm:$0xff] }
 0x4a9   : >> { %6363 = vmatmul.msk.f32.vlgmr.msra.gmra.mxu3 %vm883_vm4, %v6356_v58  ;;  %2882 = vmatpush.msrb.mxu0 %v6368_v59  ;;  %v6382_v9 = vld [vmem:[%s10574_s13 + $0x120] sm:$0xff]  ;;  %v6364_v14 = vld [vmem:[%s8472_s5 + $0x9] sm:$0xf]  ;;  %v6390_v15 = vld [vmem:[%s10574_s13 + $0x150] sm:$0xff] }
 0x4aa   : >> { %2949 = vmatpush.msrb.mxu2 %v6385_v60  ;;  %2980 = vmatpush.msrb.mxu3 %v6394_v61  ;;  %v6373_v16 = vld [vmem:[%s10574_s13 + $0xf0] sm:$0xff]  ;;  %v6402_v18 = vld [vmem:[%s10574_s13 + $0x1a0] sm:$0xff]  ;;  %v6372_v19 = vld [vmem:[%s8472_s5 + $0xa] sm:$0xf] }
 0x4ab   : >> { %2913 = vmatpush.msrb.mxu1 %v6377_v62  ;;  %2883 = vmatpush.msrb.mxu0 %v6367_v63  ;;  %v6389_v17 = vld [vmem:[%s8472_s5 + $0x11] sm:$0xf]  ;;  %v6401_v20 = vld [vmem:[%s10574_s13 + $0x198] sm:$0xff]  ;;  %v6399_v23 = vld [vmem:[%s10574_s13 + $0x188] sm:$0xff] }
 0x4ac   : >> { %6347 = vmatmul.msk.f32.vlgmr.msra.gmra.mxu1 %vm883_vm4, %v2731_v0  ;;  %2950 = vmatpush.msrb.mxu2 %v6384_v1  ;;  %v6400_v22 = vld [vmem:[%s10574_s13 + $0x190] sm:$0xff]  ;;  %v6398_v25 = vld [vmem:[%s10574_s13 + $0x180] sm:$0xff] }
 0x4ad   : >> { %2981 = vmatpush.msrb.mxu3 %v6393_v3  ;;  %2914 = vmatpush.msrb.mxu1 %v6376_v4  ;;  %v6397_v21 = vld [vmem:[%s8472_s5 + $0x12] sm:$0xf]  ;;  %s10618_s5 = sshll.u32 %s7271_s30, 3  ;;  %s2728_s30 = sadd.s32 1, %s7271_s30  }
 0x4ae   : >> { %2884 = vmatpush.msrb.mxu0 %v6366_v5  ;;  %2951 = vmatpush.msrb.mxu2 %v6383_v6  ;;  %s5940_s28 = scalar_lea.vmem [#allocation8], %s10618_s5  ;;  %p2725_p10 = scmp.ge.s32.totalorder %s2728_s30, 4  }
 0x4af   : >> { %2982 = vmatpush.msrb.mxu3 %v6392_v7  ;;  %2915 = vmatpush.msrb.mxu1 %v6375_v2  ;;  %v8586_v46 = vld [vmem:[%s10577_s16] sm:$0x3] (%p2725_p10)  ;;  %s8588_s3 = smov (%p2725_p10), 0  }
 0x4b0   : >> { %2885 = vmatpush.msrb.mxu0 %v6365_v8  ;;  %2952 = vmatpush.msrb.mxu2 %v6382_v9 }
 0x4b1   : >> { %2983 = vmatpush.msrb.mxu3 %v6391_v10  ;;  %2916 = vmatpush.msrb.mxu1 %v6374_v11 }
 0x4b2   : >> { %6388 = vmatmul.msk.f32.vlgmr.msrb.gmra.mxu2 %vm883_vm4, %v6381_v12  ;;  %3011 = vmatpush.msra.mxu0 %v6403_v13 }
 0x4b3   : >> { %6371 = vmatmul.msk.f32.vlgmr.msrb.gmra.mxu0 %vm883_vm4, %v6364_v14  ;;  %2984 = vmatpush.msrb.mxu3 %v6390_v15 }
 0x4b4   : >> { %2917 = vmatpush.msrb.mxu1 %v6373_v16  ;;  %6396 = vmatmul.msk.f32.vlgmr.msrb.gmra.mxu3 %vm883_vm4, %v6389_v17 }
 0x4b5   : >> { %3012 = vmatpush.msra.mxu0 %v6402_v18  ;;  %6379 = vmatmul.msk.f32.vlgmr.msrb.gmra.mxu1 %vm883_vm4, %v6372_v19 }
 0x4b7   : >> { %3013 = vmatpush.msra.mxu0 %v6401_v20 }
 0x4b9   : >> { %3014 = vmatpush.msra.mxu0 %v6400_v22 }
 0x4bb   : >> { %3015 = vmatpush.msra.mxu0 %v6399_v23 }
 0x4bd   : >> { %3016 = vmatpush.msra.mxu0 %v6398_v25 }
 0x4be   : >> { %6404 = vmatmul.msk.f32.vlgmr.msra.gmra.mxu0 %vm883_vm4, %v6397_v21 }
 0x525   : >> { %v2766_v27 = vpop.f32.mrf.mxu0 }
 0x529   : >> { %v2789_v28 = vpop.f32.mrf.mxu1  ;;  %v2820_v24 = vpop.f32.mrf.mxu2 }
 0x52a   : >> { %v2790_v29 = vadd.f32 %v2789_v28, %v2766_v27 }
 0x52c   : >> { %v2823_v30 = vadd.f32 %v2820_v24, %v2790_v29  ;;  %v2855_v31 = vpop.f32.mrf.mxu3 }
 0x52e   : >> { %v2858_v32 = vadd.f32 %v2855_v31, %v2823_v30 }
 0x530   : >> { %v2887_v33 = vpop.f32.mrf.mxu0 }
 0x531   : >> { %v2890_v34 = vadd.f32 %v2887_v33, %v2858_v32 }
 0x532   : >> { %v2919_v35 = vpop.f32.mrf.mxu1 }
 0x533   : >> { %v2922_v36 = vadd.f32 %v2919_v35, %v2890_v34 }
 0x535   : >> { %v2954_v37 = vpop.f32.mrf.mxu2 }
 0x536   : >> { %v2957_v38 = vadd.f32 %v2954_v37, %v2922_v36 }
 0x537   : >> { %v2986_v39 = vpop.f32.mrf.mxu3 }
 0x538   : >> { %v2989_v40 = vadd.f32 %v2986_v39, %v2957_v38 }
 0x53b   : >> { %v3018_v42 = vpop.f32.mrf.mxu0 }
 0x53c   : >> { %v3021_v43 = vadd.f32 %v3018_v42, %v2989_v40 }
 0x53e   : >> { %v3025_v44 = vadd.f32 %v3023_v41, %v3021_v43  ;;  %2727 = sbr.rel (!%p2725_p10) target bundleno = 1176 (0x498), region = 448 }
 0x540   : >> { %v3026_v45 = vmax.f32 %v3025_v44, 0.0 }
 0x542   : >> { %6406 = vst.msk [vmem:[%s5940_s28 + $0x12] sm:$0xf] %vm2720_vm11, %v3026_v45 }
 0x543 LB: >> { %v6418_v47 = vld [vmem:[%s10576_s15 + $0xb0] sm:$0xff]  ;;  %v6419_v48 = vld [vmem:[%s10576_s15 + $0xb8] sm:$0xff]  ;;  %v6416_v50 = vld [vmem:[%s10576_s15 + $0xa0] sm:$0xff]  ;;  %s6407_s8 = sshll.u32 %s7275_s3, 3  ;;  %vm3590_vm12 = vcmask 521218   ;;  %s7275_s3 = sphi %s8588_s3, %s3036_s3  }
 0x544   : >> { %v3050_v26 = vld [vmem:[%s10576_s15 + $0x50] sm:$0xff]  ;;  %3079 = vmatpush.msra.mxu0 %v6418_v47  ;;  %3099 = vmatpush.msra.mxu1 %v6419_v48  ;;  %v3051_v49 = vld [vmem:[%s10576_s15 + $0x58] sm:$0xff]  ;;  %v6417_v51 = vld [vmem:[%s10576_s15 + $0xa8] sm:$0xff]  ;;  %s8690_s9 = scalar_lea.vmem [#allocation8], %s6407_s8 }
 0x545   : >> { %3122 = vmatpush.msra.mxu2 %v3050_v26  ;;  %3142 = vmatpush.msra.mxu3 %v3051_v49  ;;  %v3048_v52 = vld [vmem:[%s10576_s15 + $0x40] sm:$0xff]  ;;  %v3049_v53 = vld [vmem:[%s10576_s15 + $0x48] sm:$0xff]  ;;  %v6414_v54 = vld [vmem:[%s10576_s15 + $0x90] sm:$0xff] }
 0x546   : >> { %3080 = vmatpush.msra.mxu0 %v6416_v50  ;;  %3100 = vmatpush.msra.mxu1 %v6417_v51  ;;  %v6415_v55 = vld [vmem:[%s10576_s15 + $0x98] sm:$0xff]  ;;  %v3046_v56 = vld [vmem:[%s10576_s15 + $0x30] sm:$0xff]  ;;  %v6412_v58 = vld [vmem:[%s10576_s15 + $0x80] sm:$0xff] }
 0x547   : >> { %v3047_v57 = vld [vmem:[%s10576_s15 + $0x38] sm:$0xff]  ;;  %3123 = vmatpush.msra.mxu2 %v3048_v52  ;;  %3143 = vmatpush.msra.mxu3 %v3049_v53  ;;  %v6413_v59 = vld [vmem:[%s10576_s15 + $0x88] sm:$0xff]  ;;  %v3044_v60 = vld [vmem:[%s10576_s15 + $0x20] sm:$0xff] }
 0x548   : >> { %3081 = vmatpush.msra.mxu0 %v6414_v54  ;;  %3101 = vmatpush.msra.mxu1 %v6415_v55  ;;  %v3045_v61 = vld [vmem:[%s10576_s15 + $0x28] sm:$0xff]  ;;  %v6410_v62 = vld [vmem:[%s10576_s15 + $0x70] sm:$0xff]  ;;  %v6411_v63 = vld [vmem:[%s10576_s15 + $0x78] sm:$0xff] }
 0x549   : >> { %3124 = vmatpush.msra.mxu2 %v3046_v56  ;;  %3144 = vmatpush.msra.mxu3 %v3047_v57  ;;  %v3042_v0 = vld [vmem:[%s10576_s15 + $0x10] sm:$0xff]  ;;  %v3043_v1 = vld [vmem:[%s10576_s15 + $0x18] sm:$0xff]  ;;  %v6408_v3 = vld [vmem:[%s10576_s15 + $0x60] sm:$0xff] }
 0x54a   : >> { %3082 = vmatpush.msra.mxu0 %v6412_v58  ;;  %3102 = vmatpush.msra.mxu1 %v6413_v59  ;;  %v6409_v4 = vld [vmem:[%s10576_s15 + $0x68] sm:$0xff]  ;;  %v3040_v5 = vld [vmem:[%s10576_s15] sm:$0xff]  ;;  %v6434_v7 = vld [vmem:[%s10576_s15 + $0x110] sm:$0xff] }
 0x54b   : >> { %3125 = vmatpush.msra.mxu2 %v3044_v60  ;;  %3145 = vmatpush.msra.mxu3 %v3045_v61  ;;  %v3041_v6 = vld [vmem:[%s10576_s15 + $0x8] sm:$0xff]  ;;  %v6435_v2 = vld [vmem:[%s10576_s15 + $0x118] sm:$0xff]  ;;  %v6450_v8 = vld [vmem:[%s10576_s15 + $0x170] sm:$0xff] }
 0x54c   : >> { %3083 = vmatpush.msra.mxu0 %v6410_v62  ;;  %3103 = vmatpush.msra.mxu1 %v6411_v63  ;;  %v6451_v9 = vld [vmem:[%s10576_s15 + $0x178] sm:$0xff]  ;;  %v6432_v10 = vld [vmem:[%s10576_s15 + $0x100] sm:$0xff]  ;;  %v6433_v11 = vld [vmem:[%s10576_s15 + $0x108] sm:$0xff] }
 0x54d   : >> { %3126 = vmatpush.msra.mxu2 %v3042_v0  ;;  %3146 = vmatpush.msra.mxu3 %v3043_v1  ;;  %v6448_v12 = vld [vmem:[%s10576_s15 + $0x160] sm:$0xff]  ;;  %v6449_v13 = vld [vmem:[%s10576_s15 + $0x168] sm:$0xff]  ;;  %v6430_v15 = vld [vmem:[%s10576_s15 + $0xf0] sm:$0xff] }
 0x54e   : >> { %3084 = vmatpush.msra.mxu0 %v6408_v3  ;;  %3104 = vmatpush.msra.mxu1 %v6409_v4  ;;  %v3039_v14 = vld [vmem:[%s8690_s9] sm:$0xf]  ;;  %v6431_v16 = vld [vmem:[%s10576_s15 + $0xf8] sm:$0xff]  ;;  %v6446_v17 = vld [vmem:[%s10576_s15 + $0x150] sm:$0xff] }
 0x54f   : >> { %3127 = vmatpush.msra.mxu2 %v3040_v5  ;;  %3147 = vmatpush.msra.mxu3 %v3041_v6  ;;  %v6447_v18 = vld [vmem:[%s10576_s15 + $0x158] sm:$0xff]  ;;  %v3052_v19 = vld [vmem:[%s8690_s9 + $0x2] sm:$0xf]  ;;  %v6429_v22 = vld [vmem:[%s10576_s15 + $0xe8] sm:$0xff] }
 0x550   : >> { %3179 = vmatpush.msrb.mxu0 %v6434_v7  ;;  %3199 = vmatpush.msrb.mxu1 %v6435_v2  ;;  %v6428_v20 = vld [vmem:[%s10576_s15 + $0xe0] sm:$0xff]  ;;  %v6445_v25 = vld [vmem:[%s10576_s15 + $0x148] sm:$0xff]  ;;  %v6426_v21 = vld [vmem:[%s10576_s15 + $0xd0] sm:$0xff] }
 0x551   : >> { %3241 = vmatpush.msrb.mxu2 %v6450_v8  ;;  %3261 = vmatpush.msrb.mxu3 %v6451_v9  ;;  %v6444_v23 = vld [vmem:[%s10576_s15 + $0x140] sm:$0xff]  ;;  %v6427_v27 = vld [vmem:[%s10576_s15 + $0xd8] sm:$0xff]  ;;  %v6442_v28 = vld [vmem:[%s10576_s15 + $0x130] sm:$0xff] }
 0x552   : >> { %3180 = vmatpush.msrb.mxu0 %v6432_v10  ;;  %3200 = vmatpush.msrb.mxu1 %v6433_v11  ;;  %v6443_v24 = vld [vmem:[%s10576_s15 + $0x138] sm:$0xff]  ;;  %v6424_v29 = vld [vmem:[%s10576_s15 + $0xc0] sm:$0xff]  ;;  %v6425_v30 = vld [vmem:[%s10576_s15 + $0xc8] sm:$0xff] }
 0x553   : >> { %3242 = vmatpush.msrb.mxu2 %v6448_v12  ;;  %3262 = vmatpush.msrb.mxu3 %v6449_v13  ;;  %v6440_v31 = vld [vmem:[%s10576_s15 + $0x120] sm:$0xff]  ;;  %v6441_v32 = vld [vmem:[%s10576_s15 + $0x128] sm:$0xff]  ;;  %v6439_v33 = vld [vmem:[%s8690_s9 + $0x10] sm:$0xf] }
 0x554   : >> { %6422 = vmatmul.msk.f32.vlgmr.msra.gmra.mxu2 %vm883_vm4, %v3039_v14  ;;  %6423 = vmatmul.msk.f32.vlgmr.msra.gmra.mxu3 %vm883_vm4, %v3039_v14  ;;  %v6465_v34 = vld [vmem:[%s10576_s15 + $0x1d0] sm:$0xff]  ;;  %v6466_v35 = vld [vmem:[%s10576_s15 + $0x1d8] sm:$0xff]  ;;  %v3152_v38 = vld [vmem:[%s8690_s9 + $0x4] sm:$0xf] }
 0x555   : >> { %3181 = vmatpush.msrb.mxu0 %v6430_v15  ;;  %3201 = vmatpush.msrb.mxu1 %v6431_v16  ;;  %v6480_v36 = vld [vmem:[%s10576_s15 + $0x230] sm:$0xff]  ;;  %v6481_v37 = vld [vmem:[%s10576_s15 + $0x238] sm:$0xff]  ;;  %v6463_v39 = vld [vmem:[%s10576_s15 + $0x1c0] sm:$0xff] }
 0x556   : >> { %3243 = vmatpush.msrb.mxu2 %v6446_v17  ;;  %3263 = vmatpush.msrb.mxu3 %v6447_v18  ;;  %v6464_v40 = vld [vmem:[%s10576_s15 + $0x1c8] sm:$0xff]  ;;  %v6478_v41 = vld [vmem:[%s10576_s15 + $0x220] sm:$0xff]  ;;  %v6461_v43 = vld [vmem:[%s10576_s15 + $0x1b0] sm:$0xff] }
 0x557   : >> { %6420 = vmatmul.msk.f32.vlgmr.msra.gmra.mxu0 %vm883_vm4, %v3052_v19  ;;  %6421 = vmatmul.msk.f32.vlgmr.msra.gmra.mxu1 %vm883_vm4, %v3052_v19  ;;  %v6479_v42 = vld [vmem:[%s10576_s15 + $0x228] sm:$0xff]  ;;  %v6462_v44 = vld [vmem:[%s10576_s15 + $0x1b8] sm:$0xff]  ;;  %v6476_v45 = vld [vmem:[%s10576_s15 + $0x210] sm:$0xff] }
 0x558   : >> { %3182 = vmatpush.msrb.mxu0 %v6428_v20  ;;  %3202 = vmatpush.msrb.mxu1 %v6429_v22  ;;  %v6477_v47 = vld [vmem:[%s10576_s15 + $0x218] sm:$0xff]  ;;  %v6459_v48 = vld [vmem:[%s10576_s15 + $0x1a0] sm:$0xff]  ;;  %v6460_v26 = vld [vmem:[%s10576_s15 + $0x1a8] sm:$0xff] }
 0x559   : >> { %3244 = vmatpush.msrb.mxu2 %v6444_v23  ;;  %3264 = vmatpush.msrb.mxu3 %v6445_v25  ;;  %v6474_v49 = vld [vmem:[%s10576_s15 + $0x200] sm:$0xff]  ;;  %v6475_v50 = vld [vmem:[%s10576_s15 + $0x208] sm:$0xff]  ;;  %v6457_v51 = vld [vmem:[%s10576_s15 + $0x190] sm:$0xff] }
 0x55a   : >> { %3183 = vmatpush.msrb.mxu0 %v6426_v21  ;;  %3203 = vmatpush.msrb.mxu1 %v6427_v27  ;;  %v6458_v52 = vld [vmem:[%s10576_s15 + $0x198] sm:$0xff]  ;;  %v6472_v53 = vld [vmem:[%s10576_s15 + $0x1f0] sm:$0xff]  ;;  %v6455_v55 = vld [vmem:[%s10576_s15 + $0x180] sm:$0xff] }
 0x55b   : >> { %3245 = vmatpush.msrb.mxu2 %v6442_v28  ;;  %3265 = vmatpush.msrb.mxu3 %v6443_v24  ;;  %v6473_v54 = vld [vmem:[%s10576_s15 + $0x1f8] sm:$0xff]  ;;  %v6456_v56 = vld [vmem:[%s10576_s15 + $0x188] sm:$0xff]  ;;  %v6470_v57 = vld [vmem:[%s10576_s15 + $0x1e0] sm:$0xff] }
 0x55c   : >> { %3184 = vmatpush.msrb.mxu0 %v6424_v29  ;;  %3204 = vmatpush.msrb.mxu1 %v6425_v30  ;;  %v6471_v58 = vld [vmem:[%s10576_s15 + $0x1e8] sm:$0xff]  ;;  %v6454_v59 = vld [vmem:[%s8690_s9 + $0x12] sm:$0xf]  ;;  %v6497_v62 = vld [vmem:[%s10576_s15 + $0x298] sm:$0xff] }
 0x55d   : >> { %3246 = vmatpush.msrb.mxu2 %v6440_v31  ;;  %3266 = vmatpush.msrb.mxu3 %v6441_v32  ;;  %v6469_v60 = vld [vmem:[%s8690_s9 + $0x14] sm:$0xf]  ;;  %v6512_v0 = vld [vmem:[%s10576_s15 + $0x2f8] sm:$0xff]  ;;  %v6494_v1 = vld [vmem:[%s10576_s15 + $0x280] sm:$0xff] }
 0x55e   : >> { %6452 = vmatmul.msk.f32.vlgmr.msrb.gmra.mxu2 %vm883_vm4, %v6439_v33  ;;  %6453 = vmatmul.msk.f32.vlgmr.msrb.gmra.mxu3 %vm883_vm4, %v6439_v33  ;;  %v6496_v61 = vld [vmem:[%s10576_s15 + $0x290] sm:$0xff]  ;;  %v6495_v3 = vld [vmem:[%s10576_s15 + $0x288] sm:$0xff]  ;;  %v6509_v4 = vld [vmem:[%s10576_s15 + $0x2e0] sm:$0xff] }
 0x55f   : >> { %3300 = vmatpush.msra.mxu0 %v6465_v34  ;;  %3320 = vmatpush.msra.mxu1 %v6466_v35  ;;  %v6511_v63 = vld [vmem:[%s10576_s15 + $0x2f0] sm:$0xff]  ;;  %v6510_v5 = vld [vmem:[%s10576_s15 + $0x2e8] sm:$0xff]  ;;  %v6493_v7 = vld [vmem:[%s10576_s15 + $0x278] sm:$0xff] }
 0x560   : >> { %3359 = vmatpush.msra.mxu2 %v6480_v36  ;;  %3379 = vmatpush.msra.mxu3 %v6481_v37  ;;  %v6492_v6 = vld [vmem:[%s10576_s15 + $0x270] sm:$0xff]  ;;  %v6508_v8 = vld [vmem:[%s10576_s15 + $0x2d8] sm:$0xff]  ;;  %v6490_v9 = vld [vmem:[%s10576_s15 + $0x260] sm:$0xff] }
 0x561   : >> { %6436 = vmatmul.msk.f32.vlgmr.msrb.gmra.mxu0 %vm883_vm4, %v3152_v38  ;;  %6437 = vmatmul.msk.f32.vlgmr.msrb.gmra.mxu1 %vm883_vm4, %v3152_v38  ;;  %v6507_v2 = vld [vmem:[%s10576_s15 + $0x2d0] sm:$0xff]  ;;  %v6491_v10 = vld [vmem:[%s10576_s15 + $0x268] sm:$0xff]  ;;  %v6505_v11 = vld [vmem:[%s10576_s15 + $0x2c0] sm:$0xff] }
 0x562   : >> { %3301 = vmatpush.msra.mxu0 %v6463_v39  ;;  %3321 = vmatpush.msra.mxu1 %v6464_v40  ;;  %v6506_v12 = vld [vmem:[%s10576_s15 + $0x2c8] sm:$0xff]  ;;  %v6488_v13 = vld [vmem:[%s10576_s15 + $0x250] sm:$0xff]  ;;  %v6489_v14 = vld [vmem:[%s10576_s15 + $0x258] sm:$0xff] }
 0x563   : >> { %3360 = vmatpush.msra.mxu2 %v6478_v41  ;;  %3380 = vmatpush.msra.mxu3 %v6479_v42  ;;  %v6503_v15 = vld [vmem:[%s10576_s15 + $0x2b0] sm:$0xff]  ;;  %v6504_v16 = vld [vmem:[%s10576_s15 + $0x2b8] sm:$0xff]  ;;  %v6486_v17 = vld [vmem:[%s10576_s15 + $0x240] sm:$0xff] }
 0x564   : >> { %3302 = vmatpush.msra.mxu0 %v6461_v43  ;;  %3322 = vmatpush.msra.mxu1 %v6462_v44  ;;  %v6487_v18 = vld [vmem:[%s10576_s15 + $0x248] sm:$0xff]  ;;  %v6501_v19 = vld [vmem:[%s10576_s15 + $0x2a0] sm:$0xff]  ;;  %v6526_v25 = vld [vmem:[%s10576_s15 + $0x350] sm:$0xff] }
 0x565   : >> { %3361 = vmatpush.msra.mxu2 %v6476_v45  ;;  %3381 = vmatpush.msra.mxu3 %v6477_v47  ;;  %v6502_v20 = vld [vmem:[%s10576_s15 + $0x2a8] sm:$0xff]  ;;  %v6485_v22 = vld [vmem:[%s8690_s9 + $0x20] sm:$0xf]  ;;  %v6527_v21 = vld [vmem:[%s10576_s15 + $0x358] sm:$0xff] }
 0x566   : >> { %3303 = vmatpush.msra.mxu0 %v6459_v48  ;;  %3323 = vmatpush.msra.mxu1 %v6460_v26  ;;  %v6500_v23 = vld [vmem:[%s8690_s9 + $0x22] sm:$0xf]  ;;  %v6525_v28 = vld [vmem:[%s10576_s15 + $0x348] sm:$0xff]  ;;  %v6522_v24 = vld [vmem:[%s10576_s15 + $0x330] sm:$0xff] }
 0x567   : >> { %3362 = vmatpush.msra.mxu2 %v6474_v49  ;;  %3382 = vmatpush.msra.mxu3 %v6475_v50  ;;  %v6524_v27 = vld [vmem:[%s10576_s15 + $0x340] sm:$0xff]  ;;  %v6523_v29 = vld [vmem:[%s10576_s15 + $0x338] sm:$0xff]  ;;  %v6521_v31 = vld [vmem:[%s10576_s15 + $0x328] sm:$0xff] }
 0x568   : >> { %3304 = vmatpush.msra.mxu0 %v6457_v51  ;;  %3324 = vmatpush.msra.mxu1 %v6458_v52  ;;  %v6520_v30 = vld [vmem:[%s10576_s15 + $0x320] sm:$0xff]  ;;  %v6518_v32 = vld [vmem:[%s10576_s15 + $0x310] sm:$0xff]  ;;  %v6519_v33 = vld [vmem:[%s10576_s15 + $0x318] sm:$0xff] }
 0x569   : >> { %3363 = vmatpush.msra.mxu2 %v6472_v53  ;;  %3383 = vmatpush.msra.mxu3 %v6473_v54  ;;  %v6516_v34 = vld [vmem:[%s10576_s15 + $0x300] sm:$0xff]  ;;  %v6517_v35 = vld [vmem:[%s10576_s15 + $0x308] sm:$0xff] }
 0x56a   : >> { %3305 = vmatpush.msra.mxu0 %v6455_v55  ;;  %3325 = vmatpush.msra.mxu1 %v6456_v56  ;;  %v6515_v36 = vld [vmem:[%s8690_s9 + $0x24] sm:$0xf]  ;;  %s6530_s9 = sshll.u32 %s7275_s3, 4  ;;  %s3036_s3 = sadd.s32 1, %s7275_s3  }
 0x56b   : >> { %3364 = vmatpush.msra.mxu2 %v6470_v57  ;;  %3384 = vmatpush.msra.mxu3 %v6471_v58  ;;  %s5951_s30 = scalar_lea.vmem [#allocation9], %s6530_s9  ;;  %p3033_p11 = scmp.ge.s32.totalorder %s3036_s3, 4  }
 0x56c   : >> { %6467 = vmatmul.msk.f32.vlgmr.msra.gmra.mxu0 %vm883_vm4, %v6454_v59  ;;  %6468 = vmatmul.msk.f32.vlgmr.msra.gmra.mxu1 %vm883_vm4, %v6454_v59  ;;  %s8958_s5 = smov (%p3033_p11), 0  }
 0x56d   : >> { %6482 = vmatmul.msk.f32.vlgmr.msra.gmra.mxu2 %vm883_vm4, %v6469_v60  ;;  %6483 = vmatmul.msk.f32.vlgmr.msra.gmra.mxu3 %vm883_vm4, %v6469_v60 }
 0x56e   : >> { %3421 = vmatpush.msrb.mxu0 %v6496_v61  ;;  %3441 = vmatpush.msrb.mxu1 %v6497_v62 }
 0x56f   : >> { %3480 = vmatpush.msrb.mxu2 %v6511_v63  ;;  %3500 = vmatpush.msrb.mxu3 %v6512_v0 }
 0x570   : >> { %3422 = vmatpush.msrb.mxu0 %v6494_v1  ;;  %3442 = vmatpush.msrb.mxu1 %v6495_v3 }
 0x571   : >> { %3481 = vmatpush.msrb.mxu2 %v6509_v4  ;;  %3501 = vmatpush.msrb.mxu3 %v6510_v5  ;;  %v3572_v4 = vperm.slane %v8586_v46, 0  ;;  %v3573_v5 = vperm.slane %v8586_v46, 1 }
 0x572   : >> { %3423 = vmatpush.msrb.mxu0 %v6492_v6  ;;  %3443 = vmatpush.msrb.mxu1 %v6493_v7 }
 0x573   : >> { %3482 = vmatpush.msrb.mxu2 %v6507_v2  ;;  %3502 = vmatpush.msrb.mxu3 %v6508_v8 }
 0x574   : >> { %3424 = vmatpush.msrb.mxu0 %v6490_v9  ;;  %3444 = vmatpush.msrb.mxu1 %v6491_v10 }
 0x575   : >> { %3483 = vmatpush.msrb.mxu2 %v6505_v11  ;;  %3503 = vmatpush.msrb.mxu3 %v6506_v12 }
 0x576   : >> { %3425 = vmatpush.msrb.mxu0 %v6488_v13  ;;  %3445 = vmatpush.msrb.mxu1 %v6489_v14 }
 0x577   : >> { %3484 = vmatpush.msrb.mxu2 %v6503_v15  ;;  %3504 = vmatpush.msrb.mxu3 %v6504_v16  ;;  %v8956_v15 = vld [vmem:[%s10579_s18] sm:$0x1] (%p3033_p11) }
 0x578   : >> { %3426 = vmatpush.msrb.mxu0 %v6486_v17  ;;  %3446 = vmatpush.msrb.mxu1 %v6487_v18 }
 0x579   : >> { %3485 = vmatpush.msrb.mxu2 %v6501_v19  ;;  %3505 = vmatpush.msrb.mxu3 %v6502_v20 }
 0x57a   : >> { %6498 = vmatmul.msk.f32.vlgmr.msrb.gmra.mxu0 %vm883_vm4, %v6485_v22  ;;  %6499 = vmatmul.msk.f32.vlgmr.msrb.gmra.mxu1 %vm883_vm4, %v6485_v22 }
 0x57b   : >> { %6513 = vmatmul.msk.f32.vlgmr.msrb.gmra.mxu2 %vm883_vm4, %v6500_v23  ;;  %6514 = vmatmul.msk.f32.vlgmr.msrb.gmra.mxu3 %vm883_vm4, %v6500_v23 }
 0x57c   : >> { %3539 = vmatpush.msra.mxu0 %v6526_v25  ;;  %3559 = vmatpush.msra.mxu1 %v6527_v21 }
 0x57e   : >> { %3540 = vmatpush.msra.mxu0 %v6524_v27  ;;  %3560 = vmatpush.msra.mxu1 %v6525_v28 }
 0x580   : >> { %3541 = vmatpush.msra.mxu0 %v6522_v24  ;;  %3561 = vmatpush.msra.mxu1 %v6523_v29 }
 0x582   : >> { %3542 = vmatpush.msra.mxu0 %v6520_v30  ;;  %3562 = vmatpush.msra.mxu1 %v6521_v31 }
 0x584   : >> { %3543 = vmatpush.msra.mxu0 %v6518_v32  ;;  %3563 = vmatpush.msra.mxu1 %v6519_v33 }
 0x586   : >> { %3544 = vmatpush.msra.mxu0 %v6516_v34  ;;  %3564 = vmatpush.msra.mxu1 %v6517_v35 }
 0x587   : >> { %6528 = vmatmul.msk.f32.vlgmr.msra.gmra.mxu0 %vm883_vm4, %v6515_v36  ;;  %6529 = vmatmul.msk.f32.vlgmr.msra.gmra.mxu1 %vm883_vm4, %v6515_v36 }
 0x5d4   : >> { %v3086_v37 = vpop.f32.mrf.mxu0  ;;  %v3106_v38 = vpop.f32.mrf.mxu1 }
 0x5d7   : >> { %v3129_v39 = vpop.f32.mrf.mxu2  ;;  %v3149_v40 = vpop.f32.mrf.mxu3 }
 0x5d8   : >> { %v3130_v48 = vadd.f32 %v3129_v39, %v3086_v37  ;;  %v3150_v26 = vadd.f32 %v3149_v40, %v3106_v38 }
 0x5de   : >> { %v3186_v41 = vpop.f32.mrf.mxu0  ;;  %v3206_v42 = vpop.f32.mrf.mxu1 }
 0x5df   : >> { %v3209_v51 = vadd.f32 %v3186_v41, %v3130_v48  ;;  %v3210_v52 = vadd.f32 %v3206_v42, %v3150_v26 }
 0x5e1   : >> { %v3248_v43 = vpop.f32.mrf.mxu2  ;;  %v3268_v44 = vpop.f32.mrf.mxu3 }
 0x5e2   : >> { %v3271_v53 = vadd.f32 %v3248_v43, %v3209_v51  ;;  %v3272_v54 = vadd.f32 %v3268_v44, %v3210_v52 }
 0x5e9   : >> { %v3307_v45 = vpop.f32.mrf.mxu0  ;;  %v3327_v47 = vpop.f32.mrf.mxu1 }
 0x5ea   : >> { %v3330_v57 = vadd.f32 %v3307_v45, %v3271_v53  ;;  %v3331_v58 = vadd.f32 %v3327_v47, %v3272_v54 }
 0x5f0   : >> { %v3366_v49 = vpop.f32.mrf.mxu2  ;;  %v3386_v50 = vpop.f32.mrf.mxu3 }
 0x5f1   : >> { %v3389_v59 = vadd.f32 %v3366_v49, %v3330_v57  ;;  %v3390_v60 = vadd.f32 %v3386_v50, %v3331_v58 }
 0x5f7   : >> { %v3428_v55 = vpop.f32.mrf.mxu0  ;;  %v3448_v56 = vpop.f32.mrf.mxu1 }
 0x5f8   : >> { %v3451_v63 = vadd.f32 %v3428_v55, %v3389_v59  ;;  %v3452_v0 = vadd.f32 %v3448_v56, %v3390_v60 }
 0x5fe   : >> { %v3487_v61 = vpop.f32.mrf.mxu2  ;;  %v3507_v62 = vpop.f32.mrf.mxu3 }
 0x5ff   : >> { %v3510_v1 = vadd.f32 %v3487_v61, %v3451_v63  ;;  %v3511_v3 = vadd.f32 %v3507_v62, %v3452_v0 }
 0x604   : >> { %v3546_v6 = vpop.f32.mrf.mxu0  ;;  %v3566_v7 = vpop.f32.mrf.mxu1 }
 0x605   : >> { %v3569_v2 = vadd.f32 %v3546_v6, %v3510_v1  ;;  %v3570_v8 = vadd.f32 %v3566_v7, %v3511_v3 }
 0x607   : >> { %v3576_v9 = vadd.f32 %v3572_v4, %v3569_v2  ;;  %v3577_v10 = vadd.f32 %v3573_v5, %v3570_v8 }
 0x609   : >> { %v3578_v11 = vmax.f32 %v3576_v9, 0.0  ;;  %v3579_v12 = vmax.f32 %v3577_v10, 0.0 }
 0x60a   : > { %3035 = sbr.rel (!%p3033_p11) target bundleno = 1347 (0x543), region = 459 }
 0x60b   : >> { %v3582_v13 = vrot.slane %v3578_v11, 6  ;;  %v3583_v14 = vrot.slane %v3579_v12, 6 }
 0x60d   : >> { %6531 = vst [vmem:[%s5951_s30 + $0x20] sm:$0x3c] %v3582_v13 }
 0x60e   : >> { %6532 = vst.msk [vmem:[%s5951_s30 + $0x28] sm:$0x3c] %vm3590_vm12, %v3583_v14 }
 0x60f LB: >> { %v6550_v16 = vld [vmem:[%s10578_s17 + $0x138] sm:$0xff]  ;;  %v6549_v19 = vld [vmem:[%s10578_s17 + $0x130] sm:$0xff]  ;;  %v6548_v25 = vld [vmem:[%s10578_s17 + $0x128] sm:$0xff]  ;;  %s7102_s26 = sshll.u32 %s7279_s5, 4  ;;  %vm4277_vm13 = vcmask 781312   ;;  %s7279_s5 = sphi %s8958_s5, %s3598_s5  }
 0x610   : >> { %v6558_v17 = vld [vmem:[%s10578_s17 + $0x178] sm:$0xff]  ;;  %3662 = vmatpush.msra.mxu0 %v6550_v16  ;;  %v6557_v20 = vld [vmem:[%s10578_s17 + $0x170] sm:$0xff]  ;;  %v6556_v21 = vld [vmem:[%s10578_s17 + $0x168] sm:$0xff]  ;;  %s9156_s0 = scalar_lea.vmem [#allocation9], %s7102_s26 }
 0x611   : >> { %v3619_v46 = vld [vmem:[%s10578_s17 + $0x78] sm:$0xff]  ;;  %3690 = vmatpush.msra.mxu1 %v6558_v17  ;;  %v3618_v22 = vld [vmem:[%s10578_s17 + $0x70] sm:$0xff]  ;;  %v3617_v27 = vld [vmem:[%s10578_s17 + $0x68] sm:$0xff] }
 0x612   : >> { %v3627_v18 = vld [vmem:[%s10578_s17 + $0xb8] sm:$0xff]  ;;  %3705 = vmatpush.msra.mxu2 %v3619_v46  ;;  %v3626_v23 = vld [vmem:[%s10578_s17 + $0xb0] sm:$0xff]  ;;  %3663 = vmatpush.msra.mxu0 %v6549_v19  ;;  %v3625_v28 = vld [vmem:[%s10578_s17 + $0xa8] sm:$0xff] }
 0x613   : >> { %3733 = vmatpush.msra.mxu3 %v3627_v18  ;;  %3691 = vmatpush.msra.mxu1 %v6557_v20  ;;  %v6547_v24 = vld [vmem:[%s10578_s17 + $0x120] sm:$0xff]  ;;  %v6546_v32 = vld [vmem:[%s10578_s17 + $0x118] sm:$0xff]  ;;  %v6545_v36 = vld [vmem:[%s10578_s17 + $0x110] sm:$0xff] }
 0x614   : >> { %3706 = vmatpush.msra.mxu2 %v3618_v22  ;;  %v6555_v29 = vld [vmem:[%s10578_s17 + $0x160] sm:$0xff]  ;;  %3664 = vmatpush.msra.mxu0 %v6548_v25  ;;  %v6554_v33 = vld [vmem:[%s10578_s17 + $0x158] sm:$0xff]  ;;  %v6553_v37 = vld [vmem:[%s10578_s17 + $0x150] sm:$0xff] }
 0x615   : >> { %3734 = vmatpush.msra.mxu3 %v3626_v23  ;;  %3692 = vmatpush.msra.mxu1 %v6556_v21  ;;  %v3616_v30 = vld [vmem:[%s10578_s17 + $0x60] sm:$0xff]  ;;  %v3615_v34 = vld [vmem:[%s10578_s17 + $0x58] sm:$0xff]  ;;  %v3614_v38 = vld [vmem:[%s10578_s17 + $0x50] sm:$0xff] }
 0x616   : >> { %v3624_v31 = vld [vmem:[%s10578_s17 + $0xa0] sm:$0xff]  ;;  %3707 = vmatpush.msra.mxu2 %v3617_v27  ;;  %3665 = vmatpush.msra.mxu0 %v6547_v24  ;;  %v3623_v35 = vld [vmem:[%s10578_s17 + $0x98] sm:$0xff]  ;;  %v3622_v39 = vld [vmem:[%s10578_s17 + $0x90] sm:$0xff] }
 0x617   : >> { %3735 = vmatpush.msra.mxu3 %v3625_v28  ;;  %3693 = vmatpush.msra.mxu1 %v6555_v29  ;;  %v6544_v40 = vld [vmem:[%s10578_s17 + $0x108] sm:$0xff]  ;;  %v6543_v44 = vld [vmem:[%s10578_s17 + $0x100] sm:$0xff]  ;;  %v6576_v26 = vld [vmem:[%s10578_s17 + $0x1f8] sm:$0xff] }
 0x618   : >> { %3708 = vmatpush.msra.mxu2 %v3616_v30  ;;  %3666 = vmatpush.msra.mxu0 %v6546_v32  ;;  %v6552_v41 = vld [vmem:[%s10578_s17 + $0x148] sm:$0xff]  ;;  %v6551_v45 = vld [vmem:[%s10578_s17 + $0x140] sm:$0xff]  ;;  %v6584_v49 = vld [vmem:[%s10578_s17 + $0x238] sm:$0xff] }
 0x619   : >> { %3736 = vmatpush.msra.mxu3 %v3624_v31  ;;  %3694 = vmatpush.msra.mxu1 %v6554_v33  ;;  %v3613_v42 = vld [vmem:[%s10578_s17 + $0x48] sm:$0xff]  ;;  %v3612_v47 = vld [vmem:[%s10578_s17 + $0x40] sm:$0xff]  ;;  %v6542_v50 = vld [vmem:[%s10578_s17 + $0xf8] sm:$0xff] }
 0x61a   : >> { %3709 = vmatpush.msra.mxu2 %v3615_v34  ;;  %3667 = vmatpush.msra.mxu0 %v6545_v36  ;;  %v3621_v43 = vld [vmem:[%s10578_s17 + $0x88] sm:$0xff]  ;;  %v3620_v48 = vld [vmem:[%s10578_s17 + $0x80] sm:$0xff]  ;;  %v3611_v51 = vld [vmem:[%s10578_s17 + $0x38] sm:$0xff] }
 0x61b   : >> { %3737 = vmatpush.msra.mxu3 %v3623_v35  ;;  %3695 = vmatpush.msra.mxu1 %v6553_v37  ;;  %v6575_v52 = vld [vmem:[%s10578_s17 + $0x1f0] sm:$0xff]  ;;  %v6574_v56 = vld [vmem:[%s10578_s17 + $0x1e8] sm:$0xff]  ;;  %v6573_v60 = vld [vmem:[%s10578_s17 + $0x1e0] sm:$0xff] }
 0x61c   : >> { %3710 = vmatpush.msra.mxu2 %v3614_v38  ;;  %3668 = vmatpush.msra.mxu0 %v6544_v40  ;;  %v6583_v53 = vld [vmem:[%s10578_s17 + $0x230] sm:$0xff]  ;;  %v6582_v57 = vld [vmem:[%s10578_s17 + $0x228] sm:$0xff]  ;;  %v6581_v61 = vld [vmem:[%s10578_s17 + $0x220] sm:$0xff] }
 0x61d   : >> { %3738 = vmatpush.msra.mxu3 %v3622_v39  ;;  %3696 = vmatpush.msra.mxu1 %v6552_v41  ;;  %v6541_v54 = vld [vmem:[%s10578_s17 + $0xf0] sm:$0xff]  ;;  %v6540_v58 = vld [vmem:[%s10578_s17 + $0xe8] sm:$0xff]  ;;  %v6539_v62 = vld [vmem:[%s10578_s17 + $0xe0] sm:$0xff] }
 0x61e   : >> { %3711 = vmatpush.msra.mxu2 %v3613_v42  ;;  %3669 = vmatpush.msra.mxu0 %v6543_v44  ;;  %v3610_v55 = vld [vmem:[%s10578_s17 + $0x30] sm:$0xff]  ;;  %v3609_v59 = vld [vmem:[%s10578_s17 + $0x28] sm:$0xff]  ;;  %v3608_v63 = vld [vmem:[%s10578_s17 + $0x20] sm:$0xff] }
 0x61f   : >> { %3739 = vmatpush.msra.mxu3 %v3621_v43  ;;  %3697 = vmatpush.msra.mxu1 %v6551_v45  ;;  %v6572_v0 = vld [vmem:[%s10578_s17 + $0x1d8] sm:$0xff]  ;;  %v6571_v5 = vld [vmem:[%s10578_s17 + $0x1d0] sm:$0xff]  ;;  %v6570_v8 = vld [vmem:[%s10578_s17 + $0x1c8] sm:$0xff] }
 0x620   : >> { %3712 = vmatpush.msra.mxu2 %v3612_v47  ;;  %3670 = vmatpush.msra.mxu0 %v6542_v50  ;;  %v6580_v1 = vld [vmem:[%s10578_s17 + $0x218] sm:$0xff]  ;;  %v6579_v6 = vld [vmem:[%s10578_s17 + $0x210] sm:$0xff]  ;;  %v6578_v9 = vld [vmem:[%s10578_s17 + $0x208] sm:$0xff] }
 0x621   : >> { %3740 = vmatpush.msra.mxu3 %v3620_v48  ;;  %3779 = vmatpush.msrb.mxu1 %v6576_v26  ;;  %v6538_v3 = vld [vmem:[%s10578_s17 + $0xd8] sm:$0xff]  ;;  %v6537_v7 = vld [vmem:[%s10578_s17 + $0xd0] sm:$0xff]  ;;  %v6536_v10 = vld [vmem:[%s10578_s17 + $0xc8] sm:$0xff] }
 0x622   : >> { %3713 = vmatpush.msra.mxu2 %v3611_v51  ;;  %3671 = vmatpush.msra.mxu0 %v6541_v54  ;;  %v3607_v4 = vld [vmem:[%s10578_s17 + $0x18] sm:$0xff]  ;;  %v3606_v2 = vld [vmem:[%s10578_s17 + $0x10] sm:$0xff]  ;;  %v3605_v11 = vld [vmem:[%s10578_s17 + $0x8] sm:$0xff] }
 0x623   : >> { %3807 = vmatpush.msrb.mxu3 %v6584_v49  ;;  %3780 = vmatpush.msrb.mxu1 %v6575_v52  ;;  %v6569_v12 = vld [vmem:[%s10578_s17 + $0x1c0] sm:$0xff]  ;;  %v3603_v17 = vld [vmem:[%s9156_s0 + $0x8] sm:$0xf]  ;;  %v6631_v18 = vld [vmem:[%s10578_s17 + $0x378] sm:$0xff] }
 0x624   : >> { %3714 = vmatpush.msra.mxu2 %v3610_v55  ;;  %3672 = vmatpush.msra.mxu0 %v6540_v58  ;;  %v6577_v13 = vld [vmem:[%s10578_s17 + $0x200] sm:$0xff]  ;;  %v6568_v19 = vld [vmem:[%s10578_s17 + $0x1b8] sm:$0xff]  ;;  %v3629_v25 = vld [vmem:[%s9156_s0 + $0x8] sm:$0x3c] }
 0x625   : >> { %3808 = vmatpush.msrb.mxu3 %v6583_v53  ;;  %3781 = vmatpush.msrb.mxu1 %v6574_v56  ;;  %v6535_v14 = vld [vmem:[%s10578_s17 + $0xc0] sm:$0xff]  ;;  %v6604_v22 = vld [vmem:[%s10578_s17 + $0x2b8] sm:$0xff]  ;;  %v6630_v21 = vld [vmem:[%s10578_s17 + $0x370] sm:$0xff]  ;;  %v3658_v31 = vrot.slane %v3629_v25, 2 }
 0x626   : >> { %3715 = vmatpush.msra.mxu2 %v3609_v59  ;;  %3673 = vmatpush.msra.mxu0 %v6539_v62  ;;  %v3604_v16 = vld [vmem:[%s10578_s17] sm:$0xff]  ;;  %v6612_v23 = vld [vmem:[%s10578_s17 + $0x2f8] sm:$0xff]  ;;  %v6567_v27 = vld [vmem:[%s10578_s17 + $0x1b0] sm:$0xff] }
 0x627   : >> { %3809 = vmatpush.msrb.mxu3 %v6582_v57  ;;  %3782 = vmatpush.msrb.mxu1 %v6573_v60  ;;  %v3602_v46 = vld [vmem:[%s9156_s0] sm:$0xf]  ;;  %v6603_v28 = vld [vmem:[%s10578_s17 + $0x2b0] sm:$0xff]  ;;  %v6629_v30 = vld [vmem:[%s10578_s17 + $0x368] sm:$0xff] }
 0x628   : >> { %3716 = vmatpush.msra.mxu2 %v3608_v63  ;;  %3674 = vmatpush.msra.mxu0 %v6538_v3  ;;  %v3628_v20 = vld [vmem:[%s9156_s0] sm:$0x3c]  ;;  %v6611_v24 = vld [vmem:[%s10578_s17 + $0x2f0] sm:$0xff]  ;;  %v6602_v32 = vld [vmem:[%s10578_s17 + $0x2a8] sm:$0xff] }
 0x629   : >> { %3810 = vmatpush.msrb.mxu3 %v6581_v61  ;;  %3783 = vmatpush.msrb.mxu1 %v6572_v0  ;;  %v3657_v29 = vrot.slane %v3628_v20, 2  ;;  %v6566_v33 = vld [vmem:[%s10578_s17 + $0x1a8] sm:$0xff]  ;;  %v6628_v35 = vld [vmem:[%s10578_s17 + $0x360] sm:$0xff]  ;;  %v6627_v40 = vld [vmem:[%s10578_s17 + $0x358] sm:$0xff] }
 0x62a   : >> { %3717 = vmatpush.msra.mxu2 %v3607_v4  ;;  %3675 = vmatpush.msra.mxu0 %v6537_v7  ;;  %v6610_v34 = vld [vmem:[%s10578_s17 + $0x2e8] sm:$0xff]  ;;  %v6601_v36 = vld [vmem:[%s10578_s17 + $0x2a0] sm:$0xff]  ;;  %v6600_v41 = vld [vmem:[%s10578_s17 + $0x298] sm:$0xff] }
 0x62b   : >> { %3811 = vmatpush.msrb.mxu3 %v6580_v1  ;;  %3784 = vmatpush.msrb.mxu1 %v6571_v5  ;;  %v3746_v37 = vld [vmem:[%s9156_s0 + $0x8] sm:$0xf0]  ;;  %v6565_v38 = vld [vmem:[%s10578_s17 + $0x1a0] sm:$0xff]  ;;  %v6564_v42 = vld [vmem:[%s10578_s17 + $0x198] sm:$0xff] }
 0x62c   : >> { %3718 = vmatpush.msra.mxu2 %v3606_v2  ;;  %3676 = vmatpush.msra.mxu0 %v6536_v10  ;;  %v6609_v39 = vld [vmem:[%s10578_s17 + $0x2e0] sm:$0xff]  ;;  %v6608_v43 = vld [vmem:[%s10578_s17 + $0x2d8] sm:$0xff]  ;;  %v3775_v44 = vrot.slane %v3746_v37, 4  ;;  %v6599_v45 = vld [vmem:[%s10578_s17 + $0x290] sm:$0xff] }
 0x62d   : >> { %3812 = vmatpush.msrb.mxu3 %v6579_v6  ;;  %3785 = vmatpush.msrb.mxu1 %v6570_v8  ;;  %v6626_v47 = vld [vmem:[%s10578_s17 + $0x350] sm:$0xff]  ;;  %v6598_v49 = vld [vmem:[%s10578_s17 + $0x288] sm:$0xff]  ;;  %v3745_v50 = vld [vmem:[%s9156_s0] sm:$0xf0] }
 0x62e   : >> { %3719 = vmatpush.msra.mxu2 %v3605_v11  ;;  %3677 = vmatpush.msra.mxu0 %v6535_v14  ;;  %v6563_v48 = vld [vmem:[%s10578_s17 + $0x190] sm:$0xff]  ;;  %v6625_v51 = vld [vmem:[%s10578_s17 + $0x348] sm:$0xff]  ;;  %v6597_v54 = vld [vmem:[%s10578_s17 + $0x280] sm:$0xff]  ;;  %v3774_v57 = vrot.slane %v3745_v50, 4 }
 0x62f   : >> { %3813 = vmatpush.msrb.mxu3 %v6578_v9  ;;  %3786 = vmatpush.msrb.mxu1 %v6569_v12  ;;  %v6607_v26 = vld [vmem:[%s10578_s17 + $0x2d0] sm:$0xff]  ;;  %v6562_v52 = vld [vmem:[%s10578_s17 + $0x188] sm:$0xff]  ;;  %v6624_v55 = vld [vmem:[%s10578_s17 + $0x340] sm:$0xff] }
 0x630   : >> { %3720 = vmatpush.msra.mxu2 %v3604_v16  ;;  %6560 = vmatmul.msk.f32.vlgmr.msra.gmra.mxu3 %vm893_vm5, %v3603_v17  ;;  %v6606_v53 = vld [vmem:[%s10578_s17 + $0x2c8] sm:$0xff]  ;;  %v6561_v56 = vld [vmem:[%s10578_s17 + $0x180] sm:$0xff]  ;;  %v6623_v59 = vld [vmem:[%s10578_s17 + $0x338] sm:$0xff] }
 0x631   : >> { %3814 = vmatpush.msrb.mxu3 %v6577_v13  ;;  %3721 = vmatmul.f32.vlgmr.msra.gmra.mxu2 %v3602_v46  ;;  %v6605_v58 = vld [vmem:[%s10578_s17 + $0x2c0] sm:$0xff]  ;;  %v6639_v60 = vld [vmem:[%s10578_s17 + $0x3b8] sm:$0xff]  ;;  %v6622_v63 = vld [vmem:[%s10578_s17 + $0x330] sm:$0xff] }
 0x632   : >> { %3787 = vmatpush.msrb.mxu1 %v6568_v19  ;;  %3854 = vmatpush.msrb.mxu0 %v6604_v22  ;;  %v6658_v61 = vld [vmem:[%s10578_s17 + $0x438] sm:$0xff]  ;;  %v6638_v0 = vld [vmem:[%s10578_s17 + $0x3b0] sm:$0xff]  ;;  %v6621_v4 = vld [vmem:[%s10578_s17 + $0x328] sm:$0xff] }
 0x633   : >> { %3929 = vmatpush.msra.mxu3 %v6631_v18  ;;  %3882 = vmatpush.msrb.mxu2 %v6612_v23  ;;  %v6596_v62 = vld [vmem:[%s10578_s17 + $0x278] sm:$0xff]  ;;  %v6657_v1 = vld [vmem:[%s10578_s17 + $0x430] sm:$0xff]  ;;  %v6637_v5 = vld [vmem:[%s10578_s17 + $0x3a8] sm:$0xff] }
 0x634   : >> { %3788 = vmatpush.msrb.mxu1 %v6567_v27  ;;  %3855 = vmatpush.msrb.mxu0 %v6603_v28  ;;  %v6595_v3 = vld [vmem:[%s10578_s17 + $0x270] sm:$0xff]  ;;  %v6656_v6 = vld [vmem:[%s10578_s17 + $0x428] sm:$0xff]  ;;  %v6620_v2 = vld [vmem:[%s10578_s17 + $0x320] sm:$0xff] }
 0x635   : >> { %3930 = vmatpush.msra.mxu3 %v6630_v21  ;;  %3883 = vmatpush.msrb.mxu2 %v6611_v24  ;;  %v6594_v7 = vld [vmem:[%s10578_s17 + $0x268] sm:$0xff]  ;;  %v6636_v8 = vld [vmem:[%s10578_s17 + $0x3a0] sm:$0xff]  ;;  %v6619_v11 = vld [vmem:[%s10578_s17 + $0x318] sm:$0xff] }
 0x636   : >> { %3678 = vmatmul.f32.vlgmr.msra.gmra.mxu0 %v3657_v29  ;;  %6559 = vmatmul.msk.f32.vlgmr.msra.gmra.mxu1 %vm893_vm5, %v3658_v31  ;;  %v6655_v9 = vld [vmem:[%s10578_s17 + $0x420] sm:$0xff]  ;;  %v6635_v12 = vld [vmem:[%s10578_s17 + $0x398] sm:$0xff]  ;;  %v6588_v16 = vld [vmem:[%s9156_s0 + $0x28] sm:$0xf] }
 0x637   : >> { %3931 = vmatpush.msra.mxu3 %v6629_v30  ;;  %3856 = vmatpush.msrb.mxu0 %v6602_v32  ;;  %v6593_v10 = vld [vmem:[%s10578_s17 + $0x260] sm:$0xff]  ;;  %v6654_v13 = vld [vmem:[%s10578_s17 + $0x418] sm:$0xff]  ;;  %v6618_v17 = vld [vmem:[%s10578_s17 + $0x310] sm:$0xff] }
 0x638   : >> { %3789 = vmatpush.msrb.mxu1 %v6566_v33  ;;  %3884 = vmatpush.msrb.mxu2 %v6610_v34  ;;  %v6592_v14 = vld [vmem:[%s10578_s17 + $0x258] sm:$0xff]  ;;  %v6634_v46 = vld [vmem:[%s10578_s17 + $0x390] sm:$0xff]  ;;  %v6617_v20 = vld [vmem:[%s10578_s17 + $0x308] sm:$0xff] }
 0x639   : >> { %3932 = vmatpush.msra.mxu3 %v6628_v35  ;;  %3857 = vmatpush.msrb.mxu0 %v6601_v36  ;;  %v6653_v18 = vld [vmem:[%s10578_s17 + $0x410] sm:$0xff]  ;;  %v6614_v22 = vld [vmem:[%s9156_s0 + $0x20] sm:$0x3c]  ;;  %v6633_v23 = vld [vmem:[%s10578_s17 + $0x388] sm:$0xff] }
 0x63a   : >> { %3790 = vmatpush.msrb.mxu1 %v6565_v38  ;;  %3885 = vmatpush.msrb.mxu2 %v6609_v39  ;;  %v6591_v19 = vld [vmem:[%s10578_s17 + $0x250] sm:$0xff]  ;;  %v6652_v25 = vld [vmem:[%s10578_s17 + $0x408] sm:$0xff]  ;;  %v6616_v27 = vld [vmem:[%s10578_s17 + $0x300] sm:$0xff]  ;;  %v3924_v29 = vrot.slane %v6614_v22, 2 }
 0x63b   : >> { %3933 = vmatpush.msra.mxu3 %v6627_v40  ;;  %3858 = vmatpush.msrb.mxu0 %v6600_v41  ;;  %v6590_v21 = vld [vmem:[%s10578_s17 + $0x248] sm:$0xff]  ;;  %v6632_v28 = vld [vmem:[%s10578_s17 + $0x380] sm:$0xff]  ;;  %v6686_v31 = vld [vmem:[%s10578_s17 + $0x4f8] sm:$0xff] }
 0x63c   : >> { %3791 = vmatpush.msrb.mxu1 %v6564_v42  ;;  %3886 = vmatpush.msrb.mxu2 %v6608_v43  ;;  %v6651_v24 = vld [vmem:[%s10578_s17 + $0x400] sm:$0xff]  ;;  %v6694_v32 = vld [vmem:[%s10578_s17 + $0x538] sm:$0xff]  ;;  %v6685_v36 = vld [vmem:[%s10578_s17 + $0x4f0] sm:$0xff] }
 0x63d   : >> { %6585 = vmatmul.msk.f32.vlgmr.msrb.gmra.mxu3 %vm893_vm5, %v3775_v44  ;;  %3859 = vmatpush.msrb.mxu0 %v6599_v45  ;;  %v6589_v30 = vld [vmem:[%s10578_s17 + $0x240] sm:$0xff]  ;;  %v6650_v34 = vld [vmem:[%s10578_s17 + $0x3f8] sm:$0xff]  ;;  %v6615_v37 = vld [vmem:[%s9156_s0 + $0x28] sm:$0x3c] }
 0x63e   : >> { %3934 = vmatpush.msra.mxu3 %v6626_v47  ;;  %3792 = vmatpush.msrb.mxu1 %v6563_v48  ;;  %v6587_v33 = vld [vmem:[%s9156_s0 + $0x20] sm:$0xf]  ;;  %v6666_v35 = vld [vmem:[%s10578_s17 + $0x478] sm:$0xff]  ;;  %v6693_v38 = vld [vmem:[%s10578_s17 + $0x530] sm:$0xff]  ;;  %v3925_v44 = vrot.slane %v6615_v37, 2 }
 0x63f   : >> { %3887 = vmatpush.msrb.mxu2 %v6607_v26  ;;  %3860 = vmatpush.msrb.mxu0 %v6598_v49  ;;  %v6649_v39 = vld [vmem:[%s10578_s17 + $0x3f0] sm:$0xff]  ;;  %v6684_v41 = vld [vmem:[%s10578_s17 + $0x4e8] sm:$0xff]  ;;  %v6683_v47 = vld [vmem:[%s10578_s17 + $0x4e0] sm:$0xff] }
 0x640   : >> { %3935 = vmatpush.msra.mxu3 %v6625_v51  ;;  %3793 = vmatpush.msrb.mxu1 %v6562_v52  ;;  %v6665_v40 = vld [vmem:[%s10578_s17 + $0x470] sm:$0xff]  ;;  %v6692_v42 = vld [vmem:[%s10578_s17 + $0x528] sm:$0xff]  ;;  %v6691_v48 = vld [vmem:[%s10578_s17 + $0x520] sm:$0xff] }
 0x641   : >> { %3888 = vmatpush.msrb.mxu2 %v6606_v53  ;;  %3861 = vmatpush.msrb.mxu0 %v6597_v54  ;;  %v6648_v43 = vld [vmem:[%s10578_s17 + $0x3e8] sm:$0xff]  ;;  %v6647_v26 = vld [vmem:[%s10578_s17 + $0x3e0] sm:$0xff]  ;;  %v6682_v50 = vld [vmem:[%s10578_s17 + $0x4d8] sm:$0xff] }
 0x642   : >> { %3936 = vmatpush.msra.mxu3 %v6624_v55  ;;  %3794 = vmatpush.msrb.mxu1 %v6561_v56  ;;  %v6664_v45 = vld [vmem:[%s10578_s17 + $0x468] sm:$0xff]  ;;  %v6663_v49 = vld [vmem:[%s10578_s17 + $0x460] sm:$0xff]  ;;  %v6690_v51 = vld [vmem:[%s10578_s17 + $0x518] sm:$0xff] }
 0x643   : >> { %3889 = vmatpush.msrb.mxu2 %v6605_v58  ;;  %3795 = vmatmul.f32.vlgmr.msrb.gmra.mxu1 %v3774_v57  ;;  %v6646_v52 = vld [vmem:[%s10578_s17 + $0x3d8] sm:$0xff]  ;;  %v6681_v54 = vld [vmem:[%s10578_s17 + $0x4d0] sm:$0xff]  ;;  %v6680_v58 = vld [vmem:[%s10578_s17 + $0x4c8] sm:$0xff] }
 0x644   : >> { %3937 = vmatpush.msra.mxu3 %v6623_v59  ;;  %3957 = vmatpush.msra.mxu1 %v6639_v60  ;;  %v6662_v53 = vld [vmem:[%s10578_s17 + $0x458] sm:$0xff]  ;;  %v6689_v55 = vld [vmem:[%s10578_s17 + $0x510] sm:$0xff]  ;;  %v6688_v59 = vld [vmem:[%s10578_s17 + $0x508] sm:$0xff] }
 0x645   : >> { %4004 = vmatpush.msra.mxu2 %v6658_v61  ;;  %3862 = vmatpush.msrb.mxu0 %v6596_v62  ;;  %v6645_v56 = vld [vmem:[%s10578_s17 + $0x3d0] sm:$0xff]  ;;  %v6641_v60 = vld [vmem:[%s9156_s0 + $0x20] sm:$0xf0]  ;;  %v6644_v61 = vld [vmem:[%s10578_s17 + $0x3c8] sm:$0xff] }
 0x646   : >> { %3938 = vmatpush.msra.mxu3 %v6622_v63  ;;  %3958 = vmatpush.msra.mxu1 %v6638_v0  ;;  %v6661_v57 = vld [vmem:[%s10578_s17 + $0x450] sm:$0xff]  ;;  %v6660_v62 = vld [vmem:[%s10578_s17 + $0x448] sm:$0xff]  ;;  %v6679_v63 = vld [vmem:[%s10578_s17 + $0x4c0] sm:$0xff] }
 0x647   : >> { %4005 = vmatpush.msra.mxu2 %v6657_v1  ;;  %3863 = vmatpush.msrb.mxu0 %v6595_v3  ;;  %v6687_v0 = vld [vmem:[%s10578_s17 + $0x500] sm:$0xff]  ;;  %v6642_v1 = vld [vmem:[%s9156_s0 + $0x28] sm:$0xf0] }
 0x648   : >> { %3939 = vmatpush.msra.mxu3 %v6621_v4  ;;  %3959 = vmatpush.msra.mxu1 %v6637_v5  ;;  %v6643_v3 = vld [vmem:[%s10578_s17 + $0x3c0] sm:$0xff]  ;;  %v3999_v5 = vrot.slane %v6641_v60, 4  ;;  %v6719_v22 = vld [vmem:[%s10578_s17 + $0x5e8] sm:$0xff] }
 0x649   : >> { %4006 = vmatpush.msra.mxu2 %v6656_v6  ;;  %3864 = vmatpush.msrb.mxu0 %v6594_v7  ;;  %v6659_v4 = vld [vmem:[%s10578_s17 + $0x440] sm:$0xff]  ;;  %v6740_v6 = vld [vmem:[%s10578_s17 + $0x678] sm:$0xff] }
 0x64a   : >> { %3940 = vmatpush.msra.mxu3 %v6620_v2  ;;  %3960 = vmatpush.msra.mxu1 %v6636_v8  ;;  %v6678_v7 = vld [vmem:[%s10578_s17 + $0x4b8] sm:$0xff]  ;;  %v4000_v8 = vrot.slane %v6642_v1, 4  ;;  %v6706_v37 = vld [vmem:[%s10578_s17 + $0x580] sm:$0xff]  ;;  %v6742_v1 = vld [vmem:[%s10578_s17 + $0x688] sm:$0xff] }
 0x64b   : >> { %4007 = vmatpush.msra.mxu2 %v6655_v9  ;;  %3865 = vmatpush.msrb.mxu0 %v6593_v10  ;;  %v6713_v2 = vld [vmem:[%s10578_s17 + $0x5b8] sm:$0xff]  ;;  %v6739_v9 = vld [vmem:[%s10578_s17 + $0x670] sm:$0xff]  ;;  %v6723_v60 = vld [vmem:[%s9156_s0 + $0x40] sm:$0xf0] }
 0x64c   : >> { %3941 = vmatpush.msra.mxu3 %v6619_v11  ;;  %3961 = vmatpush.msra.mxu1 %v6635_v12  ;;  %v6677_v10 = vld [vmem:[%s10578_s17 + $0x4b0] sm:$0xff]  ;;  %v6738_v12 = vld [vmem:[%s10578_s17 + $0x668] sm:$0xff] }
 0x64d   : >> { %4008 = vmatpush.msra.mxu2 %v6654_v13  ;;  %3866 = vmatpush.msrb.mxu0 %v6592_v14  ;;  %v6712_v11 = vld [vmem:[%s10578_s17 + $0x5b0] sm:$0xff]  ;;  %v6721_v13 = vld [vmem:[%s10578_s17 + $0x5f8] sm:$0xff]  ;;  %v6676_v14 = vld [vmem:[%s10578_s17 + $0x4a8] sm:$0xff] }
 0x64e   : >> { %6613 = vmatmul.msk.f32.vlgmr.msrb.gmra.mxu2 %vm893_vm5, %v6588_v16  ;;  %3942 = vmatpush.msra.mxu3 %v6618_v17  ;;  %v6711_v16 = vld [vmem:[%s10578_s17 + $0x5a8] sm:$0xff]  ;;  %v6737_v17 = vld [vmem:[%s10578_s17 + $0x660] sm:$0xff] }
 0x64f   : >> { %3962 = vmatpush.msra.mxu1 %v6634_v46  ;;  %4009 = vmatpush.msra.mxu2 %v6653_v18  ;;  %v6720_v46 = vld [vmem:[%s10578_s17 + $0x5f0] sm:$0xff]  ;;  %v6675_v18 = vld [vmem:[%s10578_s17 + $0x4a0] sm:$0xff] }
 0x650   : >> { %3867 = vmatpush.msrb.mxu0 %v6591_v19  ;;  %3943 = vmatpush.msra.mxu3 %v6617_v20  ;;  %v6710_v19 = vld [vmem:[%s10578_s17 + $0x5a0] sm:$0xff]  ;;  %v6736_v20 = vld [vmem:[%s10578_s17 + $0x658] sm:$0xff] }
 0x651   : >> { %3963 = vmatpush.msra.mxu1 %v6633_v23  ;;  %4010 = vmatpush.msra.mxu2 %v6652_v25  ;;  %v6674_v23 = vld [vmem:[%s10578_s17 + $0x498] sm:$0xff] }
 0x652   : >> { %3868 = vmatpush.msrb.mxu0 %v6590_v21  ;;  %3944 = vmatpush.msra.mxu3 %v6616_v27  ;;  %v6709_v25 = vld [vmem:[%s10578_s17 + $0x598] sm:$0xff]  ;;  %v6670_v21 = vld [vmem:[%s9156_s0 + $0x48] sm:$0xf]  ;;  %v6718_v27 = vld [vmem:[%s10578_s17 + $0x5e0] sm:$0xff] }
 0x653   : >> { %3964 = vmatpush.msra.mxu1 %v6632_v28  ;;  %4011 = vmatpush.msra.mxu2 %v6651_v24  ;;  %v6735_v28 = vld [vmem:[%s10578_s17 + $0x650] sm:$0xff] }
 0x654   : >> { %3869 = vmatpush.msrb.mxu0 %v6589_v30  ;;  %3945 = vmatmul.f32.vlgmr.msra.gmra.mxu3 %v3924_v29  ;;  %v6673_v24 = vld [vmem:[%s10578_s17 + $0x490] sm:$0xff]  ;;  %v6717_v30 = vld [vmem:[%s10578_s17 + $0x5d8] sm:$0xff] }
 0x655   : >> { %4079 = vmatpush.msrb.mxu1 %v6686_v31  ;;  %4107 = vmatpush.msrb.mxu3 %v6694_v32  ;;  %v6708_v29 = vld [vmem:[%s10578_s17 + $0x590] sm:$0xff]  ;;  %v6734_v31 = vld [vmem:[%s10578_s17 + $0x648] sm:$0xff] }
 0x656   : >> { %3870 = vmatmul.f32.vlgmr.msrb.gmra.mxu0 %v6587_v33  ;;  %4012 = vmatpush.msra.mxu2 %v6650_v34  ;;  %v6672_v32 = vld [vmem:[%s10578_s17 + $0x488] sm:$0xff]  ;;  %v6716_v34 = vld [vmem:[%s10578_s17 + $0x5d0] sm:$0xff] }
 0x657   : >> { %4032 = vmatpush.msra.mxu0 %v6666_v35  ;;  %4080 = vmatpush.msrb.mxu1 %v6685_v36  ;;  %v6707_v33 = vld [vmem:[%s10578_s17 + $0x588] sm:$0xff]  ;;  %v6733_v35 = vld [vmem:[%s10578_s17 + $0x640] sm:$0xff] }
 0x658   : >> { %4108 = vmatpush.msrb.mxu3 %v6693_v38  ;;  %4013 = vmatpush.msra.mxu2 %v6649_v39  ;;  %v6671_v36 = vld [vmem:[%s10578_s17 + $0x480] sm:$0xff]  ;;  %v6732_v39 = vld [vmem:[%s10578_s17 + $0x638] sm:$0xff] }
 0x659   : >> { %4033 = vmatpush.msra.mxu0 %v6665_v40  ;;  %4081 = vmatpush.msrb.mxu1 %v6684_v41  ;;  %v6669_v38 = vld [vmem:[%s9156_s0 + $0x40] sm:$0xf]  ;;  %v6748_v40 = vld [vmem:[%s10578_s17 + $0x6b8] sm:$0xff]  ;;  %v6697_v41 = vld [vmem:[%s9156_s0 + $0x48] sm:$0x3c] }
 0x65a   : >> { %4109 = vmatpush.msrb.mxu3 %v6692_v42  ;;  %4014 = vmatpush.msra.mxu2 %v6648_v43  ;;  %v6705_v42 = vld [vmem:[%s10578_s17 + $0x578] sm:$0xff]  ;;  %v6715_v43 = vld [vmem:[%s10578_s17 + $0x5c8] sm:$0xff] }
 0x65b   : >> { %4034 = vmatpush.msra.mxu0 %v6664_v45  ;;  %6640 = vmatmul.msk.f32.vlgmr.msra.gmra.mxu1 %vm893_vm5, %v3925_v44  ;;  %v6731_v44 = vld [vmem:[%s10578_s17 + $0x630] sm:$0xff] }
 0x65c   : >> { %4082 = vmatpush.msrb.mxu1 %v6683_v47  ;;  %4110 = vmatpush.msrb.mxu3 %v6691_v48  ;;  %v6747_v45 = vld [vmem:[%s10578_s17 + $0x6b0] sm:$0xff]  ;;  %v6714_v48 = vld [vmem:[%s10578_s17 + $0x5c0] sm:$0xff] }
 0x65d   : >> { %4015 = vmatpush.msra.mxu2 %v6647_v26  ;;  %4035 = vmatpush.msra.mxu0 %v6663_v49  ;;  %v6704_v47 = vld [vmem:[%s10578_s17 + $0x570] sm:$0xff]  ;;  %v4150_v26 = vrot.slane %v6697_v41, 2  ;;  %v6730_v49 = vld [vmem:[%s10578_s17 + $0x628] sm:$0xff] }
 0x65e   : >> { %4083 = vmatpush.msrb.mxu1 %v6682_v50  ;;  %4111 = vmatpush.msrb.mxu3 %v6690_v51  ;;  %v6703_v50 = vld [vmem:[%s10578_s17 + $0x568] sm:$0xff] }
 0x65f   : >> { %4016 = vmatpush.msra.mxu2 %v6646_v52  ;;  %4036 = vmatpush.msra.mxu0 %v6662_v53  ;;  %v6746_v51 = vld [vmem:[%s10578_s17 + $0x6a8] sm:$0xff]  ;;  %v6729_v52 = vld [vmem:[%s10578_s17 + $0x620] sm:$0xff] }
 0x660   : >> { %4084 = vmatpush.msrb.mxu1 %v6681_v54  ;;  %4112 = vmatpush.msrb.mxu3 %v6689_v55  ;;  %v6702_v53 = vld [vmem:[%s10578_s17 + $0x560] sm:$0xff]  ;;  %v6728_v55 = vld [vmem:[%s10578_s17 + $0x618] sm:$0xff] }
 0x661   : >> { %4017 = vmatpush.msra.mxu2 %v6645_v56  ;;  %4037 = vmatpush.msra.mxu0 %v6661_v57  ;;  %v6745_v54 = vld [vmem:[%s10578_s17 + $0x6a0] sm:$0xff]  ;;  %v6701_v56 = vld [vmem:[%s10578_s17 + $0x558] sm:$0xff] }
 0x662   : >> { %4085 = vmatpush.msrb.mxu1 %v6680_v58  ;;  %4113 = vmatpush.msrb.mxu3 %v6688_v59  ;;  %v6744_v57 = vld [vmem:[%s10578_s17 + $0x698] sm:$0xff]  ;;  %v6727_v58 = vld [vmem:[%s10578_s17 + $0x610] sm:$0xff] }
 0x663   : >> { %4018 = vmatpush.msra.mxu2 %v6644_v61  ;;  %4038 = vmatpush.msra.mxu0 %v6660_v62  ;;  %v6700_v59 = vld [vmem:[%s10578_s17 + $0x550] sm:$0xff]  ;;  %v6726_v62 = vld [vmem:[%s10578_s17 + $0x608] sm:$0xff] }
 0x664   : >> { %4086 = vmatpush.msrb.mxu1 %v6679_v63  ;;  %4114 = vmatpush.msrb.mxu3 %v6687_v0  ;;  %v6743_v61 = vld [vmem:[%s10578_s17 + $0x690] sm:$0xff]  ;;  %v6696_v63 = vld [vmem:[%s9156_s0 + $0x40] sm:$0x3c]  ;;  %v6699_v0 = vld [vmem:[%s10578_s17 + $0x548] sm:$0xff] }
 0x665   : >> { %4019 = vmatpush.msra.mxu2 %v6643_v3  ;;  %4039 = vmatpush.msra.mxu0 %v6659_v4  ;;  %v6724_v3 = vld [vmem:[%s9156_s0 + $0x48] sm:$0xf0]  ;;  %v6725_v4 = vld [vmem:[%s10578_s17 + $0x600] sm:$0xff]  ;;  %s6750_s0 = sshll.u32 %s7279_s5, 3  ;;  %s3598_s5 = sadd.s32 1, %s7279_s5  }
 0x666   : >> { %4229 = vmatpush.msra.mxu3 %v6740_v6  ;;  %4020 = vmatmul.f32.vlgmr.msra.gmra.mxu2 %v3999_v5  ;;  %v4224_v5 = vrot.slane %v6723_v60, 4  ;;  %v6698_v6 = vld [vmem:[%s10578_s17 + $0x540] sm:$0xff]  ;;  %s5962_s26 = scalar_lea.vmem [#allocation10], %s6750_s0  ;;  %p3595_p12 = scmp.ge.s32.totalorder %s3598_s5, 4  }
 0x667   : >> { %4087 = vmatpush.msrb.mxu1 %v6678_v7  ;;  %4154 = vmatpush.msrb.mxu0 %v6713_v2  ;;  %v4149_v7 = vrot.slane %v6696_v63, 2  ;;  %v6741_v2 = vld [vmem:[%s10578_s17 + $0x680] sm:$0xff]  ;;  %s9651_s4 = smov (%p3595_p12), 0  }
 0x668   : >> { %4230 = vmatpush.msra.mxu3 %v6739_v9  ;;  %6667 = vmatmul.msk.f32.vlgmr.msra.gmra.mxu0 %vm893_vm5, %v4000_v8  ;;  %v4225_v8 = vrot.slane %v6724_v3, 4 }
 0x669   : >> { %4088 = vmatpush.msrb.mxu1 %v6677_v10  ;;  %4155 = vmatpush.msrb.mxu0 %v6712_v11 }
 0x66a   : >> { %4231 = vmatpush.msra.mxu3 %v6738_v12  ;;  %4182 = vmatpush.msrb.mxu2 %v6721_v13 }
 0x66b   : >> { %4089 = vmatpush.msrb.mxu1 %v6676_v14  ;;  %4156 = vmatpush.msrb.mxu0 %v6711_v16 }
 0x66c   : >> { %4232 = vmatpush.msra.mxu3 %v6737_v17  ;;  %4183 = vmatpush.msrb.mxu2 %v6720_v46 }
 0x66d   : >> { %4090 = vmatpush.msrb.mxu1 %v6675_v18  ;;  %4157 = vmatpush.msrb.mxu0 %v6710_v19 }
 0x66e   : >> { %4233 = vmatpush.msra.mxu3 %v6736_v20  ;;  %4184 = vmatpush.msrb.mxu2 %v6719_v22 }
 0x66f   : >> { %4091 = vmatpush.msrb.mxu1 %v6674_v23  ;;  %4158 = vmatpush.msrb.mxu0 %v6709_v25 }
 0x670   : >> { %6695 = vmatmul.msk.f32.vlgmr.msrb.gmra.mxu3 %vm893_vm5, %v6670_v21  ;;  %4185 = vmatpush.msrb.mxu2 %v6718_v27 }
 0x671   : >> { %4234 = vmatpush.msra.mxu3 %v6735_v28  ;;  %4092 = vmatpush.msrb.mxu1 %v6673_v24 }
 0x672   : >> { %4159 = vmatpush.msrb.mxu0 %v6708_v29  ;;  %4186 = vmatpush.msrb.mxu2 %v6717_v30 }
 0x673   : >> { %4235 = vmatpush.msra.mxu3 %v6734_v31  ;;  %4093 = vmatpush.msrb.mxu1 %v6672_v32 }
 0x674   : >> { %4160 = vmatpush.msrb.mxu0 %v6707_v33  ;;  %4187 = vmatpush.msrb.mxu2 %v6716_v34 }
 0x675   : >> { %4236 = vmatpush.msra.mxu3 %v6733_v35  ;;  %4094 = vmatpush.msrb.mxu1 %v6671_v36 }
 0x676   : >> { %4161 = vmatpush.msrb.mxu0 %v6706_v37  ;;  %4095 = vmatmul.f32.vlgmr.msrb.gmra.mxu1 %v6669_v38 }
 0x677   : >> { %4237 = vmatpush.msra.mxu3 %v6732_v39  ;;  %4257 = vmatpush.msra.mxu1 %v6748_v40 }
 0x678   : >> { %4162 = vmatpush.msrb.mxu0 %v6705_v42  ;;  %4188 = vmatpush.msrb.mxu2 %v6715_v43 }
 0x679   : >> { %4238 = vmatpush.msra.mxu3 %v6731_v44  ;;  %4258 = vmatpush.msra.mxu1 %v6747_v45  ;;  %v4271_v44 = vperm.slane %v8956_v15, 0 }
 0x67a   : >> { %4163 = vmatpush.msrb.mxu0 %v6704_v47  ;;  %4189 = vmatpush.msrb.mxu2 %v6714_v48 }
 0x67b   : >> { %4239 = vmatpush.msra.mxu3 %v6730_v49  ;;  %6722 = vmatmul.msk.f32.vlgmr.msrb.gmra.mxu2 %vm893_vm5, %v4150_v26  ;;  %v9649_v26 = vld [vmem:[%s10581_s20] sm:$0x1] (%p3595_p12) }
 0x67c   : >> { %4164 = vmatpush.msrb.mxu0 %v6703_v50  ;;  %4259 = vmatpush.msra.mxu1 %v6746_v51 }
 0x67d   : >> { %4240 = vmatpush.msra.mxu3 %v6729_v52 }
 0x67e   : >> { %4165 = vmatpush.msrb.mxu0 %v6702_v53  ;;  %4260 = vmatpush.msra.mxu1 %v6745_v54 }
 0x67f   : >> { %4241 = vmatpush.msra.mxu3 %v6728_v55 }
 0x680   : >> { %4166 = vmatpush.msrb.mxu0 %v6701_v56  ;;  %4261 = vmatpush.msra.mxu1 %v6744_v57 }
 0x681   : >> { %4242 = vmatpush.msra.mxu3 %v6727_v58 }
 0x682   : >> { %4167 = vmatpush.msrb.mxu0 %v6700_v59  ;;  %4262 = vmatpush.msra.mxu1 %v6743_v61 }
 0x683   : >> { %4243 = vmatpush.msra.mxu3 %v6726_v62 }
 0x684   : >> { %4168 = vmatpush.msrb.mxu0 %v6699_v0  ;;  %4263 = vmatpush.msra.mxu1 %v6742_v1 }
 0x685   : >> { %4244 = vmatpush.msra.mxu3 %v6725_v4 }
 0x686   : >> { %4169 = vmatpush.msrb.mxu0 %v6698_v6  ;;  %4245 = vmatmul.f32.vlgmr.msra.gmra.mxu3 %v4224_v5 }
 0x687   : >> { %4170 = vmatmul.f32.vlgmr.msrb.gmra.mxu0 %v4149_v7  ;;  %4264 = vmatpush.msra.mxu1 %v6741_v2 }
 0x688   : >> { %6749 = vmatmul.msk.f32.vlgmr.msra.gmra.mxu1 %vm893_vm5, %v4225_v8 }
 0x6b3   : >> { %v3699_v9 = vpop.f32.mrf.mxu1  ;;  %v3742_v10 = vpop.f32.mrf.mxu3 }
 0x6b4   : >> { %v3722_v11 = vpop.f32.mrf.mxu2  ;;  %v3679_v12 = vpop.f32.mrf.mxu0 }
 0x6b5   : >> { %v3700_v46 = vadd.f32 %v3699_v9, %v3679_v12 }
 0x6b7   : >> { %v3723_v20 = vadd.f32 %v3722_v11, %v3700_v46 }
 0x6b9   : >> { %v3743_v21 = vadd.f32 %v3742_v10, %v3723_v20 }
 0x6c0   : >> { %v3796_v13 = vpop.f32.mrf.mxu1  ;;  %v3816_v14 = vpop.f32.mrf.mxu3 }
 0x6c1   : >> { %v3817_v23 = vadd.f32 %v3816_v14, %v3796_v13 }
 0x6c3   : >> { %v3819_v24 = vadd.f32 %v3817_v23, %v3743_v21 }
 0x6d1   : >> { %v3891_v16 = vpop.f32.mrf.mxu2 }
 0x6d3   : >> { %v3871_v17 = vpop.f32.mrf.mxu0 }
 0x6d4   : >> { %v3892_v27 = vadd.f32 %v3891_v16, %v3871_v17 }
 0x6d6   : >> { %v3894_v31 = vadd.f32 %v3892_v27, %v3819_v24 }
 0x6d7   : >> { %v3946_v19 = vpop.f32.mrf.mxu3 }
 0x6d8   : >> { %v3966_v18 = vpop.f32.mrf.mxu1 }
 0x6d9   : >> { %v3967_v29 = vadd.f32 %v3966_v18, %v3946_v19 }
 0x6db   : >> { %v3969_v34 = vadd.f32 %v3967_v29, %v3894_v31 }
 0x6e5   : >> { %v4041_v25 = vpop.f32.mrf.mxu0 }
 0x6e9   : >> { %v4021_v22 = vpop.f32.mrf.mxu2 }
 0x6ea   : >> { %v4042_v32 = vadd.f32 %v4041_v25, %v4021_v22 }
 0x6ec   : >> { %v4044_v37 = vadd.f32 %v4042_v32, %v3969_v34 }
 0x6f3   : >> { %v4096_v28 = vpop.f32.mrf.mxu1  ;;  %v4116_v30 = vpop.f32.mrf.mxu3 }
 0x6f4   : >> { %v4117_v35 = vadd.f32 %v4116_v30, %v4096_v28 }
 0x6f6   : >> { %v4119_v40 = vadd.f32 %v4117_v35, %v4044_v37 }
 0x6fe   : >> { %v4191_v33 = vpop.f32.mrf.mxu2 }
 0x704   : >> { %v4171_v36 = vpop.f32.mrf.mxu0 }
 0x705   : >> { %v4192_v38 = vadd.f32 %v4191_v33, %v4171_v36  ;;  %v4266_v39 = vpop.f32.mrf.mxu1 }
 0x707   : >> { %v4194_v42 = vadd.f32 %v4192_v38, %v4119_v40 }
 0x709   : >> { %v4246_v41 = vpop.f32.mrf.mxu3 }
 0x70a   : >> { %v4267_v43 = vadd.f32 %v4266_v39, %v4246_v41 }
 0x70c   : >> { %v4269_v45 = vadd.f32 %v4267_v43, %v4194_v42 }
 0x70e   : >> { %v4273_v47 = vadd.f32 %v4271_v44, %v4269_v45  ;;  %3597 = sbr.rel (!%p3595_p12) target bundleno = 1551 (0x60f), region = 470 }
 0x710   : >> { %v4274_v48 = vmax.f32 %v4273_v47, 0.0 }
 0x712   : >> { %6751 = vst.msk [vmem:[%s5962_s26 + $0x12] sm:$0xf] %vm4277_vm13, %v4274_v48 }
 0x713 LB: >> { %v6764_v49 = vld [vmem:[%s10580_s19 + $0xb8] sm:$0xff]  ;;  %v6763_v50 = vld [vmem:[%s10580_s19 + $0xb0] sm:$0xff]  ;;  %v6762_v52 = vld [vmem:[%s10580_s19 + $0xa8] sm:$0xff]  ;;  %s10595_s5 = sshll.u32 %s7283_s4, 3  ;;  %s7283_s4 = sphi %s9651_s4, %s4285_s4  }
 0x714   : >> { %4322 = vmatpush.msra.mxu0 %v6764_v49  ;;  %v6778_v15 = vld [vmem:[%s10580_s19 + $0x118] sm:$0xff]  ;;  %v6777_v51 = vld [vmem:[%s10580_s19 + $0x110] sm:$0xff]  ;;  %v6776_v55 = vld [vmem:[%s10580_s19 + $0x108] sm:$0xff]  ;;  %s9893_s25 = scalar_lea.vmem [#allocation10], %s10595_s5  ;;  %s10619_s5 = sshll.u32 %s7283_s4, 3 }
 0x715   : >> { %4382 = vmatpush.msra.mxu2 %v6778_v15  ;;  %v6793_v53 = vld [vmem:[%s10580_s19 + $0x178] sm:$0xff]  ;;  %v6792_v56 = vld [vmem:[%s10580_s19 + $0x170] sm:$0xff]  ;;  %v6761_v57 = vld [vmem:[%s10580_s19 + $0xa0] sm:$0xff]  ;;  %s4285_s4 = sadd.s32 1, %s7283_s4  }
 0x716   : >> { %v4300_v54 = vld [vmem:[%s10580_s19 + $0x58] sm:$0xff]  ;;  %4323 = vmatpush.msra.mxu0 %v6763_v50  ;;  %4423 = vmatpush.msra.mxu3 %v6793_v53  ;;  %v4299_v58 = vld [vmem:[%s10580_s19 + $0x50] sm:$0xff]  ;;  %v6791_v59 = vld [vmem:[%s10580_s19 + $0x168] sm:$0xff]  ;;  %p4282_p13 = scmp.ge.s32.totalorder %s4285_s4, 4  }
 0x717   : >> { %4383 = vmatpush.msra.mxu2 %v6777_v51  ;;  %4345 = vmatpush.msra.mxu1 %v4300_v54  ;;  %v6775_v60 = vld [vmem:[%s10580_s19 + $0x100] sm:$0xff]  ;;  %v4298_v61 = vld [vmem:[%s10580_s19 + $0x48] sm:$0xff]  ;;  %v6760_v62 = vld [vmem:[%s10580_s19 + $0x98] sm:$0xff]  ;;  %vm4948_vm14 = vcmask (%p4282_p13), 3072  }
 0x718   : >> { %4324 = vmatpush.msra.mxu0 %v6762_v52  ;;  %4424 = vmatpush.msra.mxu3 %v6792_v56  ;;  %v6790_v63 = vld [vmem:[%s10580_s19 + $0x160] sm:$0xff]  ;;  %v6774_v0 = vld [vmem:[%s10580_s19 + $0xf8] sm:$0xff]  ;;  %v6759_v3 = vld [vmem:[%s10580_s19 + $0x90] sm:$0xff] }
 0x719   : >> { %4384 = vmatpush.msra.mxu2 %v6776_v55  ;;  %4346 = vmatpush.msra.mxu1 %v4299_v58  ;;  %v4297_v1 = vld [vmem:[%s10580_s19 + $0x40] sm:$0xff]  ;;  %v6789_v4 = vld [vmem:[%s10580_s19 + $0x158] sm:$0xff]  ;;  %v6773_v5 = vld [vmem:[%s10580_s19 + $0xf0] sm:$0xff] }
 0x71a   : >> { %4325 = vmatpush.msra.mxu0 %v6761_v57  ;;  %4425 = vmatpush.msra.mxu3 %v6791_v59  ;;  %v4296_v6 = vld [vmem:[%s10580_s19 + $0x38] sm:$0xff]  ;;  %v6758_v7 = vld [vmem:[%s10580_s19 + $0x88] sm:$0xff]  ;;  %v6788_v2 = vld [vmem:[%s10580_s19 + $0x150] sm:$0xff] }
 0x71b   : >> { %4385 = vmatpush.msra.mxu2 %v6775_v60  ;;  %4347 = vmatpush.msra.mxu1 %v4298_v61  ;;  %v6772_v8 = vld [vmem:[%s10580_s19 + $0xe8] sm:$0xff]  ;;  %v4295_v9 = vld [vmem:[%s10580_s19 + $0x30] sm:$0xff]  ;;  %v6757_v10 = vld [vmem:[%s10580_s19 + $0x80] sm:$0xff] }
 0x71c   : >> { %4326 = vmatpush.msra.mxu0 %v6760_v62  ;;  %4426 = vmatpush.msra.mxu3 %v6790_v63  ;;  %v6787_v11 = vld [vmem:[%s10580_s19 + $0x148] sm:$0xff]  ;;  %v6771_v12 = vld [vmem:[%s10580_s19 + $0xe0] sm:$0xff]  ;;  %v6756_v14 = vld [vmem:[%s10580_s19 + $0x78] sm:$0xff] }
 0x71d   : >> { %4386 = vmatpush.msra.mxu2 %v6774_v0  ;;  %4348 = vmatpush.msra.mxu1 %v4297_v1  ;;  %v4294_v13 = vld [vmem:[%s10580_s19 + $0x28] sm:$0xff]  ;;  %v6786_v16 = vld [vmem:[%s10580_s19 + $0x140] sm:$0xff]  ;;  %v6770_v17 = vld [vmem:[%s10580_s19 + $0xd8] sm:$0xff] }
 0x71e   : >> { %4327 = vmatpush.msra.mxu0 %v6759_v3  ;;  %4427 = vmatpush.msra.mxu3 %v6789_v4  ;;  %v4293_v46 = vld [vmem:[%s10580_s19 + $0x20] sm:$0xff]  ;;  %v6755_v18 = vld [vmem:[%s10580_s19 + $0x70] sm:$0xff]  ;;  %v6785_v19 = vld [vmem:[%s10580_s19 + $0x138] sm:$0xff] }
 0x71f   : >> { %4387 = vmatpush.msra.mxu2 %v6773_v5  ;;  %4349 = vmatpush.msra.mxu1 %v4296_v6  ;;  %v6769_v20 = vld [vmem:[%s10580_s19 + $0xd0] sm:$0xff]  ;;  %v4292_v22 = vld [vmem:[%s10580_s19 + $0x18] sm:$0xff]  ;;  %v6754_v23 = vld [vmem:[%s10580_s19 + $0x68] sm:$0xff] }
 0x720   : >> { %4328 = vmatpush.msra.mxu0 %v6758_v7  ;;  %4428 = vmatpush.msra.mxu3 %v6788_v2  ;;  %v6784_v25 = vld [vmem:[%s10580_s19 + $0x130] sm:$0xff]  ;;  %v6768_v21 = vld [vmem:[%s10580_s19 + $0xc8] sm:$0xff]  ;;  %v6753_v28 = vld [vmem:[%s10580_s19 + $0x60] sm:$0xff] }
 0x721   : >> { %4388 = vmatpush.msra.mxu2 %v6772_v8  ;;  %4350 = vmatpush.msra.mxu1 %v4295_v9  ;;  %v4291_v27 = vld [vmem:[%s10580_s19 + $0x10] sm:$0xff]  ;;  %v6783_v24 = vld [vmem:[%s10580_s19 + $0x128] sm:$0xff]  ;;  %v6807_v29 = vld [vmem:[%s10580_s19 + $0x1d8] sm:$0xff] }
 0x722   : >> { %4329 = vmatpush.msra.mxu0 %v6757_v10  ;;  %4429 = vmatpush.msra.mxu3 %v6787_v11  ;;  %v6767_v30 = vld [vmem:[%s10580_s19 + $0xc0] sm:$0xff]  ;;  %v6836_v31 = vld [vmem:[%s10580_s19 + $0x298] sm:$0xff]  ;;  %v4290_v32 = vld [vmem:[%s10580_s19 + $0x8] sm:$0xff] }
 0x723   : >> { %4389 = vmatpush.msra.mxu2 %v6771_v12  ;;  %4351 = vmatpush.msra.mxu1 %v4294_v13  ;;  %v6806_v33 = vld [vmem:[%s10580_s19 + $0x1d0] sm:$0xff]  ;;  %v6782_v34 = vld [vmem:[%s10580_s19 + $0x120] sm:$0xff]  ;;  %v6850_v36 = vld [vmem:[%s10580_s19 + $0x2f8] sm:$0xff] }
 0x724   : >> { %4330 = vmatpush.msra.mxu0 %v6756_v14  ;;  %4430 = vmatpush.msra.mxu3 %v6786_v16  ;;  %v6835_v35 = vld [vmem:[%s10580_s19 + $0x290] sm:$0xff]  ;;  %v6805_v37 = vld [vmem:[%s10580_s19 + $0x1c8] sm:$0xff]  ;;  %v4289_v38 = vld [vmem:[%s10580_s19] sm:$0xff] }
 0x725   : >> { %4390 = vmatpush.msra.mxu2 %v6770_v17  ;;  %4352 = vmatpush.msra.mxu1 %v4293_v46  ;;  %v6821_v39 = vld [vmem:[%s10580_s19 + $0x238] sm:$0xff]  ;;  %v6834_v40 = vld [vmem:[%s10580_s19 + $0x288] sm:$0xff]  ;;  %v6804_v41 = vld [vmem:[%s10580_s19 + $0x1c0] sm:$0xff] }
 0x726   : >> { %4331 = vmatpush.msra.mxu0 %v6755_v18  ;;  %4431 = vmatpush.msra.mxu3 %v6785_v19  ;;  %v6849_v42 = vld [vmem:[%s10580_s19 + $0x2f0] sm:$0xff]  ;;  %v6833_v44 = vld [vmem:[%s10580_s19 + $0x280] sm:$0xff]  ;;  %v6803_v45 = vld [vmem:[%s10580_s19 + $0x1b8] sm:$0xff] }
 0x727   : >> { %4391 = vmatpush.msra.mxu2 %v6769_v20  ;;  %4353 = vmatpush.msra.mxu1 %v4292_v22  ;;  %v6820_v43 = vld [vmem:[%s10580_s19 + $0x230] sm:$0xff]  ;;  %v6848_v47 = vld [vmem:[%s10580_s19 + $0x2e8] sm:$0xff]  ;;  %v6832_v49 = vld [vmem:[%s10580_s19 + $0x278] sm:$0xff] }
 0x728   : >> { %4332 = vmatpush.msra.mxu0 %v6754_v23  ;;  %4432 = vmatpush.msra.mxu3 %v6784_v25  ;;  %v6819_v48 = vld [vmem:[%s10580_s19 + $0x228] sm:$0xff]  ;;  %v6802_v50 = vld [vmem:[%s10580_s19 + $0x1b0] sm:$0xff]  ;;  %v6847_v15 = vld [vmem:[%s10580_s19 + $0x2e0] sm:$0xff] }
 0x729   : >> { %4392 = vmatpush.msra.mxu2 %v6768_v21  ;;  %4354 = vmatpush.msra.mxu1 %v4291_v27  ;;  %v6818_v51 = vld [vmem:[%s10580_s19 + $0x220] sm:$0xff]  ;;  %v6831_v52 = vld [vmem:[%s10580_s19 + $0x270] sm:$0xff]  ;;  %v6801_v53 = vld [vmem:[%s10580_s19 + $0x1a8] sm:$0xff] }
 0x72a   : >> { %4333 = vmatpush.msra.mxu0 %v6753_v28  ;;  %4433 = vmatpush.msra.mxu3 %v6783_v24  ;;  %v6846_v54 = vld [vmem:[%s10580_s19 + $0x2d8] sm:$0xff]  ;;  %v6830_v56 = vld [vmem:[%s10580_s19 + $0x268] sm:$0xff]  ;;  %v6800_v57 = vld [vmem:[%s10580_s19 + $0x1a0] sm:$0xff] }
 0x72b   : >> { %4393 = vmatpush.msra.mxu2 %v6767_v30  ;;  %4355 = vmatpush.msra.mxu1 %v4290_v32  ;;  %v6817_v55 = vld [vmem:[%s10580_s19 + $0x218] sm:$0xff]  ;;  %v6845_v58 = vld [vmem:[%s10580_s19 + $0x2d0] sm:$0xff]  ;;  %v6829_v60 = vld [vmem:[%s10580_s19 + $0x260] sm:$0xff] }
 0x72c   : >> { %4461 = vmatpush.msrb.mxu0 %v6807_v29  ;;  %4434 = vmatpush.msra.mxu3 %v6782_v34  ;;  %v6816_v59 = vld [vmem:[%s10580_s19 + $0x210] sm:$0xff]  ;;  %v6799_v61 = vld [vmem:[%s10580_s19 + $0x198] sm:$0xff]  ;;  %v6844_v62 = vld [vmem:[%s10580_s19 + $0x2c8] sm:$0xff] }
 0x72d   : >> { %4540 = vmatpush.msrb.mxu2 %v6836_v31  ;;  %4356 = vmatpush.msra.mxu1 %v4289_v38  ;;  %v4361_v63 = vld [vmem:[%s9893_s25 + $0x4] sm:$0xf]  ;;  %v6815_v0 = vld [vmem:[%s10580_s19 + $0x208] sm:$0xff]  ;;  %v6798_v1 = vld [vmem:[%s10580_s19 + $0x190] sm:$0xff] }
 0x72e   : >> { %4462 = vmatpush.msrb.mxu0 %v6806_v33  ;;  %4578 = vmatpush.msrb.mxu3 %v6850_v36  ;;  %v6828_v3 = vld [vmem:[%s10580_s19 + $0x258] sm:$0xff]  ;;  %v6843_v4 = vld [vmem:[%s10580_s19 + $0x2c0] sm:$0xff]  ;;  %v6797_v6 = vld [vmem:[%s10580_s19 + $0x188] sm:$0xff] }
 0x72f   : >> { %4541 = vmatpush.msrb.mxu2 %v6835_v35  ;;  %4499 = vmatpush.msrb.mxu1 %v6821_v39  ;;  %v4301_v5 = vld [vmem:[%s9893_s25 + $0x2] sm:$0xf]  ;;  %v6781_v7 = vld [vmem:[%s9893_s25 + $0x10] sm:$0xf]  ;;  %v6842_v10 = vld [vmem:[%s10580_s19 + $0x2b8] sm:$0xff] }
 0x730   : >> { %4463 = vmatpush.msrb.mxu0 %v6805_v37  ;;  %4579 = vmatpush.msrb.mxu3 %v6849_v42  ;;  %v6814_v2 = vld [vmem:[%s10580_s19 + $0x200] sm:$0xff]  ;;  %v6827_v8 = vld [vmem:[%s10580_s19 + $0x250] sm:$0xff]  ;;  %v6864_v12 = vld [vmem:[%s10580_s19 + $0x358] sm:$0xff] }
 0x731   : >> { %4542 = vmatpush.msrb.mxu2 %v6834_v40  ;;  %4500 = vmatpush.msrb.mxu1 %v6820_v43  ;;  %v6796_v9 = vld [vmem:[%s10580_s19 + $0x180] sm:$0xff]  ;;  %v6813_v13 = vld [vmem:[%s10580_s19 + $0x1f8] sm:$0xff]  ;;  %v6826_v14 = vld [vmem:[%s10580_s19 + $0x248] sm:$0xff] }
 0x732   : >> { %4464 = vmatpush.msrb.mxu0 %v6804_v41  ;;  %4580 = vmatpush.msrb.mxu3 %v6848_v47  ;;  %v4288_v11 = vld [vmem:[%s9893_s25] sm:$0xf]  ;;  %v6841_v16 = vld [vmem:[%s10580_s19 + $0x2b0] sm:$0xff]  ;;  %v6840_v19 = vld [vmem:[%s10580_s19 + $0x2a8] sm:$0xff] }
 0x733   : >> { %4543 = vmatpush.msrb.mxu2 %v6833_v44  ;;  %4501 = vmatpush.msrb.mxu1 %v6819_v48  ;;  %v6863_v17 = vld [vmem:[%s10580_s19 + $0x350] sm:$0xff]  ;;  %v6825_v18 = vld [vmem:[%s10580_s19 + $0x240] sm:$0xff]  ;;  %v6862_v22 = vld [vmem:[%s10580_s19 + $0x348] sm:$0xff] }
 0x734   : >> { %4465 = vmatpush.msrb.mxu0 %v6803_v45  ;;  %4581 = vmatpush.msrb.mxu3 %v6847_v15  ;;  %v6812_v46 = vld [vmem:[%s10580_s19 + $0x1f0] sm:$0xff]  ;;  %v6824_v20 = vld [vmem:[%s9893_s25 + $0x20] sm:$0xf]  ;;  %v6811_v23 = vld [vmem:[%s10580_s19 + $0x1e8] sm:$0xff] }
 0x735   : >> { %4544 = vmatpush.msrb.mxu2 %v6832_v49  ;;  %4502 = vmatpush.msrb.mxu1 %v6818_v51  ;;  %v6839_v25 = vld [vmem:[%s10580_s19 + $0x2a0] sm:$0xff]  ;;  %v6795_v21 = vld [vmem:[%s9893_s25 + $0x12] sm:$0xf]  ;;  %v6860_v30 = vld [vmem:[%s10580_s19 + $0x338] sm:$0xff] }
 0x736   : >> { %4466 = vmatpush.msrb.mxu0 %v6802_v50  ;;  %4582 = vmatpush.msrb.mxu3 %v6846_v54  ;;  %v6838_v27 = vld [vmem:[%s9893_s25 + $0x22] sm:$0xf]  ;;  %v6809_v29 = vld [vmem:[%s9893_s25 + $0x14] sm:$0xf]  ;;  %v6858_v32 = vld [vmem:[%s10580_s19 + $0x328] sm:$0xff]  ;;  %v4634_v54 = vperm.slane %v9649_v26, 0 }
 0x737   : >> { %4545 = vmatpush.msrb.mxu2 %v6831_v52  ;;  %4503 = vmatpush.msrb.mxu1 %v6817_v55  ;;  %v6861_v28 = vld [vmem:[%s10580_s19 + $0x340] sm:$0xff]  ;;  %v6859_v31 = vld [vmem:[%s10580_s19 + $0x330] sm:$0xff]  ;;  %v6856_v34 = vld [vmem:[%s10580_s19 + $0x318] sm:$0xff] }
 0x738   : >> { %4467 = vmatpush.msrb.mxu0 %v6801_v53  ;;  %4583 = vmatpush.msrb.mxu3 %v6845_v58  ;;  %v6810_v24 = vld [vmem:[%s10580_s19 + $0x1e0] sm:$0xff]  ;;  %v6855_v35 = vld [vmem:[%s10580_s19 + $0x310] sm:$0xff]  ;;  %v6854_v36 = vld [vmem:[%s10580_s19 + $0x308] sm:$0xff] }
 0x739   : >> { %4546 = vmatpush.msrb.mxu2 %v6830_v56  ;;  %4504 = vmatpush.msrb.mxu1 %v6816_v59  ;;  %v6857_v33 = vld [vmem:[%s10580_s19 + $0x320] sm:$0xff]  ;;  %v10013_v59 = vld [vmem:[%s10582_s21 + $0x58] sm:$0xff] (%p4282_p13)  ;;  %v10030_v26 = vld [vmem:[%s10582_s21 + $0x28] sm:$0xff] (%p4282_p13) }
 0x73a   : >> { %4468 = vmatpush.msrb.mxu0 %v6800_v57  ;;  %4584 = vmatpush.msrb.mxu3 %v6844_v62  ;;  %v6853_v37 = vld [vmem:[%s10580_s19 + $0x300] sm:$0xff] }
 0x73b   : >> { %4547 = vmatpush.msrb.mxu2 %v6829_v60  ;;  %4505 = vmatpush.msrb.mxu1 %v6815_v0  ;;  %v6852_v38 = vld [vmem:[%s9893_s25 + $0x24] sm:$0xf]  ;;  %s5973_s25 = scalar_lea.vmem [#allocation11], %s10619_s5  ;;  %v10018_v60 = vld [vmem:[%s10582_s21 + $0x88] sm:$0xff] (%p4282_p13) }
 0x73c   : >> { %4469 = vmatpush.msrb.mxu0 %v6799_v61  ;;  %6779 = vmatmul.msk.f32.vlgmr.msra.gmra.mxu2 %vm909_vm6, %v4361_v63  ;;  %v10023_v61 = vld [vmem:[%s10582_s21 + $0x50] sm:$0xff] (%p4282_p13)  ;;  %v10035_v62 = vld [vmem:[%s10582_s21 + $0x80] sm:$0xff] (%p4282_p13)  ;;  %v10040_v63 = vld [vmem:[%s10582_s21 + $0xb8] sm:$0xff] (%p4282_p13) }
 0x73d   : >> { %4548 = vmatpush.msrb.mxu2 %v6828_v3  ;;  %4585 = vmatpush.msrb.mxu3 %v6843_v4  ;;  %v10047_v0 = vld [vmem:[%s10582_s21 + $0x48] sm:$0xff] (%p4282_p13)  ;;  %v10057_v3 = vld [vmem:[%s10582_s21 + $0x78] sm:$0xff] (%p4282_p13)  ;;  %v10064_v4 = vld [vmem:[%s10582_s21 + $0xb0] sm:$0xff] (%p4282_p13) }
 0x73e   : >> { %4470 = vmatpush.msrb.mxu0 %v6798_v1  ;;  %6794 = vmatmul.msk.f32.vlgmr.msra.gmra.mxu3 %vm909_vm6, %v6781_v7  ;;  %v10052_v1 = vld [vmem:[%s10582_s21 + $0x20] sm:$0xff] (%p4282_p13)  ;;  %v10081_v7 = vld [vmem:[%s10582_s21 + $0x70] sm:$0xff] (%p4282_p13) }
 0x73f   : >> { %6765 = vmatmul.msk.f32.vlgmr.msra.gmra.mxu0 %vm909_vm6, %v4301_v5  ;;  %4506 = vmatpush.msrb.mxu1 %v6814_v2  ;;  %v10069_v5 = vld [vmem:[%s10582_s21 + $0x18] sm:$0xff] (%p4282_p13)  ;;  %v10086_v2 = vld [vmem:[%s10582_s21 + $0xa8] sm:$0xff] (%p4282_p13) }
 0x740   : >> { %4471 = vmatpush.msrb.mxu0 %v6797_v6  ;;  %4549 = vmatpush.msrb.mxu2 %v6827_v8  ;;  %v10076_v6 = vld [vmem:[%s10582_s21 + $0x40] sm:$0xff] (%p4282_p13)  ;;  %v10093_v8 = vld [vmem:[%s10582_s21 + $0x10] sm:$0xff] (%p4282_p13) }
 0x741   : >> { %4586 = vmatpush.msrb.mxu3 %v6842_v10  ;;  %6766 = vmatmul.msk.f32.vlgmr.msra.gmra.mxu1 %vm909_vm6, %v4288_v11  ;;  %v10105_v10 = vld [vmem:[%s10582_s21 + $0x38] sm:$0xff] (%p4282_p13)  ;;  %v10110_v11 = vld [vmem:[%s10582_s21 + $0x68] sm:$0xff] (%p4282_p13) }
 0x742   : >> { %4472 = vmatpush.msrb.mxu0 %v6796_v9  ;;  %4507 = vmatpush.msrb.mxu1 %v6813_v13  ;;  %v10098_v9 = vld [vmem:[%s10582_s21 + $0xa0] sm:$0xff] (%p4282_p13)  ;;  %v10122_v13 = vld [vmem:[%s10582_s21 + $0x98] sm:$0xff] (%p4282_p13) }
 0x743   : >> { %4550 = vmatpush.msrb.mxu2 %v6826_v14  ;;  %4587 = vmatpush.msrb.mxu3 %v6841_v16  ;;  %v10129_v14 = vld [vmem:[%s10582_s21 + $0x30] sm:$0xff] (%p4282_p13)  ;;  %v10134_v16 = vld [vmem:[%s10582_s21 + $0x60] sm:$0xff] (%p4282_p13) }
 0x744   : >> { %4616 = vmatpush.msra.mxu0 %v6864_v12  ;;  %4508 = vmatpush.msrb.mxu1 %v6812_v46  ;;  %v10117_v12 = vld [vmem:[%s10582_s21 + $0x8] sm:$0xff] (%p4282_p13) }
 0x745   : >> { %4551 = vmatpush.msrb.mxu2 %v6825_v18  ;;  %4588 = vmatpush.msrb.mxu3 %v6840_v19  ;;  %v10146_v46 = vld [vmem:[%s10582_s21 + $0x148] sm:$0xff] (%p4282_p13)  ;;  %v10153_v18 = vld [vmem:[%s10582_s21] sm:$0xff] (%p4282_p13)  ;;  %v10158_v19 = vld [vmem:[%s10582_s21 + $0x90] sm:$0xff] (%p4282_p13) }
 0x746   : >> { %4617 = vmatpush.msra.mxu0 %v6863_v17  ;;  %6837 = vmatmul.msk.f32.vlgmr.msrb.gmra.mxu2 %vm909_vm6, %v6824_v20  ;;  %v10141_v17 = vld [vmem:[%s10582_s21 + $0xe8] sm:$0xff] (%p4282_p13)  ;;  %v10165_v20 = vld [vmem:[%s10582_s21 + $0xe0] sm:$0xff] (%p4282_p13) }
 0x747   : >> { %4509 = vmatpush.msrb.mxu1 %v6811_v23  ;;  %4589 = vmatpush.msrb.mxu3 %v6839_v25  ;;  %v10177_v23 = vld [vmem:[%s10582_s21 + $0x140] sm:$0xff] (%p4282_p13)  ;;  %v10182_v25 = vld [vmem:[%s10582_s21 + $0x178] sm:$0xff] (%p4282_p13) }
 0x748   : >> { %4618 = vmatpush.msra.mxu0 %v6862_v22  ;;  %6851 = vmatmul.msk.f32.vlgmr.msrb.gmra.mxu3 %vm909_vm6, %v6838_v27  ;;  %v10170_v22 = vld [vmem:[%s10582_s21 + $0x118] sm:$0xff] (%p4282_p13)  ;;  %v10194_v27 = vld [vmem:[%s10582_s21 + $0x110] sm:$0xff] (%p4282_p13) }
 0x749   : >> { %6808 = vmatmul.msk.f32.vlgmr.msrb.gmra.mxu0 %vm909_vm6, %v6795_v21  ;;  %4510 = vmatpush.msrb.mxu1 %v6810_v24  ;;  %v10189_v21 = vld [vmem:[%s10582_s21 + $0xd8] sm:$0xff] (%p4282_p13)  ;;  %v10206_v24 = vld [vmem:[%s10582_s21 + $0x170] sm:$0xff] (%p4282_p13) }
 0x74a   : >> { %4619 = vmatpush.msra.mxu0 %v6861_v28  ;;  %6822 = vmatmul.msk.f32.vlgmr.msrb.gmra.mxu1 %vm909_vm6, %v6809_v29  ;;  %v10201_v28 = vld [vmem:[%s10582_s21 + $0x138] sm:$0xff] (%p4282_p13)  ;;  %v10213_v29 = vld [vmem:[%s10582_s21 + $0xd0] sm:$0xff] (%p4282_p13) }
 0x74b   : > { %4726 = vmatpush.msra.mxu2 (%p4282_p13), %v10018_v60  ;;  %4695 = vmatpush.msra.mxu1 (%p4282_p13), %v10030_v26 }
 0x74c   : >> { %4620 = vmatpush.msra.mxu0 %v6860_v30  ;;  %4759 = vmatpush.msra.mxu3 (%p4282_p13), %v10040_v63  ;;  %v10218_v30 = vld [vmem:[%s10582_s21 + $0x108] sm:$0xff] (%p4282_p13) }
 0x74d   : > { %4727 = vmatpush.msra.mxu2 (%p4282_p13), %v10035_v62  ;;  %4696 = vmatpush.msra.mxu1 (%p4282_p13), %v10052_v1 }
 0x74e   : >> { %4621 = vmatpush.msra.mxu0 %v6859_v31  ;;  %4760 = vmatpush.msra.mxu3 (%p4282_p13), %v10064_v4  ;;  %v10225_v31 = vld [vmem:[%s10582_s21 + $0x130] sm:$0xff] (%p4282_p13) }
 0x74f   : > { %4728 = vmatpush.msra.mxu2 (%p4282_p13), %v10057_v3  ;;  %4697 = vmatpush.msra.mxu1 (%p4282_p13), %v10069_v5 }
 0x750   : >> { %4622 = vmatpush.msra.mxu0 %v6858_v32  ;;  %4761 = vmatpush.msra.mxu3 (%p4282_p13), %v10086_v2  ;;  %v10230_v32 = vld [vmem:[%s10582_s21 + $0x168] sm:$0xff] (%p4282_p13) }
 0x751   : > { %4729 = vmatpush.msra.mxu2 (%p4282_p13), %v10081_v7  ;;  %4698 = vmatpush.msra.mxu1 (%p4282_p13), %v10093_v8 }
 0x752   : >> { %4623 = vmatpush.msra.mxu0 %v6857_v33  ;;  %4762 = vmatpush.msra.mxu3 (%p4282_p13), %v10098_v9  ;;  %v10237_v33 = vld [vmem:[%s10582_s21 + $0xc8] sm:$0xff] (%p4282_p13) }
 0x753   : > { %4730 = vmatpush.msra.mxu2 (%p4282_p13), %v10110_v11  ;;  %4699 = vmatpush.msra.mxu1 (%p4282_p13), %v10117_v12 }
 0x754   : >> { %4624 = vmatpush.msra.mxu0 %v6856_v34  ;;  %4763 = vmatpush.msra.mxu3 (%p4282_p13), %v10122_v13  ;;  %v10242_v34 = vld [vmem:[%s10582_s21 + $0x100] sm:$0xff] (%p4282_p13) }
 0x755   : > { %4731 = vmatpush.msra.mxu2 (%p4282_p13), %v10134_v16  ;;  %4700 = vmatpush.msra.mxu1 (%p4282_p13), %v10153_v18 }
 0x756   : >> { %4625 = vmatpush.msra.mxu0 %v6855_v35  ;;  %4764 = vmatpush.msra.mxu3 (%p4282_p13), %v10158_v19  ;;  %v10249_v35 = vld [vmem:[%s10582_s21 + $0x128] sm:$0xff] (%p4282_p13) }
 0x757   : > { %4856 = vmatpush.msrb.mxu2 (%p4282_p13), %v10146_v46  ;;  %4823 = vmatpush.msrb.mxu1 (%p4282_p13), %v10170_v22 }
 0x758   : >> { %4626 = vmatpush.msra.mxu0 %v6854_v36  ;;  %4888 = vmatpush.msrb.mxu3 (%p4282_p13), %v10182_v25  ;;  %v10254_v36 = vld [vmem:[%s10582_s21 + $0x160] sm:$0xff] (%p4282_p13) }
 0x759   : > { %4857 = vmatpush.msrb.mxu2 (%p4282_p13), %v10177_v23  ;;  %4824 = vmatpush.msrb.mxu1 (%p4282_p13), %v10194_v27 }
 0x75a   : >> { %4627 = vmatpush.msra.mxu0 %v6853_v37  ;;  %4889 = vmatpush.msrb.mxu3 (%p4282_p13), %v10206_v24 }
 0x75b   : >> { %6865 = vmatmul.msk.f32.vlgmr.msra.gmra.mxu0 %vm909_vm6, %v6852_v38  ;;  %4858 = vmatpush.msrb.mxu2 (%p4282_p13), %v10201_v28  ;;  %v10261_v38 = vld [vmem:[%s10582_s21 + $0xc0] sm:$0xff] (%p4282_p13) }
 0x75c   : > { %4672 = vmatpush.msra.mxu0 (%p4282_p13), %v10013_v59  ;;  %4825 = vmatpush.msrb.mxu1 (%p4282_p13), %v10218_v30 }
 0x75d   : > { %4859 = vmatpush.msrb.mxu2 (%p4282_p13), %v10225_v31  ;;  %4890 = vmatpush.msrb.mxu3 (%p4282_p13), %v10230_v32 }
 0x75e   : > { %4673 = vmatpush.msra.mxu0 (%p4282_p13), %v10023_v61  ;;  %4826 = vmatpush.msrb.mxu1 (%p4282_p13), %v10242_v34 }
 0x75f   : > { %4860 = vmatpush.msrb.mxu2 (%p4282_p13), %v10249_v35  ;;  %4891 = vmatpush.msrb.mxu3 (%p4282_p13), %v10254_v36 }
 0x760   : > { %4674 = vmatpush.msra.mxu0 (%p4282_p13), %v10047_v0 }
 0x762   : > { %4675 = vmatpush.msra.mxu0 (%p4282_p13), %v10076_v6 }
 0x764   : > { %4676 = vmatpush.msra.mxu0 (%p4282_p13), %v10105_v10 }
 0x766   : > { %4677 = vmatpush.msra.mxu0 (%p4282_p13), %v10129_v14 }
 0x768   : > { %4791 = vmatpush.msrb.mxu0 (%p4282_p13), %v10141_v17 }
 0x76a   : > { %4792 = vmatpush.msrb.mxu0 (%p4282_p13), %v10165_v20 }
 0x76c   : > { %4793 = vmatpush.msrb.mxu0 (%p4282_p13), %v10189_v21 }
 0x76e   : > { %4794 = vmatpush.msrb.mxu0 (%p4282_p13), %v10213_v29 }
 0x770   : > { %4795 = vmatpush.msrb.mxu0 (%p4282_p13), %v10237_v33 }
 0x772   : > { %4796 = vmatpush.msrb.mxu0 (%p4282_p13), %v10261_v38 }
 0x7bc   : >> { %v4335_v39 = vpop.f32.mrf.mxu0 }
 0x7be   : >> { %v4358_v40 = vpop.f32.mrf.mxu1 }
 0x7bf   : >> { %v4395_v41 = vpop.f32.mrf.mxu2  ;;  %v4359_v42 = vadd.f32 %v4358_v40, %v4335_v39  ;;  %v10268_v39 = vld [vmem:[%s10582_s21 + $0xf8] sm:$0xff] (%p4282_p13)  ;;  %v10273_v40 = vld [vmem:[%s10582_s21 + $0x120] sm:$0xff] (%p4282_p13) }
 0x7c0   : > { %4827 = vmatpush.msrb.mxu1 (%p4282_p13), %v10268_v39  ;;  %4861 = vmatpush.msrb.mxu2 (%p4282_p13), %v10273_v40 }
 0x7c1   : >> { %v4398_v43 = vadd.f32 %v4395_v41, %v4359_v42  ;;  %v4436_v44 = vpop.f32.mrf.mxu3  ;;  %v10278_v41 = vld [vmem:[%s10582_s21 + $0x158] sm:$0xff] (%p4282_p13) }
 0x7c2   : > { %4892 = vmatpush.msrb.mxu3 (%p4282_p13), %v10278_v41 }
 0x7c3   : >> { %v4439_v45 = vadd.f32 %v4436_v44, %v4398_v43  ;;  %v10287_v44 = vld [vmem:[%s10582_s21 + $0x1a8] sm:$0xff] (%p4282_p13) }
 0x7c6   : >> { %v4474_v47 = vpop.f32.mrf.mxu0 }
 0x7c7   : >> { %v4477_v48 = vadd.f32 %v4474_v47, %v4439_v45  ;;  %v4512_v49 = vpop.f32.mrf.mxu1  ;;  %v10294_v45 = vld [vmem:[%s10582_s21 + $0xf0] sm:$0xff] (%p4282_p13) }
 0x7c8   : > { %v10301_v47 = vld [vmem:[%s10582_s21 + $0x150] sm:$0xff] (%p4282_p13)  ;;  %4828 = vmatpush.msrb.mxu1 (%p4282_p13), %v10294_v45 }
 0x7c9   : >> { %v4515_v50 = vadd.f32 %v4512_v49, %v4477_v48  ;;  %v4553_v15 = vpop.f32.mrf.mxu2  ;;  %v10308_v49 = vld [vmem:[%s10582_s21 + $0x1a0] sm:$0xff] (%p4282_p13)  ;;  %4893 = vmatpush.msrb.mxu3 (%p4282_p13), %v10301_v47 }
 0x7cb   : >> { %v4556_v51 = vadd.f32 %v4553_v15, %v4515_v50  ;;  %v4591_v52 = vpop.f32.mrf.mxu3  ;;  %v10317_v50 = vld [vmem:[%s10582_s21 + $0x198] sm:$0xff] (%p4282_p13) }
 0x7cd   : >> { %v4594_v53 = vadd.f32 %v4591_v52, %v4556_v51  ;;  %v10326_v51 = vld [vmem:[%s10582_s21 + $0x190] sm:$0xff] (%p4282_p13) }
 0x7d8   : >> { %v4629_v55 = vpop.f32.mrf.mxu0 }
 0x7d9   : >> { %v4632_v56 = vadd.f32 %v4629_v55, %v4594_v53 }
 0x7db   : >> { %v4636_v57 = vadd.f32 %v4634_v54, %v4632_v56  ;;  %4284 = sbr.rel (!%p4282_p13) target bundleno = 1811 (0x713), region = 481  ;;  %v10337_v54 = vld [vmem:[%s10582_s21 + $0x188] sm:$0xff] (%p4282_p13)  ;;  %v10348_v56 = vld [vmem:[%s10582_s21 + $0x180] sm:$0xff] (%p4282_p13) }
 0x7dd   : >> { %v4637_v58 = vmax.f32 %v4636_v57, 0.0 }
 0x7df   : >> { %6867 = vst.msk [vmem:[%s5973_s25 + $0x12] sm:$0xf] %vm2720_vm11, %v4637_v58 }
 0x7e6   : > { %v4705_v37 = vld [vmem:[#allocation11 + $0x4] sm:$0xf]  ;;  %v4738_v43 = vld [vmem:[#allocation11 + $0x10] sm:$0xf]  ;;  %v4644_v48 = vld [vmem:[#allocation11] sm:$0xf] }
 0x7e7   : > { %v4651_v42 = vld [vmem:[#allocation11 + $0x2] sm:$0xf]  ;;  %6882 = vmatmul.msk.f32.vlgmr.msra.gmra.mxu2 %vm883_vm4, %v4705_v37  ;;  %6889 = vmatmul.msk.f32.vlgmr.msra.gmra.mxu3 %vm883_vm4, %v4738_v43  ;;  %v4770_v52 = vld [vmem:[#allocation11 + $0x12] sm:$0xf]  ;;  %v4951_v58 = vld [vmem:[#allocation11 + $0x8] sm:$0xf] }
 0x7e8   : > { %6874 = vmatmul.msk.f32.vlgmr.msra.gmra.mxu0 %vm883_vm4, %v4651_v42  ;;  %5001 = vmatpush.msra.mxu2 %v10030_v26  ;;  %v4835_v15 = vld [vmem:[#allocation11 + $0x20] sm:$0xf]  ;;  %v4802_v55 = vld [vmem:[#allocation11 + $0x14] sm:$0xf]  ;;  %v4899_v57 = vld [vmem:[#allocation11 + $0x24] sm:$0xf] }
 0x7e9   : > { %4920 = vmatpush.msra.mxu0 %v10287_v44  ;;  %6875 = vmatmul.msk.f32.vlgmr.msra.gmra.mxu1 %vm883_vm4, %v4644_v48  ;;  %v4867_v53 = vld [vmem:[#allocation11 + $0x22] sm:$0xf]  ;;  %v5011_v37 = vld [vmem:[#allocation11 + $0xc] sm:$0xf]  ;;  %v5105_v43 = vld [vmem:[#allocation11 + $0x1c] sm:$0xf] }
 0x7ea   : > { %4978 = vmatpush.msra.mxu1 %v10013_v59  ;;  %5002 = vmatpush.msra.mxu2 %v10052_v1  ;;  %v4958_v42 = vld [vmem:[#allocation11 + $0xa] sm:$0xf]  ;;  %v5043_v48 = vld [vmem:[#allocation11 + $0x18] sm:$0xf] }
 0x7eb   : > { %4921 = vmatpush.msra.mxu0 %v10308_v49  ;;  %5031 = vmatpush.msra.mxu3 %v10018_v60 }
 0x7ec   : > { %4979 = vmatpush.msra.mxu1 %v10023_v61  ;;  %5003 = vmatpush.msra.mxu2 %v10069_v5 }
 0x7ed   : > { %4922 = vmatpush.msra.mxu0 %v10317_v50  ;;  %5032 = vmatpush.msra.mxu3 %v10035_v62 }
 0x7ee   : > { %4980 = vmatpush.msra.mxu1 %v10047_v0  ;;  %5004 = vmatpush.msra.mxu2 %v10093_v8 }
 0x7ef   : > { %6910 = vmatmul.msk.f32.vlgmr.msrb.gmra.mxu2 %vm883_vm4, %v4835_v15  ;;  %4923 = vmatpush.msra.mxu0 %v10326_v51  ;;  %v5137_v15 = vld [vmem:[#allocation11 + $0x28] sm:$0xf] }
 0x7f0   : > { %5033 = vmatpush.msra.mxu3 %v10057_v3  ;;  %6896 = vmatmul.msk.f32.vlgmr.msrb.gmra.mxu0 %vm883_vm4, %v4770_v52  ;;  %v5074_v52 = vld [vmem:[#allocation11 + $0x1a] sm:$0xf] }
 0x7f1   : > { %6917 = vmatmul.msk.f32.vlgmr.msrb.gmra.mxu3 %vm883_vm4, %v4867_v53  ;;  %4924 = vmatpush.msra.mxu0 %v10337_v54  ;;  %v5168_v53 = vld [vmem:[#allocation11 + $0x2a] sm:$0xf] }
 0x7f2   : > { %4981 = vmatpush.msra.mxu1 %v10076_v6  ;;  %5005 = vmatpush.msra.mxu2 %v10117_v12 }
 0x7f3   : > { %5034 = vmatpush.msra.mxu3 %v10081_v7  ;;  %6903 = vmatmul.msk.f32.vlgmr.msrb.gmra.mxu1 %vm883_vm4, %v4802_v55  ;;  %v5199_v55 = vld [vmem:[#allocation11 + $0x2c] sm:$0xf] }
 0x7f4   : > { %4925 = vmatpush.msra.mxu0 %v10348_v56  ;;  %4982 = vmatpush.msra.mxu1 %v10105_v10 }
 0x7f5   : > { %5006 = vmatpush.msra.mxu2 %v10153_v18  ;;  %5035 = vmatpush.msra.mxu3 %v10110_v11 }
 0x7f6   : > { %5063 = vmatpush.msrb.mxu0 %v10040_v63  ;;  %4983 = vmatpush.msra.mxu1 %v10129_v14 }
 0x7f7   : > { %5125 = vmatpush.msrb.mxu2 %v10170_v22  ;;  %5036 = vmatpush.msra.mxu3 %v10134_v16 }
 0x7f8   : > { %5064 = vmatpush.msrb.mxu0 %v10064_v4  ;;  %5094 = vmatpush.msrb.mxu1 %v10141_v17 }
 0x7f9   : > { %5126 = vmatpush.msrb.mxu2 %v10194_v27  ;;  %5157 = vmatpush.msrb.mxu3 %v10146_v46 }
 0x7fa   : > { %5065 = vmatpush.msrb.mxu0 %v10086_v2  ;;  %5095 = vmatpush.msrb.mxu1 %v10165_v20 }
 0x7fb   : > { %5127 = vmatpush.msrb.mxu2 %v10218_v30  ;;  %5158 = vmatpush.msrb.mxu3 %v10177_v23 }
 0x7fc   : > { %6924 = vmatmul.msk.f32.vlgmr.msra.gmra.mxu0 %vm883_vm4, %v4899_v57  ;;  %5096 = vmatpush.msrb.mxu1 %v10189_v21  ;;  %v5245_v57 = vld [vmem:[#allocation11 + $0x12] sm:$0xf] }
 0x7fd   : > { %5066 = vmatpush.msrb.mxu0 %v10098_v9  ;;  %5128 = vmatpush.msrb.mxu2 %v10242_v34 }
 0x7fe   : > { %5159 = vmatpush.msrb.mxu3 %v10201_v28  ;;  %5097 = vmatpush.msrb.mxu1 %v10213_v29 }
 0x7ff   : > { %5067 = vmatpush.msrb.mxu0 %v10122_v13  ;;  %5129 = vmatpush.msrb.mxu2 %v10268_v39 }
 0x800   : > { %5160 = vmatpush.msrb.mxu3 %v10225_v31  ;;  %6932 = vmatmul.msk.f32.vlgmr.msra.gmra.mxu2 %vm883_vm4, %v4951_v58  ;;  %v5238_v58 = vld [vmem:[#allocation11 + $0x10] sm:$0xf] }
 0x801   : > { %5068 = vmatpush.msrb.mxu0 %v10158_v19  ;;  %5098 = vmatpush.msrb.mxu1 %v10237_v33 }
 0x802   : > { %5130 = vmatpush.msrb.mxu2 %v10294_v45  ;;  %5161 = vmatpush.msrb.mxu3 %v10249_v35 }
 0x803   : > { %6939 = vmatmul.msk.f32.vlgmr.msra.gmra.mxu3 %vm883_vm4, %v5011_v37  ;;  %5188 = vmatpush.msra.mxu0 %v10182_v25  ;;  %v5360_v37 = vld [vmem:[#allocation11 + $0x22] sm:$0xf] }
 0x804   : > { %5265 = vmatpush.msra.mxu2 %v10013_v59  ;;  %5099 = vmatpush.msrb.mxu1 %v10261_v38 }
 0x805   : > { %5162 = vmatpush.msrb.mxu3 %v10273_v40  ;;  %6931 = vmatmul.msk.f32.vlgmr.msra.gmra.mxu1 %vm883_vm4, %v4958_v42  ;;  %v5298_v42 = vld [vmem:[#allocation11 + $0x14] sm:$0xf] }
 0x806   : > { %5189 = vmatpush.msra.mxu0 %v10206_v24  ;;  %5219 = vmatpush.msra.mxu1 %v10287_v44 }
 0x807   : > { %5266 = vmatpush.msra.mxu2 %v10023_v61  ;;  %5288 = vmatpush.msra.mxu3 %v10030_v26 }
 0x808   : > { %5190 = vmatpush.msra.mxu0 %v10230_v32  ;;  %5220 = vmatpush.msra.mxu1 %v10308_v49 }
 0x809   : > { %5267 = vmatpush.msra.mxu2 %v10047_v0  ;;  %5289 = vmatpush.msra.mxu3 %v10052_v1 }
 0x80a   : > { %6960 = vmatmul.msk.f32.vlgmr.msrb.gmra.mxu2 %vm883_vm4, %v5105_v43  ;;  %5191 = vmatpush.msra.mxu0 %v10254_v36  ;;  %v5391_v43 = vld [vmem:[#allocation11 + $0x24] sm:$0xf] }
 0x80b   : > { %5221 = vmatpush.msra.mxu1 %v10317_v50  ;;  %5268 = vmatpush.msra.mxu2 %v10076_v6 }
 0x80c   : > { %5290 = vmatpush.msra.mxu3 %v10069_v5  ;;  %6946 = vmatmul.msk.f32.vlgmr.msrb.gmra.mxu0 %vm883_vm4, %v5043_v48 }
 0x80d   : > { %6967 = vmatmul.msk.f32.vlgmr.msrb.gmra.mxu3 %vm883_vm4, %v5137_v15  ;;  %5192 = vmatpush.msra.mxu0 %v10278_v41 }
 0x80e   : > { %5222 = vmatpush.msra.mxu1 %v10326_v51  ;;  %5269 = vmatpush.msra.mxu2 %v10105_v10 }
 0x80f   : > { %5291 = vmatpush.msra.mxu3 %v10093_v8  ;;  %6953 = vmatmul.msk.f32.vlgmr.msrb.gmra.mxu1 %vm883_vm4, %v5074_v52 }
 0x810   : > { %5193 = vmatpush.msra.mxu0 %v10301_v47  ;;  %5223 = vmatpush.msra.mxu1 %v10337_v54 }
 0x811   : > { %5270 = vmatpush.msra.mxu2 %v10129_v14  ;;  %5292 = vmatpush.msra.mxu3 %v10117_v12 }
 0x812   : > { %5318 = vmatpush.msrb.mxu0 %v10018_v60  ;;  %5224 = vmatpush.msra.mxu1 %v10348_v56 }
 0x813   : > { %5380 = vmatpush.msrb.mxu2 %v10141_v17  ;;  %5293 = vmatpush.msra.mxu3 %v10153_v18 }
 0x814   : > { %5319 = vmatpush.msrb.mxu0 %v10035_v62  ;;  %5349 = vmatpush.msrb.mxu1 %v10040_v63 }
 0x815   : > { %5381 = vmatpush.msrb.mxu2 %v10165_v20  ;;  %5411 = vmatpush.msrb.mxu3 %v10170_v22 }
 0x816   : > { %5320 = vmatpush.msrb.mxu0 %v10057_v3  ;;  %5350 = vmatpush.msrb.mxu1 %v10064_v4 }
 0x817   : > { %5382 = vmatpush.msrb.mxu2 %v10189_v21  ;;  %5412 = vmatpush.msrb.mxu3 %v10194_v27 }
 0x818   : > { %6974 = vmatmul.msk.f32.vlgmr.msra.gmra.mxu0 %vm883_vm4, %v5168_v53  ;;  %5351 = vmatpush.msrb.mxu1 %v10086_v2 }
 0x819   : > { %5321 = vmatpush.msrb.mxu0 %v10081_v7  ;;  %5383 = vmatpush.msrb.mxu2 %v10213_v29 }
 0x81a   : > { %5413 = vmatpush.msrb.mxu3 %v10218_v30  ;;  %6981 = vmatmul.msk.f32.vlgmr.msra.gmra.mxu1 %vm883_vm4, %v5199_v55 }
 0x81b   : > { %5322 = vmatpush.msrb.mxu0 %v10110_v11  ;;  %5352 = vmatpush.msrb.mxu1 %v10098_v9 }
 0x81c   : > { %5384 = vmatpush.msrb.mxu2 %v10237_v33  ;;  %5414 = vmatpush.msrb.mxu3 %v10242_v34 }
 0x81d   : > { %6988 = vmatmul.msk.f32.vlgmr.msra.gmra.mxu2 %vm883_vm4, %v5245_v57  ;;  %5323 = vmatpush.msrb.mxu0 %v10134_v16 }
 0x81e   : > { %5353 = vmatpush.msrb.mxu1 %v10122_v13  ;;  %5385 = vmatpush.msrb.mxu2 %v10261_v38 }
 0x81f   : > { %5415 = vmatpush.msrb.mxu3 %v10268_v39  ;;  %5443 = vmatpush.msra.mxu0 %v10146_v46 }
 0x820   : > { %6989 = vmatmul.msk.f32.vlgmr.msra.gmra.mxu3 %vm883_vm4, %v5238_v58  ;;  %5505 = vmatpush.msra.mxu2 %v10287_v44 }
 0x821   : > { %5354 = vmatpush.msrb.mxu1 %v10158_v19  ;;  %5416 = vmatpush.msrb.mxu3 %v10294_v45 }
 0x822   : > { %5444 = vmatpush.msra.mxu0 %v10177_v23  ;;  %5506 = vmatpush.msra.mxu2 %v10308_v49 }
 0x823   : > { %5474 = vmatpush.msra.mxu1 %v10182_v25  ;;  %5551 = vmatpush.msra.mxu3 %v10013_v59  ;;  %v5329_v59 = vld [vmem:[#allocation11 + $0x20] sm:$0xf] }
 0x824   : > { %5445 = vmatpush.msra.mxu0 %v10201_v28  ;;  %5507 = vmatpush.msra.mxu2 %v10317_v50 }
 0x825   : > { %5475 = vmatpush.msra.mxu1 %v10206_v24  ;;  %5552 = vmatpush.msra.mxu3 %v10023_v61  ;;  %v5485_v61 = vld [vmem:[#allocation11 + $0x34] sm:$0xf] }
 0x826   : > { %7010 = vmatmul.msk.f32.vlgmr.msrb.gmra.mxu2 %vm883_vm4, %v5360_v37  ;;  %5446 = vmatpush.msra.mxu0 %v10225_v31 }
 0x827   : > { %5476 = vmatpush.msra.mxu1 %v10230_v32  ;;  %5508 = vmatpush.msra.mxu2 %v10326_v51 }
 0x828   : > { %5553 = vmatpush.msra.mxu3 %v10047_v0  ;;  %6996 = vmatmul.msk.f32.vlgmr.msrb.gmra.mxu0 %vm883_vm4, %v5298_v42  ;;  %v5423_v0 = vld [vmem:[#allocation11 + $0x30] sm:$0xf] }
 0x829   : > { %7017 = vmatmul.msk.f32.vlgmr.msrb.gmra.mxu3 %vm883_vm4, %v5391_v43  ;;  %5447 = vmatpush.msra.mxu0 %v10249_v35 }
 0x82a   : > { %5477 = vmatpush.msra.mxu1 %v10254_v36  ;;  %5509 = vmatpush.msra.mxu2 %v10337_v54 }
 0x82b   : > { %5554 = vmatpush.msra.mxu3 %v10076_v6  ;;  %7003 = vmatmul.msk.f32.vlgmr.msrb.gmra.mxu1 %vm883_vm4, %v5329_v59  ;;  %v5709_v6 = vld [vmem:[#allocation11 + $0x38] sm:$0xf] }
 0x82c   : > { %5448 = vmatpush.msra.mxu0 %v10273_v40  ;;  %5478 = vmatpush.msra.mxu1 %v10278_v41 }
 0x82d   : > { %5510 = vmatpush.msra.mxu2 %v10348_v56  ;;  %5555 = vmatpush.msra.mxu3 %v10105_v10 }
 0x82e   : > { %5574 = vmatpush.msrb.mxu0 %v10030_v26  ;;  %5479 = vmatpush.msra.mxu1 %v10301_v47  ;;  %v5531_v26 = vld [vmem:[#allocation11 + $0x1a] sm:$0xf] }
 0x82f   : > { %5635 = vmatpush.msrb.mxu2 %v10040_v63  ;;  %5556 = vmatpush.msra.mxu3 %v10129_v14  ;;  %v5454_v63 = vld [vmem:[#allocation11 + $0x32] sm:$0xf] }
 0x830   : > { %5575 = vmatpush.msrb.mxu0 %v10052_v1  ;;  %5604 = vmatpush.msrb.mxu1 %v10018_v60  ;;  %v5615_v60 = vld [vmem:[#allocation11 + $0x28] sm:$0xf] }
 0x831   : > { %5636 = vmatpush.msrb.mxu2 %v10064_v4  ;;  %5666 = vmatpush.msrb.mxu3 %v10141_v17  ;;  %v5646_v1 = vld [vmem:[#allocation11 + $0x2a] sm:$0xf] }
 0x832   : > { %7038 = vmatmul.msk.f32.vlgmr.msra.gmra.mxu2 %vm883_vm4, %v5485_v61  ;;  %5576 = vmatpush.msrb.mxu0 %v10069_v5  ;;  %v5677_v4 = vld [vmem:[#allocation11 + $0x2c] sm:$0xf]  ;;  %v5740_v5 = vld [vmem:[#allocation11 + $0x3a] sm:$0xf] }
 0x833   : > { %5605 = vmatpush.msrb.mxu1 %v10035_v62  ;;  %5637 = vmatpush.msrb.mxu2 %v10086_v2  ;;  %v5524_v62 = vld [vmem:[#allocation11 + $0x18] sm:$0xf] }
 0x834   : > { %5667 = vmatpush.msrb.mxu3 %v10165_v20  ;;  %7024 = vmatmul.msk.f32.vlgmr.msra.gmra.mxu0 %vm883_vm4, %v5423_v0 }
 0x835   : > { %7045 = vmatmul.msk.f32.vlgmr.msra.gmra.mxu3 %vm883_vm4, %v5531_v26  ;;  %5577 = vmatpush.msrb.mxu0 %v10093_v8 }
 0x836   : > { %5606 = vmatpush.msrb.mxu1 %v10057_v3  ;;  %5638 = vmatpush.msrb.mxu2 %v10098_v9  ;;  %v5584_v3 = vld [vmem:[#allocation11 + $0x1c] sm:$0xf] }
 0x837   : > { %5668 = vmatpush.msrb.mxu3 %v10189_v21  ;;  %7031 = vmatmul.msk.f32.vlgmr.msra.gmra.mxu1 %vm883_vm4, %v5454_v63 }
 0x838   : > { %5578 = vmatpush.msrb.mxu0 %v10117_v12  ;;  %5607 = vmatpush.msrb.mxu1 %v10081_v7  ;;  %v5771_v7 = vld [vmem:[#allocation11 + $0x3c] sm:$0xf] }
 0x839   : > { %5639 = vmatpush.msrb.mxu2 %v10122_v13  ;;  %5669 = vmatpush.msrb.mxu3 %v10213_v29 }
 0x83a   : > { %5579 = vmatpush.msrb.mxu0 %v10153_v18  ;;  %5608 = vmatpush.msrb.mxu1 %v10110_v11 }
 0x83b   : > { %5640 = vmatpush.msrb.mxu2 %v10158_v19  ;;  %5670 = vmatpush.msrb.mxu3 %v10237_v33 }
 0x83c   : > { %5697 = vmatpush.msra.mxu0 %v10170_v22  ;;  %5609 = vmatpush.msrb.mxu1 %v10134_v16 }
 0x83d   : > { %5760 = vmatpush.msra.mxu2 %v10182_v25  ;;  %5671 = vmatpush.msrb.mxu3 %v10261_v38 }
 0x83e   : > { %7060 = vmatmul.msk.f32.vlgmr.msrb.gmra.mxu2 %vm883_vm4, %v5615_v60  ;;  %5698 = vmatpush.msra.mxu0 %v10194_v27 }
 0x83f   : > { %5729 = vmatpush.msra.mxu1 %v10146_v46  ;;  %5761 = vmatpush.msra.mxu2 %v10206_v24 }
 0x840   : > { %5791 = vmatpush.msra.mxu3 %v10287_v44  ;;  %7046 = vmatmul.msk.f32.vlgmr.msrb.gmra.mxu0 %vm883_vm4, %v5524_v62 }
 0x841   : > { %7067 = vmatmul.msk.f32.vlgmr.msrb.gmra.mxu3 %vm883_vm4, %v5646_v1  ;;  %5699 = vmatpush.msra.mxu0 %v10218_v30 }
 0x842   : > { %5730 = vmatpush.msra.mxu1 %v10177_v23  ;;  %5762 = vmatpush.msra.mxu2 %v10230_v32  ;;  %v10535_v23 = vld [vmem:[%s10583_s22] ss:$0 sm:$0xff] }
 0x843   : > { %5792 = vmatpush.msra.mxu3 %v10308_v49  ;;  %7053 = vmatmul.msk.f32.vlgmr.msrb.gmra.mxu1 %vm883_vm4, %v5584_v3 }
 0x844   : > { %5700 = vmatpush.msra.mxu0 %v10242_v34  ;;  %5731 = vmatpush.msra.mxu1 %v10201_v28  ;;  %v10541_v28 = vld [vmem:[%s10584_s23] ss:$0 sm:$0xff] }
 0x845   : > { %5763 = vmatpush.msra.mxu2 %v10254_v36  ;;  %5793 = vmatpush.msra.mxu3 %v10317_v50 }
 0x846   : > { %5701 = vmatpush.msra.mxu0 %v10268_v39  ;;  %5732 = vmatpush.msra.mxu1 %v10225_v31 }
 0x847   : > { %5764 = vmatpush.msra.mxu2 %v10278_v41  ;;  %5794 = vmatpush.msra.mxu3 %v10326_v51 }
 0x848   : > { %5702 = vmatpush.msra.mxu0 %v10294_v45  ;;  %5733 = vmatpush.msra.mxu1 %v10249_v35 }
 0x849   : > { %5765 = vmatpush.msra.mxu2 %v10301_v47  ;;  %5795 = vmatpush.msra.mxu3 %v10337_v54 }
 0x84a   : > { %7074 = vmatmul.msk.f32.vlgmr.msra.gmra.mxu0 %vm883_vm4, %v5677_v4  ;;  %7088 = vmatmul.msk.f32.vlgmr.msra.gmra.mxu2 %vm883_vm4, %v5740_v5 }
 0x84b   : > { %5734 = vmatpush.msra.mxu1 %v10273_v40  ;;  %5796 = vmatpush.msra.mxu3 %v10348_v56 }
 0x84c   : > { %7081 = vmatmul.msk.f32.vlgmr.msra.gmra.mxu1 %vm883_vm4, %v5709_v6  ;;  %7095 = vmatmul.msk.f32.vlgmr.msra.gmra.mxu3 %vm883_vm4, %v5771_v7 }
 0x865   : > { %v4679_v2 = vpop.f32.mrf.mxu0 }
 0x866   : > { %v4702_v8 = vpop.f32.mrf.mxu1 }
 0x867   : > { %v4703_v9 = vadd.f32 %v4702_v8, %v4679_v2 }
 0x86a   : > { %v4733_v10 = vpop.f32.mrf.mxu2  ;;  %v4766_v12 = vpop.f32.mrf.mxu3 }
 0x86b   : > { %v4736_v11 = vadd.f32 %v4733_v10, %v4703_v9 }
 0x86d   : > { %v4769_v13 = vadd.f32 %v4766_v12, %v4736_v11  ;;  %v4798_v14 = vpop.f32.mrf.mxu0 }
 0x86f   : > { %v4801_v16 = vadd.f32 %v4798_v14, %v4769_v13 }
 0x870   : > { %v4830_v17 = vpop.f32.mrf.mxu1 }
 0x871   : > { %v4833_v46 = vadd.f32 %v4830_v17, %v4801_v16 }
 0x872   : > { %v4863_v18 = vpop.f32.mrf.mxu2 }
 0x873   : > { %v4866_v19 = vadd.f32 %v4863_v18, %v4833_v46 }
 0x874   : > { %v4895_v20 = vpop.f32.mrf.mxu3 }
 0x875   : > { %v4898_v22 = vadd.f32 %v4895_v20, %v4866_v19 }
 0x879   : > { %v4927_v25 = vpop.f32.mrf.mxu0 }
 0x87a   : > { %v4930_v21 = vadd.f32 %v4927_v25, %v4898_v22 }
 0x87c   : > { %v4934_v27 = vadd.f32 %v10535_v23, %v4930_v21 }
 0x87e   : > { %v4935_v24 = vmax.f32 %v4934_v27, 0.0 }
 0x880   : > { %v4939_v29 = vmul.f32 %v10541_v28, %v4935_v24 }
 0x882   : > { %v4985_v30 = vpop.f32.mrf.mxu1  ;;  %v4941_v31 = vsel %vm2720_vm11, %v4939_v29, 0.0 }
 0x883   : > { %v5008_v32 = vpop.f32.mrf.mxu2  ;;  %4942 = vadd.xlane.f32.xlu0 %v4941_v31 }
 0x884   : > { %v5009_v33 = vadd.f32 %v5008_v32, %v4985_v30  ;;  %v7196_v32 = vld [vmem:[#allocation12] ss:$0 sm:$0xff] }
 0x886   : > { %v5038_v34 = vpop.f32.mrf.mxu3 }
 0x887   : > { %v5041_v35 = vadd.f32 %v5038_v34, %v5009_v33 }
 0x889   : > { %v5070_v36 = vpop.f32.mrf.mxu0 }
 0x88a   : > { %v5073_v38 = vadd.f32 %v5070_v36, %v5041_v35 }
 0x88c   : > { %v5101_v39 = vpop.f32.mrf.mxu1 }
 0x88d   : > { %v5104_v40 = vadd.f32 %v5101_v39, %v5073_v38  ;;  %v5132_v41 = vpop.f32.mrf.mxu2 }
 0x88f   : > { %v5135_v44 = vadd.f32 %v5132_v41, %v5104_v40 }
 0x890   : > { %v5164_v45 = vpop.f32.mrf.mxu3 }
 0x891   : > { %v5167_v47 = vadd.f32 %v5164_v45, %v5135_v44 }
 0x895   : > { %v5195_v49 = vpop.f32.mrf.mxu0 }
 0x896   : > { %v5198_v50 = vadd.f32 %v5195_v49, %v5167_v47 }
 0x897   : > { %v5226_v51 = vpop.f32.mrf.mxu1 }
 0x898   : > { %v5229_v54 = vadd.f32 %v5226_v51, %v5198_v50 }
 0x89a   : > { %v5230_v56 = vadd.f32 %v10535_v23, %v5229_v54 }
 0x89c   : > { %v5231_v48 = vmax.f32 %v5230_v56, 0.0 }
 0x89e   : > { %v5232_v15 = vmul.f32 %v10541_v28, %v5231_v48 }
 0x8a0   : > { %v5272_v52 = vpop.f32.mrf.mxu2  ;;  %v5233_v53 = vsel %vm2720_vm11, %v5232_v15, 0.0 }
 0x8a1   : > { %5234 = vadd.xlane.f32.xlu0 %v5233_v53 }
 0x8a3   : > { %v5295_v55 = vpop.f32.mrf.mxu3 }
 0x8a4   : > { %v5296_v57 = vadd.f32 %v5295_v55, %v5272_v52 }
 0x8a5   : > { %v5325_v58 = vpop.f32.mrf.mxu0 }
 0x8a6   : > { %v5328_v37 = vadd.f32 %v5325_v58, %v5296_v57 }
 0x8a8   : > { %v5356_v42 = vpop.f32.mrf.mxu1 }
 0x8a9   : > { %v5359_v43 = vadd.f32 %v5356_v42, %v5328_v37  ;;  %v5387_v59 = vpop.f32.mrf.mxu2 }
 0x8ab   : > { %v5390_v61 = vadd.f32 %v5387_v59, %v5359_v43 }
 0x8ac   : > { %v5418_v0 = vpop.f32.mrf.mxu3 }
 0x8ad   : > { %v5421_v26 = vadd.f32 %v5418_v0, %v5390_v61 }
 0x8b1   : > { %v5450_v63 = vpop.f32.mrf.mxu0 }
 0x8b2   : > { %v5453_v60 = vadd.f32 %v5450_v63, %v5421_v26 }
 0x8b4   : > { %v5481_v62 = vpop.f32.mrf.mxu1 }
 0x8b5   : > { %v5484_v1 = vadd.f32 %v5481_v62, %v5453_v60  ;;  %v5512_v3 = vpop.f32.mrf.mxu2 }
 0x8b7   : > { %v5515_v4 = vadd.f32 %v5512_v3, %v5484_v1 }
 0x8b8   : > { %v5558_v6 = vpop.f32.mrf.mxu3 }
 0x8b9   : > { %v5516_v5 = vadd.f32 %v10535_v23, %v5515_v4 }
 0x8bb   : > { %v5517_v7 = vmax.f32 %v5516_v5, 0.0 }
 0x8bd   : > { %v5581_v2 = vpop.f32.mrf.mxu0  ;;  %v5518_v8 = vmul.f32 %v10541_v28, %v5517_v7 }
 0x8be   : > { %v5582_v9 = vadd.f32 %v5581_v2, %v5558_v6 }
 0x8bf   : > { %v5519_v10 = vsel %vm2720_vm11, %v5518_v8, 0.0 }
 0x8c0   : > { %v5611_v11 = vpop.f32.mrf.mxu1  ;;  %5520 = vadd.xlane.f32.xlu1 %v5519_v10 }
 0x8c1   : > { %v5642_v12 = vpop.f32.mrf.mxu2  ;;  %v5614_v13 = vadd.f32 %v5611_v11, %v5582_v9 }
 0x8c3   : > { %v5645_v14 = vadd.f32 %v5642_v12, %v5614_v13 }
 0x8c4   : > { %v5673_v16 = vpop.f32.mrf.mxu3 }
 0x8c5   : > { %v5676_v17 = vadd.f32 %v5673_v16, %v5645_v14 }
 0x8c7   : > { %v5704_v46 = vpop.f32.mrf.mxu0 }
 0x8c8   : > { %v5707_v18 = vadd.f32 %v5704_v46, %v5676_v17 }
 0x8c9   : > { %v5736_v19 = vpop.f32.mrf.mxu1 }
 0x8ca   : > { %v5739_v20 = vadd.f32 %v5736_v19, %v5707_v18 }
 0x8cd   : > { %v5767_v22 = vpop.f32.mrf.mxu2 }
 0x8ce   : > { %v5770_v25 = vadd.f32 %v5767_v22, %v5739_v20 }
 0x8cf   : > { %v5798_v21 = vpop.f32.mrf.mxu3 }
 0x8d0   : > { %v5801_v27 = vadd.f32 %v5798_v21, %v5770_v25 }
 0x8d2   : > { %v5802_v24 = vadd.f32 %v10535_v23, %v5801_v27 }
 0x8d4   : > { %v5803_v29 = vmax.f32 %v5802_v24, 0.0 }
 0x8d6   : > { %v5804_v30 = vmul.f32 %v10541_v28, %v5803_v29 }
 0x8d8   : > { %v5805_v31 = vsel %vm2720_vm11, %v5804_v30, 0.0 }
 0x8d9   : > { %5806 = vadd.xlane.f32.xlu1 %v5805_v31 }
 0x8f6   : > { %v4943_v33 = vpop.xlane.xlu0 %4942 }
 0x8f7   : > { %v4947_v34 = vadd.f32 %v7196_v32, %v4943_v33 }
 0x8f9   : > { %4949 = vst.msk [vmem:[%s7438_s1] sm:$0xf] %vm4948_vm14, %v4947_v34 }
 0x914   : > { %v5235_v35 = vpop.xlane.xlu0 %5234 }
 0x915   : > { %v5236_v36 = vadd.f32 %v7196_v32, %v5235_v35 }
 0x917   : > { %5237 = vst.msk [vmem:[%s7438_s1 + $0x4] sm:$0xf] %vm4948_vm14, %v5236_v36 }
 0x933   : > { %v5521_v38 = vpop.xlane.xlu1 %5520 }
 0x934   : > { %v5522_v39 = vadd.f32 %v7196_v32, %v5521_v38 }
 0x936   : > { %5523 = vst.msk [vmem:[%s7438_s1 + $0x8] sm:$0xf] %vm4948_vm14, %v5522_v39 }
 0x94c   : > { %v5807_v40 = vpop.xlane.xlu1 %5806 }
 0x94d   : > { %v5808_v23 = vadd.f32 %v7196_v32, %v5807_v40 }
 0x94f   : > { %5809 = vst.msk [vmem:[%s7438_s1 + $0xc] sm:$0xf] %vm4948_vm14, %v5808_v23 }
 0x950 PF: > { %s37_s6 = sadd.s32 1, %s7243_s6  }
 0x951   : > { %p34_p0 = scmp.ge.s32.totalorder %s37_s6, 4  }
 0x953   :  { %36 = sbr.rel (!%p34_p0) target bundleno = 12 (0xc), region = 492 }

</bundles_post_ra>
